<compile_context>
chip_gen: v5e
topology: v5e:2x2
jax: 0.10.0
libtpu: 0.0.40
codegen_flags: <defaults>
</compile_context>

<pallas_src>
import functools

import jax
import jax.numpy as jnp
from jax.experimental import pallas as pl
from jax.experimental.pallas import tpu as pltpu


# ----------------------------------------------------------------------------
# Pallas kernels
# ----------------------------------------------------------------------------
def conv_pool_relu_kernel(p_ref, w_ref, b_ref, o_ref, *, tb, m_pad):
    # p_ref: (4*TB*Mpad, Kpad) bf16 -- phase-major im2col rows for TB images
    # w_ref: (Kpad, Cout)      bf16 -- conv weight flattened (dy, dx, cin) -> k
    # b_ref: (1, Cout)         f32
    # o_ref: (TB*Mpad, Cout)   bf16 -- pooled + ReLU'd activations
    r = tb * m_pad
    # One MXU matmul covering all 4 pooling phases of the batch block.
    y = jnp.dot(p_ref[...], w_ref[...], preferred_element_type=jnp.float32)
    # max-pool 2x2 == elementwise max over the 4 phase slabs (VPU work).
    y = jnp.maximum(jnp.maximum(y[0 * r:1 * r], y[1 * r:2 * r]),
                    jnp.maximum(y[2 * r:3 * r], y[3 * r:4 * r]))
    y = jnp.maximum(y + b_ref[...], 0.0)        # bias is phase-invariant
    o_ref[...] = y.astype(o_ref.dtype)


def mlp_kernel(x_ref, w1_ref, b1_ref, w2_ref, b2_ref, o_ref):
    # x_ref: (TB, 3136) bf16, w1_ref: (3136, 128) bf16, b1_ref: (1, 128) f32
    # w2_ref: (128, Opad) bf16, b2_ref: (1, Opad) f32, o_ref: (TB, Opad) f32
    h = jnp.dot(x_ref[...], w1_ref[...], preferred_element_type=jnp.float32)
    h = jnp.maximum(h + b1_ref[...], 0.0).astype(w2_ref.dtype)
    y = jnp.dot(h, w2_ref[...], preferred_element_type=jnp.float32)
    o_ref[...] = y + b2_ref[...]


# ----------------------------------------------------------------------------
# Wrappers (im2col / layout shuffles are glue and stay in plain JAX)
# ----------------------------------------------------------------------------
def _round_up(x, m):
    return (x + m - 1) // m * m


def _pick_tile(b_pad, target):
    """Largest multiple of 8 <= target that divides b_pad (b_pad % 8 == 0)."""
    t = min(target, b_pad)
    while b_pad % t:
        t -= 8
    return t


def _im2col_pooled(x_nhwc, pooled_size):
    """Gather 3x3 (padding=1) patches for each of the 4 max-pool-2 phases.

    x_nhwc: (B, 2P, 2P, Cin)  ->  (4, B, P*P, 9*Cin)
    """
    b, h, w, cin = x_nhwc.shape
    p_out = pooled_size
    xp = jnp.pad(x_nhwc, ((0, 0), (1, 1), (1, 1), (0, 0)))
    phases = []
    for p in range(2):
        for q in range(2):
            cols = []
            for dy in range(3):
                for dx in range(3):
                    ys, xs = p + dy, q + dx
                    sl = xp[:, ys:ys + 2 * p_out - 1:2, xs:xs + 2 * p_out - 1:2, :]
                    cols.append(sl)  # (B, P, P, Cin)
            phase = jnp.concatenate(cols, axis=-1)           # (B, P, P, 9*Cin)
            phases.append(phase.reshape(b, p_out * p_out, 9 * cin))
    return jnp.stack(phases, axis=0)                         # (4, B, P*P, 9*Cin)


def conv_pool_relu(x_nhwc, w_hwio, bias, pooled_size, tb):
    """conv3x3(pad=1) + maxpool2 + relu; all compute inside one Pallas kernel."""
    b_pad = x_nhwc.shape[0]                                  # multiple of tb
    cin = x_nhwc.shape[-1]
    cout = w_hwio.shape[-1]
    m = pooled_size * pooled_size
    m_pad = _round_up(m, 8)                                  # sublane alignment
    k = 9 * cin
    k_pad = _round_up(k, 16)                                 # bf16 packing unit
    nb = b_pad // tb

    # im2col in bf16 (halves HBM traffic of the patch expansion).
    patches = _im2col_pooled(x_nhwc.astype(jnp.bfloat16), pooled_size)
    if (m_pad - m) or (k_pad - k):
        patches = jnp.pad(
            patches, ((0, 0), (0, 0), (0, m_pad - m), (0, k_pad - k)))
    # Per-batch-block phase-major row layout: (nb, 4, TB, Mpad, Kpad) -> 2D
    # slab, so the kernel is purely 2D (one matmul + aligned static slices).
    patches = patches.reshape(4, nb, tb, m_pad, k_pad)
    patches = patches.transpose(1, 0, 2, 3, 4).reshape(nb * 4 * tb * m_pad, k_pad)

    w_mat = w_hwio.reshape(k, cout).astype(jnp.bfloat16)     # (dy,dx,cin) -> k
    if k_pad != k:
        w_mat = jnp.pad(w_mat, ((0, k_pad - k), (0, 0)))
    b_mat = bias.reshape(1, cout).astype(jnp.float32)

    out = pl.pallas_call(
        functools.partial(conv_pool_relu_kernel, tb=tb, m_pad=m_pad),
        out_shape=jax.ShapeDtypeStruct((b_pad * m_pad, cout), jnp.bfloat16),
        grid=(nb,),
        in_specs=[
            pl.BlockSpec((4 * tb * m_pad, k_pad), lambda i: (i, 0)),
            pl.BlockSpec((k_pad, cout), lambda i: (0, 0)),
            pl.BlockSpec((1, cout), lambda i: (0, 0)),
        ],
        out_specs=pl.BlockSpec((tb * m_pad, cout), lambda i: (i, 0)),
        compiler_params=pltpu.CompilerParams(dimension_semantics=("parallel",)),
    )(patches, w_mat, b_mat)                                 # (B_pad*Mpad, Cout)

    return out.reshape(b_pad, m_pad, cout)[:, :m, :]         # (B_pad, M, Cout)


def mlp(x_bf16, fw1, fb1, fw2, fb2, tb):
    b_pad, d = x_bf16.shape
    h = fw1.shape[1]
    o = fw2.shape[1]
    o_pad = _round_up(o, 128)                                # lane-dense stores
    nb = b_pad // tb

    w2 = fw2.astype(jnp.bfloat16)
    b2 = fb2.reshape(1, o).astype(jnp.float32)
    if o_pad != o:
        w2 = jnp.pad(w2, ((0, 0), (0, o_pad - o)))
        b2 = jnp.pad(b2, ((0, 0), (0, o_pad - o)))

    out = pl.pallas_call(
        mlp_kernel,
        out_shape=jax.ShapeDtypeStruct((b_pad, o_pad), jnp.float32),
        grid=(nb,),
        in_specs=[
            pl.BlockSpec((tb, d), lambda i: (i, 0)),         # streamed per block
            pl.BlockSpec((d, h), lambda i: (0, 0)),          # weights resident
            pl.BlockSpec((1, h), lambda i: (0, 0)),
            pl.BlockSpec((h, o_pad), lambda i: (0, 0)),
            pl.BlockSpec((1, o_pad), lambda i: (0, 0)),
        ],
        out_specs=pl.BlockSpec((tb, o_pad), lambda i: (i, 0)),
        compiler_params=pltpu.CompilerParams(dimension_semantics=("parallel",)),
    )(x_bf16, fw1.astype(jnp.bfloat16), fb1.reshape(1, h).astype(jnp.float32),
      w2, b2)
    return out[:, :o]                                        # (B_pad, num_classes)


@jax.jit
def mnist_forward(x_nchw, params):
    w1, b1, w2, b2, fw1, fb1, fw2, fb2 = params
    b = x_nchw.shape[0]
    b_pad = _round_up(b, 8)
    tb_conv = _pick_tile(b_pad, 16)
    tb_fc = _pick_tile(b_pad, 256)

    x = jnp.transpose(x_nchw, (0, 2, 3, 1))                  # NCHW -> NHWC (glue)
    if b_pad != b:
        x = jnp.pad(x, ((0, b_pad - b), (0, 0), (0, 0), (0, 0)))

    h1 = conv_pool_relu(x, w1, b1, pooled_size=14, tb=tb_conv)   # (B_pad, 196, 32)
    h1 = h1.reshape(b_pad, 14, 14, 32)                           # NHWC
    h2 = conv_pool_relu(h1, w2, b2, pooled_size=7, tb=tb_conv)   # (B_pad, 49, 64)

    # PyTorch x.view(B, -1) flattens (C, H, W); fold that permutation into
    # fc1's weight rows (cheap one-off transform) so h2 feeds fc1 directly.
    fw1_perm = fw1.reshape(64, 49, 128).transpose(1, 0, 2).reshape(3136, 128)
    flat = h2.reshape(b_pad, 64 * 7 * 7).astype(jnp.bfloat16)    # (B_pad, 3136)
    logits = mlp(flat, fw1_perm, fb1, fw2, fb2, tb=tb_fc)        # (B_pad, 10)
    return logits[:b]


# ----------------------------------------------------------------------------
# Pure-JAX (f32) reference for validation
# ----------------------------------------------------------------------------
def ref_forward(x_nchw, params):
    w1, b1, w2, b2, fw1, fb1, fw2, fb2 = params

    def conv_block(x, w_hwio, bias):
        y = jax.lax.conv_general_dilated(
            x, w_hwio, window_strides=(1, 1), padding=((1, 1), (1, 1)),
            dimension_numbers=("NCHW", "HWIO", "NCHW"),
            precision=jax.lax.Precision.HIGHEST)
        y = y + bias[None, :, None, None]
        bb, c, hh, ww = y.shape
        y = y.reshape(bb, c, hh // 2, 2, ww // 2, 2).max(axis=(3, 5))  # maxpool 2
        return jnp.maximum(y, 0.0)

    h = conv_block(x_nchw, w1, b1)
    h = conv_block(h, w2, b2)
    h = h.reshape(h.shape[0], -1)
    h = jnp.maximum(jnp.dot(h, fw1, precision=jax.lax.Precision.HIGHEST) + fb1, 0.0)
    return jnp.dot(h, fw2, precision=jax.lax.Precision.HIGHEST) + fb2


# ----------------------------------------------------------------------------
# Deterministic parameter init (synthetic; conv weights stored HWIO)
# ----------------------------------------------------------------------------
def init_params(keys):
    def n(key, shape, scale):
        return jax.random.normal(key, shape, jnp.float32) * scale

    w1 = n(keys[0], (3, 3, 1, 32), 1.0 / 3.0)            # conv1: 1 -> 32, 3x3
    b1 = n(keys[1], (32,), 0.05)
    w2 = n(keys[2], (3, 3, 32, 64), 1.0 / (288 ** 0.5))  # conv2: 32 -> 64, 3x3
    b2 = n(keys[3], (64,), 0.05)
    fw1 = n(keys[4], (64 * 7 * 7, 128), 1.0 / (3136 ** 0.5))
    fb1 = n(keys[5], (128,), 0.05)
    fw2 = n(keys[6], (128, 10), 1.0 / (128 ** 0.5))
    fb2 = n(keys[7], (10,), 0.05)
    return (w1, b1, w2, b2, fw1, fb1, fw2, fb2)


if __name__ == "__main__":
    key = jax.random.PRNGKey(0)
    keys = jax.random.split(key, 9)
    batch = 2
    # fc1 expects 64*7*7, which implies 28x28 single-channel (MNIST) input.
    x = jax.random.normal(keys[0], (batch, 1, 28, 28), jnp.float32)
    params = init_params(keys[1:])

    out = jax.block_until_ready(mnist_forward(x, params))
    assert out.shape == (batch, 10), out.shape

    ref = ref_forward(x, params)
    # bf16 MXU operands (f32 accumulation) vs an f32 reference -> loose tol;
    # a real bug (wrong permutation / phase) produces errors >> 0.1.
    if not bool(jnp.allclose(out, ref, rtol=1e-1, atol=1e-1)):
        err = float(jnp.max(jnp.abs(out - ref)))
        raise AssertionError(
            f"Pallas output does not match JAX reference (max abs err {err})")

    print("KERNEL_OK")
</pallas_src>

<mosaic_0001>
module attributes {stable_mosaic.version = 11 : i64} {
  func.func @conv_pool_relu_kernel(%arg0: i32, %arg1: memref<6400x16xbf16, #tpu.memory_space<vmem>>, %arg2: memref<16x32xbf16, #tpu.memory_space<vmem>>, %arg3: memref<1x32xf32, #tpu.memory_space<vmem>>, %arg4: memref<1600x32xbf16, #tpu.memory_space<vmem>>) attributes {dimension_semantics = [#tpu.dimension_semantics<parallel>], iteration_bounds = array<i64: 1>, scalar_prefetch = 0 : i64, scratch_operands = 0 : i64, tpu.core_type = #tpu.core_type<tc>, window_params = [{transform_indices = @transform_0, window_bounds = array<i64: 6400, 16>}, {pipeline_mode = #tpu.pipeline_mode<synchronous>, transform_indices = @transform_1, window_bounds = array<i64: 16, 32>}, {pipeline_mode = #tpu.pipeline_mode<synchronous>, transform_indices = @transform_2, window_bounds = array<i64: 1, 32>}, {transform_indices = @transform_3, window_bounds = array<i64: 1600, 32>}]} {
    %c0 = arith.constant 0 : index
    %c0_0 = arith.constant 0 : index
    %0 = vector.load %arg1[%c0, %c0_0] : memref<6400x16xbf16, #tpu.memory_space<vmem>>, vector<6400x16xbf16>
    %c0_1 = arith.constant 0 : index
    %c0_2 = arith.constant 0 : index
    %1 = vector.load %arg2[%c0_1, %c0_2] : memref<16x32xbf16, #tpu.memory_space<vmem>>, vector<16x32xbf16>
    %cst = arith.constant dense<0.000000e+00> : vector<6400x32xf32>
    %2 = tpu.matmul %0, %1, %cst {dimension_numbers = #tpu.dot_dimension_numbers<[1], [0], [0], [1], [0, 0, 1, 1], [], []>} : vector<6400x16xbf16>, vector<16x32xbf16>, vector<6400x32xf32> -> vector<6400x32xf32>
    %3 = vector.extract_strided_slice %2 {offsets = [0, 0], sizes = [1600, 32], strides = [1, 1]} : vector<6400x32xf32> to vector<1600x32xf32>
    %4 = vector.extract_strided_slice %2 {offsets = [1600, 0], sizes = [1600, 32], strides = [1, 1]} : vector<6400x32xf32> to vector<1600x32xf32>
    %5 = arith.maximumf %3, %4 : vector<1600x32xf32>
    %6 = vector.extract_strided_slice %2 {offsets = [3200, 0], sizes = [1600, 32], strides = [1, 1]} : vector<6400x32xf32> to vector<1600x32xf32>
    %7 = vector.extract_strided_slice %2 {offsets = [4800, 0], sizes = [1600, 32], strides = [1, 1]} : vector<6400x32xf32> to vector<1600x32xf32>
    %8 = arith.maximumf %6, %7 : vector<1600x32xf32>
    %9 = arith.maximumf %5, %8 : vector<1600x32xf32>
    %c0_3 = arith.constant 0 : index
    %c0_4 = arith.constant 0 : index
    %10 = vector.load %arg3[%c0_3, %c0_4] : memref<1x32xf32, #tpu.memory_space<vmem>>, vector<1x32xf32>
    %11 = vector.broadcast %10 : vector<1x32xf32> to vector<1600x32xf32>
    %12 = arith.addf %9, %11 : vector<1600x32xf32>
    %cst_5 = arith.constant 0.000000e+00 : f32
    %13 = vector.broadcast %cst_5 : f32 to vector<1600x32xf32>
    %14 = arith.maximumf %12, %13 : vector<1600x32xf32>
    %15 = arith.truncf %14 : vector<1600x32xf32> to vector<1600x32xbf16>
    %c0_6 = arith.constant 0 : index
    %c0_7 = arith.constant 0 : index
    %16 = vector.load %arg4[%c0_6, %c0_7] : memref<1600x32xbf16, #tpu.memory_space<vmem>>, vector<1600x32xbf16>
    tpu.vector_store %arg4[%c0_6, %c0_7], %15 {strides = array<i32>} : memref<1600x32xbf16, #tpu.memory_space<vmem>>, vector<1600x32xbf16>,
    return
  }
  func.func @transform_0(%arg0: i32) -> (i32, i32) {
    %c0_i32 = arith.constant 0 : i32
    %c0_i32_0 = arith.constant 0 : i32
    return %arg0, %c0_i32 : i32, i32
  }
  func.func @transform_1(%arg0: i32) -> (i32, i32) {
    %c0_i32 = arith.constant 0 : i32
    %c0_i32_0 = arith.constant 0 : i32
    %c0_i32_1 = arith.constant 0 : i32
    return %c0_i32, %c0_i32_0 : i32, i32
  }
  func.func @transform_2(%arg0: i32) -> (i32, i32) {
    %c0_i32 = arith.constant 0 : i32
    %c0_i32_0 = arith.constant 0 : i32
    %c0_i32_1 = arith.constant 0 : i32
    return %c0_i32, %c0_i32_0 : i32, i32
  }
  func.func @transform_3(%arg0: i32) -> (i32, i32) {
    %c0_i32 = arith.constant 0 : i32
    %c0_i32_0 = arith.constant 0 : i32
    return %arg0, %c0_i32 : i32, i32
  }
}

module attributes {stable_mosaic.version = 11 : i64} {
  func.func @conv_pool_relu_kernel(%arg0: i32, %arg1: memref<1792x288xbf16, #tpu.memory_space<vmem>>, %arg2: memref<288x64xbf16, #tpu.memory_space<vmem>>, %arg3: memref<1x64xf32, #tpu.memory_space<vmem>>, %arg4: memref<448x64xbf16, #tpu.memory_space<vmem>>) attributes {dimension_semantics = [#tpu.dimension_semantics<parallel>], iteration_bounds = array<i64: 1>, scalar_prefetch = 0 : i64, scratch_operands = 0 : i64, tpu.core_type = #tpu.core_type<tc>, window_params = [{transform_indices = @transform_0, window_bounds = array<i64: 1792, 288>}, {pipeline_mode = #tpu.pipeline_mode<synchronous>, transform_indices = @transform_1, window_bounds = array<i64: 288, 64>}, {pipeline_mode = #tpu.pipeline_mode<synchronous>, transform_indices = @transform_2, window_bounds = array<i64: 1, 64>}, {transform_indices = @transform_3, window_bounds = array<i64: 448, 64>}]} {
    %c0 = arith.constant 0 : index
    %c0_0 = arith.constant 0 : index
    %0 = vector.load %arg1[%c0, %c0_0] : memref<1792x288xbf16, #tpu.memory_space<vmem>>, vector<1792x288xbf16>
    %c0_1 = arith.constant 0 : index
    %c0_2 = arith.constant 0 : index
    %1 = vector.load %arg2[%c0_1, %c0_2] : memref<288x64xbf16, #tpu.memory_space<vmem>>, vector<288x64xbf16>
    %cst = arith.constant dense<0.000000e+00> : vector<1792x64xf32>
    %2 = tpu.matmul %0, %1, %cst {dimension_numbers = #tpu.dot_dimension_numbers<[1], [0], [0], [1], [0, 0, 1, 1], [], []>} : vector<1792x288xbf16>, vector<288x64xbf16>, vector<1792x64xf32> -> vector<1792x64xf32>
    %3 = vector.extract_strided_slice %2 {offsets = [0, 0], sizes = [448, 64], strides = [1, 1]} : vector<1792x64xf32> to vector<448x64xf32>
    %4 = vector.extract_strided_slice %2 {offsets = [448, 0], sizes = [448, 64], strides = [1, 1]} : vector<1792x64xf32> to vector<448x64xf32>
    %5 = arith.maximumf %3, %4 : vector<448x64xf32>
    %6 = vector.extract_strided_slice %2 {offsets = [896, 0], sizes = [448, 64], strides = [1, 1]} : vector<1792x64xf32> to vector<448x64xf32>
    %7 = vector.extract_strided_slice %2 {offsets = [1344, 0], sizes = [448, 64], strides = [1, 1]} : vector<1792x64xf32> to vector<448x64xf32>
    %8 = arith.maximumf %6, %7 : vector<448x64xf32>
    %9 = arith.maximumf %5, %8 : vector<448x64xf32>
    %c0_3 = arith.constant 0 : index
    %c0_4 = arith.constant 0 : index
    %10 = vector.load %arg3[%c0_3, %c0_4] : memref<1x64xf32, #tpu.memory_space<vmem>>, vector<1x64xf32>
    %11 = vector.broadcast %10 : vector<1x64xf32> to vector<448x64xf32>
    %12 = arith.addf %9, %11 : vector<448x64xf32>
    %cst_5 = arith.constant 0.000000e+00 : f32
    %13 = vector.broadcast %cst_5 : f32 to vector<448x64xf32>
    %14 = arith.maximumf %12, %13 : vector<448x64xf32>
    %15 = arith.truncf %14 : vector<448x64xf32> to vector<448x64xbf16>
    %c0_6 = arith.constant 0 : index
    %c0_7 = arith.constant 0 : index
    %16 = vector.load %arg4[%c0_6, %c0_7] : memref<448x64xbf16, #tpu.memory_space<vmem>>, vector<448x64xbf16>
    tpu.vector_store %arg4[%c0_6, %c0_7], %15 {strides = array<i32>} : memref<448x64xbf16, #tpu.memory_space<vmem>>, vector<448x64xbf16>,
    return
  }
  func.func @transform_0(%arg0: i32) -> (i32, i32) {
    %c0_i32 = arith.constant 0 : i32
    %c0_i32_0 = arith.constant 0 : i32
    return %arg0, %c0_i32 : i32, i32
  }
  func.func @transform_1(%arg0: i32) -> (i32, i32) {
    %c0_i32 = arith.constant 0 : i32
    %c0_i32_0 = arith.constant 0 : i32
    %c0_i32_1 = arith.constant 0 : i32
    return %c0_i32, %c0_i32_0 : i32, i32
  }
  func.func @transform_2(%arg0: i32) -> (i32, i32) {
    %c0_i32 = arith.constant 0 : i32
    %c0_i32_0 = arith.constant 0 : i32
    %c0_i32_1 = arith.constant 0 : i32
    return %c0_i32, %c0_i32_0 : i32, i32
  }
  func.func @transform_3(%arg0: i32) -> (i32, i32) {
    %c0_i32 = arith.constant 0 : i32
    %c0_i32_0 = arith.constant 0 : i32
    return %arg0, %c0_i32 : i32, i32
  }
}

module attributes {stable_mosaic.version = 11 : i64} {
  func.func @mlp_kernel(%arg0: i32, %arg1: memref<8x3136xbf16, #tpu.memory_space<vmem>>, %arg2: memref<3136x128xbf16, #tpu.memory_space<vmem>>, %arg3: memref<1x128xf32, #tpu.memory_space<vmem>>, %arg4: memref<128x128xbf16, #tpu.memory_space<vmem>>, %arg5: memref<1x128xf32, #tpu.memory_space<vmem>>, %arg6: memref<8x128xf32, #tpu.memory_space<vmem>>) attributes {dimension_semantics = [#tpu.dimension_semantics<parallel>], iteration_bounds = array<i64: 1>, scalar_prefetch = 0 : i64, scratch_operands = 0 : i64, tpu.core_type = #tpu.core_type<tc>, window_params = [{transform_indices = @transform_0, window_bounds = array<i64: 8, 3136>}, {pipeline_mode = #tpu.pipeline_mode<synchronous>, transform_indices = @transform_1, window_bounds = array<i64: 3136, 128>}, {pipeline_mode = #tpu.pipeline_mode<synchronous>, transform_indices = @transform_2, window_bounds = array<i64: 1, 128>}, {pipeline_mode = #tpu.pipeline_mode<synchronous>, transform_indices = @transform_3, window_bounds = array<i64: 128, 128>}, {pipeline_mode = #tpu.pipeline_mode<synchronous>, transform_indices = @transform_4, window_bounds = array<i64: 1, 128>}, {transform_indices = @transform_5, window_bounds = array<i64: 8, 128>}]} {
    %c0 = arith.constant 0 : index
    %c0_0 = arith.constant 0 : index
    %0 = vector.load %arg1[%c0, %c0_0] : memref<8x3136xbf16, #tpu.memory_space<vmem>>, vector<8x3136xbf16>
    %c0_1 = arith.constant 0 : index
    %c0_2 = arith.constant 0 : index
    %1 = vector.load %arg2[%c0_1, %c0_2] : memref<3136x128xbf16, #tpu.memory_space<vmem>>, vector<3136x128xbf16>
    %cst = arith.constant dense<0.000000e+00> : vector<8x128xf32>
    %2 = tpu.matmul %0, %1, %cst {dimension_numbers = #tpu.dot_dimension_numbers<[1], [0], [0], [1], [0, 0, 1, 1], [], []>} : vector<8x3136xbf16>, vector<3136x128xbf16>, vector<8x128xf32> -> vector<8x128xf32>
    %c0_3 = arith.constant 0 : index
    %c0_4 = arith.constant 0 : index
    %3 = vector.load %arg3[%c0_3, %c0_4] : memref<1x128xf32, #tpu.memory_space<vmem>>, vector<1x128xf32>
    %4 = vector.broadcast %3 : vector<1x128xf32> to vector<8x128xf32>
    %5 = arith.addf %2, %4 : vector<8x128xf32>
    %cst_5 = arith.constant 0.000000e+00 : f32
    %6 = vector.broadcast %cst_5 : f32 to vector<8x128xf32>
    %7 = arith.maximumf %5, %6 : vector<8x128xf32>
    %8 = arith.truncf %7 : vector<8x128xf32> to vector<8x128xbf16>
    %c0_6 = arith.constant 0 : index
    %c0_7 = arith.constant 0 : index
    %9 = vector.load %arg4[%c0_6, %c0_7] : memref<128x128xbf16, #tpu.memory_space<vmem>>, vector<128x128xbf16>
    %cst_8 = arith.constant dense<0.000000e+00> : vector<8x128xf32>
    %10 = tpu.matmul %8, %9, %cst_8 {dimension_numbers = #tpu.dot_dimension_numbers<[1], [0], [0], [1], [0, 0, 1, 1], [], []>} : vector<8x128xbf16>, vector<128x128xbf16>, vector<8x128xf32> -> vector<8x128xf32>
    %c0_9 = arith.constant 0 : index
    %c0_10 = arith.constant 0 : index
    %11 = vector.load %arg5[%c0_9, %c0_10] : memref<1x128xf32, #tpu.memory_space<vmem>>, vector<1x128xf32>
    %12 = vector.broadcast %11 : vector<1x128xf32> to vector<8x128xf32>
    %13 = arith.addf %10, %12 : vector<8x128xf32>
    %c0_11 = arith.constant 0 : index
    %c0_12 = arith.constant 0 : index
    %14 = vector.load %arg6[%c0_11, %c0_12] : memref<8x128xf32, #tpu.memory_space<vmem>>, vector<8x128xf32>
    tpu.vector_store %arg6[%c0_11, %c0_12], %13 {strides = array<i32>} : memref<8x128xf32, #tpu.memory_space<vmem>>, vector<8x128xf32>,
    return
  }
  func.func @transform_0(%arg0: i32) -> (i32, i32) {
    %c0_i32 = arith.constant 0 : i32
    %c0_i32_0 = arith.constant 0 : i32
    return %arg0, %c0_i32 : i32, i32
  }
  func.func @transform_1(%arg0: i32) -> (i32, i32) {
    %c0_i32 = arith.constant 0 : i32
    %c0_i32_0 = arith.constant 0 : i32
    %c0_i32_1 = arith.constant 0 : i32
    return %c0_i32, %c0_i32_0 : i32, i32
  }
  func.func @transform_2(%arg0: i32) -> (i32, i32) {
    %c0_i32 = arith.constant 0 : i32
    %c0_i32_0 = arith.constant 0 : i32
    %c0_i32_1 = arith.constant 0 : i32
    return %c0_i32, %c0_i32_0 : i32, i32
  }
  func.func @transform_3(%arg0: i32) -> (i32, i32) {
    %c0_i32 = arith.constant 0 : i32
    %c0_i32_0 = arith.constant 0 : i32
    %c0_i32_1 = arith.constant 0 : i32
    return %c0_i32, %c0_i32_0 : i32, i32
  }
  func.func @transform_4(%arg0: i32) -> (i32, i32) {
    %c0_i32 = arith.constant 0 : i32
    %c0_i32_0 = arith.constant 0 : i32
    %c0_i32_1 = arith.constant 0 : i32
    return %c0_i32, %c0_i32_0 : i32, i32
  }
  func.func @transform_5(%arg0: i32) -> (i32, i32) {
    %c0_i32 = arith.constant 0 : i32
    %c0_i32_0 = arith.constant 0 : i32
    return %arg0, %c0_i32 : i32, i32
  }
}

</mosaic_0001>

<bundles_post_ra>
// kernel: mnist_forward.3
= control target key start
LH: loop header
LB: loop body
LE: loop exit
PB: predicated region body
PF: predicated region fallthrough
CT: control target
= control target key end

     0   :  { %vm2823_vm0 = vcmask 130048   ;;  %vm7237_vm1 = vcmask 257024   ;;  %s12509_s1 = inlined_call_operand.vmem [shape: bf16[16,32], index: 1, kind: input, shape index: {}]   ;;  %s12510_s0 = inlined_call_operand.vmem [shape: bf16[6400,16], index: 0, kind: input, shape index: {}]   ;;  %s12511_s2 = inlined_call_operand.vmem [shape: f32[1,32], index: 2, kind: input, shape index: {}]   ;;  %s12512_s3 = inlined_call_operand.vmem [shape: bf16[1600,32], index: 3, kind: output, shape index: {}]  }
   0x1   :  { %v9846_v0 = vld [vmem:[%s12509_s1] sm:$0xff]  ;;  %v9447_v5 = vld [vmem:[%s12510_s0 + $0x8] sm:$0xff]  ;;  %v9448_v9 = vld [vmem:[%s12510_s0 + $0x10] sm:$0xff] }
   0x2   :  { %v9446_v1 = vld [vmem:[%s12510_s0] sm:$0xff]  ;;  %4031 = vmatpush.bf16.msra.mxu0 %v9846_v0  ;;  %9847 = vmatpush.bf16.msra.mxu1 %v9846_v0  ;;  %v9547_v6 = vld [vmem:[%s12510_s0 + $0x328] sm:$0xff]  ;;  %v9548_v10 = vld [vmem:[%s12510_s0 + $0x330] sm:$0xff] }
   0x3   :  { %v9546_v2 = vld [vmem:[%s12510_s0 + $0x320] sm:$0xff]  ;;  %9848 = vmatpush.bf16.msra.mxu2 %v9846_v0  ;;  %9849 = vmatpush.bf16.msra.mxu3 %v9846_v0  ;;  %v9647_v7 = vld [vmem:[%s12510_s0 + $0x648] sm:$0xff]  ;;  %v9648_v11 = vld [vmem:[%s12510_s0 + $0x650] sm:$0xff] }
   0x4   :  { %v9646_v3 = vld [vmem:[%s12510_s0 + $0x640] sm:$0xff]  ;;  %v9747_v8 = vld [vmem:[%s12510_s0 + $0x968] sm:$0xff]  ;;  %v9748_v12 = vld [vmem:[%s12510_s0 + $0x970] sm:$0xff] }
   0x5   :  { %v9746_v4 = vld [vmem:[%s12510_s0 + $0x960] sm:$0xff]  ;;  %9046 = vmatmul.msk.bf16.vlgmr.msra.gmra.mxu0 %vm2823_vm0, %v9446_v1  ;;  %9146 = vmatmul.msk.bf16.vlgmr.msra.gmra.mxu1 %vm2823_vm0, %v9546_v2  ;;  %v9449_v13 = vld [vmem:[%s12510_s0 + $0x18] sm:$0xff]  ;;  %v9451_v21 = vld [vmem:[%s12510_s0 + $0x28] sm:$0xff] }
   0x6   :  { %9246 = vmatmul.msk.bf16.vlgmr.msra.gmra.mxu2 %vm2823_vm0, %v9646_v3  ;;  %9346 = vmatmul.msk.bf16.vlgmr.msra.gmra.mxu3 %vm2823_vm0, %v9746_v4  ;;  %v9549_v14 = vld [vmem:[%s12510_s0 + $0x338] sm:$0xff]  ;;  %v9450_v17 = vld [vmem:[%s12510_s0 + $0x20] sm:$0xff]  ;;  %v9551_v22 = vld [vmem:[%s12510_s0 + $0x348] sm:$0xff] }
   0x7   :  { %v9649_v15 = vld [vmem:[%s12510_s0 + $0x658] sm:$0xff]  ;;  %v9550_v18 = vld [vmem:[%s12510_s0 + $0x340] sm:$0xff]  ;;  %v9651_v23 = vld [vmem:[%s12510_s0 + $0x668] sm:$0xff] }
   0x8   :  { %v9749_v16 = vld [vmem:[%s12510_s0 + $0x978] sm:$0xff]  ;;  %v9650_v19 = vld [vmem:[%s12510_s0 + $0x660] sm:$0xff]  ;;  %v9751_v24 = vld [vmem:[%s12510_s0 + $0x988] sm:$0xff] }
   0x9   :  { %v9750_v20 = vld [vmem:[%s12510_s0 + $0x980] sm:$0xff]  ;;  %v9452_v25 = vld [vmem:[%s12510_s0 + $0x30] sm:$0xff]  ;;  %v9453_v29 = vld [vmem:[%s12510_s0 + $0x38] sm:$0xff] }
   0xa   :  { %v9552_v26 = vld [vmem:[%s12510_s0 + $0x350] sm:$0xff]  ;;  %v9553_v30 = vld [vmem:[%s12510_s0 + $0x358] sm:$0xff]  ;;  %v9454_v33 = vld [vmem:[%s12510_s0 + $0x40] sm:$0xff] }
   0xb   :  { %v9652_v27 = vld [vmem:[%s12510_s0 + $0x670] sm:$0xff]  ;;  %v9653_v31 = vld [vmem:[%s12510_s0 + $0x678] sm:$0xff]  ;;  %v9554_v34 = vld [vmem:[%s12510_s0 + $0x360] sm:$0xff] }
   0xc   :  { %v9752_v28 = vld [vmem:[%s12510_s0 + $0x990] sm:$0xff]  ;;  %v9753_v32 = vld [vmem:[%s12510_s0 + $0x998] sm:$0xff]  ;;  %v9654_v37 = vld [vmem:[%s12510_s0 + $0x680] sm:$0xff] }
   0xd   :  { %v9754_v38 = vld [vmem:[%s12510_s0 + $0x9a0] sm:$0xff]  ;;  %v9455_v51 = vld [vmem:[%s12510_s0 + $0x48] sm:$0xff] }
   0xe   :  { %v10026_v43 = vld [vmem:[%s12511_s2] ss:$0 sm:$0xff]  ;;  %v9555_v52 = vld [vmem:[%s12510_s0 + $0x368] sm:$0xff] }
   0xf   :  { %v9655_v58 = vld [vmem:[%s12510_s0 + $0x688] sm:$0xff] }
  0x10   :  { %v9755_v59 = vld [vmem:[%s12510_s0 + $0x9a8] sm:$0xff] }
  0x15   :  { %9047 = vmatmul.msk.bf16.gmra.mxu0 %vm2823_vm0, %v9447_v5  ;;  %9147 = vmatmul.msk.bf16.gmra.mxu1 %vm2823_vm0, %v9547_v6 }
  0x16   :  { %9247 = vmatmul.msk.bf16.gmra.mxu2 %vm2823_vm0, %v9647_v7  ;;  %9347 = vmatmul.msk.bf16.gmra.mxu3 %vm2823_vm0, %v9747_v8 }
  0x25   :  { %9048 = vmatmul.msk.bf16.gmra.mxu0 %vm2823_vm0, %v9448_v9  ;;  %9148 = vmatmul.msk.bf16.gmra.mxu1 %vm2823_vm0, %v9548_v10 }
  0x26   :  { %9248 = vmatmul.msk.bf16.gmra.mxu2 %vm2823_vm0, %v9648_v11  ;;  %9348 = vmatmul.msk.bf16.gmra.mxu3 %vm2823_vm0, %v9748_v12  ;;  %v9456_v11 = vld [vmem:[%s12510_s0 + $0x50] sm:$0xff] }
  0x27   :  { %v9556_v12 = vld [vmem:[%s12510_s0 + $0x370] sm:$0xff] }
  0x35   :  { %9049 = vmatmul.msk.bf16.gmra.mxu0 %vm2823_vm0, %v9449_v13  ;;  %9149 = vmatmul.msk.bf16.gmra.mxu1 %vm2823_vm0, %v9549_v14 }
  0x36   :  { %9249 = vmatmul.msk.bf16.gmra.mxu2 %vm2823_vm0, %v9649_v15  ;;  %9349 = vmatmul.msk.bf16.gmra.mxu3 %vm2823_vm0, %v9749_v16 }
  0x45   :  { %9050 = vmatmul.msk.bf16.gmra.mxu0 %vm2823_vm0, %v9450_v17  ;;  %9150 = vmatmul.msk.bf16.gmra.mxu1 %vm2823_vm0, %v9550_v18  ;;  %v9656_v18 = vld [vmem:[%s12510_s0 + $0x690] sm:$0xff] }
  0x46   :  { %9250 = vmatmul.msk.bf16.gmra.mxu2 %vm2823_vm0, %v9650_v19  ;;  %9350 = vmatmul.msk.bf16.gmra.mxu3 %vm2823_vm0, %v9750_v20  ;;  %v9756_v19 = vld [vmem:[%s12510_s0 + $0x9b0] sm:$0xff] }
  0x55   :  { %9051 = vmatmul.msk.bf16.gmra.mxu0 %vm2823_vm0, %v9451_v21  ;;  %9151 = vmatmul.msk.bf16.gmra.mxu1 %vm2823_vm0, %v9551_v22 }
  0x56   :  { %9251 = vmatmul.msk.bf16.gmra.mxu2 %vm2823_vm0, %v9651_v23  ;;  %9351 = vmatmul.msk.bf16.gmra.mxu3 %vm2823_vm0, %v9751_v24 }
  0x65   :  { %9052 = vmatmul.msk.bf16.gmra.mxu0 %vm2823_vm0, %v9452_v25  ;;  %9152 = vmatmul.msk.bf16.gmra.mxu1 %vm2823_vm0, %v9552_v26 }
  0x66   :  { %9252 = vmatmul.msk.bf16.gmra.mxu2 %vm2823_vm0, %v9652_v27  ;;  %9352 = vmatmul.msk.bf16.gmra.mxu3 %vm2823_vm0, %v9752_v28 }
  0x75   :  { %9053 = vmatmul.msk.bf16.gmra.mxu0 %vm2823_vm0, %v9453_v29  ;;  %9153 = vmatmul.msk.bf16.gmra.mxu1 %vm2823_vm0, %v9553_v30 }
  0x76   :  { %9253 = vmatmul.msk.bf16.gmra.mxu2 %vm2823_vm0, %v9653_v31  ;;  %9353 = vmatmul.msk.bf16.gmra.mxu3 %vm2823_vm0, %v9753_v32 }
  0x82   :  { %v4033_v35 = vpop.f32.mrf.mxu0  ;;  %v4533_v36 = vpop.f32.mrf.mxu1 }
  0x83   :  { %v6033_v39 = vmax.f32 %v4033_v35, %v4533_v36  ;;  %v9457_v35 = vld [vmem:[%s12510_s0 + $0x58] sm:$0xff] }
  0x84   :  { %v9557_v36 = vld [vmem:[%s12510_s0 + $0x378] sm:$0xff] }
  0x85   :  { %9054 = vmatmul.msk.bf16.gmra.mxu0 %vm2823_vm0, %v9454_v33  ;;  %9154 = vmatmul.msk.bf16.gmra.mxu1 %vm2823_vm0, %v9554_v34 }
  0x86   :  { %9254 = vmatmul.msk.bf16.gmra.mxu2 %vm2823_vm0, %v9654_v37  ;;  %9354 = vmatmul.msk.bf16.gmra.mxu3 %vm2823_vm0, %v9754_v38 }
  0x89   :  { %v5033_v40 = vpop.f32.mrf.mxu2  ;;  %v5533_v41 = vpop.f32.mrf.mxu3 }
  0x8a   :  { %v6233_v42 = vmax.f32 %v5033_v40, %v5533_v41  ;;  %v4035_v44 = vpop.f32.mrf.mxu0  ;;  %v4535_v45 = vpop.f32.mrf.mxu1 }
  0x8b   :  { %v6034_v54 = vmax.f32 %v4035_v44, %v4535_v45  ;;  %v9757_v44 = vld [vmem:[%s12510_s0 + $0x9b8] sm:$0xff] }
  0x8c   :  { %v6433_v46 = vmax.f32 %v6033_v39, %v6233_v42  ;;  %v9657_v42 = vld [vmem:[%s12510_s0 + $0x698] sm:$0xff] }
  0x8e   :  { %v6637_v47 = vadd.f32 %v10026_v43, %v6433_v46 }
  0x90   :  { %v6837_v48 = vmax.f32 %v6637_v47, 0.0 }
  0x91   :  { %v5035_v49 = vpop.f32.mrf.mxu2  ;;  %v5535_v50 = vpop.f32.mrf.mxu3 }
  0x92   :  { %v7037_v53 = vpack.c.bf16 %v6837_v48, %v6837_v48  ;;  %v6234_v55 = vmax.f32 %v5035_v49, %v5535_v50  ;;  %v4038_v56 = vpop.f32.mrf.mxu0  ;;  %v4538_v57 = vpop.f32.mrf.mxu1 }
  0x93   :  { %v6035_v63 = vmax.f32 %v4038_v56, %v4538_v57 }
  0x94   :  { %7238 = vst.msk [vmem:[%s12512_s3] sm:$0xf] %vm7237_vm1, %v7037_v53  ;;  %v6434_v60 = vmax.f32 %v6034_v54, %v6234_v55 }
  0x95   :  { %9055 = vmatmul.msk.bf16.gmra.mxu0 %vm2823_vm0, %v9455_v51  ;;  %9155 = vmatmul.msk.bf16.gmra.mxu1 %vm2823_vm0, %v9555_v52 }
  0x96   :  { %v6638_v61 = vadd.f32 %v10026_v43, %v6434_v60  ;;  %9255 = vmatmul.msk.bf16.gmra.mxu2 %vm2823_vm0, %v9655_v58  ;;  %9355 = vmatmul.msk.bf16.gmra.mxu3 %vm2823_vm0, %v9755_v59  ;;  %v9458_v60 = vld [vmem:[%s12510_s0 + $0x60] sm:$0xff] }
  0x98   :  { %v6838_v62 = vmax.f32 %v6638_v61, 0.0  ;;  %v9558_v61 = vld [vmem:[%s12510_s0 + $0x380] sm:$0xff] }
  0x99   :  { %v5038_v0 = vpop.f32.mrf.mxu2  ;;  %v5538_v1 = vpop.f32.mrf.mxu3 }
  0x9a   :  { %v7038_v2 = vpack.c.bf16 %v6838_v62, %v6838_v62  ;;  %v6235_v3 = vmax.f32 %v5038_v0, %v5538_v1  ;;  %v4040_v4 = vpop.f32.mrf.mxu0  ;;  %v4540_v5 = vpop.f32.mrf.mxu1 }
  0x9b   :  { %v6036_v14 = vmax.f32 %v4040_v4, %v4540_v5  ;;  %v9758_v4 = vld [vmem:[%s12510_s0 + $0x9c0] sm:$0xff] }
  0x9c   :  { %7239 = vst.msk [vmem:[%s12512_s3 + $0x4] sm:$0xf] %vm7237_vm1, %v7038_v2  ;;  %v6435_v6 = vmax.f32 %v6035_v63, %v6235_v3  ;;  %v9658_v3 = vld [vmem:[%s12510_s0 + $0x6a0] sm:$0xff] }
  0x9e   :  { %v6639_v7 = vadd.f32 %v10026_v43, %v6435_v6 }
  0xa0   :  { %v6839_v8 = vmax.f32 %v6639_v7, 0.0 }
  0xa1   :  { %v5040_v9 = vpop.f32.mrf.mxu2  ;;  %v5540_v10 = vpop.f32.mrf.mxu3 }
  0xa2   :  { %v7039_v13 = vpack.c.bf16 %v6839_v8, %v6839_v8  ;;  %v6236_v15 = vmax.f32 %v5040_v9, %v5540_v10  ;;  %v4043_v16 = vpop.f32.mrf.mxu0  ;;  %v4543_v17 = vpop.f32.mrf.mxu1 }
  0xa3   :  { %v6037_v23 = vmax.f32 %v4043_v16, %v4543_v17 }
  0xa4   :  { %7240 = vst.msk [vmem:[%s12512_s3 + $0x8] sm:$0xf] %vm7237_vm1, %v7039_v13  ;;  %v6436_v20 = vmax.f32 %v6036_v14, %v6236_v15 }
  0xa5   :  { %9056 = vmatmul.msk.bf16.gmra.mxu0 %vm2823_vm0, %v9456_v11  ;;  %9156 = vmatmul.msk.bf16.gmra.mxu1 %vm2823_vm0, %v9556_v12 }
  0xa6   :  { %v6640_v21 = vadd.f32 %v10026_v43, %v6436_v20  ;;  %9256 = vmatmul.msk.bf16.gmra.mxu2 %vm2823_vm0, %v9656_v18  ;;  %9356 = vmatmul.msk.bf16.gmra.mxu3 %vm2823_vm0, %v9756_v19  ;;  %v9459_v20 = vld [vmem:[%s12510_s0 + $0x68] sm:$0xff] }
  0xa8   :  { %v6840_v22 = vmax.f32 %v6640_v21, 0.0  ;;  %v9559_v21 = vld [vmem:[%s12510_s0 + $0x388] sm:$0xff] }
  0xa9   :  { %v5043_v24 = vpop.f32.mrf.mxu2  ;;  %v5543_v25 = vpop.f32.mrf.mxu3 }
  0xaa   :  { %v7040_v26 = vpack.c.bf16 %v6840_v22, %v6840_v22  ;;  %v6237_v27 = vmax.f32 %v5043_v24, %v5543_v25  ;;  %v4045_v28 = vpop.f32.mrf.mxu0  ;;  %v4545_v29 = vpop.f32.mrf.mxu1 }
  0xab   :  { %v6038_v38 = vmax.f32 %v4045_v28, %v4545_v29  ;;  %v9759_v28 = vld [vmem:[%s12510_s0 + $0x9c8] sm:$0xff] }
  0xac   :  { %7241 = vst.msk [vmem:[%s12512_s3 + $0xc] sm:$0xf] %vm7237_vm1, %v7040_v26  ;;  %v6437_v30 = vmax.f32 %v6037_v23, %v6237_v27  ;;  %v9659_v27 = vld [vmem:[%s12510_s0 + $0x6a8] sm:$0xff] }
  0xae   :  { %v6641_v31 = vadd.f32 %v10026_v43, %v6437_v30 }
  0xb0   :  { %v6841_v32 = vmax.f32 %v6641_v31, 0.0 }
  0xb1   :  { %v5045_v33 = vpop.f32.mrf.mxu2  ;;  %v5545_v34 = vpop.f32.mrf.mxu3 }
  0xb2   :  { %v7041_v37 = vpack.c.bf16 %v6841_v32, %v6841_v32  ;;  %v6238_v39 = vmax.f32 %v5045_v33, %v5545_v34  ;;  %v4048_v40 = vpop.f32.mrf.mxu0  ;;  %v4548_v41 = vpop.f32.mrf.mxu1 }
  0xb3   :  { %v6039_v48 = vmax.f32 %v4048_v40, %v4548_v41 }
  0xb4   :  { %7242 = vst.msk [vmem:[%s12512_s3 + $0x10] sm:$0xf] %vm7237_vm1, %v7041_v37  ;;  %v6438_v45 = vmax.f32 %v6038_v38, %v6238_v39 }
  0xb5   :  { %9057 = vmatmul.msk.bf16.gmra.mxu0 %vm2823_vm0, %v9457_v35  ;;  %9157 = vmatmul.msk.bf16.gmra.mxu1 %vm2823_vm0, %v9557_v36 }
  0xb6   :  { %v6642_v46 = vadd.f32 %v10026_v43, %v6438_v45  ;;  %9257 = vmatmul.msk.bf16.gmra.mxu2 %vm2823_vm0, %v9657_v42  ;;  %9357 = vmatmul.msk.bf16.gmra.mxu3 %vm2823_vm0, %v9757_v44  ;;  %v9460_v45 = vld [vmem:[%s12510_s0 + $0x70] sm:$0xff] }
  0xb8   :  { %v6842_v47 = vmax.f32 %v6642_v46, 0.0  ;;  %v9560_v46 = vld [vmem:[%s12510_s0 + $0x390] sm:$0xff] }
  0xb9   :  { %v5048_v49 = vpop.f32.mrf.mxu2  ;;  %v5548_v50 = vpop.f32.mrf.mxu3 }
  0xba   :  { %v7042_v51 = vpack.c.bf16 %v6842_v47, %v6842_v47  ;;  %v6239_v52 = vmax.f32 %v5048_v49, %v5548_v50  ;;  %v4050_v53 = vpop.f32.mrf.mxu0  ;;  %v4550_v54 = vpop.f32.mrf.mxu1 }
  0xbb   :  { %v6040_v63 = vmax.f32 %v4050_v53, %v4550_v54  ;;  %v9760_v53 = vld [vmem:[%s12510_s0 + $0x9d0] sm:$0xff] }
  0xbc   :  { %7243 = vst.msk [vmem:[%s12512_s3 + $0x14] sm:$0xf] %vm7237_vm1, %v7042_v51  ;;  %v6439_v55 = vmax.f32 %v6039_v48, %v6239_v52  ;;  %v9660_v52 = vld [vmem:[%s12510_s0 + $0x6b0] sm:$0xff] }
  0xbe   :  { %v6643_v56 = vadd.f32 %v10026_v43, %v6439_v55 }
  0xc0   :  { %v6843_v57 = vmax.f32 %v6643_v56, 0.0 }
  0xc1   :  { %v5050_v58 = vpop.f32.mrf.mxu2  ;;  %v5550_v59 = vpop.f32.mrf.mxu3 }
  0xc2   :  { %v7043_v62 = vpack.c.bf16 %v6843_v57, %v6843_v57  ;;  %v6240_v0 = vmax.f32 %v5050_v58, %v5550_v59  ;;  %v4053_v1 = vpop.f32.mrf.mxu0  ;;  %v4553_v2 = vpop.f32.mrf.mxu1 }
  0xc3   :  { %v6041_v8 = vmax.f32 %v4053_v1, %v4553_v2 }
  0xc4   :  { %7244 = vst.msk [vmem:[%s12512_s3 + $0x18] sm:$0xf] %vm7237_vm1, %v7043_v62  ;;  %v6440_v5 = vmax.f32 %v6040_v63, %v6240_v0 }
  0xc5   :  { %9058 = vmatmul.msk.bf16.gmra.mxu0 %vm2823_vm0, %v9458_v60  ;;  %9158 = vmatmul.msk.bf16.gmra.mxu1 %vm2823_vm0, %v9558_v61 }
  0xc6   :  { %v6644_v6 = vadd.f32 %v10026_v43, %v6440_v5  ;;  %9258 = vmatmul.msk.bf16.gmra.mxu2 %vm2823_vm0, %v9658_v3  ;;  %9358 = vmatmul.msk.bf16.gmra.mxu3 %vm2823_vm0, %v9758_v4  ;;  %v9461_v5 = vld [vmem:[%s12510_s0 + $0x78] sm:$0xff] }
  0xc8   :  { %v6844_v7 = vmax.f32 %v6644_v6, 0.0  ;;  %v9561_v6 = vld [vmem:[%s12510_s0 + $0x398] sm:$0xff] }
  0xc9   :  { %v5053_v9 = vpop.f32.mrf.mxu2  ;;  %v5553_v10 = vpop.f32.mrf.mxu3 }
  0xca   :  { %v7044_v11 = vpack.c.bf16 %v6844_v7, %v6844_v7  ;;  %v6241_v12 = vmax.f32 %v5053_v9, %v5553_v10  ;;  %v4055_v13 = vpop.f32.mrf.mxu0  ;;  %v4555_v14 = vpop.f32.mrf.mxu1 }
  0xcb   :  { %v6042_v23 = vmax.f32 %v4055_v13, %v4555_v14  ;;  %v9761_v13 = vld [vmem:[%s12510_s0 + $0x9d8] sm:$0xff] }
  0xcc   :  { %7245 = vst.msk [vmem:[%s12512_s3 + $0x1c] sm:$0xf] %vm7237_vm1, %v7044_v11  ;;  %v6441_v15 = vmax.f32 %v6041_v8, %v6241_v12  ;;  %v9661_v12 = vld [vmem:[%s12510_s0 + $0x6b8] sm:$0xff] }
  0xce   :  { %v6645_v16 = vadd.f32 %v10026_v43, %v6441_v15 }
  0xd0   :  { %v6845_v17 = vmax.f32 %v6645_v16, 0.0 }
  0xd1   :  { %v5055_v18 = vpop.f32.mrf.mxu2  ;;  %v5555_v19 = vpop.f32.mrf.mxu3 }
  0xd2   :  { %v7045_v22 = vpack.c.bf16 %v6845_v17, %v6845_v17  ;;  %v6242_v24 = vmax.f32 %v5055_v18, %v5555_v19  ;;  %v4058_v25 = vpop.f32.mrf.mxu0  ;;  %v4558_v26 = vpop.f32.mrf.mxu1 }
  0xd3   :  { %v6043_v32 = vmax.f32 %v4058_v25, %v4558_v26 }
  0xd4   :  { %7246 = vst.msk [vmem:[%s12512_s3 + $0x20] sm:$0xf] %vm7237_vm1, %v7045_v22  ;;  %v6442_v29 = vmax.f32 %v6042_v23, %v6242_v24 }
  0xd5   :  { %9059 = vmatmul.msk.bf16.gmra.mxu0 %vm2823_vm0, %v9459_v20  ;;  %9159 = vmatmul.msk.bf16.gmra.mxu1 %vm2823_vm0, %v9559_v21 }
  0xd6   :  { %v6646_v30 = vadd.f32 %v10026_v43, %v6442_v29  ;;  %9259 = vmatmul.msk.bf16.gmra.mxu2 %vm2823_vm0, %v9659_v27  ;;  %9359 = vmatmul.msk.bf16.gmra.mxu3 %vm2823_vm0, %v9759_v28  ;;  %v9462_v29 = vld [vmem:[%s12510_s0 + $0x80] sm:$0xff] }
  0xd8   :  { %v6846_v31 = vmax.f32 %v6646_v30, 0.0  ;;  %v9562_v30 = vld [vmem:[%s12510_s0 + $0x3a0] sm:$0xff] }
  0xd9   :  { %v5058_v33 = vpop.f32.mrf.mxu2  ;;  %v5558_v34 = vpop.f32.mrf.mxu3 }
  0xda   :  { %v7046_v35 = vpack.c.bf16 %v6846_v31, %v6846_v31  ;;  %v6243_v36 = vmax.f32 %v5058_v33, %v5558_v34  ;;  %v4060_v37 = vpop.f32.mrf.mxu0  ;;  %v4560_v38 = vpop.f32.mrf.mxu1 }
  0xdb   :  { %v6044_v48 = vmax.f32 %v4060_v37, %v4560_v38  ;;  %v9762_v37 = vld [vmem:[%s12510_s0 + $0x9e0] sm:$0xff] }
  0xdc   :  { %7247 = vst.msk [vmem:[%s12512_s3 + $0x24] sm:$0xf] %vm7237_vm1, %v7046_v35  ;;  %v6443_v39 = vmax.f32 %v6043_v32, %v6243_v36  ;;  %v9662_v36 = vld [vmem:[%s12510_s0 + $0x6c0] sm:$0xff] }
  0xde   :  { %v6647_v40 = vadd.f32 %v10026_v43, %v6443_v39 }
  0xe0   :  { %v6847_v41 = vmax.f32 %v6647_v40, 0.0 }
  0xe1   :  { %v5060_v42 = vpop.f32.mrf.mxu2  ;;  %v5560_v44 = vpop.f32.mrf.mxu3 }
  0xe2   :  { %v7047_v47 = vpack.c.bf16 %v6847_v41, %v6847_v41  ;;  %v6244_v49 = vmax.f32 %v5060_v42, %v5560_v44  ;;  %v4063_v50 = vpop.f32.mrf.mxu0  ;;  %v4563_v51 = vpop.f32.mrf.mxu1 }
  0xe3   :  { %v6045_v57 = vmax.f32 %v4063_v50, %v4563_v51 }
  0xe4   :  { %7248 = vst.msk [vmem:[%s12512_s3 + $0x28] sm:$0xf] %vm7237_vm1, %v7047_v47  ;;  %v6444_v54 = vmax.f32 %v6044_v48, %v6244_v49 }
  0xe5   :  { %9060 = vmatmul.msk.bf16.gmra.mxu0 %vm2823_vm0, %v9460_v45  ;;  %9160 = vmatmul.msk.bf16.gmra.mxu1 %vm2823_vm0, %v9560_v46 }
  0xe6   :  { %v6648_v55 = vadd.f32 %v10026_v43, %v6444_v54  ;;  %9260 = vmatmul.msk.bf16.gmra.mxu2 %vm2823_vm0, %v9660_v52  ;;  %9360 = vmatmul.msk.bf16.gmra.mxu3 %vm2823_vm0, %v9760_v53  ;;  %v9463_v54 = vld [vmem:[%s12510_s0 + $0x88] sm:$0xff] }
  0xe8   :  { %v6848_v56 = vmax.f32 %v6648_v55, 0.0  ;;  %v9563_v55 = vld [vmem:[%s12510_s0 + $0x3a8] sm:$0xff] }
  0xe9   :  { %v5063_v58 = vpop.f32.mrf.mxu2  ;;  %v5563_v59 = vpop.f32.mrf.mxu3 }
  0xea   :  { %v7048_v60 = vpack.c.bf16 %v6848_v56, %v6848_v56  ;;  %v6245_v61 = vmax.f32 %v5063_v58, %v5563_v59  ;;  %v4065_v62 = vpop.f32.mrf.mxu0  ;;  %v4565_v63 = vpop.f32.mrf.mxu1 }
  0xeb   :  { %v6046_v8 = vmax.f32 %v4065_v62, %v4565_v63  ;;  %v9763_v62 = vld [vmem:[%s12510_s0 + $0x9e8] sm:$0xff] }
  0xec   :  { %7249 = vst.msk [vmem:[%s12512_s3 + $0x2c] sm:$0xf] %vm7237_vm1, %v7048_v60  ;;  %v6445_v0 = vmax.f32 %v6045_v57, %v6245_v61  ;;  %v9663_v61 = vld [vmem:[%s12510_s0 + $0x6c8] sm:$0xff] }
  0xee   :  { %v6649_v1 = vadd.f32 %v10026_v43, %v6445_v0 }
  0xf0   :  { %v6849_v2 = vmax.f32 %v6649_v1, 0.0 }
  0xf1   :  { %v5065_v3 = vpop.f32.mrf.mxu2  ;;  %v5565_v4 = vpop.f32.mrf.mxu3 }
  0xf2   :  { %v7049_v7 = vpack.c.bf16 %v6849_v2, %v6849_v2  ;;  %v6246_v9 = vmax.f32 %v5065_v3, %v5565_v4  ;;  %v4068_v10 = vpop.f32.mrf.mxu0  ;;  %v4568_v11 = vpop.f32.mrf.mxu1 }
  0xf3   :  { %v6047_v17 = vmax.f32 %v4068_v10, %v4568_v11 }
  0xf4   :  { %7250 = vst.msk [vmem:[%s12512_s3 + $0x30] sm:$0xf] %vm7237_vm1, %v7049_v7  ;;  %v6446_v14 = vmax.f32 %v6046_v8, %v6246_v9 }
  0xf5   :  { %9061 = vmatmul.msk.bf16.gmra.mxu0 %vm2823_vm0, %v9461_v5  ;;  %9161 = vmatmul.msk.bf16.gmra.mxu1 %vm2823_vm0, %v9561_v6 }
  0xf6   :  { %v6650_v15 = vadd.f32 %v10026_v43, %v6446_v14  ;;  %9261 = vmatmul.msk.bf16.gmra.mxu2 %vm2823_vm0, %v9661_v12  ;;  %9361 = vmatmul.msk.bf16.gmra.mxu3 %vm2823_vm0, %v9761_v13  ;;  %v9464_v14 = vld [vmem:[%s12510_s0 + $0x90] sm:$0xff] }
  0xf8   :  { %v6850_v16 = vmax.f32 %v6650_v15, 0.0  ;;  %v9564_v15 = vld [vmem:[%s12510_s0 + $0x3b0] sm:$0xff] }
  0xf9   :  { %v5068_v18 = vpop.f32.mrf.mxu2  ;;  %v5568_v19 = vpop.f32.mrf.mxu3 }
  0xfa   :  { %v7050_v20 = vpack.c.bf16 %v6850_v16, %v6850_v16  ;;  %v6247_v21 = vmax.f32 %v5068_v18, %v5568_v19  ;;  %v4070_v22 = vpop.f32.mrf.mxu0  ;;  %v4570_v23 = vpop.f32.mrf.mxu1 }
  0xfb   :  { %v6048_v32 = vmax.f32 %v4070_v22, %v4570_v23  ;;  %v9764_v22 = vld [vmem:[%s12510_s0 + $0x9f0] sm:$0xff] }
  0xfc   :  { %7251 = vst.msk [vmem:[%s12512_s3 + $0x34] sm:$0xf] %vm7237_vm1, %v7050_v20  ;;  %v6447_v24 = vmax.f32 %v6047_v17, %v6247_v21  ;;  %v9664_v21 = vld [vmem:[%s12510_s0 + $0x6d0] sm:$0xff] }
  0xfe   :  { %v6651_v25 = vadd.f32 %v10026_v43, %v6447_v24 }
 0x100   :  { %v6851_v26 = vmax.f32 %v6651_v25, 0.0 }
 0x101   :  { %v5070_v27 = vpop.f32.mrf.mxu2  ;;  %v5570_v28 = vpop.f32.mrf.mxu3 }
 0x102   :  { %v7051_v31 = vpack.c.bf16 %v6851_v26, %v6851_v26  ;;  %v6248_v33 = vmax.f32 %v5070_v27, %v5570_v28  ;;  %v4073_v34 = vpop.f32.mrf.mxu0  ;;  %v4573_v35 = vpop.f32.mrf.mxu1 }
 0x103   :  { %v6049_v41 = vmax.f32 %v4073_v34, %v4573_v35 }
 0x104   :  { %7252 = vst.msk [vmem:[%s12512_s3 + $0x38] sm:$0xf] %vm7237_vm1, %v7051_v31  ;;  %v6448_v38 = vmax.f32 %v6048_v32, %v6248_v33 }
 0x105   :  { %9062 = vmatmul.msk.bf16.gmra.mxu0 %vm2823_vm0, %v9462_v29  ;;  %9162 = vmatmul.msk.bf16.gmra.mxu1 %vm2823_vm0, %v9562_v30 }
 0x106   :  { %v6652_v39 = vadd.f32 %v10026_v43, %v6448_v38  ;;  %9262 = vmatmul.msk.bf16.gmra.mxu2 %vm2823_vm0, %v9662_v36  ;;  %9362 = vmatmul.msk.bf16.gmra.mxu3 %vm2823_vm0, %v9762_v37  ;;  %v9465_v38 = vld [vmem:[%s12510_s0 + $0x98] sm:$0xff] }
 0x108   :  { %v6852_v40 = vmax.f32 %v6652_v39, 0.0  ;;  %v9565_v39 = vld [vmem:[%s12510_s0 + $0x3b8] sm:$0xff] }
 0x109   :  { %v5073_v42 = vpop.f32.mrf.mxu2  ;;  %v5573_v44 = vpop.f32.mrf.mxu3 }
 0x10a   :  { %v7052_v45 = vpack.c.bf16 %v6852_v40, %v6852_v40  ;;  %v6249_v46 = vmax.f32 %v5073_v42, %v5573_v44  ;;  %v4075_v47 = vpop.f32.mrf.mxu0  ;;  %v4575_v48 = vpop.f32.mrf.mxu1 }
 0x10b   :  { %v6050_v57 = vmax.f32 %v4075_v47, %v4575_v48  ;;  %v9765_v47 = vld [vmem:[%s12510_s0 + $0x9f8] sm:$0xff] }
 0x10c   :  { %7253 = vst.msk [vmem:[%s12512_s3 + $0x3c] sm:$0xf] %vm7237_vm1, %v7052_v45  ;;  %v6449_v49 = vmax.f32 %v6049_v41, %v6249_v46  ;;  %v9665_v46 = vld [vmem:[%s12510_s0 + $0x6d8] sm:$0xff] }
 0x10e   :  { %v6653_v50 = vadd.f32 %v10026_v43, %v6449_v49 }
 0x110   :  { %v6853_v51 = vmax.f32 %v6653_v50, 0.0 }
 0x111   :  { %v5075_v52 = vpop.f32.mrf.mxu2  ;;  %v5575_v53 = vpop.f32.mrf.mxu3 }
 0x112   :  { %v7053_v56 = vpack.c.bf16 %v6853_v51, %v6853_v51  ;;  %v6250_v58 = vmax.f32 %v5075_v52, %v5575_v53  ;;  %v4078_v59 = vpop.f32.mrf.mxu0  ;;  %v4578_v60 = vpop.f32.mrf.mxu1 }
 0x113   :  { %v6051_v2 = vmax.f32 %v4078_v59, %v4578_v60 }
 0x114   :  { %7254 = vst.msk [vmem:[%s12512_s3 + $0x40] sm:$0xf] %vm7237_vm1, %v7053_v56  ;;  %v6450_v63 = vmax.f32 %v6050_v57, %v6250_v58 }
 0x115   :  { %9063 = vmatmul.msk.bf16.gmra.mxu0 %vm2823_vm0, %v9463_v54  ;;  %9163 = vmatmul.msk.bf16.gmra.mxu1 %vm2823_vm0, %v9563_v55 }
 0x116   :  { %v6654_v0 = vadd.f32 %v10026_v43, %v6450_v63  ;;  %9263 = vmatmul.msk.bf16.gmra.mxu2 %vm2823_vm0, %v9663_v61  ;;  %9363 = vmatmul.msk.bf16.gmra.mxu3 %vm2823_vm0, %v9763_v62  ;;  %v9466_v63 = vld [vmem:[%s12510_s0 + $0xa0] sm:$0xff] }
 0x118   :  { %v6854_v1 = vmax.f32 %v6654_v0, 0.0  ;;  %v9566_v0 = vld [vmem:[%s12510_s0 + $0x3c0] sm:$0xff] }
 0x119   :  { %v5078_v3 = vpop.f32.mrf.mxu2  ;;  %v5578_v4 = vpop.f32.mrf.mxu3 }
 0x11a   :  { %v7054_v5 = vpack.c.bf16 %v6854_v1, %v6854_v1  ;;  %v6251_v6 = vmax.f32 %v5078_v3, %v5578_v4  ;;  %v4080_v7 = vpop.f32.mrf.mxu0  ;;  %v4580_v8 = vpop.f32.mrf.mxu1 }
 0x11b   :  { %v6052_v17 = vmax.f32 %v4080_v7, %v4580_v8  ;;  %v9766_v7 = vld [vmem:[%s12510_s0 + $0xa00] sm:$0xff] }
 0x11c   :  { %7255 = vst.msk [vmem:[%s12512_s3 + $0x44] sm:$0xf] %vm7237_vm1, %v7054_v5  ;;  %v6451_v9 = vmax.f32 %v6051_v2, %v6251_v6  ;;  %v9666_v6 = vld [vmem:[%s12510_s0 + $0x6e0] sm:$0xff] }
 0x11e   :  { %v6655_v10 = vadd.f32 %v10026_v43, %v6451_v9 }
 0x120   :  { %v6855_v11 = vmax.f32 %v6655_v10, 0.0 }
 0x121   :  { %v5080_v12 = vpop.f32.mrf.mxu2  ;;  %v5580_v13 = vpop.f32.mrf.mxu3 }
 0x122   :  { %v7055_v16 = vpack.c.bf16 %v6855_v11, %v6855_v11  ;;  %v6252_v18 = vmax.f32 %v5080_v12, %v5580_v13  ;;  %v4083_v19 = vpop.f32.mrf.mxu0  ;;  %v4583_v20 = vpop.f32.mrf.mxu1 }
 0x123   :  { %v6053_v26 = vmax.f32 %v4083_v19, %v4583_v20 }
 0x124   :  { %7256 = vst.msk [vmem:[%s12512_s3 + $0x48] sm:$0xf] %vm7237_vm1, %v7055_v16  ;;  %v6452_v23 = vmax.f32 %v6052_v17, %v6252_v18 }
 0x125   :  { %9064 = vmatmul.msk.bf16.gmra.mxu0 %vm2823_vm0, %v9464_v14  ;;  %9164 = vmatmul.msk.bf16.gmra.mxu1 %vm2823_vm0, %v9564_v15 }
 0x126   :  { %v6656_v24 = vadd.f32 %v10026_v43, %v6452_v23  ;;  %9264 = vmatmul.msk.bf16.gmra.mxu2 %vm2823_vm0, %v9664_v21  ;;  %9364 = vmatmul.msk.bf16.gmra.mxu3 %vm2823_vm0, %v9764_v22  ;;  %v9467_v23 = vld [vmem:[%s12510_s0 + $0xa8] sm:$0xff] }
 0x128   :  { %v6856_v25 = vmax.f32 %v6656_v24, 0.0  ;;  %v9567_v24 = vld [vmem:[%s12510_s0 + $0x3c8] sm:$0xff] }
 0x129   :  { %v5083_v27 = vpop.f32.mrf.mxu2  ;;  %v5583_v28 = vpop.f32.mrf.mxu3 }
 0x12a   :  { %v7056_v29 = vpack.c.bf16 %v6856_v25, %v6856_v25  ;;  %v6253_v30 = vmax.f32 %v5083_v27, %v5583_v28  ;;  %v4085_v31 = vpop.f32.mrf.mxu0  ;;  %v4585_v32 = vpop.f32.mrf.mxu1 }
 0x12b   :  { %v6054_v41 = vmax.f32 %v4085_v31, %v4585_v32  ;;  %v9767_v31 = vld [vmem:[%s12510_s0 + $0xa08] sm:$0xff] }
 0x12c   :  { %7257 = vst.msk [vmem:[%s12512_s3 + $0x4c] sm:$0xf] %vm7237_vm1, %v7056_v29  ;;  %v6453_v33 = vmax.f32 %v6053_v26, %v6253_v30  ;;  %v9667_v30 = vld [vmem:[%s12510_s0 + $0x6e8] sm:$0xff] }
 0x12e   :  { %v6657_v34 = vadd.f32 %v10026_v43, %v6453_v33 }
 0x130   :  { %v6857_v35 = vmax.f32 %v6657_v34, 0.0 }
 0x131   :  { %v5085_v36 = vpop.f32.mrf.mxu2  ;;  %v5585_v37 = vpop.f32.mrf.mxu3 }
 0x132   :  { %v7057_v40 = vpack.c.bf16 %v6857_v35, %v6857_v35  ;;  %v6254_v42 = vmax.f32 %v5085_v36, %v5585_v37  ;;  %v4088_v44 = vpop.f32.mrf.mxu0  ;;  %v4588_v45 = vpop.f32.mrf.mxu1 }
 0x133   :  { %v6055_v51 = vmax.f32 %v4088_v44, %v4588_v45 }
 0x134   :  { %7258 = vst.msk [vmem:[%s12512_s3 + $0x50] sm:$0xf] %vm7237_vm1, %v7057_v40  ;;  %v6454_v48 = vmax.f32 %v6054_v41, %v6254_v42 }
 0x135   :  { %9065 = vmatmul.msk.bf16.gmra.mxu0 %vm2823_vm0, %v9465_v38  ;;  %9165 = vmatmul.msk.bf16.gmra.mxu1 %vm2823_vm0, %v9565_v39 }
 0x136   :  { %v6658_v49 = vadd.f32 %v10026_v43, %v6454_v48  ;;  %9265 = vmatmul.msk.bf16.gmra.mxu2 %vm2823_vm0, %v9665_v46  ;;  %9365 = vmatmul.msk.bf16.gmra.mxu3 %vm2823_vm0, %v9765_v47  ;;  %v9468_v48 = vld [vmem:[%s12510_s0 + $0xb0] sm:$0xff] }
 0x138   :  { %v6858_v50 = vmax.f32 %v6658_v49, 0.0  ;;  %v9568_v49 = vld [vmem:[%s12510_s0 + $0x3d0] sm:$0xff] }
 0x139   :  { %v5088_v52 = vpop.f32.mrf.mxu2  ;;  %v5588_v53 = vpop.f32.mrf.mxu3 }
 0x13a   :  { %v7058_v54 = vpack.c.bf16 %v6858_v50, %v6858_v50  ;;  %v6255_v55 = vmax.f32 %v5088_v52, %v5588_v53  ;;  %v4090_v56 = vpop.f32.mrf.mxu0  ;;  %v4590_v57 = vpop.f32.mrf.mxu1 }
 0x13b   :  { %v6056_v2 = vmax.f32 %v4090_v56, %v4590_v57  ;;  %v9768_v56 = vld [vmem:[%s12510_s0 + $0xa10] sm:$0xff] }
 0x13c   :  { %7259 = vst.msk [vmem:[%s12512_s3 + $0x54] sm:$0xf] %vm7237_vm1, %v7058_v54  ;;  %v6455_v58 = vmax.f32 %v6055_v51, %v6255_v55  ;;  %v9668_v55 = vld [vmem:[%s12510_s0 + $0x6f0] sm:$0xff] }
 0x13e   :  { %v6659_v59 = vadd.f32 %v10026_v43, %v6455_v58 }
 0x140   :  { %v6859_v60 = vmax.f32 %v6659_v59, 0.0 }
 0x141   :  { %v5090_v61 = vpop.f32.mrf.mxu2  ;;  %v5590_v62 = vpop.f32.mrf.mxu3 }
 0x142   :  { %v7059_v1 = vpack.c.bf16 %v6859_v60, %v6859_v60  ;;  %v6256_v3 = vmax.f32 %v5090_v61, %v5590_v62  ;;  %v4093_v4 = vpop.f32.mrf.mxu0  ;;  %v4593_v5 = vpop.f32.mrf.mxu1 }
 0x143   :  { %v6057_v11 = vmax.f32 %v4093_v4, %v4593_v5 }
 0x144   :  { %7260 = vst.msk [vmem:[%s12512_s3 + $0x58] sm:$0xf] %vm7237_vm1, %v7059_v1  ;;  %v6456_v8 = vmax.f32 %v6056_v2, %v6256_v3 }
 0x145   :  { %9066 = vmatmul.msk.bf16.gmra.mxu0 %vm2823_vm0, %v9466_v63  ;;  %9166 = vmatmul.msk.bf16.gmra.mxu1 %vm2823_vm0, %v9566_v0 }
 0x146   :  { %v6660_v9 = vadd.f32 %v10026_v43, %v6456_v8  ;;  %9266 = vmatmul.msk.bf16.gmra.mxu2 %vm2823_vm0, %v9666_v6  ;;  %9366 = vmatmul.msk.bf16.gmra.mxu3 %vm2823_vm0, %v9766_v7  ;;  %v9469_v8 = vld [vmem:[%s12510_s0 + $0xb8] sm:$0xff] }
 0x148   :  { %v6860_v10 = vmax.f32 %v6660_v9, 0.0  ;;  %v9569_v9 = vld [vmem:[%s12510_s0 + $0x3d8] sm:$0xff] }
 0x149   :  { %v5093_v12 = vpop.f32.mrf.mxu2  ;;  %v5593_v13 = vpop.f32.mrf.mxu3 }
 0x14a   :  { %v7060_v14 = vpack.c.bf16 %v6860_v10, %v6860_v10  ;;  %v6257_v15 = vmax.f32 %v5093_v12, %v5593_v13  ;;  %v4095_v16 = vpop.f32.mrf.mxu0  ;;  %v4595_v17 = vpop.f32.mrf.mxu1 }
 0x14b   :  { %v6058_v26 = vmax.f32 %v4095_v16, %v4595_v17  ;;  %v9769_v16 = vld [vmem:[%s12510_s0 + $0xa18] sm:$0xff] }
 0x14c   :  { %7261 = vst.msk [vmem:[%s12512_s3 + $0x5c] sm:$0xf] %vm7237_vm1, %v7060_v14  ;;  %v6457_v18 = vmax.f32 %v6057_v11, %v6257_v15  ;;  %v9669_v15 = vld [vmem:[%s12510_s0 + $0x6f8] sm:$0xff] }
 0x14e   :  { %v6661_v19 = vadd.f32 %v10026_v43, %v6457_v18 }
 0x150   :  { %v6861_v20 = vmax.f32 %v6661_v19, 0.0 }
 0x151   :  { %v5095_v21 = vpop.f32.mrf.mxu2  ;;  %v5595_v22 = vpop.f32.mrf.mxu3 }
 0x152   :  { %v7061_v25 = vpack.c.bf16 %v6861_v20, %v6861_v20  ;;  %v6258_v27 = vmax.f32 %v5095_v21, %v5595_v22  ;;  %v4098_v28 = vpop.f32.mrf.mxu0  ;;  %v4598_v29 = vpop.f32.mrf.mxu1 }
 0x153   :  { %v6059_v35 = vmax.f32 %v4098_v28, %v4598_v29 }
 0x154   :  { %7262 = vst.msk [vmem:[%s12512_s3 + $0x60] sm:$0xf] %vm7237_vm1, %v7061_v25  ;;  %v6458_v32 = vmax.f32 %v6058_v26, %v6258_v27 }
 0x155   :  { %9067 = vmatmul.msk.bf16.gmra.mxu0 %vm2823_vm0, %v9467_v23  ;;  %9167 = vmatmul.msk.bf16.gmra.mxu1 %vm2823_vm0, %v9567_v24 }
 0x156   :  { %v6662_v33 = vadd.f32 %v10026_v43, %v6458_v32  ;;  %9267 = vmatmul.msk.bf16.gmra.mxu2 %vm2823_vm0, %v9667_v30  ;;  %9367 = vmatmul.msk.bf16.gmra.mxu3 %vm2823_vm0, %v9767_v31  ;;  %v9470_v32 = vld [vmem:[%s12510_s0 + $0xc0] sm:$0xff] }
 0x158   :  { %v6862_v34 = vmax.f32 %v6662_v33, 0.0  ;;  %v9570_v33 = vld [vmem:[%s12510_s0 + $0x3e0] sm:$0xff] }
 0x159   :  { %v5098_v36 = vpop.f32.mrf.mxu2  ;;  %v5598_v37 = vpop.f32.mrf.mxu3 }
 0x15a   :  { %v7062_v38 = vpack.c.bf16 %v6862_v34, %v6862_v34  ;;  %v6259_v39 = vmax.f32 %v5098_v36, %v5598_v37  ;;  %v4100_v40 = vpop.f32.mrf.mxu0  ;;  %v4600_v41 = vpop.f32.mrf.mxu1 }
 0x15b   :  { %v6060_v51 = vmax.f32 %v4100_v40, %v4600_v41  ;;  %v9770_v40 = vld [vmem:[%s12510_s0 + $0xa20] sm:$0xff] }
 0x15c   :  { %7263 = vst.msk [vmem:[%s12512_s3 + $0x64] sm:$0xf] %vm7237_vm1, %v7062_v38  ;;  %v6459_v42 = vmax.f32 %v6059_v35, %v6259_v39  ;;  %v9670_v39 = vld [vmem:[%s12510_s0 + $0x700] sm:$0xff] }
 0x15e   :  { %v6663_v44 = vadd.f32 %v10026_v43, %v6459_v42 }
 0x160   :  { %v6863_v45 = vmax.f32 %v6663_v44, 0.0 }
 0x161   :  { %v5100_v46 = vpop.f32.mrf.mxu2  ;;  %v5600_v47 = vpop.f32.mrf.mxu3 }
 0x162   :  { %v7063_v50 = vpack.c.bf16 %v6863_v45, %v6863_v45  ;;  %v6260_v52 = vmax.f32 %v5100_v46, %v5600_v47  ;;  %v4103_v53 = vpop.f32.mrf.mxu0  ;;  %v4603_v54 = vpop.f32.mrf.mxu1 }
 0x163   :  { %v6061_v60 = vmax.f32 %v4103_v53, %v4603_v54 }
 0x164   :  { %7264 = vst.msk [vmem:[%s12512_s3 + $0x68] sm:$0xf] %vm7237_vm1, %v7063_v50  ;;  %v6460_v57 = vmax.f32 %v6060_v51, %v6260_v52 }
 0x165   :  { %9068 = vmatmul.msk.bf16.gmra.mxu0 %vm2823_vm0, %v9468_v48  ;;  %9168 = vmatmul.msk.bf16.gmra.mxu1 %vm2823_vm0, %v9568_v49 }
 0x166   :  { %v6664_v58 = vadd.f32 %v10026_v43, %v6460_v57  ;;  %9268 = vmatmul.msk.bf16.gmra.mxu2 %vm2823_vm0, %v9668_v55  ;;  %9368 = vmatmul.msk.bf16.gmra.mxu3 %vm2823_vm0, %v9768_v56  ;;  %v9471_v57 = vld [vmem:[%s12510_s0 + $0xc8] sm:$0xff] }
 0x168   :  { %v6864_v59 = vmax.f32 %v6664_v58, 0.0  ;;  %v9571_v58 = vld [vmem:[%s12510_s0 + $0x3e8] sm:$0xff] }
 0x169   :  { %v5103_v61 = vpop.f32.mrf.mxu2  ;;  %v5603_v62 = vpop.f32.mrf.mxu3 }
 0x16a   :  { %v7064_v63 = vpack.c.bf16 %v6864_v59, %v6864_v59  ;;  %v6261_v0 = vmax.f32 %v5103_v61, %v5603_v62  ;;  %v4105_v1 = vpop.f32.mrf.mxu0  ;;  %v4605_v2 = vpop.f32.mrf.mxu1 }
 0x16b   :  { %v6062_v11 = vmax.f32 %v4105_v1, %v4605_v2  ;;  %v9771_v1 = vld [vmem:[%s12510_s0 + $0xa28] sm:$0xff] }
 0x16c   :  { %7265 = vst.msk [vmem:[%s12512_s3 + $0x6c] sm:$0xf] %vm7237_vm1, %v7064_v63  ;;  %v6461_v3 = vmax.f32 %v6061_v60, %v6261_v0  ;;  %v9671_v0 = vld [vmem:[%s12510_s0 + $0x708] sm:$0xff] }
 0x16e   :  { %v6665_v4 = vadd.f32 %v10026_v43, %v6461_v3 }
 0x170   :  { %v6865_v5 = vmax.f32 %v6665_v4, 0.0 }
 0x171   :  { %v5105_v6 = vpop.f32.mrf.mxu2  ;;  %v5605_v7 = vpop.f32.mrf.mxu3 }
 0x172   :  { %v7065_v10 = vpack.c.bf16 %v6865_v5, %v6865_v5  ;;  %v6262_v12 = vmax.f32 %v5105_v6, %v5605_v7  ;;  %v4108_v13 = vpop.f32.mrf.mxu0  ;;  %v4608_v14 = vpop.f32.mrf.mxu1 }
 0x173   :  { %v6063_v20 = vmax.f32 %v4108_v13, %v4608_v14 }
 0x174   :  { %7266 = vst.msk [vmem:[%s12512_s3 + $0x70] sm:$0xf] %vm7237_vm1, %v7065_v10  ;;  %v6462_v17 = vmax.f32 %v6062_v11, %v6262_v12 }
 0x175   :  { %9069 = vmatmul.msk.bf16.gmra.mxu0 %vm2823_vm0, %v9469_v8  ;;  %9169 = vmatmul.msk.bf16.gmra.mxu1 %vm2823_vm0, %v9569_v9 }
 0x176   :  { %v6666_v18 = vadd.f32 %v10026_v43, %v6462_v17  ;;  %9269 = vmatmul.msk.bf16.gmra.mxu2 %vm2823_vm0, %v9669_v15  ;;  %9369 = vmatmul.msk.bf16.gmra.mxu3 %vm2823_vm0, %v9769_v16  ;;  %v9472_v17 = vld [vmem:[%s12510_s0 + $0xd0] sm:$0xff] }
 0x178   :  { %v6866_v19 = vmax.f32 %v6666_v18, 0.0  ;;  %v9572_v18 = vld [vmem:[%s12510_s0 + $0x3f0] sm:$0xff] }
 0x179   :  { %v5108_v21 = vpop.f32.mrf.mxu2  ;;  %v5608_v22 = vpop.f32.mrf.mxu3 }
 0x17a   :  { %v7066_v23 = vpack.c.bf16 %v6866_v19, %v6866_v19  ;;  %v6263_v24 = vmax.f32 %v5108_v21, %v5608_v22  ;;  %v4110_v25 = vpop.f32.mrf.mxu0  ;;  %v4610_v26 = vpop.f32.mrf.mxu1 }
 0x17b   :  { %v6064_v35 = vmax.f32 %v4110_v25, %v4610_v26  ;;  %v9772_v25 = vld [vmem:[%s12510_s0 + $0xa30] sm:$0xff] }
 0x17c   :  { %7267 = vst.msk [vmem:[%s12512_s3 + $0x74] sm:$0xf] %vm7237_vm1, %v7066_v23  ;;  %v6463_v27 = vmax.f32 %v6063_v20, %v6263_v24  ;;  %v9672_v24 = vld [vmem:[%s12510_s0 + $0x710] sm:$0xff] }
 0x17e   :  { %v6667_v28 = vadd.f32 %v10026_v43, %v6463_v27 }
 0x180   :  { %v6867_v29 = vmax.f32 %v6667_v28, 0.0 }
 0x181   :  { %v5110_v30 = vpop.f32.mrf.mxu2  ;;  %v5610_v31 = vpop.f32.mrf.mxu3 }
 0x182   :  { %v7067_v34 = vpack.c.bf16 %v6867_v29, %v6867_v29  ;;  %v6264_v36 = vmax.f32 %v5110_v30, %v5610_v31  ;;  %v4113_v37 = vpop.f32.mrf.mxu0  ;;  %v4613_v38 = vpop.f32.mrf.mxu1 }
 0x183   :  { %v6065_v45 = vmax.f32 %v4113_v37, %v4613_v38 }
 0x184   :  { %7268 = vst.msk [vmem:[%s12512_s3 + $0x78] sm:$0xf] %vm7237_vm1, %v7067_v34  ;;  %v6464_v41 = vmax.f32 %v6064_v35, %v6264_v36 }
 0x185   :  { %9070 = vmatmul.msk.bf16.gmra.mxu0 %vm2823_vm0, %v9470_v32  ;;  %9170 = vmatmul.msk.bf16.gmra.mxu1 %vm2823_vm0, %v9570_v33 }
 0x186   :  { %v6668_v42 = vadd.f32 %v10026_v43, %v6464_v41  ;;  %9270 = vmatmul.msk.bf16.gmra.mxu2 %vm2823_vm0, %v9670_v39  ;;  %9370 = vmatmul.msk.bf16.gmra.mxu3 %vm2823_vm0, %v9770_v40  ;;  %v9473_v41 = vld [vmem:[%s12510_s0 + $0xd8] sm:$0xff] }
 0x188   :  { %v6868_v44 = vmax.f32 %v6668_v42, 0.0  ;;  %v9573_v42 = vld [vmem:[%s12510_s0 + $0x3f8] sm:$0xff] }
 0x189   :  { %v5113_v46 = vpop.f32.mrf.mxu2  ;;  %v5613_v47 = vpop.f32.mrf.mxu3 }
 0x18a   :  { %v7068_v48 = vpack.c.bf16 %v6868_v44, %v6868_v44  ;;  %v6265_v49 = vmax.f32 %v5113_v46, %v5613_v47  ;;  %v4115_v50 = vpop.f32.mrf.mxu0  ;;  %v4615_v51 = vpop.f32.mrf.mxu1 }
 0x18b   :  { %v6066_v60 = vmax.f32 %v4115_v50, %v4615_v51  ;;  %v9773_v50 = vld [vmem:[%s12510_s0 + $0xa38] sm:$0xff] }
 0x18c   :  { %7269 = vst.msk [vmem:[%s12512_s3 + $0x7c] sm:$0xf] %vm7237_vm1, %v7068_v48  ;;  %v6465_v52 = vmax.f32 %v6065_v45, %v6265_v49  ;;  %v9673_v49 = vld [vmem:[%s12510_s0 + $0x718] sm:$0xff] }
 0x18e   :  { %v6669_v53 = vadd.f32 %v10026_v43, %v6465_v52 }
 0x190   :  { %v6869_v54 = vmax.f32 %v6669_v53, 0.0 }
 0x191   :  { %v5115_v55 = vpop.f32.mrf.mxu2  ;;  %v5615_v56 = vpop.f32.mrf.mxu3 }
 0x192   :  { %v7069_v59 = vpack.c.bf16 %v6869_v54, %v6869_v54  ;;  %v6266_v61 = vmax.f32 %v5115_v55, %v5615_v56  ;;  %v4118_v62 = vpop.f32.mrf.mxu0  ;;  %v4618_v63 = vpop.f32.mrf.mxu1 }
 0x193   :  { %v6067_v5 = vmax.f32 %v4118_v62, %v4618_v63 }
 0x194   :  { %7270 = vst.msk [vmem:[%s12512_s3 + $0x80] sm:$0xf] %vm7237_vm1, %v7069_v59  ;;  %v6466_v2 = vmax.f32 %v6066_v60, %v6266_v61 }
 0x195   :  { %9071 = vmatmul.msk.bf16.gmra.mxu0 %vm2823_vm0, %v9471_v57  ;;  %9171 = vmatmul.msk.bf16.gmra.mxu1 %vm2823_vm0, %v9571_v58 }
 0x196   :  { %v6670_v3 = vadd.f32 %v10026_v43, %v6466_v2  ;;  %9271 = vmatmul.msk.bf16.gmra.mxu2 %vm2823_vm0, %v9671_v0  ;;  %9371 = vmatmul.msk.bf16.gmra.mxu3 %vm2823_vm0, %v9771_v1  ;;  %v10473_v43 = vld [vmem:[%s12511_s2] ss:$0 sm:$0xff] }
 0x197   :  { %v9474_v2 = vld [vmem:[%s12510_s0 + $0xe0] sm:$0xff] }
 0x198   :  { %v6870_v4 = vmax.f32 %v6670_v3, 0.0  ;;  %v9574_v3 = vld [vmem:[%s12510_s0 + $0x400] sm:$0xff] }
 0x199   :  { %v5118_v6 = vpop.f32.mrf.mxu2  ;;  %v5618_v7 = vpop.f32.mrf.mxu3 }
 0x19a   :  { %v7070_v8 = vpack.c.bf16 %v6870_v4, %v6870_v4  ;;  %v6267_v9 = vmax.f32 %v5118_v6, %v5618_v7  ;;  %v4120_v10 = vpop.f32.mrf.mxu0  ;;  %v4620_v11 = vpop.f32.mrf.mxu1 }
 0x19b   :  { %v6068_v20 = vmax.f32 %v4120_v10, %v4620_v11  ;;  %v9774_v10 = vld [vmem:[%s12510_s0 + $0xa40] sm:$0xff] }
 0x19c   :  { %7271 = vst.msk [vmem:[%s12512_s3 + $0x84] sm:$0xf] %vm7237_vm1, %v7070_v8  ;;  %v6467_v12 = vmax.f32 %v6067_v5, %v6267_v9  ;;  %v9674_v9 = vld [vmem:[%s12510_s0 + $0x720] sm:$0xff] }
 0x19e   :  { %v6671_v13 = vadd.f32 %v10473_v43, %v6467_v12 }
 0x1a0   :  { %v6871_v14 = vmax.f32 %v6671_v13, 0.0 }
 0x1a1   :  { %v5120_v15 = vpop.f32.mrf.mxu2  ;;  %v5620_v16 = vpop.f32.mrf.mxu3 }
 0x1a2   :  { %v7071_v19 = vpack.c.bf16 %v6871_v14, %v6871_v14  ;;  %v6268_v21 = vmax.f32 %v5120_v15, %v5620_v16  ;;  %v4123_v22 = vpop.f32.mrf.mxu0  ;;  %v4623_v23 = vpop.f32.mrf.mxu1 }
 0x1a3   :  { %v6069_v29 = vmax.f32 %v4123_v22, %v4623_v23 }
 0x1a4   :  { %7272 = vst.msk [vmem:[%s12512_s3 + $0x88] sm:$0xf] %vm7237_vm1, %v7071_v19  ;;  %v6468_v26 = vmax.f32 %v6068_v20, %v6268_v21 }
 0x1a5   :  { %9072 = vmatmul.msk.bf16.gmra.mxu0 %vm2823_vm0, %v9472_v17  ;;  %9172 = vmatmul.msk.bf16.gmra.mxu1 %vm2823_vm0, %v9572_v18 }
 0x1a6   :  { %v6672_v27 = vadd.f32 %v10473_v43, %v6468_v26  ;;  %9272 = vmatmul.msk.bf16.gmra.mxu2 %vm2823_vm0, %v9672_v24  ;;  %9372 = vmatmul.msk.bf16.gmra.mxu3 %vm2823_vm0, %v9772_v25  ;;  %v9475_v26 = vld [vmem:[%s12510_s0 + $0xe8] sm:$0xff] }
 0x1a8   :  { %v6872_v28 = vmax.f32 %v6672_v27, 0.0  ;;  %v9575_v27 = vld [vmem:[%s12510_s0 + $0x408] sm:$0xff] }
 0x1a9   :  { %v5123_v30 = vpop.f32.mrf.mxu2  ;;  %v5623_v31 = vpop.f32.mrf.mxu3 }
 0x1aa   :  { %v7072_v32 = vpack.c.bf16 %v6872_v28, %v6872_v28  ;;  %v6269_v33 = vmax.f32 %v5123_v30, %v5623_v31  ;;  %v4125_v34 = vpop.f32.mrf.mxu0  ;;  %v4625_v35 = vpop.f32.mrf.mxu1 }
 0x1ab   :  { %v6070_v45 = vmax.f32 %v4125_v34, %v4625_v35  ;;  %v9775_v34 = vld [vmem:[%s12510_s0 + $0xa48] sm:$0xff] }
 0x1ac   :  { %7273 = vst.msk [vmem:[%s12512_s3 + $0x8c] sm:$0xf] %vm7237_vm1, %v7072_v32  ;;  %v6469_v36 = vmax.f32 %v6069_v29, %v6269_v33  ;;  %v9675_v33 = vld [vmem:[%s12510_s0 + $0x728] sm:$0xff] }
 0x1ae   :  { %v6673_v37 = vadd.f32 %v10473_v43, %v6469_v36 }
 0x1b0   :  { %v6873_v38 = vmax.f32 %v6673_v37, 0.0 }
 0x1b1   :  { %v5125_v39 = vpop.f32.mrf.mxu2  ;;  %v5625_v40 = vpop.f32.mrf.mxu3 }
 0x1b2   :  { %v7073_v44 = vpack.c.bf16 %v6873_v38, %v6873_v38  ;;  %v6270_v46 = vmax.f32 %v5125_v39, %v5625_v40  ;;  %v4128_v47 = vpop.f32.mrf.mxu0  ;;  %v4628_v48 = vpop.f32.mrf.mxu1 }
 0x1b3   :  { %v6071_v54 = vmax.f32 %v4128_v47, %v4628_v48 }
 0x1b4   :  { %7274 = vst.msk [vmem:[%s12512_s3 + $0x90] sm:$0xf] %vm7237_vm1, %v7073_v44  ;;  %v6470_v51 = vmax.f32 %v6070_v45, %v6270_v46 }
 0x1b5   :  { %9073 = vmatmul.msk.bf16.gmra.mxu0 %vm2823_vm0, %v9473_v41  ;;  %9173 = vmatmul.msk.bf16.gmra.mxu1 %vm2823_vm0, %v9573_v42 }
 0x1b6   :  { %v6674_v52 = vadd.f32 %v10473_v43, %v6470_v51  ;;  %9273 = vmatmul.msk.bf16.gmra.mxu2 %vm2823_vm0, %v9673_v49  ;;  %9373 = vmatmul.msk.bf16.gmra.mxu3 %vm2823_vm0, %v9773_v50  ;;  %v9476_v51 = vld [vmem:[%s12510_s0 + $0xf0] sm:$0xff] }
 0x1b8   :  { %v6874_v53 = vmax.f32 %v6674_v52, 0.0  ;;  %v9576_v52 = vld [vmem:[%s12510_s0 + $0x410] sm:$0xff] }
 0x1b9   :  { %v5128_v55 = vpop.f32.mrf.mxu2  ;;  %v5628_v56 = vpop.f32.mrf.mxu3 }
 0x1ba   :  { %v7074_v57 = vpack.c.bf16 %v6874_v53, %v6874_v53  ;;  %v6271_v58 = vmax.f32 %v5128_v55, %v5628_v56  ;;  %v4130_v59 = vpop.f32.mrf.mxu0  ;;  %v4630_v60 = vpop.f32.mrf.mxu1 }
 0x1bb   :  { %v6072_v5 = vmax.f32 %v4130_v59, %v4630_v60  ;;  %v9776_v59 = vld [vmem:[%s12510_s0 + $0xa50] sm:$0xff] }
 0x1bc   :  { %7275 = vst.msk [vmem:[%s12512_s3 + $0x94] sm:$0xf] %vm7237_vm1, %v7074_v57  ;;  %v6471_v61 = vmax.f32 %v6071_v54, %v6271_v58  ;;  %v9676_v58 = vld [vmem:[%s12510_s0 + $0x730] sm:$0xff] }
 0x1be   :  { %v6675_v62 = vadd.f32 %v10473_v43, %v6471_v61 }
 0x1c0   :  { %v6875_v63 = vmax.f32 %v6675_v62, 0.0 }
 0x1c1   :  { %v5130_v0 = vpop.f32.mrf.mxu2  ;;  %v5630_v1 = vpop.f32.mrf.mxu3 }
 0x1c2   :  { %v7075_v4 = vpack.c.bf16 %v6875_v63, %v6875_v63  ;;  %v6272_v6 = vmax.f32 %v5130_v0, %v5630_v1  ;;  %v4133_v7 = vpop.f32.mrf.mxu0  ;;  %v4633_v8 = vpop.f32.mrf.mxu1 }
 0x1c3   :  { %v6073_v14 = vmax.f32 %v4133_v7, %v4633_v8 }
 0x1c4   :  { %7276 = vst.msk [vmem:[%s12512_s3 + $0x98] sm:$0xf] %vm7237_vm1, %v7075_v4  ;;  %v6472_v11 = vmax.f32 %v6072_v5, %v6272_v6 }
 0x1c5   :  { %9074 = vmatmul.msk.bf16.gmra.mxu0 %vm2823_vm0, %v9474_v2  ;;  %9174 = vmatmul.msk.bf16.gmra.mxu1 %vm2823_vm0, %v9574_v3 }
 0x1c6   :  { %v6676_v12 = vadd.f32 %v10473_v43, %v6472_v11  ;;  %9274 = vmatmul.msk.bf16.gmra.mxu2 %vm2823_vm0, %v9674_v9  ;;  %9374 = vmatmul.msk.bf16.gmra.mxu3 %vm2823_vm0, %v9774_v10  ;;  %v9477_v11 = vld [vmem:[%s12510_s0 + $0xf8] sm:$0xff] }
 0x1c8   :  { %v6876_v13 = vmax.f32 %v6676_v12, 0.0  ;;  %v9577_v12 = vld [vmem:[%s12510_s0 + $0x418] sm:$0xff] }
 0x1c9   :  { %v5133_v15 = vpop.f32.mrf.mxu2  ;;  %v5633_v16 = vpop.f32.mrf.mxu3 }
 0x1ca   :  { %v7076_v17 = vpack.c.bf16 %v6876_v13, %v6876_v13  ;;  %v6273_v18 = vmax.f32 %v5133_v15, %v5633_v16  ;;  %v4135_v19 = vpop.f32.mrf.mxu0  ;;  %v4635_v20 = vpop.f32.mrf.mxu1 }
 0x1cb   :  { %v6074_v29 = vmax.f32 %v4135_v19, %v4635_v20  ;;  %v9777_v19 = vld [vmem:[%s12510_s0 + $0xa58] sm:$0xff] }
 0x1cc   :  { %7277 = vst.msk [vmem:[%s12512_s3 + $0x9c] sm:$0xf] %vm7237_vm1, %v7076_v17  ;;  %v6473_v21 = vmax.f32 %v6073_v14, %v6273_v18  ;;  %v9677_v18 = vld [vmem:[%s12510_s0 + $0x738] sm:$0xff] }
 0x1ce   :  { %v6677_v22 = vadd.f32 %v10473_v43, %v6473_v21 }
 0x1d0   :  { %v6877_v23 = vmax.f32 %v6677_v22, 0.0 }
 0x1d1   :  { %v5135_v24 = vpop.f32.mrf.mxu2  ;;  %v5635_v25 = vpop.f32.mrf.mxu3 }
 0x1d2   :  { %v7077_v28 = vpack.c.bf16 %v6877_v23, %v6877_v23  ;;  %v6274_v30 = vmax.f32 %v5135_v24, %v5635_v25  ;;  %v4138_v31 = vpop.f32.mrf.mxu0  ;;  %v4638_v32 = vpop.f32.mrf.mxu1 }
 0x1d3   :  { %v6075_v38 = vmax.f32 %v4138_v31, %v4638_v32 }
 0x1d4   :  { %7278 = vst.msk [vmem:[%s12512_s3 + $0xa0] sm:$0xf] %vm7237_vm1, %v7077_v28  ;;  %v6474_v35 = vmax.f32 %v6074_v29, %v6274_v30 }
 0x1d5   :  { %9075 = vmatmul.msk.bf16.gmra.mxu0 %vm2823_vm0, %v9475_v26  ;;  %9175 = vmatmul.msk.bf16.gmra.mxu1 %vm2823_vm0, %v9575_v27 }
 0x1d6   :  { %v6678_v36 = vadd.f32 %v10473_v43, %v6474_v35  ;;  %9275 = vmatmul.msk.bf16.gmra.mxu2 %vm2823_vm0, %v9675_v33  ;;  %9375 = vmatmul.msk.bf16.gmra.mxu3 %vm2823_vm0, %v9775_v34  ;;  %v9478_v35 = vld [vmem:[%s12510_s0 + $0x100] sm:$0xff] }
 0x1d8   :  { %v6878_v37 = vmax.f32 %v6678_v36, 0.0  ;;  %v9578_v36 = vld [vmem:[%s12510_s0 + $0x420] sm:$0xff] }
 0x1d9   :  { %v5138_v39 = vpop.f32.mrf.mxu2  ;;  %v5638_v40 = vpop.f32.mrf.mxu3 }
 0x1da   :  { %v7078_v41 = vpack.c.bf16 %v6878_v37, %v6878_v37  ;;  %v6275_v42 = vmax.f32 %v5138_v39, %v5638_v40  ;;  %v4140_v44 = vpop.f32.mrf.mxu0  ;;  %v4640_v45 = vpop.f32.mrf.mxu1 }
 0x1db   :  { %v6076_v54 = vmax.f32 %v4140_v44, %v4640_v45  ;;  %v9778_v44 = vld [vmem:[%s12510_s0 + $0xa60] sm:$0xff] }
 0x1dc   :  { %7279 = vst.msk [vmem:[%s12512_s3 + $0xa4] sm:$0xf] %vm7237_vm1, %v7078_v41  ;;  %v6475_v46 = vmax.f32 %v6075_v38, %v6275_v42  ;;  %v9678_v42 = vld [vmem:[%s12510_s0 + $0x740] sm:$0xff] }
 0x1de   :  { %v6679_v47 = vadd.f32 %v10473_v43, %v6475_v46 }
 0x1e0   :  { %v6879_v48 = vmax.f32 %v6679_v47, 0.0 }
 0x1e1   :  { %v5140_v49 = vpop.f32.mrf.mxu2  ;;  %v5640_v50 = vpop.f32.mrf.mxu3 }
 0x1e2   :  { %v7079_v53 = vpack.c.bf16 %v6879_v48, %v6879_v48  ;;  %v6276_v55 = vmax.f32 %v5140_v49, %v5640_v50  ;;  %v4143_v56 = vpop.f32.mrf.mxu0  ;;  %v4643_v57 = vpop.f32.mrf.mxu1 }
 0x1e3   :  { %v6077_v63 = vmax.f32 %v4143_v56, %v4643_v57 }
 0x1e4   :  { %7280 = vst.msk [vmem:[%s12512_s3 + $0xa8] sm:$0xf] %vm7237_vm1, %v7079_v53  ;;  %v6476_v60 = vmax.f32 %v6076_v54, %v6276_v55 }
 0x1e5   :  { %9076 = vmatmul.msk.bf16.gmra.mxu0 %vm2823_vm0, %v9476_v51  ;;  %9176 = vmatmul.msk.bf16.gmra.mxu1 %vm2823_vm0, %v9576_v52 }
 0x1e6   :  { %v6680_v61 = vadd.f32 %v10473_v43, %v6476_v60  ;;  %9276 = vmatmul.msk.bf16.gmra.mxu2 %vm2823_vm0, %v9676_v58  ;;  %9376 = vmatmul.msk.bf16.gmra.mxu3 %vm2823_vm0, %v9776_v59  ;;  %v9479_v60 = vld [vmem:[%s12510_s0 + $0x108] sm:$0xff] }
 0x1e8   :  { %v6880_v62 = vmax.f32 %v6680_v61, 0.0  ;;  %v9579_v61 = vld [vmem:[%s12510_s0 + $0x428] sm:$0xff] }
 0x1e9   :  { %v5143_v0 = vpop.f32.mrf.mxu2  ;;  %v5643_v1 = vpop.f32.mrf.mxu3 }
 0x1ea   :  { %v7080_v2 = vpack.c.bf16 %v6880_v62, %v6880_v62  ;;  %v6277_v3 = vmax.f32 %v5143_v0, %v5643_v1  ;;  %v4145_v4 = vpop.f32.mrf.mxu0  ;;  %v4645_v5 = vpop.f32.mrf.mxu1 }
 0x1eb   :  { %v6078_v14 = vmax.f32 %v4145_v4, %v4645_v5  ;;  %v9779_v4 = vld [vmem:[%s12510_s0 + $0xa68] sm:$0xff] }
 0x1ec   :  { %7281 = vst.msk [vmem:[%s12512_s3 + $0xac] sm:$0xf] %vm7237_vm1, %v7080_v2  ;;  %v6477_v6 = vmax.f32 %v6077_v63, %v6277_v3  ;;  %v9679_v3 = vld [vmem:[%s12510_s0 + $0x748] sm:$0xff] }
 0x1ee   :  { %v6681_v7 = vadd.f32 %v10473_v43, %v6477_v6 }
 0x1f0   :  { %v6881_v8 = vmax.f32 %v6681_v7, 0.0 }
 0x1f1   :  { %v5145_v9 = vpop.f32.mrf.mxu2  ;;  %v5645_v10 = vpop.f32.mrf.mxu3 }
 0x1f2   :  { %v7081_v13 = vpack.c.bf16 %v6881_v8, %v6881_v8  ;;  %v6278_v15 = vmax.f32 %v5145_v9, %v5645_v10  ;;  %v4148_v16 = vpop.f32.mrf.mxu0  ;;  %v4648_v17 = vpop.f32.mrf.mxu1 }
 0x1f3   :  { %v6079_v23 = vmax.f32 %v4148_v16, %v4648_v17 }
 0x1f4   :  { %7282 = vst.msk [vmem:[%s12512_s3 + $0xb0] sm:$0xf] %vm7237_vm1, %v7081_v13  ;;  %v6478_v20 = vmax.f32 %v6078_v14, %v6278_v15 }
 0x1f5   :  { %9077 = vmatmul.msk.bf16.gmra.mxu0 %vm2823_vm0, %v9477_v11  ;;  %9177 = vmatmul.msk.bf16.gmra.mxu1 %vm2823_vm0, %v9577_v12 }
 0x1f6   :  { %v6682_v21 = vadd.f32 %v10473_v43, %v6478_v20  ;;  %9277 = vmatmul.msk.bf16.gmra.mxu2 %vm2823_vm0, %v9677_v18  ;;  %9377 = vmatmul.msk.bf16.gmra.mxu3 %vm2823_vm0, %v9777_v19  ;;  %v9480_v20 = vld [vmem:[%s12510_s0 + $0x110] sm:$0xff] }
 0x1f8   :  { %v6882_v22 = vmax.f32 %v6682_v21, 0.0  ;;  %v9580_v21 = vld [vmem:[%s12510_s0 + $0x430] sm:$0xff] }
 0x1f9   :  { %v5148_v24 = vpop.f32.mrf.mxu2  ;;  %v5648_v25 = vpop.f32.mrf.mxu3 }
 0x1fa   :  { %v7082_v26 = vpack.c.bf16 %v6882_v22, %v6882_v22  ;;  %v6279_v27 = vmax.f32 %v5148_v24, %v5648_v25  ;;  %v4150_v28 = vpop.f32.mrf.mxu0  ;;  %v4650_v29 = vpop.f32.mrf.mxu1 }
 0x1fb   :  { %v6080_v38 = vmax.f32 %v4150_v28, %v4650_v29  ;;  %v9780_v28 = vld [vmem:[%s12510_s0 + $0xa70] sm:$0xff] }
 0x1fc   :  { %7283 = vst.msk [vmem:[%s12512_s3 + $0xb4] sm:$0xf] %vm7237_vm1, %v7082_v26  ;;  %v6479_v30 = vmax.f32 %v6079_v23, %v6279_v27  ;;  %v9680_v27 = vld [vmem:[%s12510_s0 + $0x750] sm:$0xff] }
 0x1fe   :  { %v6683_v31 = vadd.f32 %v10473_v43, %v6479_v30 }
 0x200   :  { %v6883_v32 = vmax.f32 %v6683_v31, 0.0 }
 0x201   :  { %v5150_v33 = vpop.f32.mrf.mxu2  ;;  %v5650_v34 = vpop.f32.mrf.mxu3 }
 0x202   :  { %v7083_v37 = vpack.c.bf16 %v6883_v32, %v6883_v32  ;;  %v6280_v39 = vmax.f32 %v5150_v33, %v5650_v34  ;;  %v4153_v40 = vpop.f32.mrf.mxu0  ;;  %v4653_v41 = vpop.f32.mrf.mxu1 }
 0x203   :  { %v6081_v48 = vmax.f32 %v4153_v40, %v4653_v41 }
 0x204   :  { %7284 = vst.msk [vmem:[%s12512_s3 + $0xb8] sm:$0xf] %vm7237_vm1, %v7083_v37  ;;  %v6480_v45 = vmax.f32 %v6080_v38, %v6280_v39 }
 0x205   :  { %9078 = vmatmul.msk.bf16.gmra.mxu0 %vm2823_vm0, %v9478_v35  ;;  %9178 = vmatmul.msk.bf16.gmra.mxu1 %vm2823_vm0, %v9578_v36 }
 0x206   :  { %v6684_v46 = vadd.f32 %v10473_v43, %v6480_v45  ;;  %9278 = vmatmul.msk.bf16.gmra.mxu2 %vm2823_vm0, %v9678_v42  ;;  %9378 = vmatmul.msk.bf16.gmra.mxu3 %vm2823_vm0, %v9778_v44  ;;  %v9481_v45 = vld [vmem:[%s12510_s0 + $0x118] sm:$0xff] }
 0x208   :  { %v6884_v47 = vmax.f32 %v6684_v46, 0.0  ;;  %v9581_v46 = vld [vmem:[%s12510_s0 + $0x438] sm:$0xff] }
 0x209   :  { %v5153_v49 = vpop.f32.mrf.mxu2  ;;  %v5653_v50 = vpop.f32.mrf.mxu3 }
 0x20a   :  { %v7084_v51 = vpack.c.bf16 %v6884_v47, %v6884_v47  ;;  %v6281_v52 = vmax.f32 %v5153_v49, %v5653_v50  ;;  %v4155_v53 = vpop.f32.mrf.mxu0  ;;  %v4655_v54 = vpop.f32.mrf.mxu1 }
 0x20b   :  { %v6082_v63 = vmax.f32 %v4155_v53, %v4655_v54  ;;  %v9781_v53 = vld [vmem:[%s12510_s0 + $0xa78] sm:$0xff] }
 0x20c   :  { %7285 = vst.msk [vmem:[%s12512_s3 + $0xbc] sm:$0xf] %vm7237_vm1, %v7084_v51  ;;  %v6481_v55 = vmax.f32 %v6081_v48, %v6281_v52  ;;  %v9681_v52 = vld [vmem:[%s12510_s0 + $0x758] sm:$0xff] }
 0x20e   :  { %v6685_v56 = vadd.f32 %v10473_v43, %v6481_v55 }
 0x210   :  { %v6885_v57 = vmax.f32 %v6685_v56, 0.0 }
 0x211   :  { %v5155_v58 = vpop.f32.mrf.mxu2  ;;  %v5655_v59 = vpop.f32.mrf.mxu3 }
 0x212   :  { %v7085_v62 = vpack.c.bf16 %v6885_v57, %v6885_v57  ;;  %v6282_v0 = vmax.f32 %v5155_v58, %v5655_v59  ;;  %v4158_v1 = vpop.f32.mrf.mxu0  ;;  %v4658_v2 = vpop.f32.mrf.mxu1 }
 0x213   :  { %v6083_v8 = vmax.f32 %v4158_v1, %v4658_v2 }
 0x214   :  { %7286 = vst.msk [vmem:[%s12512_s3 + $0xc0] sm:$0xf] %vm7237_vm1, %v7085_v62  ;;  %v6482_v5 = vmax.f32 %v6082_v63, %v6282_v0 }
 0x215   :  { %9079 = vmatmul.msk.bf16.gmra.mxu0 %vm2823_vm0, %v9479_v60  ;;  %9179 = vmatmul.msk.bf16.gmra.mxu1 %vm2823_vm0, %v9579_v61 }
 0x216   :  { %v6686_v6 = vadd.f32 %v10473_v43, %v6482_v5  ;;  %9279 = vmatmul.msk.bf16.gmra.mxu2 %vm2823_vm0, %v9679_v3  ;;  %9379 = vmatmul.msk.bf16.gmra.mxu3 %vm2823_vm0, %v9779_v4  ;;  %v9482_v5 = vld [vmem:[%s12510_s0 + $0x120] sm:$0xff] }
 0x218   :  { %v6886_v7 = vmax.f32 %v6686_v6, 0.0  ;;  %v9582_v6 = vld [vmem:[%s12510_s0 + $0x440] sm:$0xff] }
 0x219   :  { %v5158_v9 = vpop.f32.mrf.mxu2  ;;  %v5658_v10 = vpop.f32.mrf.mxu3 }
 0x21a   :  { %v7086_v11 = vpack.c.bf16 %v6886_v7, %v6886_v7  ;;  %v6283_v12 = vmax.f32 %v5158_v9, %v5658_v10  ;;  %v4160_v13 = vpop.f32.mrf.mxu0  ;;  %v4660_v14 = vpop.f32.mrf.mxu1 }
 0x21b   :  { %v6084_v23 = vmax.f32 %v4160_v13, %v4660_v14  ;;  %v9782_v13 = vld [vmem:[%s12510_s0 + $0xa80] sm:$0xff] }
 0x21c   :  { %7287 = vst.msk [vmem:[%s12512_s3 + $0xc4] sm:$0xf] %vm7237_vm1, %v7086_v11  ;;  %v6483_v15 = vmax.f32 %v6083_v8, %v6283_v12  ;;  %v9682_v12 = vld [vmem:[%s12510_s0 + $0x760] sm:$0xff] }
 0x21e   :  { %v6687_v16 = vadd.f32 %v10473_v43, %v6483_v15 }
 0x220   :  { %v6887_v17 = vmax.f32 %v6687_v16, 0.0 }
 0x221   :  { %v5160_v18 = vpop.f32.mrf.mxu2  ;;  %v5660_v19 = vpop.f32.mrf.mxu3 }
 0x222   :  { %v7087_v22 = vpack.c.bf16 %v6887_v17, %v6887_v17  ;;  %v6284_v24 = vmax.f32 %v5160_v18, %v5660_v19  ;;  %v4163_v25 = vpop.f32.mrf.mxu0  ;;  %v4663_v26 = vpop.f32.mrf.mxu1 }
 0x223   :  { %v6085_v32 = vmax.f32 %v4163_v25, %v4663_v26 }
 0x224   :  { %7288 = vst.msk [vmem:[%s12512_s3 + $0xc8] sm:$0xf] %vm7237_vm1, %v7087_v22  ;;  %v6484_v29 = vmax.f32 %v6084_v23, %v6284_v24 }
 0x225   :  { %9080 = vmatmul.msk.bf16.gmra.mxu0 %vm2823_vm0, %v9480_v20  ;;  %9180 = vmatmul.msk.bf16.gmra.mxu1 %vm2823_vm0, %v9580_v21 }
 0x226   :  { %v6688_v30 = vadd.f32 %v10473_v43, %v6484_v29  ;;  %9280 = vmatmul.msk.bf16.gmra.mxu2 %vm2823_vm0, %v9680_v27  ;;  %9380 = vmatmul.msk.bf16.gmra.mxu3 %vm2823_vm0, %v9780_v28  ;;  %v9483_v29 = vld [vmem:[%s12510_s0 + $0x128] sm:$0xff] }
 0x228   :  { %v6888_v31 = vmax.f32 %v6688_v30, 0.0  ;;  %v9583_v30 = vld [vmem:[%s12510_s0 + $0x448] sm:$0xff] }
 0x229   :  { %v5163_v33 = vpop.f32.mrf.mxu2  ;;  %v5663_v34 = vpop.f32.mrf.mxu3 }
 0x22a   :  { %v7088_v35 = vpack.c.bf16 %v6888_v31, %v6888_v31  ;;  %v6285_v36 = vmax.f32 %v5163_v33, %v5663_v34  ;;  %v4165_v37 = vpop.f32.mrf.mxu0  ;;  %v4665_v38 = vpop.f32.mrf.mxu1 }
 0x22b   :  { %v6086_v48 = vmax.f32 %v4165_v37, %v4665_v38  ;;  %v9783_v37 = vld [vmem:[%s12510_s0 + $0xa88] sm:$0xff] }
 0x22c   :  { %7289 = vst.msk [vmem:[%s12512_s3 + $0xcc] sm:$0xf] %vm7237_vm1, %v7088_v35  ;;  %v6485_v39 = vmax.f32 %v6085_v32, %v6285_v36  ;;  %v9683_v36 = vld [vmem:[%s12510_s0 + $0x768] sm:$0xff] }
 0x22e   :  { %v6689_v40 = vadd.f32 %v10473_v43, %v6485_v39 }
 0x230   :  { %v6889_v41 = vmax.f32 %v6689_v40, 0.0 }
 0x231   :  { %v5165_v42 = vpop.f32.mrf.mxu2  ;;  %v5665_v44 = vpop.f32.mrf.mxu3 }
 0x232   :  { %v7089_v47 = vpack.c.bf16 %v6889_v41, %v6889_v41  ;;  %v6286_v49 = vmax.f32 %v5165_v42, %v5665_v44  ;;  %v4168_v50 = vpop.f32.mrf.mxu0  ;;  %v4668_v51 = vpop.f32.mrf.mxu1 }
 0x233   :  { %v6087_v57 = vmax.f32 %v4168_v50, %v4668_v51 }
 0x234   :  { %7290 = vst.msk [vmem:[%s12512_s3 + $0xd0] sm:$0xf] %vm7237_vm1, %v7089_v47  ;;  %v6486_v54 = vmax.f32 %v6086_v48, %v6286_v49 }
 0x235   :  { %9081 = vmatmul.msk.bf16.gmra.mxu0 %vm2823_vm0, %v9481_v45  ;;  %9181 = vmatmul.msk.bf16.gmra.mxu1 %vm2823_vm0, %v9581_v46 }
 0x236   :  { %v6690_v55 = vadd.f32 %v10473_v43, %v6486_v54  ;;  %9281 = vmatmul.msk.bf16.gmra.mxu2 %vm2823_vm0, %v9681_v52  ;;  %9381 = vmatmul.msk.bf16.gmra.mxu3 %vm2823_vm0, %v9781_v53  ;;  %v9484_v54 = vld [vmem:[%s12510_s0 + $0x130] sm:$0xff] }
 0x238   :  { %v6890_v56 = vmax.f32 %v6690_v55, 0.0  ;;  %v9584_v55 = vld [vmem:[%s12510_s0 + $0x450] sm:$0xff] }
 0x239   :  { %v5168_v58 = vpop.f32.mrf.mxu2  ;;  %v5668_v59 = vpop.f32.mrf.mxu3 }
 0x23a   :  { %v7090_v60 = vpack.c.bf16 %v6890_v56, %v6890_v56  ;;  %v6287_v61 = vmax.f32 %v5168_v58, %v5668_v59  ;;  %v4170_v62 = vpop.f32.mrf.mxu0  ;;  %v4670_v63 = vpop.f32.mrf.mxu1 }
 0x23b   :  { %v6088_v8 = vmax.f32 %v4170_v62, %v4670_v63  ;;  %v9784_v62 = vld [vmem:[%s12510_s0 + $0xa90] sm:$0xff] }
 0x23c   :  { %7291 = vst.msk [vmem:[%s12512_s3 + $0xd4] sm:$0xf] %vm7237_vm1, %v7090_v60  ;;  %v6487_v0 = vmax.f32 %v6087_v57, %v6287_v61  ;;  %v9684_v61 = vld [vmem:[%s12510_s0 + $0x770] sm:$0xff] }
 0x23e   :  { %v6691_v1 = vadd.f32 %v10473_v43, %v6487_v0 }
 0x240   :  { %v6891_v2 = vmax.f32 %v6691_v1, 0.0 }
 0x241   :  { %v5170_v3 = vpop.f32.mrf.mxu2  ;;  %v5670_v4 = vpop.f32.mrf.mxu3 }
 0x242   :  { %v7091_v7 = vpack.c.bf16 %v6891_v2, %v6891_v2  ;;  %v6288_v9 = vmax.f32 %v5170_v3, %v5670_v4  ;;  %v4173_v10 = vpop.f32.mrf.mxu0  ;;  %v4673_v11 = vpop.f32.mrf.mxu1 }
 0x243   :  { %v6089_v17 = vmax.f32 %v4173_v10, %v4673_v11 }
 0x244   :  { %7292 = vst.msk [vmem:[%s12512_s3 + $0xd8] sm:$0xf] %vm7237_vm1, %v7091_v7  ;;  %v6488_v14 = vmax.f32 %v6088_v8, %v6288_v9 }
 0x245   :  { %9082 = vmatmul.msk.bf16.gmra.mxu0 %vm2823_vm0, %v9482_v5  ;;  %9182 = vmatmul.msk.bf16.gmra.mxu1 %vm2823_vm0, %v9582_v6 }
 0x246   :  { %v6692_v15 = vadd.f32 %v10473_v43, %v6488_v14  ;;  %9282 = vmatmul.msk.bf16.gmra.mxu2 %vm2823_vm0, %v9682_v12  ;;  %9382 = vmatmul.msk.bf16.gmra.mxu3 %vm2823_vm0, %v9782_v13  ;;  %v9485_v14 = vld [vmem:[%s12510_s0 + $0x138] sm:$0xff] }
 0x248   :  { %v6892_v16 = vmax.f32 %v6692_v15, 0.0  ;;  %v9585_v15 = vld [vmem:[%s12510_s0 + $0x458] sm:$0xff] }
 0x249   :  { %v5173_v18 = vpop.f32.mrf.mxu2  ;;  %v5673_v19 = vpop.f32.mrf.mxu3 }
 0x24a   :  { %v7092_v20 = vpack.c.bf16 %v6892_v16, %v6892_v16  ;;  %v6289_v21 = vmax.f32 %v5173_v18, %v5673_v19  ;;  %v4175_v22 = vpop.f32.mrf.mxu0  ;;  %v4675_v23 = vpop.f32.mrf.mxu1 }
 0x24b   :  { %v6090_v32 = vmax.f32 %v4175_v22, %v4675_v23  ;;  %v9785_v22 = vld [vmem:[%s12510_s0 + $0xa98] sm:$0xff] }
 0x24c   :  { %7293 = vst.msk [vmem:[%s12512_s3 + $0xdc] sm:$0xf] %vm7237_vm1, %v7092_v20  ;;  %v6489_v24 = vmax.f32 %v6089_v17, %v6289_v21  ;;  %v9685_v21 = vld [vmem:[%s12510_s0 + $0x778] sm:$0xff] }
 0x24e   :  { %v6693_v25 = vadd.f32 %v10473_v43, %v6489_v24 }
 0x250   :  { %v6893_v26 = vmax.f32 %v6693_v25, 0.0 }
 0x251   :  { %v5175_v27 = vpop.f32.mrf.mxu2  ;;  %v5675_v28 = vpop.f32.mrf.mxu3 }
 0x252   :  { %v7093_v31 = vpack.c.bf16 %v6893_v26, %v6893_v26  ;;  %v6290_v33 = vmax.f32 %v5175_v27, %v5675_v28  ;;  %v4178_v34 = vpop.f32.mrf.mxu0  ;;  %v4678_v35 = vpop.f32.mrf.mxu1 }
 0x253   :  { %v6091_v41 = vmax.f32 %v4178_v34, %v4678_v35 }
 0x254   :  { %7294 = vst.msk [vmem:[%s12512_s3 + $0xe0] sm:$0xf] %vm7237_vm1, %v7093_v31  ;;  %v6490_v38 = vmax.f32 %v6090_v32, %v6290_v33 }
 0x255   :  { %9083 = vmatmul.msk.bf16.gmra.mxu0 %vm2823_vm0, %v9483_v29  ;;  %9183 = vmatmul.msk.bf16.gmra.mxu1 %vm2823_vm0, %v9583_v30 }
 0x256   :  { %v6694_v39 = vadd.f32 %v10473_v43, %v6490_v38  ;;  %9283 = vmatmul.msk.bf16.gmra.mxu2 %vm2823_vm0, %v9683_v36  ;;  %9383 = vmatmul.msk.bf16.gmra.mxu3 %vm2823_vm0, %v9783_v37  ;;  %v9486_v38 = vld [vmem:[%s12510_s0 + $0x140] sm:$0xff] }
 0x258   :  { %v6894_v40 = vmax.f32 %v6694_v39, 0.0  ;;  %v9586_v39 = vld [vmem:[%s12510_s0 + $0x460] sm:$0xff] }
 0x259   :  { %v5178_v42 = vpop.f32.mrf.mxu2  ;;  %v5678_v44 = vpop.f32.mrf.mxu3 }
 0x25a   :  { %v7094_v45 = vpack.c.bf16 %v6894_v40, %v6894_v40  ;;  %v6291_v46 = vmax.f32 %v5178_v42, %v5678_v44  ;;  %v4180_v47 = vpop.f32.mrf.mxu0  ;;  %v4680_v48 = vpop.f32.mrf.mxu1 }
 0x25b   :  { %v6092_v57 = vmax.f32 %v4180_v47, %v4680_v48  ;;  %v9786_v47 = vld [vmem:[%s12510_s0 + $0xaa0] sm:$0xff] }
 0x25c   :  { %7295 = vst.msk [vmem:[%s12512_s3 + $0xe4] sm:$0xf] %vm7237_vm1, %v7094_v45  ;;  %v6491_v49 = vmax.f32 %v6091_v41, %v6291_v46  ;;  %v9686_v46 = vld [vmem:[%s12510_s0 + $0x780] sm:$0xff] }
 0x25e   :  { %v6695_v50 = vadd.f32 %v10473_v43, %v6491_v49 }
 0x260   :  { %v6895_v51 = vmax.f32 %v6695_v50, 0.0 }
 0x261   :  { %v5180_v52 = vpop.f32.mrf.mxu2  ;;  %v5680_v53 = vpop.f32.mrf.mxu3 }
 0x262   :  { %v7095_v56 = vpack.c.bf16 %v6895_v51, %v6895_v51  ;;  %v6292_v58 = vmax.f32 %v5180_v52, %v5680_v53  ;;  %v4183_v59 = vpop.f32.mrf.mxu0  ;;  %v4683_v60 = vpop.f32.mrf.mxu1 }
 0x263   :  { %v6093_v2 = vmax.f32 %v4183_v59, %v4683_v60 }
 0x264   :  { %7296 = vst.msk [vmem:[%s12512_s3 + $0xe8] sm:$0xf] %vm7237_vm1, %v7095_v56  ;;  %v6492_v63 = vmax.f32 %v6092_v57, %v6292_v58 }
 0x265   :  { %9084 = vmatmul.msk.bf16.gmra.mxu0 %vm2823_vm0, %v9484_v54  ;;  %9184 = vmatmul.msk.bf16.gmra.mxu1 %vm2823_vm0, %v9584_v55 }
 0x266   :  { %v6696_v0 = vadd.f32 %v10473_v43, %v6492_v63  ;;  %9284 = vmatmul.msk.bf16.gmra.mxu2 %vm2823_vm0, %v9684_v61  ;;  %9384 = vmatmul.msk.bf16.gmra.mxu3 %vm2823_vm0, %v9784_v62  ;;  %v9487_v63 = vld [vmem:[%s12510_s0 + $0x148] sm:$0xff] }
 0x268   :  { %v6896_v1 = vmax.f32 %v6696_v0, 0.0  ;;  %v9587_v0 = vld [vmem:[%s12510_s0 + $0x468] sm:$0xff] }
 0x269   :  { %v5183_v3 = vpop.f32.mrf.mxu2  ;;  %v5683_v4 = vpop.f32.mrf.mxu3 }
 0x26a   :  { %v7096_v5 = vpack.c.bf16 %v6896_v1, %v6896_v1  ;;  %v6293_v6 = vmax.f32 %v5183_v3, %v5683_v4  ;;  %v4185_v7 = vpop.f32.mrf.mxu0  ;;  %v4685_v8 = vpop.f32.mrf.mxu1 }
 0x26b   :  { %v6094_v17 = vmax.f32 %v4185_v7, %v4685_v8  ;;  %v9787_v7 = vld [vmem:[%s12510_s0 + $0xaa8] sm:$0xff] }
 0x26c   :  { %7297 = vst.msk [vmem:[%s12512_s3 + $0xec] sm:$0xf] %vm7237_vm1, %v7096_v5  ;;  %v6493_v9 = vmax.f32 %v6093_v2, %v6293_v6  ;;  %v9687_v6 = vld [vmem:[%s12510_s0 + $0x788] sm:$0xff] }
 0x26e   :  { %v6697_v10 = vadd.f32 %v10473_v43, %v6493_v9 }
 0x270   :  { %v6897_v11 = vmax.f32 %v6697_v10, 0.0 }
 0x271   :  { %v5185_v12 = vpop.f32.mrf.mxu2  ;;  %v5685_v13 = vpop.f32.mrf.mxu3 }
 0x272   :  { %v7097_v16 = vpack.c.bf16 %v6897_v11, %v6897_v11  ;;  %v6294_v18 = vmax.f32 %v5185_v12, %v5685_v13  ;;  %v4188_v19 = vpop.f32.mrf.mxu0  ;;  %v4688_v20 = vpop.f32.mrf.mxu1 }
 0x273   :  { %v6095_v26 = vmax.f32 %v4188_v19, %v4688_v20 }
 0x274   :  { %7298 = vst.msk [vmem:[%s12512_s3 + $0xf0] sm:$0xf] %vm7237_vm1, %v7097_v16  ;;  %v6494_v23 = vmax.f32 %v6094_v17, %v6294_v18 }
 0x275   :  { %9085 = vmatmul.msk.bf16.gmra.mxu0 %vm2823_vm0, %v9485_v14  ;;  %9185 = vmatmul.msk.bf16.gmra.mxu1 %vm2823_vm0, %v9585_v15 }
 0x276   :  { %v6698_v24 = vadd.f32 %v10473_v43, %v6494_v23  ;;  %9285 = vmatmul.msk.bf16.gmra.mxu2 %vm2823_vm0, %v9685_v21  ;;  %9385 = vmatmul.msk.bf16.gmra.mxu3 %vm2823_vm0, %v9785_v22  ;;  %v9488_v23 = vld [vmem:[%s12510_s0 + $0x150] sm:$0xff] }
 0x278   :  { %v6898_v25 = vmax.f32 %v6698_v24, 0.0  ;;  %v9588_v24 = vld [vmem:[%s12510_s0 + $0x470] sm:$0xff] }
 0x279   :  { %v5188_v27 = vpop.f32.mrf.mxu2  ;;  %v5688_v28 = vpop.f32.mrf.mxu3 }
 0x27a   :  { %v7098_v29 = vpack.c.bf16 %v6898_v25, %v6898_v25  ;;  %v6295_v30 = vmax.f32 %v5188_v27, %v5688_v28  ;;  %v4190_v31 = vpop.f32.mrf.mxu0  ;;  %v4690_v32 = vpop.f32.mrf.mxu1 }
 0x27b   :  { %v6096_v41 = vmax.f32 %v4190_v31, %v4690_v32  ;;  %v9788_v31 = vld [vmem:[%s12510_s0 + $0xab0] sm:$0xff] }
 0x27c   :  { %7299 = vst.msk [vmem:[%s12512_s3 + $0xf4] sm:$0xf] %vm7237_vm1, %v7098_v29  ;;  %v6495_v33 = vmax.f32 %v6095_v26, %v6295_v30  ;;  %v9688_v30 = vld [vmem:[%s12510_s0 + $0x790] sm:$0xff] }
 0x27e   :  { %v6699_v34 = vadd.f32 %v10473_v43, %v6495_v33 }
 0x280   :  { %v6899_v35 = vmax.f32 %v6699_v34, 0.0 }
 0x281   :  { %v5190_v36 = vpop.f32.mrf.mxu2  ;;  %v5690_v37 = vpop.f32.mrf.mxu3 }
 0x282   :  { %v7099_v40 = vpack.c.bf16 %v6899_v35, %v6899_v35  ;;  %v6296_v42 = vmax.f32 %v5190_v36, %v5690_v37  ;;  %v4193_v44 = vpop.f32.mrf.mxu0  ;;  %v4693_v45 = vpop.f32.mrf.mxu1 }
 0x283   :  { %v6097_v51 = vmax.f32 %v4193_v44, %v4693_v45 }
 0x284   :  { %7300 = vst.msk [vmem:[%s12512_s3 + $0xf8] sm:$0xf] %vm7237_vm1, %v7099_v40  ;;  %v6496_v48 = vmax.f32 %v6096_v41, %v6296_v42 }
 0x285   :  { %9086 = vmatmul.msk.bf16.gmra.mxu0 %vm2823_vm0, %v9486_v38  ;;  %9186 = vmatmul.msk.bf16.gmra.mxu1 %vm2823_vm0, %v9586_v39 }
 0x286   :  { %v6700_v49 = vadd.f32 %v10473_v43, %v6496_v48  ;;  %9286 = vmatmul.msk.bf16.gmra.mxu2 %vm2823_vm0, %v9686_v46  ;;  %9386 = vmatmul.msk.bf16.gmra.mxu3 %vm2823_vm0, %v9786_v47  ;;  %v9489_v48 = vld [vmem:[%s12510_s0 + $0x158] sm:$0xff] }
 0x288   :  { %v6900_v50 = vmax.f32 %v6700_v49, 0.0  ;;  %v9589_v49 = vld [vmem:[%s12510_s0 + $0x478] sm:$0xff] }
 0x289   :  { %v5193_v52 = vpop.f32.mrf.mxu2  ;;  %v5693_v53 = vpop.f32.mrf.mxu3 }
 0x28a   :  { %v7100_v54 = vpack.c.bf16 %v6900_v50, %v6900_v50  ;;  %v6297_v55 = vmax.f32 %v5193_v52, %v5693_v53  ;;  %v4195_v56 = vpop.f32.mrf.mxu0  ;;  %v4695_v57 = vpop.f32.mrf.mxu1 }
 0x28b   :  { %v6098_v2 = vmax.f32 %v4195_v56, %v4695_v57  ;;  %v10939_v57 = vld [vmem:[%s12511_s2] ss:$0 sm:$0xff] }
 0x28c   :  { %7301 = vst.msk [vmem:[%s12512_s3 + $0xfc] sm:$0xf] %vm7237_vm1, %v7100_v54  ;;  %v6497_v58 = vmax.f32 %v6097_v51, %v6297_v55  ;;  %v9789_v55 = vld [vmem:[%s12510_s0 + $0xab8] sm:$0xff] }
 0x28e   :  { %v6701_v59 = vadd.f32 %v10473_v43, %v6497_v58 }
 0x290   :  { %v6901_v60 = vmax.f32 %v6701_v59, 0.0 }
 0x291   :  { %v5195_v61 = vpop.f32.mrf.mxu2  ;;  %v5695_v62 = vpop.f32.mrf.mxu3 }
 0x292   :  { %v7101_v1 = vpack.c.bf16 %v6901_v60, %v6901_v60  ;;  %v6298_v3 = vmax.f32 %v5195_v61, %v5695_v62  ;;  %v4198_v4 = vpop.f32.mrf.mxu0  ;;  %v4698_v5 = vpop.f32.mrf.mxu1 }
 0x293   :  { %v6099_v11 = vmax.f32 %v4198_v4, %v4698_v5 }
 0x294   :  { %7302 = vst.msk [vmem:[%s12512_s3 + $0x100] sm:$0xf] %vm7237_vm1, %v7101_v1  ;;  %v6498_v8 = vmax.f32 %v6098_v2, %v6298_v3 }
 0x295   :  { %9087 = vmatmul.msk.bf16.gmra.mxu0 %vm2823_vm0, %v9487_v63  ;;  %9187 = vmatmul.msk.bf16.gmra.mxu1 %vm2823_vm0, %v9587_v0 }
 0x296   :  { %v6702_v9 = vadd.f32 %v10473_v43, %v6498_v8  ;;  %9287 = vmatmul.msk.bf16.gmra.mxu2 %vm2823_vm0, %v9687_v6  ;;  %9387 = vmatmul.msk.bf16.gmra.mxu3 %vm2823_vm0, %v9787_v7  ;;  %v9490_v8 = vld [vmem:[%s12510_s0 + $0x160] sm:$0xff] }
 0x298   :  { %v6902_v10 = vmax.f32 %v6702_v9, 0.0  ;;  %v9590_v9 = vld [vmem:[%s12510_s0 + $0x480] sm:$0xff] }
 0x299   :  { %v5198_v12 = vpop.f32.mrf.mxu2  ;;  %v5698_v13 = vpop.f32.mrf.mxu3 }
 0x29a   :  { %v7102_v14 = vpack.c.bf16 %v6902_v10, %v6902_v10  ;;  %v6299_v15 = vmax.f32 %v5198_v12, %v5698_v13  ;;  %v4200_v16 = vpop.f32.mrf.mxu0  ;;  %v4700_v17 = vpop.f32.mrf.mxu1 }
 0x29b   :  { %v6100_v26 = vmax.f32 %v4200_v16, %v4700_v17  ;;  %v9790_v16 = vld [vmem:[%s12510_s0 + $0xac0] sm:$0xff] }
 0x29c   :  { %7303 = vst.msk [vmem:[%s12512_s3 + $0x104] sm:$0xf] %vm7237_vm1, %v7102_v14  ;;  %v6499_v18 = vmax.f32 %v6099_v11, %v6299_v15  ;;  %v9690_v15 = vld [vmem:[%s12510_s0 + $0x7a0] sm:$0xff] }
 0x29e   :  { %v6703_v19 = vadd.f32 %v10473_v43, %v6499_v18 }
 0x2a0   :  { %v6903_v20 = vmax.f32 %v6703_v19, 0.0 }
 0x2a1   :  { %v5200_v21 = vpop.f32.mrf.mxu2  ;;  %v5700_v22 = vpop.f32.mrf.mxu3 }
 0x2a2   :  { %v7103_v25 = vpack.c.bf16 %v6903_v20, %v6903_v20  ;;  %v6300_v27 = vmax.f32 %v5200_v21, %v5700_v22  ;;  %v4203_v28 = vpop.f32.mrf.mxu0  ;;  %v4703_v29 = vpop.f32.mrf.mxu1 }
 0x2a3   :  { %v6101_v35 = vmax.f32 %v4203_v28, %v4703_v29 }
 0x2a4   :  { %7304 = vst.msk [vmem:[%s12512_s3 + $0x108] sm:$0xf] %vm7237_vm1, %v7103_v25  ;;  %v6500_v32 = vmax.f32 %v6100_v26, %v6300_v27 }
 0x2a5   :  { %9088 = vmatmul.msk.bf16.gmra.mxu0 %vm2823_vm0, %v9488_v23  ;;  %9188 = vmatmul.msk.bf16.gmra.mxu1 %vm2823_vm0, %v9588_v24 }
 0x2a6   :  { %v6704_v33 = vadd.f32 %v10473_v43, %v6500_v32  ;;  %9288 = vmatmul.msk.bf16.gmra.mxu2 %vm2823_vm0, %v9688_v30  ;;  %9388 = vmatmul.msk.bf16.gmra.mxu3 %vm2823_vm0, %v9788_v31  ;;  %v9491_v32 = vld [vmem:[%s12510_s0 + $0x168] sm:$0xff] }
 0x2a8   :  { %v6904_v34 = vmax.f32 %v6704_v33, 0.0  ;;  %v9591_v33 = vld [vmem:[%s12510_s0 + $0x488] sm:$0xff] }
 0x2a9   :  { %v5203_v36 = vpop.f32.mrf.mxu2  ;;  %v5703_v37 = vpop.f32.mrf.mxu3 }
 0x2aa   :  { %v7104_v38 = vpack.c.bf16 %v6904_v34, %v6904_v34  ;;  %v6301_v39 = vmax.f32 %v5203_v36, %v5703_v37  ;;  %v4205_v40 = vpop.f32.mrf.mxu0  ;;  %v4705_v41 = vpop.f32.mrf.mxu1 }
 0x2ab   :  { %v6102_v51 = vmax.f32 %v4205_v40, %v4705_v41  ;;  %v9791_v40 = vld [vmem:[%s12510_s0 + $0xac8] sm:$0xff] }
 0x2ac   :  { %7305 = vst.msk [vmem:[%s12512_s3 + $0x10c] sm:$0xf] %vm7237_vm1, %v7104_v38  ;;  %v6501_v42 = vmax.f32 %v6101_v35, %v6301_v39  ;;  %v9691_v39 = vld [vmem:[%s12510_s0 + $0x7a8] sm:$0xff] }
 0x2ae   :  { %v6705_v44 = vadd.f32 %v10473_v43, %v6501_v42  ;;  %v9689_v43 = vld [vmem:[%s12510_s0 + $0x798] sm:$0xff] }
 0x2b0   :  { %v6905_v45 = vmax.f32 %v6705_v44, 0.0 }
 0x2b1   :  { %v5205_v46 = vpop.f32.mrf.mxu2  ;;  %v5705_v47 = vpop.f32.mrf.mxu3 }
 0x2b2   :  { %v7105_v50 = vpack.c.bf16 %v6905_v45, %v6905_v45  ;;  %v6302_v52 = vmax.f32 %v5205_v46, %v5705_v47  ;;  %v4208_v53 = vpop.f32.mrf.mxu0  ;;  %v4708_v54 = vpop.f32.mrf.mxu1 }
 0x2b3   :  { %v6103_v60 = vmax.f32 %v4208_v53, %v4708_v54 }
 0x2b4   :  { %7306 = vst.msk [vmem:[%s12512_s3 + $0x110] sm:$0xf] %vm7237_vm1, %v7105_v50  ;;  %v6502_v56 = vmax.f32 %v6102_v51, %v6302_v52 }
 0x2b5   :  { %9089 = vmatmul.msk.bf16.gmra.mxu0 %vm2823_vm0, %v9489_v48  ;;  %9189 = vmatmul.msk.bf16.gmra.mxu1 %vm2823_vm0, %v9589_v49 }
 0x2b6   :  { %v6706_v58 = vadd.f32 %v10939_v57, %v6502_v56  ;;  %9289 = vmatmul.msk.bf16.gmra.mxu2 %vm2823_vm0, %v9689_v43  ;;  %9389 = vmatmul.msk.bf16.gmra.mxu3 %vm2823_vm0, %v9789_v55  ;;  %v9492_v56 = vld [vmem:[%s12510_s0 + $0x170] sm:$0xff] }
 0x2b8   :  { %v6906_v59 = vmax.f32 %v6706_v58, 0.0  ;;  %v9592_v58 = vld [vmem:[%s12510_s0 + $0x490] sm:$0xff] }
 0x2b9   :  { %v5208_v61 = vpop.f32.mrf.mxu2  ;;  %v5708_v62 = vpop.f32.mrf.mxu3 }
 0x2ba   :  { %v7106_v63 = vpack.c.bf16 %v6906_v59, %v6906_v59  ;;  %v6303_v0 = vmax.f32 %v5208_v61, %v5708_v62  ;;  %v4210_v1 = vpop.f32.mrf.mxu0  ;;  %v4710_v2 = vpop.f32.mrf.mxu1 }
 0x2bb   :  { %v6104_v11 = vmax.f32 %v4210_v1, %v4710_v2  ;;  %v9792_v1 = vld [vmem:[%s12510_s0 + $0xad0] sm:$0xff] }
 0x2bc   :  { %7307 = vst.msk [vmem:[%s12512_s3 + $0x114] sm:$0xf] %vm7237_vm1, %v7106_v63  ;;  %v6503_v3 = vmax.f32 %v6103_v60, %v6303_v0  ;;  %v9692_v0 = vld [vmem:[%s12510_s0 + $0x7b0] sm:$0xff] }
 0x2be   :  { %v6707_v4 = vadd.f32 %v10939_v57, %v6503_v3 }
 0x2c0   :  { %v6907_v5 = vmax.f32 %v6707_v4, 0.0 }
 0x2c1   :  { %v5210_v6 = vpop.f32.mrf.mxu2  ;;  %v5710_v7 = vpop.f32.mrf.mxu3 }
 0x2c2   :  { %v7107_v10 = vpack.c.bf16 %v6907_v5, %v6907_v5  ;;  %v6304_v12 = vmax.f32 %v5210_v6, %v5710_v7  ;;  %v4213_v13 = vpop.f32.mrf.mxu0  ;;  %v4713_v14 = vpop.f32.mrf.mxu1 }
 0x2c3   :  { %v6105_v20 = vmax.f32 %v4213_v13, %v4713_v14 }
 0x2c4   :  { %7308 = vst.msk [vmem:[%s12512_s3 + $0x118] sm:$0xf] %vm7237_vm1, %v7107_v10  ;;  %v6504_v17 = vmax.f32 %v6104_v11, %v6304_v12 }
 0x2c5   :  { %9090 = vmatmul.msk.bf16.gmra.mxu0 %vm2823_vm0, %v9490_v8  ;;  %9190 = vmatmul.msk.bf16.gmra.mxu1 %vm2823_vm0, %v9590_v9 }
 0x2c6   :  { %v6708_v18 = vadd.f32 %v10939_v57, %v6504_v17  ;;  %9290 = vmatmul.msk.bf16.gmra.mxu2 %vm2823_vm0, %v9690_v15  ;;  %9390 = vmatmul.msk.bf16.gmra.mxu3 %vm2823_vm0, %v9790_v16  ;;  %v9493_v17 = vld [vmem:[%s12510_s0 + $0x178] sm:$0xff] }
 0x2c8   :  { %v6908_v19 = vmax.f32 %v6708_v18, 0.0  ;;  %v9593_v18 = vld [vmem:[%s12510_s0 + $0x498] sm:$0xff] }
 0x2c9   :  { %v5213_v21 = vpop.f32.mrf.mxu2  ;;  %v5713_v22 = vpop.f32.mrf.mxu3 }
 0x2ca   :  { %v7108_v23 = vpack.c.bf16 %v6908_v19, %v6908_v19  ;;  %v6305_v24 = vmax.f32 %v5213_v21, %v5713_v22  ;;  %v4215_v25 = vpop.f32.mrf.mxu0  ;;  %v4715_v26 = vpop.f32.mrf.mxu1 }
 0x2cb   :  { %v6106_v35 = vmax.f32 %v4215_v25, %v4715_v26  ;;  %v9793_v25 = vld [vmem:[%s12510_s0 + $0xad8] sm:$0xff] }
 0x2cc   :  { %7309 = vst.msk [vmem:[%s12512_s3 + $0x11c] sm:$0xf] %vm7237_vm1, %v7108_v23  ;;  %v6505_v27 = vmax.f32 %v6105_v20, %v6305_v24  ;;  %v9693_v24 = vld [vmem:[%s12510_s0 + $0x7b8] sm:$0xff] }
 0x2ce   :  { %v6709_v28 = vadd.f32 %v10939_v57, %v6505_v27 }
 0x2d0   :  { %v6909_v29 = vmax.f32 %v6709_v28, 0.0 }
 0x2d1   :  { %v5215_v30 = vpop.f32.mrf.mxu2  ;;  %v5715_v31 = vpop.f32.mrf.mxu3 }
 0x2d2   :  { %v7109_v34 = vpack.c.bf16 %v6909_v29, %v6909_v29  ;;  %v6306_v36 = vmax.f32 %v5215_v30, %v5715_v31  ;;  %v4218_v37 = vpop.f32.mrf.mxu0  ;;  %v4718_v38 = vpop.f32.mrf.mxu1 }
 0x2d3   :  { %v6107_v45 = vmax.f32 %v4218_v37, %v4718_v38 }
 0x2d4   :  { %7310 = vst.msk [vmem:[%s12512_s3 + $0x120] sm:$0xf] %vm7237_vm1, %v7109_v34  ;;  %v6506_v41 = vmax.f32 %v6106_v35, %v6306_v36 }
 0x2d5   :  { %9091 = vmatmul.msk.bf16.gmra.mxu0 %vm2823_vm0, %v9491_v32  ;;  %9191 = vmatmul.msk.bf16.gmra.mxu1 %vm2823_vm0, %v9591_v33 }
 0x2d6   :  { %v6710_v42 = vadd.f32 %v10939_v57, %v6506_v41  ;;  %9291 = vmatmul.msk.bf16.gmra.mxu2 %vm2823_vm0, %v9691_v39  ;;  %9391 = vmatmul.msk.bf16.gmra.mxu3 %vm2823_vm0, %v9791_v40  ;;  %v9494_v41 = vld [vmem:[%s12510_s0 + $0x180] sm:$0xff] }
 0x2d8   :  { %v6910_v44 = vmax.f32 %v6710_v42, 0.0  ;;  %v9594_v42 = vld [vmem:[%s12510_s0 + $0x4a0] sm:$0xff] }
 0x2d9   :  { %v5218_v46 = vpop.f32.mrf.mxu2  ;;  %v5718_v47 = vpop.f32.mrf.mxu3 }
 0x2da   :  { %v7110_v48 = vpack.c.bf16 %v6910_v44, %v6910_v44  ;;  %v6307_v49 = vmax.f32 %v5218_v46, %v5718_v47  ;;  %v4220_v50 = vpop.f32.mrf.mxu0  ;;  %v4720_v51 = vpop.f32.mrf.mxu1 }
 0x2db   :  { %v6108_v60 = vmax.f32 %v4220_v50, %v4720_v51  ;;  %v9794_v50 = vld [vmem:[%s12510_s0 + $0xae0] sm:$0xff] }
 0x2dc   :  { %7311 = vst.msk [vmem:[%s12512_s3 + $0x124] sm:$0xf] %vm7237_vm1, %v7110_v48  ;;  %v6507_v52 = vmax.f32 %v6107_v45, %v6307_v49  ;;  %v9694_v49 = vld [vmem:[%s12510_s0 + $0x7c0] sm:$0xff] }
 0x2de   :  { %v6711_v53 = vadd.f32 %v10939_v57, %v6507_v52 }
 0x2e0   :  { %v6911_v54 = vmax.f32 %v6711_v53, 0.0 }
 0x2e1   :  { %v5220_v43 = vpop.f32.mrf.mxu2  ;;  %v5720_v55 = vpop.f32.mrf.mxu3 }
 0x2e2   :  { %v7111_v59 = vpack.c.bf16 %v6911_v54, %v6911_v54  ;;  %v6308_v61 = vmax.f32 %v5220_v43, %v5720_v55  ;;  %v4223_v62 = vpop.f32.mrf.mxu0  ;;  %v4723_v63 = vpop.f32.mrf.mxu1 }
 0x2e3   :  { %v6109_v5 = vmax.f32 %v4223_v62, %v4723_v63 }
 0x2e4   :  { %7312 = vst.msk [vmem:[%s12512_s3 + $0x128] sm:$0xf] %vm7237_vm1, %v7111_v59  ;;  %v6508_v2 = vmax.f32 %v6108_v60, %v6308_v61 }
 0x2e5   :  { %9092 = vmatmul.msk.bf16.gmra.mxu0 %vm2823_vm0, %v9492_v56  ;;  %9192 = vmatmul.msk.bf16.gmra.mxu1 %vm2823_vm0, %v9592_v58 }
 0x2e6   :  { %v6712_v3 = vadd.f32 %v10939_v57, %v6508_v2  ;;  %9292 = vmatmul.msk.bf16.gmra.mxu2 %vm2823_vm0, %v9692_v0  ;;  %9392 = vmatmul.msk.bf16.gmra.mxu3 %vm2823_vm0, %v9792_v1  ;;  %v9495_v2 = vld [vmem:[%s12510_s0 + $0x188] sm:$0xff] }
 0x2e8   :  { %v6912_v4 = vmax.f32 %v6712_v3, 0.0  ;;  %v9595_v3 = vld [vmem:[%s12510_s0 + $0x4a8] sm:$0xff] }
 0x2e9   :  { %v5223_v6 = vpop.f32.mrf.mxu2  ;;  %v5723_v7 = vpop.f32.mrf.mxu3 }
 0x2ea   :  { %v7112_v8 = vpack.c.bf16 %v6912_v4, %v6912_v4  ;;  %v6309_v9 = vmax.f32 %v5223_v6, %v5723_v7  ;;  %v4225_v10 = vpop.f32.mrf.mxu0  ;;  %v4725_v11 = vpop.f32.mrf.mxu1 }
 0x2eb   :  { %v6110_v20 = vmax.f32 %v4225_v10, %v4725_v11  ;;  %v9795_v10 = vld [vmem:[%s12510_s0 + $0xae8] sm:$0xff] }
 0x2ec   :  { %7313 = vst.msk [vmem:[%s12512_s3 + $0x12c] sm:$0xf] %vm7237_vm1, %v7112_v8  ;;  %v6509_v12 = vmax.f32 %v6109_v5, %v6309_v9  ;;  %v9695_v9 = vld [vmem:[%s12510_s0 + $0x7c8] sm:$0xff] }
 0x2ee   :  { %v6713_v13 = vadd.f32 %v10939_v57, %v6509_v12 }
 0x2f0   :  { %v6913_v14 = vmax.f32 %v6713_v13, 0.0 }
 0x2f1   :  { %v5225_v15 = vpop.f32.mrf.mxu2  ;;  %v5725_v16 = vpop.f32.mrf.mxu3 }
 0x2f2   :  { %v7113_v19 = vpack.c.bf16 %v6913_v14, %v6913_v14  ;;  %v6310_v21 = vmax.f32 %v5225_v15, %v5725_v16  ;;  %v4228_v22 = vpop.f32.mrf.mxu0  ;;  %v4728_v23 = vpop.f32.mrf.mxu1 }
 0x2f3   :  { %v6111_v29 = vmax.f32 %v4228_v22, %v4728_v23 }
 0x2f4   :  { %7314 = vst.msk [vmem:[%s12512_s3 + $0x130] sm:$0xf] %vm7237_vm1, %v7113_v19  ;;  %v6510_v26 = vmax.f32 %v6110_v20, %v6310_v21 }
 0x2f5   :  { %9093 = vmatmul.msk.bf16.gmra.mxu0 %vm2823_vm0, %v9493_v17  ;;  %9193 = vmatmul.msk.bf16.gmra.mxu1 %vm2823_vm0, %v9593_v18 }
 0x2f6   :  { %v6714_v27 = vadd.f32 %v10939_v57, %v6510_v26  ;;  %9293 = vmatmul.msk.bf16.gmra.mxu2 %vm2823_vm0, %v9693_v24  ;;  %9393 = vmatmul.msk.bf16.gmra.mxu3 %vm2823_vm0, %v9793_v25  ;;  %v9496_v26 = vld [vmem:[%s12510_s0 + $0x190] sm:$0xff] }
 0x2f8   :  { %v6914_v28 = vmax.f32 %v6714_v27, 0.0  ;;  %v9596_v27 = vld [vmem:[%s12510_s0 + $0x4b0] sm:$0xff] }
 0x2f9   :  { %v5228_v30 = vpop.f32.mrf.mxu2  ;;  %v5728_v31 = vpop.f32.mrf.mxu3 }
 0x2fa   :  { %v7114_v32 = vpack.c.bf16 %v6914_v28, %v6914_v28  ;;  %v6311_v33 = vmax.f32 %v5228_v30, %v5728_v31  ;;  %v4230_v34 = vpop.f32.mrf.mxu0  ;;  %v4730_v35 = vpop.f32.mrf.mxu1 }
 0x2fb   :  { %v6112_v45 = vmax.f32 %v4230_v34, %v4730_v35  ;;  %v9796_v34 = vld [vmem:[%s12510_s0 + $0xaf0] sm:$0xff] }
 0x2fc   :  { %7315 = vst.msk [vmem:[%s12512_s3 + $0x134] sm:$0xf] %vm7237_vm1, %v7114_v32  ;;  %v6511_v36 = vmax.f32 %v6111_v29, %v6311_v33  ;;  %v9696_v33 = vld [vmem:[%s12510_s0 + $0x7d0] sm:$0xff] }
 0x2fe   :  { %v6715_v37 = vadd.f32 %v10939_v57, %v6511_v36 }
 0x300   :  { %v6915_v38 = vmax.f32 %v6715_v37, 0.0 }
 0x301   :  { %v5230_v39 = vpop.f32.mrf.mxu2  ;;  %v5730_v40 = vpop.f32.mrf.mxu3 }
 0x302   :  { %v7115_v44 = vpack.c.bf16 %v6915_v38, %v6915_v38  ;;  %v6312_v46 = vmax.f32 %v5230_v39, %v5730_v40  ;;  %v4233_v47 = vpop.f32.mrf.mxu0  ;;  %v4733_v48 = vpop.f32.mrf.mxu1 }
 0x303   :  { %v6113_v54 = vmax.f32 %v4233_v47, %v4733_v48 }
 0x304   :  { %7316 = vst.msk [vmem:[%s12512_s3 + $0x138] sm:$0xf] %vm7237_vm1, %v7115_v44  ;;  %v6512_v51 = vmax.f32 %v6112_v45, %v6312_v46 }
 0x305   :  { %9094 = vmatmul.msk.bf16.gmra.mxu0 %vm2823_vm0, %v9494_v41  ;;  %9194 = vmatmul.msk.bf16.gmra.mxu1 %vm2823_vm0, %v9594_v42 }
 0x306   :  { %v6716_v52 = vadd.f32 %v10939_v57, %v6512_v51  ;;  %9294 = vmatmul.msk.bf16.gmra.mxu2 %vm2823_vm0, %v9694_v49  ;;  %9394 = vmatmul.msk.bf16.gmra.mxu3 %vm2823_vm0, %v9794_v50  ;;  %v9497_v51 = vld [vmem:[%s12510_s0 + $0x198] sm:$0xff] }
 0x308   :  { %v6916_v53 = vmax.f32 %v6716_v52, 0.0  ;;  %v9597_v52 = vld [vmem:[%s12510_s0 + $0x4b8] sm:$0xff] }
 0x309   :  { %v5233_v43 = vpop.f32.mrf.mxu2  ;;  %v5733_v55 = vpop.f32.mrf.mxu3 }
 0x30a   :  { %v7116_v56 = vpack.c.bf16 %v6916_v53, %v6916_v53  ;;  %v6313_v58 = vmax.f32 %v5233_v43, %v5733_v55  ;;  %v4235_v59 = vpop.f32.mrf.mxu0  ;;  %v4735_v60 = vpop.f32.mrf.mxu1 }
 0x30b   :  { %v6114_v5 = vmax.f32 %v4235_v59, %v4735_v60  ;;  %v9797_v59 = vld [vmem:[%s12510_s0 + $0xaf8] sm:$0xff] }
 0x30c   :  { %7317 = vst.msk [vmem:[%s12512_s3 + $0x13c] sm:$0xf] %vm7237_vm1, %v7116_v56  ;;  %v6513_v61 = vmax.f32 %v6113_v54, %v6313_v58  ;;  %v9697_v58 = vld [vmem:[%s12510_s0 + $0x7d8] sm:$0xff] }
 0x30e   :  { %v6717_v62 = vadd.f32 %v10939_v57, %v6513_v61 }
 0x310   :  { %v6917_v63 = vmax.f32 %v6717_v62, 0.0 }
 0x311   :  { %v5235_v0 = vpop.f32.mrf.mxu2  ;;  %v5735_v1 = vpop.f32.mrf.mxu3 }
 0x312   :  { %v7117_v4 = vpack.c.bf16 %v6917_v63, %v6917_v63  ;;  %v6314_v6 = vmax.f32 %v5235_v0, %v5735_v1  ;;  %v4238_v7 = vpop.f32.mrf.mxu0  ;;  %v4738_v8 = vpop.f32.mrf.mxu1 }
 0x313   :  { %v6115_v14 = vmax.f32 %v4238_v7, %v4738_v8 }
 0x314   :  { %7318 = vst.msk [vmem:[%s12512_s3 + $0x140] sm:$0xf] %vm7237_vm1, %v7117_v4  ;;  %v6514_v11 = vmax.f32 %v6114_v5, %v6314_v6 }
 0x315   :  { %9095 = vmatmul.msk.bf16.gmra.mxu0 %vm2823_vm0, %v9495_v2  ;;  %9195 = vmatmul.msk.bf16.gmra.mxu1 %vm2823_vm0, %v9595_v3 }
 0x316   :  { %v6718_v12 = vadd.f32 %v10939_v57, %v6514_v11  ;;  %9295 = vmatmul.msk.bf16.gmra.mxu2 %vm2823_vm0, %v9695_v9  ;;  %9395 = vmatmul.msk.bf16.gmra.mxu3 %vm2823_vm0, %v9795_v10  ;;  %v9498_v11 = vld [vmem:[%s12510_s0 + $0x1a0] sm:$0xff] }
 0x318   :  { %v6918_v13 = vmax.f32 %v6718_v12, 0.0  ;;  %v9598_v12 = vld [vmem:[%s12510_s0 + $0x4c0] sm:$0xff] }
 0x319   :  { %v5238_v15 = vpop.f32.mrf.mxu2  ;;  %v5738_v16 = vpop.f32.mrf.mxu3 }
 0x31a   :  { %v7118_v17 = vpack.c.bf16 %v6918_v13, %v6918_v13  ;;  %v6315_v18 = vmax.f32 %v5238_v15, %v5738_v16  ;;  %v4240_v19 = vpop.f32.mrf.mxu0  ;;  %v4740_v20 = vpop.f32.mrf.mxu1 }
 0x31b   :  { %v6116_v29 = vmax.f32 %v4240_v19, %v4740_v20  ;;  %v9798_v19 = vld [vmem:[%s12510_s0 + $0xb00] sm:$0xff] }
 0x31c   :  { %7319 = vst.msk [vmem:[%s12512_s3 + $0x144] sm:$0xf] %vm7237_vm1, %v7118_v17  ;;  %v6515_v21 = vmax.f32 %v6115_v14, %v6315_v18  ;;  %v9698_v18 = vld [vmem:[%s12510_s0 + $0x7e0] sm:$0xff] }
 0x31e   :  { %v6719_v22 = vadd.f32 %v10939_v57, %v6515_v21 }
 0x320   :  { %v6919_v23 = vmax.f32 %v6719_v22, 0.0 }
 0x321   :  { %v5240_v24 = vpop.f32.mrf.mxu2  ;;  %v5740_v25 = vpop.f32.mrf.mxu3 }
 0x322   :  { %v7119_v28 = vpack.c.bf16 %v6919_v23, %v6919_v23  ;;  %v6316_v30 = vmax.f32 %v5240_v24, %v5740_v25  ;;  %v4243_v31 = vpop.f32.mrf.mxu0  ;;  %v4743_v32 = vpop.f32.mrf.mxu1 }
 0x323   :  { %v6117_v38 = vmax.f32 %v4243_v31, %v4743_v32 }
 0x324   :  { %7320 = vst.msk [vmem:[%s12512_s3 + $0x148] sm:$0xf] %vm7237_vm1, %v7119_v28  ;;  %v6516_v35 = vmax.f32 %v6116_v29, %v6316_v30 }
 0x325   :  { %9096 = vmatmul.msk.bf16.gmra.mxu0 %vm2823_vm0, %v9496_v26  ;;  %9196 = vmatmul.msk.bf16.gmra.mxu1 %vm2823_vm0, %v9596_v27 }
 0x326   :  { %v6720_v36 = vadd.f32 %v10939_v57, %v6516_v35  ;;  %9296 = vmatmul.msk.bf16.gmra.mxu2 %vm2823_vm0, %v9696_v33  ;;  %9396 = vmatmul.msk.bf16.gmra.mxu3 %vm2823_vm0, %v9796_v34  ;;  %v9499_v35 = vld [vmem:[%s12510_s0 + $0x1a8] sm:$0xff] }
 0x328   :  { %v6920_v37 = vmax.f32 %v6720_v36, 0.0  ;;  %v9599_v36 = vld [vmem:[%s12510_s0 + $0x4c8] sm:$0xff] }
 0x329   :  { %v5243_v39 = vpop.f32.mrf.mxu2  ;;  %v5743_v40 = vpop.f32.mrf.mxu3 }
 0x32a   :  { %v7120_v41 = vpack.c.bf16 %v6920_v37, %v6920_v37  ;;  %v6317_v42 = vmax.f32 %v5243_v39, %v5743_v40  ;;  %v4245_v44 = vpop.f32.mrf.mxu0  ;;  %v4745_v45 = vpop.f32.mrf.mxu1 }
 0x32b   :  { %v6118_v54 = vmax.f32 %v4245_v44, %v4745_v45  ;;  %v9799_v44 = vld [vmem:[%s12510_s0 + $0xb08] sm:$0xff] }
 0x32c   :  { %7321 = vst.msk [vmem:[%s12512_s3 + $0x14c] sm:$0xf] %vm7237_vm1, %v7120_v41  ;;  %v6517_v46 = vmax.f32 %v6117_v38, %v6317_v42  ;;  %v9699_v42 = vld [vmem:[%s12510_s0 + $0x7e8] sm:$0xff] }
 0x32e   :  { %v6721_v47 = vadd.f32 %v10939_v57, %v6517_v46 }
 0x330   :  { %v6921_v48 = vmax.f32 %v6721_v47, 0.0 }
 0x331   :  { %v5245_v49 = vpop.f32.mrf.mxu2  ;;  %v5745_v50 = vpop.f32.mrf.mxu3 }
 0x332   :  { %v7121_v53 = vpack.c.bf16 %v6921_v48, %v6921_v48  ;;  %v6318_v43 = vmax.f32 %v5245_v49, %v5745_v50  ;;  %v4248_v55 = vpop.f32.mrf.mxu0  ;;  %v4748_v56 = vpop.f32.mrf.mxu1 }
 0x333   :  { %v6119_v63 = vmax.f32 %v4248_v55, %v4748_v56 }
 0x334   :  { %7322 = vst.msk [vmem:[%s12512_s3 + $0x150] sm:$0xf] %vm7237_vm1, %v7121_v53  ;;  %v6518_v60 = vmax.f32 %v6118_v54, %v6318_v43 }
 0x335   :  { %9097 = vmatmul.msk.bf16.gmra.mxu0 %vm2823_vm0, %v9497_v51  ;;  %9197 = vmatmul.msk.bf16.gmra.mxu1 %vm2823_vm0, %v9597_v52 }
 0x336   :  { %v6722_v61 = vadd.f32 %v10939_v57, %v6518_v60  ;;  %9297 = vmatmul.msk.bf16.gmra.mxu2 %vm2823_vm0, %v9697_v58  ;;  %9397 = vmatmul.msk.bf16.gmra.mxu3 %vm2823_vm0, %v9797_v59  ;;  %v9500_v60 = vld [vmem:[%s12510_s0 + $0x1b0] sm:$0xff] }
 0x338   :  { %v6922_v62 = vmax.f32 %v6722_v61, 0.0  ;;  %v9600_v61 = vld [vmem:[%s12510_s0 + $0x4d0] sm:$0xff] }
 0x339   :  { %v5248_v0 = vpop.f32.mrf.mxu2  ;;  %v5748_v1 = vpop.f32.mrf.mxu3 }
 0x33a   :  { %v7122_v2 = vpack.c.bf16 %v6922_v62, %v6922_v62  ;;  %v6319_v3 = vmax.f32 %v5248_v0, %v5748_v1  ;;  %v4250_v4 = vpop.f32.mrf.mxu0  ;;  %v4750_v5 = vpop.f32.mrf.mxu1 }
 0x33b   :  { %v6120_v14 = vmax.f32 %v4250_v4, %v4750_v5  ;;  %v9800_v4 = vld [vmem:[%s12510_s0 + $0xb10] sm:$0xff] }
 0x33c   :  { %7323 = vst.msk [vmem:[%s12512_s3 + $0x154] sm:$0xf] %vm7237_vm1, %v7122_v2  ;;  %v6519_v6 = vmax.f32 %v6119_v63, %v6319_v3  ;;  %v9700_v3 = vld [vmem:[%s12510_s0 + $0x7f0] sm:$0xff] }
 0x33e   :  { %v6723_v7 = vadd.f32 %v10939_v57, %v6519_v6 }
 0x340   :  { %v6923_v8 = vmax.f32 %v6723_v7, 0.0 }
 0x341   :  { %v5250_v9 = vpop.f32.mrf.mxu2  ;;  %v5750_v10 = vpop.f32.mrf.mxu3 }
 0x342   :  { %v7123_v13 = vpack.c.bf16 %v6923_v8, %v6923_v8  ;;  %v6320_v15 = vmax.f32 %v5250_v9, %v5750_v10  ;;  %v4253_v16 = vpop.f32.mrf.mxu0  ;;  %v4753_v17 = vpop.f32.mrf.mxu1 }
 0x343   :  { %v6121_v23 = vmax.f32 %v4253_v16, %v4753_v17 }
 0x344   :  { %7324 = vst.msk [vmem:[%s12512_s3 + $0x158] sm:$0xf] %vm7237_vm1, %v7123_v13  ;;  %v6520_v20 = vmax.f32 %v6120_v14, %v6320_v15 }
 0x345   :  { %9098 = vmatmul.msk.bf16.gmra.mxu0 %vm2823_vm0, %v9498_v11  ;;  %9198 = vmatmul.msk.bf16.gmra.mxu1 %vm2823_vm0, %v9598_v12 }
 0x346   :  { %v6724_v21 = vadd.f32 %v10939_v57, %v6520_v20  ;;  %9298 = vmatmul.msk.bf16.gmra.mxu2 %vm2823_vm0, %v9698_v18  ;;  %9398 = vmatmul.msk.bf16.gmra.mxu3 %vm2823_vm0, %v9798_v19  ;;  %v9501_v20 = vld [vmem:[%s12510_s0 + $0x1b8] sm:$0xff] }
 0x348   :  { %v6924_v22 = vmax.f32 %v6724_v21, 0.0  ;;  %v9601_v21 = vld [vmem:[%s12510_s0 + $0x4d8] sm:$0xff] }
 0x349   :  { %v5253_v24 = vpop.f32.mrf.mxu2  ;;  %v5753_v25 = vpop.f32.mrf.mxu3 }
 0x34a   :  { %v7124_v26 = vpack.c.bf16 %v6924_v22, %v6924_v22  ;;  %v6321_v27 = vmax.f32 %v5253_v24, %v5753_v25  ;;  %v4255_v28 = vpop.f32.mrf.mxu0  ;;  %v4755_v29 = vpop.f32.mrf.mxu1 }
 0x34b   :  { %v6122_v38 = vmax.f32 %v4255_v28, %v4755_v29  ;;  %v9801_v28 = vld [vmem:[%s12510_s0 + $0xb18] sm:$0xff] }
 0x34c   :  { %7325 = vst.msk [vmem:[%s12512_s3 + $0x15c] sm:$0xf] %vm7237_vm1, %v7124_v26  ;;  %v6521_v30 = vmax.f32 %v6121_v23, %v6321_v27  ;;  %v9701_v27 = vld [vmem:[%s12510_s0 + $0x7f8] sm:$0xff] }
 0x34e   :  { %v6725_v31 = vadd.f32 %v10939_v57, %v6521_v30 }
 0x350   :  { %v6925_v32 = vmax.f32 %v6725_v31, 0.0 }
 0x351   :  { %v5255_v33 = vpop.f32.mrf.mxu2  ;;  %v5755_v34 = vpop.f32.mrf.mxu3 }
 0x352   :  { %v7125_v37 = vpack.c.bf16 %v6925_v32, %v6925_v32  ;;  %v6322_v39 = vmax.f32 %v5255_v33, %v5755_v34  ;;  %v4258_v40 = vpop.f32.mrf.mxu0  ;;  %v4758_v41 = vpop.f32.mrf.mxu1 }
 0x353   :  { %v6123_v48 = vmax.f32 %v4258_v40, %v4758_v41 }
 0x354   :  { %7326 = vst.msk [vmem:[%s12512_s3 + $0x160] sm:$0xf] %vm7237_vm1, %v7125_v37  ;;  %v6522_v45 = vmax.f32 %v6122_v38, %v6322_v39 }
 0x355   :  { %9099 = vmatmul.msk.bf16.gmra.mxu0 %vm2823_vm0, %v9499_v35  ;;  %9199 = vmatmul.msk.bf16.gmra.mxu1 %vm2823_vm0, %v9599_v36 }
 0x356   :  { %v6726_v46 = vadd.f32 %v10939_v57, %v6522_v45  ;;  %9299 = vmatmul.msk.bf16.gmra.mxu2 %vm2823_vm0, %v9699_v42  ;;  %9399 = vmatmul.msk.bf16.gmra.mxu3 %vm2823_vm0, %v9799_v44  ;;  %v9502_v45 = vld [vmem:[%s12510_s0 + $0x1c0] sm:$0xff] }
 0x358   :  { %v6926_v47 = vmax.f32 %v6726_v46, 0.0  ;;  %v9602_v46 = vld [vmem:[%s12510_s0 + $0x4e0] sm:$0xff] }
 0x359   :  { %v5258_v49 = vpop.f32.mrf.mxu2  ;;  %v5758_v50 = vpop.f32.mrf.mxu3 }
 0x35a   :  { %v7126_v51 = vpack.c.bf16 %v6926_v47, %v6926_v47  ;;  %v6323_v52 = vmax.f32 %v5258_v49, %v5758_v50  ;;  %v4260_v53 = vpop.f32.mrf.mxu0  ;;  %v4760_v54 = vpop.f32.mrf.mxu1 }
 0x35b   :  { %v6124_v63 = vmax.f32 %v4260_v53, %v4760_v54  ;;  %v9802_v53 = vld [vmem:[%s12510_s0 + $0xb20] sm:$0xff] }
 0x35c   :  { %7327 = vst.msk [vmem:[%s12512_s3 + $0x164] sm:$0xf] %vm7237_vm1, %v7126_v51  ;;  %v6523_v43 = vmax.f32 %v6123_v48, %v6323_v52  ;;  %v9702_v52 = vld [vmem:[%s12510_s0 + $0x800] sm:$0xff] }
 0x35e   :  { %v6727_v55 = vadd.f32 %v10939_v57, %v6523_v43 }
 0x360   :  { %v6927_v56 = vmax.f32 %v6727_v55, 0.0 }
 0x361   :  { %v5260_v58 = vpop.f32.mrf.mxu2  ;;  %v5760_v59 = vpop.f32.mrf.mxu3 }
 0x362   :  { %v7127_v62 = vpack.c.bf16 %v6927_v56, %v6927_v56  ;;  %v6324_v0 = vmax.f32 %v5260_v58, %v5760_v59  ;;  %v4263_v1 = vpop.f32.mrf.mxu0  ;;  %v4763_v2 = vpop.f32.mrf.mxu1 }
 0x363   :  { %v6125_v8 = vmax.f32 %v4263_v1, %v4763_v2 }
 0x364   :  { %7328 = vst.msk [vmem:[%s12512_s3 + $0x168] sm:$0xf] %vm7237_vm1, %v7127_v62  ;;  %v6524_v5 = vmax.f32 %v6124_v63, %v6324_v0 }
 0x365   :  { %9100 = vmatmul.msk.bf16.gmra.mxu0 %vm2823_vm0, %v9500_v60  ;;  %9200 = vmatmul.msk.bf16.gmra.mxu1 %vm2823_vm0, %v9600_v61 }
 0x366   :  { %v6728_v6 = vadd.f32 %v10939_v57, %v6524_v5  ;;  %9300 = vmatmul.msk.bf16.gmra.mxu2 %vm2823_vm0, %v9700_v3  ;;  %9400 = vmatmul.msk.bf16.gmra.mxu3 %vm2823_vm0, %v9800_v4  ;;  %v9503_v5 = vld [vmem:[%s12510_s0 + $0x1c8] sm:$0xff] }
 0x368   :  { %v6928_v7 = vmax.f32 %v6728_v6, 0.0  ;;  %v9603_v6 = vld [vmem:[%s12510_s0 + $0x4e8] sm:$0xff] }
 0x369   :  { %v5263_v9 = vpop.f32.mrf.mxu2  ;;  %v5763_v10 = vpop.f32.mrf.mxu3 }
 0x36a   :  { %v7128_v11 = vpack.c.bf16 %v6928_v7, %v6928_v7  ;;  %v6325_v12 = vmax.f32 %v5263_v9, %v5763_v10  ;;  %v4265_v13 = vpop.f32.mrf.mxu0  ;;  %v4765_v14 = vpop.f32.mrf.mxu1 }
 0x36b   :  { %v6126_v23 = vmax.f32 %v4265_v13, %v4765_v14  ;;  %v9803_v13 = vld [vmem:[%s12510_s0 + $0xb28] sm:$0xff] }
 0x36c   :  { %7329 = vst.msk [vmem:[%s12512_s3 + $0x16c] sm:$0xf] %vm7237_vm1, %v7128_v11  ;;  %v6525_v15 = vmax.f32 %v6125_v8, %v6325_v12  ;;  %v9703_v12 = vld [vmem:[%s12510_s0 + $0x808] sm:$0xff] }
 0x36e   :  { %v6729_v16 = vadd.f32 %v10939_v57, %v6525_v15 }
 0x370   :  { %v6929_v17 = vmax.f32 %v6729_v16, 0.0 }
 0x371   :  { %v5265_v18 = vpop.f32.mrf.mxu2  ;;  %v5765_v19 = vpop.f32.mrf.mxu3 }
 0x372   :  { %v7129_v22 = vpack.c.bf16 %v6929_v17, %v6929_v17  ;;  %v6326_v24 = vmax.f32 %v5265_v18, %v5765_v19  ;;  %v4268_v25 = vpop.f32.mrf.mxu0  ;;  %v4768_v26 = vpop.f32.mrf.mxu1 }
 0x373   :  { %v6127_v32 = vmax.f32 %v4268_v25, %v4768_v26 }
 0x374   :  { %7330 = vst.msk [vmem:[%s12512_s3 + $0x170] sm:$0xf] %vm7237_vm1, %v7129_v22  ;;  %v6526_v29 = vmax.f32 %v6126_v23, %v6326_v24 }
 0x375   :  { %9101 = vmatmul.msk.bf16.gmra.mxu0 %vm2823_vm0, %v9501_v20  ;;  %9201 = vmatmul.msk.bf16.gmra.mxu1 %vm2823_vm0, %v9601_v21 }
 0x376   :  { %v6730_v30 = vadd.f32 %v10939_v57, %v6526_v29  ;;  %9301 = vmatmul.msk.bf16.gmra.mxu2 %vm2823_vm0, %v9701_v27  ;;  %9401 = vmatmul.msk.bf16.gmra.mxu3 %vm2823_vm0, %v9801_v28  ;;  %v9504_v29 = vld [vmem:[%s12510_s0 + $0x1d0] sm:$0xff] }
 0x378   :  { %v6930_v31 = vmax.f32 %v6730_v30, 0.0  ;;  %v9604_v30 = vld [vmem:[%s12510_s0 + $0x4f0] sm:$0xff] }
 0x379   :  { %v5268_v33 = vpop.f32.mrf.mxu2  ;;  %v5768_v34 = vpop.f32.mrf.mxu3 }
 0x37a   :  { %v7130_v35 = vpack.c.bf16 %v6930_v31, %v6930_v31  ;;  %v6327_v36 = vmax.f32 %v5268_v33, %v5768_v34  ;;  %v4270_v37 = vpop.f32.mrf.mxu0  ;;  %v4770_v38 = vpop.f32.mrf.mxu1 }
 0x37b   :  { %v6128_v48 = vmax.f32 %v4270_v37, %v4770_v38  ;;  %v9804_v37 = vld [vmem:[%s12510_s0 + $0xb30] sm:$0xff] }
 0x37c   :  { %7331 = vst.msk [vmem:[%s12512_s3 + $0x174] sm:$0xf] %vm7237_vm1, %v7130_v35  ;;  %v6527_v39 = vmax.f32 %v6127_v32, %v6327_v36  ;;  %v9704_v36 = vld [vmem:[%s12510_s0 + $0x810] sm:$0xff] }
 0x37e   :  { %v6731_v40 = vadd.f32 %v10939_v57, %v6527_v39 }
 0x380   :  { %v6931_v41 = vmax.f32 %v6731_v40, 0.0 }
 0x381   :  { %v5270_v42 = vpop.f32.mrf.mxu2  ;;  %v5770_v44 = vpop.f32.mrf.mxu3 }
 0x382   :  { %v7131_v47 = vpack.c.bf16 %v6931_v41, %v6931_v41  ;;  %v6328_v49 = vmax.f32 %v5270_v42, %v5770_v44  ;;  %v4273_v50 = vpop.f32.mrf.mxu0  ;;  %v4773_v51 = vpop.f32.mrf.mxu1 }
 0x383   :  { %v6129_v56 = vmax.f32 %v4273_v50, %v4773_v51 }
 0x384   :  { %7332 = vst.msk [vmem:[%s12512_s3 + $0x178] sm:$0xf] %vm7237_vm1, %v7131_v47  ;;  %v6528_v54 = vmax.f32 %v6128_v48, %v6328_v49 }
 0x385   :  { %9102 = vmatmul.msk.bf16.gmra.mxu0 %vm2823_vm0, %v9502_v45  ;;  %9202 = vmatmul.msk.bf16.gmra.mxu1 %vm2823_vm0, %v9602_v46 }
 0x386   :  { %v6732_v43 = vadd.f32 %v10939_v57, %v6528_v54  ;;  %9302 = vmatmul.msk.bf16.gmra.mxu2 %vm2823_vm0, %v9702_v52  ;;  %9402 = vmatmul.msk.bf16.gmra.mxu3 %vm2823_vm0, %v9802_v53  ;;  %v9505_v54 = vld [vmem:[%s12510_s0 + $0x1d8] sm:$0xff] }
 0x388   :  { %v6932_v55 = vmax.f32 %v6732_v43, 0.0  ;;  %v9605_v43 = vld [vmem:[%s12510_s0 + $0x4f8] sm:$0xff] }
 0x389   :  { %v5273_v58 = vpop.f32.mrf.mxu2  ;;  %v5773_v59 = vpop.f32.mrf.mxu3 }
 0x38a   :  { %v7132_v60 = vpack.c.bf16 %v6932_v55, %v6932_v55  ;;  %v6329_v61 = vmax.f32 %v5273_v58, %v5773_v59  ;;  %v4275_v62 = vpop.f32.mrf.mxu0  ;;  %v4775_v63 = vpop.f32.mrf.mxu1 }
 0x38b   :  { %v6130_v8 = vmax.f32 %v4275_v62, %v4775_v63  ;;  %v9805_v62 = vld [vmem:[%s12510_s0 + $0xb38] sm:$0xff] }
 0x38c   :  { %7333 = vst.msk [vmem:[%s12512_s3 + $0x17c] sm:$0xf] %vm7237_vm1, %v7132_v60  ;;  %v6529_v0 = vmax.f32 %v6129_v56, %v6329_v61  ;;  %v9705_v61 = vld [vmem:[%s12510_s0 + $0x818] sm:$0xff] }
 0x38e   :  { %v6733_v1 = vadd.f32 %v10939_v57, %v6529_v0 }
 0x390   :  { %v6933_v2 = vmax.f32 %v6733_v1, 0.0 }
 0x391   :  { %v5275_v3 = vpop.f32.mrf.mxu2  ;;  %v5775_v4 = vpop.f32.mrf.mxu3 }
 0x392   :  { %v7133_v7 = vpack.c.bf16 %v6933_v2, %v6933_v2  ;;  %v6330_v9 = vmax.f32 %v5275_v3, %v5775_v4  ;;  %v4278_v10 = vpop.f32.mrf.mxu0  ;;  %v4778_v11 = vpop.f32.mrf.mxu1 }
 0x393   :  { %v6131_v17 = vmax.f32 %v4278_v10, %v4778_v11 }
 0x394   :  { %7334 = vst.msk [vmem:[%s12512_s3 + $0x180] sm:$0xf] %vm7237_vm1, %v7133_v7  ;;  %v6530_v14 = vmax.f32 %v6130_v8, %v6330_v9 }
 0x395   :  { %9103 = vmatmul.msk.bf16.gmra.mxu0 %vm2823_vm0, %v9503_v5  ;;  %9203 = vmatmul.msk.bf16.gmra.mxu1 %vm2823_vm0, %v9603_v6 }
 0x396   :  { %v6734_v15 = vadd.f32 %v10939_v57, %v6530_v14  ;;  %9303 = vmatmul.msk.bf16.gmra.mxu2 %vm2823_vm0, %v9703_v12  ;;  %9403 = vmatmul.msk.bf16.gmra.mxu3 %vm2823_vm0, %v9803_v13  ;;  %v9506_v14 = vld [vmem:[%s12510_s0 + $0x1e0] sm:$0xff] }
 0x398   :  { %v6934_v16 = vmax.f32 %v6734_v15, 0.0  ;;  %v9606_v15 = vld [vmem:[%s12510_s0 + $0x500] sm:$0xff] }
 0x399   :  { %v5278_v18 = vpop.f32.mrf.mxu2  ;;  %v5778_v19 = vpop.f32.mrf.mxu3 }
 0x39a   :  { %v7134_v20 = vpack.c.bf16 %v6934_v16, %v6934_v16  ;;  %v6331_v21 = vmax.f32 %v5278_v18, %v5778_v19  ;;  %v4280_v22 = vpop.f32.mrf.mxu0  ;;  %v4780_v23 = vpop.f32.mrf.mxu1 }
 0x39b   :  { %v6132_v32 = vmax.f32 %v4280_v22, %v4780_v23  ;;  %v9806_v22 = vld [vmem:[%s12510_s0 + $0xb40] sm:$0xff] }
 0x39c   :  { %7335 = vst.msk [vmem:[%s12512_s3 + $0x184] sm:$0xf] %vm7237_vm1, %v7134_v20  ;;  %v6531_v24 = vmax.f32 %v6131_v17, %v6331_v21  ;;  %v9706_v21 = vld [vmem:[%s12510_s0 + $0x820] sm:$0xff] }
 0x39e   :  { %v6735_v25 = vadd.f32 %v10939_v57, %v6531_v24 }
 0x3a0   :  { %v6935_v26 = vmax.f32 %v6735_v25, 0.0 }
 0x3a1   :  { %v5280_v27 = vpop.f32.mrf.mxu2  ;;  %v5780_v28 = vpop.f32.mrf.mxu3 }
 0x3a2   :  { %v7135_v31 = vpack.c.bf16 %v6935_v26, %v6935_v26  ;;  %v6332_v33 = vmax.f32 %v5280_v27, %v5780_v28  ;;  %v4283_v34 = vpop.f32.mrf.mxu0  ;;  %v4783_v35 = vpop.f32.mrf.mxu1 }
 0x3a3   :  { %v6133_v41 = vmax.f32 %v4283_v34, %v4783_v35 }
 0x3a4   :  { %7336 = vst.msk [vmem:[%s12512_s3 + $0x188] sm:$0xf] %vm7237_vm1, %v7135_v31  ;;  %v6532_v38 = vmax.f32 %v6132_v32, %v6332_v33 }
 0x3a5   :  { %9104 = vmatmul.msk.bf16.gmra.mxu0 %vm2823_vm0, %v9504_v29  ;;  %9204 = vmatmul.msk.bf16.gmra.mxu1 %vm2823_vm0, %v9604_v30 }
 0x3a6   :  { %v6736_v39 = vadd.f32 %v10939_v57, %v6532_v38  ;;  %9304 = vmatmul.msk.bf16.gmra.mxu2 %vm2823_vm0, %v9704_v36  ;;  %9404 = vmatmul.msk.bf16.gmra.mxu3 %vm2823_vm0, %v9804_v37  ;;  %v9507_v38 = vld [vmem:[%s12510_s0 + $0x1e8] sm:$0xff] }
 0x3a8   :  { %v6936_v40 = vmax.f32 %v6736_v39, 0.0  ;;  %v9607_v39 = vld [vmem:[%s12510_s0 + $0x508] sm:$0xff] }
 0x3a9   :  { %v5283_v42 = vpop.f32.mrf.mxu2  ;;  %v5783_v44 = vpop.f32.mrf.mxu3 }
 0x3aa   :  { %v7136_v45 = vpack.c.bf16 %v6936_v40, %v6936_v40  ;;  %v6333_v46 = vmax.f32 %v5283_v42, %v5783_v44  ;;  %v4285_v47 = vpop.f32.mrf.mxu0  ;;  %v4785_v48 = vpop.f32.mrf.mxu1 }
 0x3ab   :  { %v6134_v56 = vmax.f32 %v4285_v47, %v4785_v48  ;;  %v9807_v47 = vld [vmem:[%s12510_s0 + $0xb48] sm:$0xff] }
 0x3ac   :  { %7337 = vst.msk [vmem:[%s12512_s3 + $0x18c] sm:$0xf] %vm7237_vm1, %v7136_v45  ;;  %v6533_v49 = vmax.f32 %v6133_v41, %v6333_v46  ;;  %v9707_v46 = vld [vmem:[%s12510_s0 + $0x828] sm:$0xff] }
 0x3ae   :  { %v6737_v50 = vadd.f32 %v10939_v57, %v6533_v49 }
 0x3b0   :  { %v6937_v51 = vmax.f32 %v6737_v50, 0.0 }
 0x3b1   :  { %v5285_v52 = vpop.f32.mrf.mxu2  ;;  %v5785_v53 = vpop.f32.mrf.mxu3 }
 0x3b2   :  { %v7137_v55 = vpack.c.bf16 %v6937_v51, %v6937_v51  ;;  %v6334_v58 = vmax.f32 %v5285_v52, %v5785_v53  ;;  %v4288_v59 = vpop.f32.mrf.mxu0  ;;  %v4788_v60 = vpop.f32.mrf.mxu1 }
 0x3b3   :  { %v6135_v2 = vmax.f32 %v4288_v59, %v4788_v60 }
 0x3b4   :  { %7338 = vst.msk [vmem:[%s12512_s3 + $0x190] sm:$0xf] %vm7237_vm1, %v7137_v55  ;;  %v6534_v63 = vmax.f32 %v6134_v56, %v6334_v58 }
 0x3b5   :  { %9105 = vmatmul.msk.bf16.gmra.mxu0 %vm2823_vm0, %v9505_v54  ;;  %9205 = vmatmul.msk.bf16.gmra.mxu1 %vm2823_vm0, %v9605_v43 }
 0x3b6   :  { %v6738_v0 = vadd.f32 %v10939_v57, %v6534_v63  ;;  %9305 = vmatmul.msk.bf16.gmra.mxu2 %vm2823_vm0, %v9705_v61  ;;  %9405 = vmatmul.msk.bf16.gmra.mxu3 %vm2823_vm0, %v9805_v62  ;;  %v9508_v63 = vld [vmem:[%s12510_s0 + $0x1f0] sm:$0xff] }
 0x3b8   :  { %v6938_v1 = vmax.f32 %v6738_v0, 0.0  ;;  %v9608_v0 = vld [vmem:[%s12510_s0 + $0x510] sm:$0xff] }
 0x3b9   :  { %v5288_v3 = vpop.f32.mrf.mxu2  ;;  %v5788_v4 = vpop.f32.mrf.mxu3 }
 0x3ba   :  { %v7138_v5 = vpack.c.bf16 %v6938_v1, %v6938_v1  ;;  %v6335_v6 = vmax.f32 %v5288_v3, %v5788_v4  ;;  %v4290_v7 = vpop.f32.mrf.mxu0  ;;  %v4790_v8 = vpop.f32.mrf.mxu1 }
 0x3bb   :  { %v6136_v17 = vmax.f32 %v4290_v7, %v4790_v8  ;;  %v9808_v7 = vld [vmem:[%s12510_s0 + $0xb50] sm:$0xff] }
 0x3bc   :  { %7339 = vst.msk [vmem:[%s12512_s3 + $0x194] sm:$0xf] %vm7237_vm1, %v7138_v5  ;;  %v6535_v9 = vmax.f32 %v6135_v2, %v6335_v6  ;;  %v9708_v6 = vld [vmem:[%s12510_s0 + $0x830] sm:$0xff] }
 0x3be   :  { %v6739_v10 = vadd.f32 %v10939_v57, %v6535_v9 }
 0x3c0   :  { %v6939_v11 = vmax.f32 %v6739_v10, 0.0 }
 0x3c1   :  { %v5290_v12 = vpop.f32.mrf.mxu2  ;;  %v5790_v13 = vpop.f32.mrf.mxu3 }
 0x3c2   :  { %v7139_v16 = vpack.c.bf16 %v6939_v11, %v6939_v11  ;;  %v6336_v18 = vmax.f32 %v5290_v12, %v5790_v13  ;;  %v4293_v19 = vpop.f32.mrf.mxu0  ;;  %v4793_v20 = vpop.f32.mrf.mxu1 }
 0x3c3   :  { %v6137_v26 = vmax.f32 %v4293_v19, %v4793_v20 }
 0x3c4   :  { %7340 = vst.msk [vmem:[%s12512_s3 + $0x198] sm:$0xf] %vm7237_vm1, %v7139_v16  ;;  %v6536_v23 = vmax.f32 %v6136_v17, %v6336_v18 }
 0x3c5   :  { %9106 = vmatmul.msk.bf16.gmra.mxu0 %vm2823_vm0, %v9506_v14  ;;  %9206 = vmatmul.msk.bf16.gmra.mxu1 %vm2823_vm0, %v9606_v15 }
 0x3c6   :  { %v6740_v24 = vadd.f32 %v10939_v57, %v6536_v23  ;;  %9306 = vmatmul.msk.bf16.gmra.mxu2 %vm2823_vm0, %v9706_v21  ;;  %9406 = vmatmul.msk.bf16.gmra.mxu3 %vm2823_vm0, %v9806_v22  ;;  %v11393_v57 = vld [vmem:[%s12511_s2] ss:$0 sm:$0xff]  ;;  %v9509_v23 = vld [vmem:[%s12510_s0 + $0x1f8] sm:$0xff] }
 0x3c8   :  { %v6940_v25 = vmax.f32 %v6740_v24, 0.0  ;;  %v9609_v24 = vld [vmem:[%s12510_s0 + $0x518] sm:$0xff] }
 0x3c9   :  { %v5293_v27 = vpop.f32.mrf.mxu2  ;;  %v5793_v28 = vpop.f32.mrf.mxu3 }
 0x3ca   :  { %v7140_v29 = vpack.c.bf16 %v6940_v25, %v6940_v25  ;;  %v6337_v30 = vmax.f32 %v5293_v27, %v5793_v28  ;;  %v4295_v31 = vpop.f32.mrf.mxu0  ;;  %v4795_v32 = vpop.f32.mrf.mxu1 }
 0x3cb   :  { %v6138_v41 = vmax.f32 %v4295_v31, %v4795_v32  ;;  %v9809_v31 = vld [vmem:[%s12510_s0 + $0xb58] sm:$0xff] }
 0x3cc   :  { %7341 = vst.msk [vmem:[%s12512_s3 + $0x19c] sm:$0xf] %vm7237_vm1, %v7140_v29  ;;  %v6537_v33 = vmax.f32 %v6137_v26, %v6337_v30  ;;  %v9709_v30 = vld [vmem:[%s12510_s0 + $0x838] sm:$0xff] }
 0x3ce   :  { %v6741_v34 = vadd.f32 %v11393_v57, %v6537_v33 }
 0x3d0   :  { %v6941_v35 = vmax.f32 %v6741_v34, 0.0 }
 0x3d1   :  { %v5295_v36 = vpop.f32.mrf.mxu2  ;;  %v5795_v37 = vpop.f32.mrf.mxu3 }
 0x3d2   :  { %v7141_v40 = vpack.c.bf16 %v6941_v35, %v6941_v35  ;;  %v6338_v42 = vmax.f32 %v5295_v36, %v5795_v37  ;;  %v4298_v44 = vpop.f32.mrf.mxu0  ;;  %v4798_v45 = vpop.f32.mrf.mxu1 }
 0x3d3   :  { %v6139_v51 = vmax.f32 %v4298_v44, %v4798_v45 }
 0x3d4   :  { %7342 = vst.msk [vmem:[%s12512_s3 + $0x1a0] sm:$0xf] %vm7237_vm1, %v7141_v40  ;;  %v6538_v48 = vmax.f32 %v6138_v41, %v6338_v42 }
 0x3d5   :  { %9107 = vmatmul.msk.bf16.gmra.mxu0 %vm2823_vm0, %v9507_v38  ;;  %9207 = vmatmul.msk.bf16.gmra.mxu1 %vm2823_vm0, %v9607_v39 }
 0x3d6   :  { %v6742_v49 = vadd.f32 %v11393_v57, %v6538_v48  ;;  %9307 = vmatmul.msk.bf16.gmra.mxu2 %vm2823_vm0, %v9707_v46  ;;  %9407 = vmatmul.msk.bf16.gmra.mxu3 %vm2823_vm0, %v9807_v47  ;;  %v9510_v48 = vld [vmem:[%s12510_s0 + $0x200] sm:$0xff] }
 0x3d8   :  { %v6942_v50 = vmax.f32 %v6742_v49, 0.0  ;;  %v9610_v49 = vld [vmem:[%s12510_s0 + $0x520] sm:$0xff] }
 0x3d9   :  { %v5298_v52 = vpop.f32.mrf.mxu2  ;;  %v5798_v53 = vpop.f32.mrf.mxu3 }
 0x3da   :  { %v7142_v54 = vpack.c.bf16 %v6942_v50, %v6942_v50  ;;  %v6339_v43 = vmax.f32 %v5298_v52, %v5798_v53  ;;  %v4300_v55 = vpop.f32.mrf.mxu0  ;;  %v4800_v56 = vpop.f32.mrf.mxu1 }
 0x3db   :  { %v6140_v2 = vmax.f32 %v4300_v55, %v4800_v56  ;;  %v9810_v55 = vld [vmem:[%s12510_s0 + $0xb60] sm:$0xff] }
 0x3dc   :  { %7343 = vst.msk [vmem:[%s12512_s3 + $0x1a4] sm:$0xf] %vm7237_vm1, %v7142_v54  ;;  %v6539_v58 = vmax.f32 %v6139_v51, %v6339_v43  ;;  %v9710_v43 = vld [vmem:[%s12510_s0 + $0x840] sm:$0xff] }
 0x3de   :  { %v6743_v59 = vadd.f32 %v11393_v57, %v6539_v58 }
 0x3e0   :  { %v6943_v60 = vmax.f32 %v6743_v59, 0.0 }
 0x3e1   :  { %v5300_v61 = vpop.f32.mrf.mxu2  ;;  %v5800_v62 = vpop.f32.mrf.mxu3 }
 0x3e2   :  { %v7143_v1 = vpack.c.bf16 %v6943_v60, %v6943_v60  ;;  %v6340_v3 = vmax.f32 %v5300_v61, %v5800_v62  ;;  %v4303_v4 = vpop.f32.mrf.mxu0  ;;  %v4803_v5 = vpop.f32.mrf.mxu1 }
 0x3e3   :  { %v6141_v11 = vmax.f32 %v4303_v4, %v4803_v5 }
 0x3e4   :  { %7344 = vst.msk [vmem:[%s12512_s3 + $0x1a8] sm:$0xf] %vm7237_vm1, %v7143_v1  ;;  %v6540_v8 = vmax.f32 %v6140_v2, %v6340_v3 }
 0x3e5   :  { %9108 = vmatmul.msk.bf16.gmra.mxu0 %vm2823_vm0, %v9508_v63  ;;  %9208 = vmatmul.msk.bf16.gmra.mxu1 %vm2823_vm0, %v9608_v0 }
 0x3e6   :  { %v6744_v9 = vadd.f32 %v11393_v57, %v6540_v8  ;;  %9308 = vmatmul.msk.bf16.gmra.mxu2 %vm2823_vm0, %v9708_v6  ;;  %9408 = vmatmul.msk.bf16.gmra.mxu3 %vm2823_vm0, %v9808_v7  ;;  %v9511_v8 = vld [vmem:[%s12510_s0 + $0x208] sm:$0xff] }
 0x3e8   :  { %v6944_v10 = vmax.f32 %v6744_v9, 0.0  ;;  %v9611_v9 = vld [vmem:[%s12510_s0 + $0x528] sm:$0xff] }
 0x3e9   :  { %v5303_v12 = vpop.f32.mrf.mxu2  ;;  %v5803_v13 = vpop.f32.mrf.mxu3 }
 0x3ea   :  { %v7144_v14 = vpack.c.bf16 %v6944_v10, %v6944_v10  ;;  %v6341_v15 = vmax.f32 %v5303_v12, %v5803_v13  ;;  %v4305_v16 = vpop.f32.mrf.mxu0  ;;  %v4805_v17 = vpop.f32.mrf.mxu1 }
 0x3eb   :  { %v6142_v26 = vmax.f32 %v4305_v16, %v4805_v17  ;;  %v9811_v16 = vld [vmem:[%s12510_s0 + $0xb68] sm:$0xff] }
 0x3ec   :  { %7345 = vst.msk [vmem:[%s12512_s3 + $0x1ac] sm:$0xf] %vm7237_vm1, %v7144_v14  ;;  %v6541_v18 = vmax.f32 %v6141_v11, %v6341_v15  ;;  %v9711_v15 = vld [vmem:[%s12510_s0 + $0x848] sm:$0xff] }
 0x3ee   :  { %v6745_v19 = vadd.f32 %v11393_v57, %v6541_v18 }
 0x3f0   :  { %v6945_v20 = vmax.f32 %v6745_v19, 0.0 }
 0x3f1   :  { %v5305_v21 = vpop.f32.mrf.mxu2  ;;  %v5805_v22 = vpop.f32.mrf.mxu3 }
 0x3f2   :  { %v7145_v25 = vpack.c.bf16 %v6945_v20, %v6945_v20  ;;  %v6342_v27 = vmax.f32 %v5305_v21, %v5805_v22  ;;  %v4308_v28 = vpop.f32.mrf.mxu0  ;;  %v4808_v29 = vpop.f32.mrf.mxu1 }
 0x3f3   :  { %v6143_v35 = vmax.f32 %v4308_v28, %v4808_v29 }
 0x3f4   :  { %7346 = vst.msk [vmem:[%s12512_s3 + $0x1b0] sm:$0xf] %vm7237_vm1, %v7145_v25  ;;  %v6542_v32 = vmax.f32 %v6142_v26, %v6342_v27 }
 0x3f5   :  { %9109 = vmatmul.msk.bf16.gmra.mxu0 %vm2823_vm0, %v9509_v23  ;;  %9209 = vmatmul.msk.bf16.gmra.mxu1 %vm2823_vm0, %v9609_v24 }
 0x3f6   :  { %v6746_v33 = vadd.f32 %v11393_v57, %v6542_v32  ;;  %9309 = vmatmul.msk.bf16.gmra.mxu2 %vm2823_vm0, %v9709_v30  ;;  %9409 = vmatmul.msk.bf16.gmra.mxu3 %vm2823_vm0, %v9809_v31  ;;  %v9512_v32 = vld [vmem:[%s12510_s0 + $0x210] sm:$0xff] }
 0x3f8   :  { %v6946_v34 = vmax.f32 %v6746_v33, 0.0  ;;  %v9612_v33 = vld [vmem:[%s12510_s0 + $0x530] sm:$0xff] }
 0x3f9   :  { %v5308_v36 = vpop.f32.mrf.mxu2  ;;  %v5808_v37 = vpop.f32.mrf.mxu3 }
 0x3fa   :  { %v7146_v38 = vpack.c.bf16 %v6946_v34, %v6946_v34  ;;  %v6343_v39 = vmax.f32 %v5308_v36, %v5808_v37  ;;  %v4310_v40 = vpop.f32.mrf.mxu0  ;;  %v4810_v41 = vpop.f32.mrf.mxu1 }
 0x3fb   :  { %v6144_v51 = vmax.f32 %v4310_v40, %v4810_v41  ;;  %v9812_v40 = vld [vmem:[%s12510_s0 + $0xb70] sm:$0xff] }
 0x3fc   :  { %7347 = vst.msk [vmem:[%s12512_s3 + $0x1b4] sm:$0xf] %vm7237_vm1, %v7146_v38  ;;  %v6543_v42 = vmax.f32 %v6143_v35, %v6343_v39  ;;  %v9712_v39 = vld [vmem:[%s12510_s0 + $0x850] sm:$0xff] }
 0x3fe   :  { %v6747_v44 = vadd.f32 %v11393_v57, %v6543_v42 }
 0x400   :  { %v6947_v45 = vmax.f32 %v6747_v44, 0.0 }
 0x401   :  { %v5310_v46 = vpop.f32.mrf.mxu2  ;;  %v5810_v47 = vpop.f32.mrf.mxu3 }
 0x402   :  { %v7147_v50 = vpack.c.bf16 %v6947_v45, %v6947_v45  ;;  %v6344_v52 = vmax.f32 %v5310_v46, %v5810_v47  ;;  %v4313_v53 = vpop.f32.mrf.mxu0  ;;  %v4813_v54 = vpop.f32.mrf.mxu1 }
 0x403   :  { %v6145_v60 = vmax.f32 %v4313_v53, %v4813_v54 }
 0x404   :  { %7348 = vst.msk [vmem:[%s12512_s3 + $0x1b8] sm:$0xf] %vm7237_vm1, %v7147_v50  ;;  %v6544_v56 = vmax.f32 %v6144_v51, %v6344_v52 }
 0x405   :  { %9110 = vmatmul.msk.bf16.gmra.mxu0 %vm2823_vm0, %v9510_v48  ;;  %9210 = vmatmul.msk.bf16.gmra.mxu1 %vm2823_vm0, %v9610_v49 }
 0x406   :  { %v6748_v58 = vadd.f32 %v11393_v57, %v6544_v56  ;;  %9310 = vmatmul.msk.bf16.gmra.mxu2 %vm2823_vm0, %v9710_v43  ;;  %9410 = vmatmul.msk.bf16.gmra.mxu3 %vm2823_vm0, %v9810_v55  ;;  %v9513_v56 = vld [vmem:[%s12510_s0 + $0x218] sm:$0xff] }
 0x408   :  { %v6948_v59 = vmax.f32 %v6748_v58, 0.0  ;;  %v9613_v58 = vld [vmem:[%s12510_s0 + $0x538] sm:$0xff] }
 0x409   :  { %v5313_v61 = vpop.f32.mrf.mxu2  ;;  %v5813_v62 = vpop.f32.mrf.mxu3 }
 0x40a   :  { %v7148_v63 = vpack.c.bf16 %v6948_v59, %v6948_v59  ;;  %v6345_v0 = vmax.f32 %v5313_v61, %v5813_v62  ;;  %v4315_v1 = vpop.f32.mrf.mxu0  ;;  %v4815_v2 = vpop.f32.mrf.mxu1 }
 0x40b   :  { %v6146_v11 = vmax.f32 %v4315_v1, %v4815_v2  ;;  %v9813_v1 = vld [vmem:[%s12510_s0 + $0xb78] sm:$0xff] }
 0x40c   :  { %7349 = vst.msk [vmem:[%s12512_s3 + $0x1bc] sm:$0xf] %vm7237_vm1, %v7148_v63  ;;  %v6545_v3 = vmax.f32 %v6145_v60, %v6345_v0  ;;  %v9713_v0 = vld [vmem:[%s12510_s0 + $0x858] sm:$0xff] }
 0x40e   :  { %v6749_v4 = vadd.f32 %v11393_v57, %v6545_v3 }
 0x410   :  { %v6949_v5 = vmax.f32 %v6749_v4, 0.0 }
 0x411   :  { %v5315_v6 = vpop.f32.mrf.mxu2  ;;  %v5815_v7 = vpop.f32.mrf.mxu3 }
 0x412   :  { %v7149_v10 = vpack.c.bf16 %v6949_v5, %v6949_v5  ;;  %v6346_v12 = vmax.f32 %v5315_v6, %v5815_v7  ;;  %v4318_v13 = vpop.f32.mrf.mxu0  ;;  %v4818_v14 = vpop.f32.mrf.mxu1 }
 0x413   :  { %v6147_v20 = vmax.f32 %v4318_v13, %v4818_v14 }
 0x414   :  { %7350 = vst.msk [vmem:[%s12512_s3 + $0x1c0] sm:$0xf] %vm7237_vm1, %v7149_v10  ;;  %v6546_v17 = vmax.f32 %v6146_v11, %v6346_v12 }
 0x415   :  { %9111 = vmatmul.msk.bf16.gmra.mxu0 %vm2823_vm0, %v9511_v8  ;;  %9211 = vmatmul.msk.bf16.gmra.mxu1 %vm2823_vm0, %v9611_v9 }
 0x416   :  { %v6750_v18 = vadd.f32 %v11393_v57, %v6546_v17  ;;  %9311 = vmatmul.msk.bf16.gmra.mxu2 %vm2823_vm0, %v9711_v15  ;;  %9411 = vmatmul.msk.bf16.gmra.mxu3 %vm2823_vm0, %v9811_v16  ;;  %v9514_v17 = vld [vmem:[%s12510_s0 + $0x220] sm:$0xff] }
 0x418   :  { %v6950_v19 = vmax.f32 %v6750_v18, 0.0  ;;  %v9614_v18 = vld [vmem:[%s12510_s0 + $0x540] sm:$0xff] }
 0x419   :  { %v5318_v21 = vpop.f32.mrf.mxu2  ;;  %v5818_v22 = vpop.f32.mrf.mxu3 }
 0x41a   :  { %v7150_v23 = vpack.c.bf16 %v6950_v19, %v6950_v19  ;;  %v6347_v24 = vmax.f32 %v5318_v21, %v5818_v22  ;;  %v4320_v25 = vpop.f32.mrf.mxu0  ;;  %v4820_v26 = vpop.f32.mrf.mxu1 }
 0x41b   :  { %v6148_v35 = vmax.f32 %v4320_v25, %v4820_v26  ;;  %v9814_v25 = vld [vmem:[%s12510_s0 + $0xb80] sm:$0xff] }
 0x41c   :  { %7351 = vst.msk [vmem:[%s12512_s3 + $0x1c4] sm:$0xf] %vm7237_vm1, %v7150_v23  ;;  %v6547_v27 = vmax.f32 %v6147_v20, %v6347_v24  ;;  %v9714_v24 = vld [vmem:[%s12510_s0 + $0x860] sm:$0xff] }
 0x41e   :  { %v6751_v28 = vadd.f32 %v11393_v57, %v6547_v27 }
 0x420   :  { %v6951_v29 = vmax.f32 %v6751_v28, 0.0 }
 0x421   :  { %v5320_v30 = vpop.f32.mrf.mxu2  ;;  %v5820_v31 = vpop.f32.mrf.mxu3 }
 0x422   :  { %v7151_v34 = vpack.c.bf16 %v6951_v29, %v6951_v29  ;;  %v6348_v36 = vmax.f32 %v5320_v30, %v5820_v31  ;;  %v4323_v37 = vpop.f32.mrf.mxu0  ;;  %v4823_v38 = vpop.f32.mrf.mxu1 }
 0x423   :  { %v6149_v45 = vmax.f32 %v4323_v37, %v4823_v38 }
 0x424   :  { %7352 = vst.msk [vmem:[%s12512_s3 + $0x1c8] sm:$0xf] %vm7237_vm1, %v7151_v34  ;;  %v6548_v41 = vmax.f32 %v6148_v35, %v6348_v36 }
 0x425   :  { %9112 = vmatmul.msk.bf16.gmra.mxu0 %vm2823_vm0, %v9512_v32  ;;  %9212 = vmatmul.msk.bf16.gmra.mxu1 %vm2823_vm0, %v9612_v33 }
 0x426   :  { %v6752_v42 = vadd.f32 %v11393_v57, %v6548_v41  ;;  %9312 = vmatmul.msk.bf16.gmra.mxu2 %vm2823_vm0, %v9712_v39  ;;  %9412 = vmatmul.msk.bf16.gmra.mxu3 %vm2823_vm0, %v9812_v40  ;;  %v9515_v41 = vld [vmem:[%s12510_s0 + $0x228] sm:$0xff] }
 0x428   :  { %v6952_v44 = vmax.f32 %v6752_v42, 0.0  ;;  %v9615_v42 = vld [vmem:[%s12510_s0 + $0x548] sm:$0xff] }
 0x429   :  { %v5323_v46 = vpop.f32.mrf.mxu2  ;;  %v5823_v47 = vpop.f32.mrf.mxu3 }
 0x42a   :  { %v7152_v48 = vpack.c.bf16 %v6952_v44, %v6952_v44  ;;  %v6349_v49 = vmax.f32 %v5323_v46, %v5823_v47  ;;  %v4325_v50 = vpop.f32.mrf.mxu0  ;;  %v4825_v51 = vpop.f32.mrf.mxu1 }
 0x42b   :  { %v6150_v60 = vmax.f32 %v4325_v50, %v4825_v51  ;;  %v9815_v50 = vld [vmem:[%s12510_s0 + $0xb88] sm:$0xff] }
 0x42c   :  { %7353 = vst.msk [vmem:[%s12512_s3 + $0x1cc] sm:$0xf] %vm7237_vm1, %v7152_v48  ;;  %v6549_v52 = vmax.f32 %v6149_v45, %v6349_v49  ;;  %v9715_v49 = vld [vmem:[%s12510_s0 + $0x868] sm:$0xff] }
 0x42e   :  { %v6753_v53 = vadd.f32 %v11393_v57, %v6549_v52 }
 0x430   :  { %v6953_v54 = vmax.f32 %v6753_v53, 0.0 }
 0x431   :  { %v5325_v43 = vpop.f32.mrf.mxu2  ;;  %v5825_v55 = vpop.f32.mrf.mxu3 }
 0x432   :  { %v7153_v59 = vpack.c.bf16 %v6953_v54, %v6953_v54  ;;  %v6350_v61 = vmax.f32 %v5325_v43, %v5825_v55  ;;  %v4328_v62 = vpop.f32.mrf.mxu0  ;;  %v4828_v63 = vpop.f32.mrf.mxu1 }
 0x433   :  { %v6151_v5 = vmax.f32 %v4328_v62, %v4828_v63 }
 0x434   :  { %7354 = vst.msk [vmem:[%s12512_s3 + $0x1d0] sm:$0xf] %vm7237_vm1, %v7153_v59  ;;  %v6550_v2 = vmax.f32 %v6150_v60, %v6350_v61 }
 0x435   :  { %9113 = vmatmul.msk.bf16.gmra.mxu0 %vm2823_vm0, %v9513_v56  ;;  %9213 = vmatmul.msk.bf16.gmra.mxu1 %vm2823_vm0, %v9613_v58 }
 0x436   :  { %v6754_v3 = vadd.f32 %v11393_v57, %v6550_v2  ;;  %9313 = vmatmul.msk.bf16.gmra.mxu2 %vm2823_vm0, %v9713_v0  ;;  %9413 = vmatmul.msk.bf16.gmra.mxu3 %vm2823_vm0, %v9813_v1  ;;  %v9516_v2 = vld [vmem:[%s12510_s0 + $0x230] sm:$0xff] }
 0x438   :  { %v6954_v4 = vmax.f32 %v6754_v3, 0.0  ;;  %v9616_v3 = vld [vmem:[%s12510_s0 + $0x550] sm:$0xff] }
 0x439   :  { %v5328_v6 = vpop.f32.mrf.mxu2  ;;  %v5828_v7 = vpop.f32.mrf.mxu3 }
 0x43a   :  { %v7154_v8 = vpack.c.bf16 %v6954_v4, %v6954_v4  ;;  %v6351_v9 = vmax.f32 %v5328_v6, %v5828_v7  ;;  %v4330_v10 = vpop.f32.mrf.mxu0  ;;  %v4830_v11 = vpop.f32.mrf.mxu1 }
 0x43b   :  { %v6152_v20 = vmax.f32 %v4330_v10, %v4830_v11  ;;  %v9816_v10 = vld [vmem:[%s12510_s0 + $0xb90] sm:$0xff] }
 0x43c   :  { %7355 = vst.msk [vmem:[%s12512_s3 + $0x1d4] sm:$0xf] %vm7237_vm1, %v7154_v8  ;;  %v6551_v12 = vmax.f32 %v6151_v5, %v6351_v9  ;;  %v9716_v9 = vld [vmem:[%s12510_s0 + $0x870] sm:$0xff] }
 0x43e   :  { %v6755_v13 = vadd.f32 %v11393_v57, %v6551_v12 }
 0x440   :  { %v6955_v14 = vmax.f32 %v6755_v13, 0.0 }
 0x441   :  { %v5330_v15 = vpop.f32.mrf.mxu2  ;;  %v5830_v16 = vpop.f32.mrf.mxu3 }
 0x442   :  { %v7155_v19 = vpack.c.bf16 %v6955_v14, %v6955_v14  ;;  %v6352_v21 = vmax.f32 %v5330_v15, %v5830_v16  ;;  %v4333_v22 = vpop.f32.mrf.mxu0  ;;  %v4833_v23 = vpop.f32.mrf.mxu1 }
 0x443   :  { %v6153_v29 = vmax.f32 %v4333_v22, %v4833_v23 }
 0x444   :  { %7356 = vst.msk [vmem:[%s12512_s3 + $0x1d8] sm:$0xf] %vm7237_vm1, %v7155_v19  ;;  %v6552_v26 = vmax.f32 %v6152_v20, %v6352_v21 }
 0x445   :  { %9114 = vmatmul.msk.bf16.gmra.mxu0 %vm2823_vm0, %v9514_v17  ;;  %9214 = vmatmul.msk.bf16.gmra.mxu1 %vm2823_vm0, %v9614_v18 }
 0x446   :  { %v6756_v27 = vadd.f32 %v11393_v57, %v6552_v26  ;;  %9314 = vmatmul.msk.bf16.gmra.mxu2 %vm2823_vm0, %v9714_v24  ;;  %9414 = vmatmul.msk.bf16.gmra.mxu3 %vm2823_vm0, %v9814_v25  ;;  %v9517_v26 = vld [vmem:[%s12510_s0 + $0x238] sm:$0xff] }
 0x448   :  { %v6956_v28 = vmax.f32 %v6756_v27, 0.0  ;;  %v9617_v27 = vld [vmem:[%s12510_s0 + $0x558] sm:$0xff] }
 0x449   :  { %v5333_v30 = vpop.f32.mrf.mxu2  ;;  %v5833_v31 = vpop.f32.mrf.mxu3 }
 0x44a   :  { %v7156_v32 = vpack.c.bf16 %v6956_v28, %v6956_v28  ;;  %v6353_v33 = vmax.f32 %v5333_v30, %v5833_v31  ;;  %v4335_v34 = vpop.f32.mrf.mxu0  ;;  %v4835_v35 = vpop.f32.mrf.mxu1 }
 0x44b   :  { %v6154_v45 = vmax.f32 %v4335_v34, %v4835_v35  ;;  %v9817_v34 = vld [vmem:[%s12510_s0 + $0xb98] sm:$0xff] }
 0x44c   :  { %7357 = vst.msk [vmem:[%s12512_s3 + $0x1dc] sm:$0xf] %vm7237_vm1, %v7156_v32  ;;  %v6553_v36 = vmax.f32 %v6153_v29, %v6353_v33  ;;  %v9717_v33 = vld [vmem:[%s12510_s0 + $0x878] sm:$0xff] }
 0x44e   :  { %v6757_v37 = vadd.f32 %v11393_v57, %v6553_v36 }
 0x450   :  { %v6957_v38 = vmax.f32 %v6757_v37, 0.0 }
 0x451   :  { %v5335_v39 = vpop.f32.mrf.mxu2  ;;  %v5835_v40 = vpop.f32.mrf.mxu3 }
 0x452   :  { %v7157_v44 = vpack.c.bf16 %v6957_v38, %v6957_v38  ;;  %v6354_v46 = vmax.f32 %v5335_v39, %v5835_v40  ;;  %v4338_v47 = vpop.f32.mrf.mxu0  ;;  %v4838_v48 = vpop.f32.mrf.mxu1 }
 0x453   :  { %v6155_v54 = vmax.f32 %v4338_v47, %v4838_v48 }
 0x454   :  { %7358 = vst.msk [vmem:[%s12512_s3 + $0x1e0] sm:$0xf] %vm7237_vm1, %v7157_v44  ;;  %v6554_v51 = vmax.f32 %v6154_v45, %v6354_v46 }
 0x455   :  { %9115 = vmatmul.msk.bf16.gmra.mxu0 %vm2823_vm0, %v9515_v41  ;;  %9215 = vmatmul.msk.bf16.gmra.mxu1 %vm2823_vm0, %v9615_v42 }
 0x456   :  { %v6758_v52 = vadd.f32 %v11393_v57, %v6554_v51  ;;  %9315 = vmatmul.msk.bf16.gmra.mxu2 %vm2823_vm0, %v9715_v49  ;;  %9415 = vmatmul.msk.bf16.gmra.mxu3 %vm2823_vm0, %v9815_v50  ;;  %v9518_v51 = vld [vmem:[%s12510_s0 + $0x240] sm:$0xff] }
 0x458   :  { %v6958_v53 = vmax.f32 %v6758_v52, 0.0  ;;  %v9618_v52 = vld [vmem:[%s12510_s0 + $0x560] sm:$0xff] }
 0x459   :  { %v5338_v43 = vpop.f32.mrf.mxu2  ;;  %v5838_v55 = vpop.f32.mrf.mxu3 }
 0x45a   :  { %v7158_v56 = vpack.c.bf16 %v6958_v53, %v6958_v53  ;;  %v6355_v58 = vmax.f32 %v5338_v43, %v5838_v55  ;;  %v4340_v59 = vpop.f32.mrf.mxu0  ;;  %v4840_v60 = vpop.f32.mrf.mxu1 }
 0x45b   :  { %v6156_v5 = vmax.f32 %v4340_v59, %v4840_v60  ;;  %v9818_v59 = vld [vmem:[%s12510_s0 + $0xba0] sm:$0xff] }
 0x45c   :  { %7359 = vst.msk [vmem:[%s12512_s3 + $0x1e4] sm:$0xf] %vm7237_vm1, %v7158_v56  ;;  %v6555_v61 = vmax.f32 %v6155_v54, %v6355_v58  ;;  %v9718_v58 = vld [vmem:[%s12510_s0 + $0x880] sm:$0xff] }
 0x45e   :  { %v6759_v62 = vadd.f32 %v11393_v57, %v6555_v61 }
 0x460   :  { %v6959_v63 = vmax.f32 %v6759_v62, 0.0 }
 0x461   :  { %v5340_v0 = vpop.f32.mrf.mxu2  ;;  %v5840_v1 = vpop.f32.mrf.mxu3 }
 0x462   :  { %v7159_v4 = vpack.c.bf16 %v6959_v63, %v6959_v63  ;;  %v6356_v6 = vmax.f32 %v5340_v0, %v5840_v1  ;;  %v4343_v7 = vpop.f32.mrf.mxu0  ;;  %v4843_v8 = vpop.f32.mrf.mxu1 }
 0x463   :  { %v6157_v14 = vmax.f32 %v4343_v7, %v4843_v8 }
 0x464   :  { %7360 = vst.msk [vmem:[%s12512_s3 + $0x1e8] sm:$0xf] %vm7237_vm1, %v7159_v4  ;;  %v6556_v11 = vmax.f32 %v6156_v5, %v6356_v6 }
 0x465   :  { %9116 = vmatmul.msk.bf16.gmra.mxu0 %vm2823_vm0, %v9516_v2  ;;  %9216 = vmatmul.msk.bf16.gmra.mxu1 %vm2823_vm0, %v9616_v3 }
 0x466   :  { %v6760_v12 = vadd.f32 %v11393_v57, %v6556_v11  ;;  %9316 = vmatmul.msk.bf16.gmra.mxu2 %vm2823_vm0, %v9716_v9  ;;  %9416 = vmatmul.msk.bf16.gmra.mxu3 %vm2823_vm0, %v9816_v10  ;;  %v9519_v11 = vld [vmem:[%s12510_s0 + $0x248] sm:$0xff] }
 0x468   :  { %v6960_v13 = vmax.f32 %v6760_v12, 0.0  ;;  %v9619_v12 = vld [vmem:[%s12510_s0 + $0x568] sm:$0xff] }
 0x469   :  { %v5343_v15 = vpop.f32.mrf.mxu2  ;;  %v5843_v16 = vpop.f32.mrf.mxu3 }
 0x46a   :  { %v7160_v17 = vpack.c.bf16 %v6960_v13, %v6960_v13  ;;  %v6357_v18 = vmax.f32 %v5343_v15, %v5843_v16  ;;  %v4345_v19 = vpop.f32.mrf.mxu0  ;;  %v4845_v20 = vpop.f32.mrf.mxu1 }
 0x46b   :  { %v6158_v29 = vmax.f32 %v4345_v19, %v4845_v20  ;;  %v9819_v19 = vld [vmem:[%s12510_s0 + $0xba8] sm:$0xff] }
 0x46c   :  { %7361 = vst.msk [vmem:[%s12512_s3 + $0x1ec] sm:$0xf] %vm7237_vm1, %v7160_v17  ;;  %v6557_v21 = vmax.f32 %v6157_v14, %v6357_v18  ;;  %v9719_v18 = vld [vmem:[%s12510_s0 + $0x888] sm:$0xff] }
 0x46e   :  { %v6761_v22 = vadd.f32 %v11393_v57, %v6557_v21 }
 0x470   :  { %v6961_v23 = vmax.f32 %v6761_v22, 0.0 }
 0x471   :  { %v5345_v24 = vpop.f32.mrf.mxu2  ;;  %v5845_v25 = vpop.f32.mrf.mxu3 }
 0x472   :  { %v7161_v28 = vpack.c.bf16 %v6961_v23, %v6961_v23  ;;  %v6358_v30 = vmax.f32 %v5345_v24, %v5845_v25  ;;  %v4348_v31 = vpop.f32.mrf.mxu0  ;;  %v4848_v32 = vpop.f32.mrf.mxu1 }
 0x473   :  { %v6159_v38 = vmax.f32 %v4348_v31, %v4848_v32 }
 0x474   :  { %7362 = vst.msk [vmem:[%s12512_s3 + $0x1f0] sm:$0xf] %vm7237_vm1, %v7161_v28  ;;  %v6558_v35 = vmax.f32 %v6158_v29, %v6358_v30 }
 0x475   :  { %9117 = vmatmul.msk.bf16.gmra.mxu0 %vm2823_vm0, %v9517_v26  ;;  %9217 = vmatmul.msk.bf16.gmra.mxu1 %vm2823_vm0, %v9617_v27 }
 0x476   :  { %v6762_v36 = vadd.f32 %v11393_v57, %v6558_v35  ;;  %9317 = vmatmul.msk.bf16.gmra.mxu2 %vm2823_vm0, %v9717_v33  ;;  %9417 = vmatmul.msk.bf16.gmra.mxu3 %vm2823_vm0, %v9817_v34  ;;  %v9520_v35 = vld [vmem:[%s12510_s0 + $0x250] sm:$0xff] }
 0x478   :  { %v6962_v37 = vmax.f32 %v6762_v36, 0.0  ;;  %v9620_v36 = vld [vmem:[%s12510_s0 + $0x570] sm:$0xff] }
 0x479   :  { %v5348_v39 = vpop.f32.mrf.mxu2  ;;  %v5848_v40 = vpop.f32.mrf.mxu3 }
 0x47a   :  { %v7162_v41 = vpack.c.bf16 %v6962_v37, %v6962_v37  ;;  %v6359_v42 = vmax.f32 %v5348_v39, %v5848_v40  ;;  %v4350_v44 = vpop.f32.mrf.mxu0  ;;  %v4850_v45 = vpop.f32.mrf.mxu1 }
 0x47b   :  { %v6160_v54 = vmax.f32 %v4350_v44, %v4850_v45  ;;  %v9820_v44 = vld [vmem:[%s12510_s0 + $0xbb0] sm:$0xff] }
 0x47c   :  { %7363 = vst.msk [vmem:[%s12512_s3 + $0x1f4] sm:$0xf] %vm7237_vm1, %v7162_v41  ;;  %v6559_v46 = vmax.f32 %v6159_v38, %v6359_v42  ;;  %v9720_v42 = vld [vmem:[%s12510_s0 + $0x890] sm:$0xff] }
 0x47e   :  { %v6763_v47 = vadd.f32 %v11393_v57, %v6559_v46 }
 0x480   :  { %v6963_v48 = vmax.f32 %v6763_v47, 0.0 }
 0x481   :  { %v5350_v49 = vpop.f32.mrf.mxu2  ;;  %v5850_v50 = vpop.f32.mrf.mxu3 }
 0x482   :  { %v7163_v53 = vpack.c.bf16 %v6963_v48, %v6963_v48  ;;  %v6360_v43 = vmax.f32 %v5350_v49, %v5850_v50  ;;  %v4353_v55 = vpop.f32.mrf.mxu0  ;;  %v4853_v56 = vpop.f32.mrf.mxu1 }
 0x483   :  { %v6161_v63 = vmax.f32 %v4353_v55, %v4853_v56 }
 0x484   :  { %7364 = vst.msk [vmem:[%s12512_s3 + $0x1f8] sm:$0xf] %vm7237_vm1, %v7163_v53  ;;  %v6560_v60 = vmax.f32 %v6160_v54, %v6360_v43 }
 0x485   :  { %9118 = vmatmul.msk.bf16.gmra.mxu0 %vm2823_vm0, %v9518_v51  ;;  %9218 = vmatmul.msk.bf16.gmra.mxu1 %vm2823_vm0, %v9618_v52 }
 0x486   :  { %v6764_v61 = vadd.f32 %v11393_v57, %v6560_v60  ;;  %9318 = vmatmul.msk.bf16.gmra.mxu2 %vm2823_vm0, %v9718_v58  ;;  %9418 = vmatmul.msk.bf16.gmra.mxu3 %vm2823_vm0, %v9818_v59  ;;  %v9521_v60 = vld [vmem:[%s12510_s0 + $0x258] sm:$0xff] }
 0x488   :  { %v6964_v62 = vmax.f32 %v6764_v61, 0.0  ;;  %v9621_v61 = vld [vmem:[%s12510_s0 + $0x578] sm:$0xff] }
 0x489   :  { %v5353_v0 = vpop.f32.mrf.mxu2  ;;  %v5853_v1 = vpop.f32.mrf.mxu3 }
 0x48a   :  { %v7164_v2 = vpack.c.bf16 %v6964_v62, %v6964_v62  ;;  %v6361_v3 = vmax.f32 %v5353_v0, %v5853_v1  ;;  %v4355_v4 = vpop.f32.mrf.mxu0  ;;  %v4855_v5 = vpop.f32.mrf.mxu1 }
 0x48b   :  { %v6162_v14 = vmax.f32 %v4355_v4, %v4855_v5  ;;  %v9821_v4 = vld [vmem:[%s12510_s0 + $0xbb8] sm:$0xff] }
 0x48c   :  { %7365 = vst.msk [vmem:[%s12512_s3 + $0x1fc] sm:$0xf] %vm7237_vm1, %v7164_v2  ;;  %v6561_v6 = vmax.f32 %v6161_v63, %v6361_v3  ;;  %v9721_v3 = vld [vmem:[%s12510_s0 + $0x898] sm:$0xff] }
 0x48e   :  { %v6765_v7 = vadd.f32 %v11393_v57, %v6561_v6 }
 0x490   :  { %v6965_v8 = vmax.f32 %v6765_v7, 0.0 }
 0x491   :  { %v5355_v9 = vpop.f32.mrf.mxu2  ;;  %v5855_v10 = vpop.f32.mrf.mxu3 }
 0x492   :  { %v7165_v13 = vpack.c.bf16 %v6965_v8, %v6965_v8  ;;  %v6362_v15 = vmax.f32 %v5355_v9, %v5855_v10  ;;  %v4358_v16 = vpop.f32.mrf.mxu0  ;;  %v4858_v17 = vpop.f32.mrf.mxu1 }
 0x493   :  { %v6163_v23 = vmax.f32 %v4358_v16, %v4858_v17 }
 0x494   :  { %7366 = vst.msk [vmem:[%s12512_s3 + $0x200] sm:$0xf] %vm7237_vm1, %v7165_v13  ;;  %v6562_v20 = vmax.f32 %v6162_v14, %v6362_v15 }
 0x495   :  { %9119 = vmatmul.msk.bf16.gmra.mxu0 %vm2823_vm0, %v9519_v11  ;;  %9219 = vmatmul.msk.bf16.gmra.mxu1 %vm2823_vm0, %v9619_v12 }
 0x496   :  { %v6766_v21 = vadd.f32 %v11393_v57, %v6562_v20  ;;  %9319 = vmatmul.msk.bf16.gmra.mxu2 %vm2823_vm0, %v9719_v18  ;;  %9419 = vmatmul.msk.bf16.gmra.mxu3 %vm2823_vm0, %v9819_v19  ;;  %v9522_v20 = vld [vmem:[%s12510_s0 + $0x260] sm:$0xff] }
 0x498   :  { %v6966_v22 = vmax.f32 %v6766_v21, 0.0  ;;  %v9622_v21 = vld [vmem:[%s12510_s0 + $0x580] sm:$0xff] }
 0x499   :  { %v5358_v24 = vpop.f32.mrf.mxu2  ;;  %v5858_v25 = vpop.f32.mrf.mxu3 }
 0x49a   :  { %v7166_v26 = vpack.c.bf16 %v6966_v22, %v6966_v22  ;;  %v6363_v27 = vmax.f32 %v5358_v24, %v5858_v25  ;;  %v4360_v28 = vpop.f32.mrf.mxu0  ;;  %v4860_v29 = vpop.f32.mrf.mxu1 }
 0x49b   :  { %v6164_v38 = vmax.f32 %v4360_v28, %v4860_v29  ;;  %v9822_v28 = vld [vmem:[%s12510_s0 + $0xbc0] sm:$0xff] }
 0x49c   :  { %7367 = vst.msk [vmem:[%s12512_s3 + $0x204] sm:$0xf] %vm7237_vm1, %v7166_v26  ;;  %v6563_v30 = vmax.f32 %v6163_v23, %v6363_v27  ;;  %v9722_v27 = vld [vmem:[%s12510_s0 + $0x8a0] sm:$0xff] }
 0x49e   :  { %v6767_v31 = vadd.f32 %v11393_v57, %v6563_v30 }
 0x4a0   :  { %v6967_v32 = vmax.f32 %v6767_v31, 0.0 }
 0x4a1   :  { %v5360_v33 = vpop.f32.mrf.mxu2  ;;  %v5860_v34 = vpop.f32.mrf.mxu3 }
 0x4a2   :  { %v7167_v37 = vpack.c.bf16 %v6967_v32, %v6967_v32  ;;  %v6364_v39 = vmax.f32 %v5360_v33, %v5860_v34  ;;  %v4363_v40 = vpop.f32.mrf.mxu0  ;;  %v4863_v41 = vpop.f32.mrf.mxu1 }
 0x4a3   :  { %v6165_v48 = vmax.f32 %v4363_v40, %v4863_v41 }
 0x4a4   :  { %7368 = vst.msk [vmem:[%s12512_s3 + $0x208] sm:$0xf] %vm7237_vm1, %v7167_v37  ;;  %v6564_v45 = vmax.f32 %v6164_v38, %v6364_v39 }
 0x4a5   :  { %9120 = vmatmul.msk.bf16.gmra.mxu0 %vm2823_vm0, %v9520_v35  ;;  %9220 = vmatmul.msk.bf16.gmra.mxu1 %vm2823_vm0, %v9620_v36 }
 0x4a6   :  { %v6768_v46 = vadd.f32 %v11393_v57, %v6564_v45  ;;  %9320 = vmatmul.msk.bf16.gmra.mxu2 %vm2823_vm0, %v9720_v42  ;;  %9420 = vmatmul.msk.bf16.gmra.mxu3 %vm2823_vm0, %v9820_v44  ;;  %v9523_v45 = vld [vmem:[%s12510_s0 + $0x268] sm:$0xff] }
 0x4a8   :  { %v6968_v47 = vmax.f32 %v6768_v46, 0.0  ;;  %v9623_v46 = vld [vmem:[%s12510_s0 + $0x588] sm:$0xff] }
 0x4a9   :  { %v5363_v49 = vpop.f32.mrf.mxu2  ;;  %v5863_v50 = vpop.f32.mrf.mxu3 }
 0x4aa   :  { %v7168_v51 = vpack.c.bf16 %v6968_v47, %v6968_v47  ;;  %v6365_v52 = vmax.f32 %v5363_v49, %v5863_v50  ;;  %v4365_v53 = vpop.f32.mrf.mxu0  ;;  %v4865_v54 = vpop.f32.mrf.mxu1 }
 0x4ab   :  { %v6166_v63 = vmax.f32 %v4365_v53, %v4865_v54  ;;  %v9823_v53 = vld [vmem:[%s12510_s0 + $0xbc8] sm:$0xff] }
 0x4ac   :  { %7369 = vst.msk [vmem:[%s12512_s3 + $0x20c] sm:$0xf] %vm7237_vm1, %v7168_v51  ;;  %v6565_v43 = vmax.f32 %v6165_v48, %v6365_v52  ;;  %v9723_v52 = vld [vmem:[%s12510_s0 + $0x8a8] sm:$0xff] }
 0x4ae   :  { %v6769_v55 = vadd.f32 %v11393_v57, %v6565_v43 }
 0x4b0   :  { %v6969_v56 = vmax.f32 %v6769_v55, 0.0 }
 0x4b1   :  { %v5365_v58 = vpop.f32.mrf.mxu2  ;;  %v5865_v59 = vpop.f32.mrf.mxu3 }
 0x4b2   :  { %v7169_v62 = vpack.c.bf16 %v6969_v56, %v6969_v56  ;;  %v6366_v0 = vmax.f32 %v5365_v58, %v5865_v59  ;;  %v4368_v1 = vpop.f32.mrf.mxu0  ;;  %v4868_v2 = vpop.f32.mrf.mxu1 }
 0x4b3   :  { %v6167_v8 = vmax.f32 %v4368_v1, %v4868_v2 }
 0x4b4   :  { %7370 = vst.msk [vmem:[%s12512_s3 + $0x210] sm:$0xf] %vm7237_vm1, %v7169_v62  ;;  %v6566_v5 = vmax.f32 %v6166_v63, %v6366_v0 }
 0x4b5   :  { %9121 = vmatmul.msk.bf16.gmra.mxu0 %vm2823_vm0, %v9521_v60  ;;  %9221 = vmatmul.msk.bf16.gmra.mxu1 %vm2823_vm0, %v9621_v61 }
 0x4b6   :  { %v6770_v6 = vadd.f32 %v11393_v57, %v6566_v5  ;;  %9321 = vmatmul.msk.bf16.gmra.mxu2 %vm2823_vm0, %v9721_v3  ;;  %9421 = vmatmul.msk.bf16.gmra.mxu3 %vm2823_vm0, %v9821_v4  ;;  %v9524_v5 = vld [vmem:[%s12510_s0 + $0x270] sm:$0xff] }
 0x4b8   :  { %v6970_v7 = vmax.f32 %v6770_v6, 0.0  ;;  %v9624_v6 = vld [vmem:[%s12510_s0 + $0x590] sm:$0xff] }
 0x4b9   :  { %v5368_v9 = vpop.f32.mrf.mxu2  ;;  %v5868_v10 = vpop.f32.mrf.mxu3 }
 0x4ba   :  { %v7170_v11 = vpack.c.bf16 %v6970_v7, %v6970_v7  ;;  %v6367_v12 = vmax.f32 %v5368_v9, %v5868_v10  ;;  %v4370_v13 = vpop.f32.mrf.mxu0  ;;  %v4870_v14 = vpop.f32.mrf.mxu1 }
 0x4bb   :  { %v6168_v23 = vmax.f32 %v4370_v13, %v4870_v14  ;;  %v11859_v14 = vld [vmem:[%s12511_s2] ss:$0 sm:$0xff] }
 0x4bc   :  { %7371 = vst.msk [vmem:[%s12512_s3 + $0x214] sm:$0xf] %vm7237_vm1, %v7170_v11  ;;  %v6567_v15 = vmax.f32 %v6167_v8, %v6367_v12  ;;  %v9824_v12 = vld [vmem:[%s12510_s0 + $0xbd0] sm:$0xff] }
 0x4be   :  { %v6771_v16 = vadd.f32 %v11393_v57, %v6567_v15 }
 0x4c0   :  { %v6971_v17 = vmax.f32 %v6771_v16, 0.0 }
 0x4c1   :  { %v5370_v18 = vpop.f32.mrf.mxu2  ;;  %v5870_v19 = vpop.f32.mrf.mxu3 }
 0x4c2   :  { %v7171_v22 = vpack.c.bf16 %v6971_v17, %v6971_v17  ;;  %v6368_v24 = vmax.f32 %v5370_v18, %v5870_v19  ;;  %v4373_v25 = vpop.f32.mrf.mxu0  ;;  %v4873_v26 = vpop.f32.mrf.mxu1 }
 0x4c3   :  { %v6169_v32 = vmax.f32 %v4373_v25, %v4873_v26 }
 0x4c4   :  { %7372 = vst.msk [vmem:[%s12512_s3 + $0x218] sm:$0xf] %vm7237_vm1, %v7171_v22  ;;  %v6568_v29 = vmax.f32 %v6168_v23, %v6368_v24 }
 0x4c5   :  { %9122 = vmatmul.msk.bf16.gmra.mxu0 %vm2823_vm0, %v9522_v20  ;;  %9222 = vmatmul.msk.bf16.gmra.mxu1 %vm2823_vm0, %v9622_v21 }
 0x4c6   :  { %v6772_v30 = vadd.f32 %v11393_v57, %v6568_v29  ;;  %9322 = vmatmul.msk.bf16.gmra.mxu2 %vm2823_vm0, %v9722_v27  ;;  %9422 = vmatmul.msk.bf16.gmra.mxu3 %vm2823_vm0, %v9822_v28  ;;  %v9525_v29 = vld [vmem:[%s12510_s0 + $0x278] sm:$0xff] }
 0x4c8   :  { %v6972_v31 = vmax.f32 %v6772_v30, 0.0  ;;  %v9625_v30 = vld [vmem:[%s12510_s0 + $0x598] sm:$0xff] }
 0x4c9   :  { %v5373_v33 = vpop.f32.mrf.mxu2  ;;  %v5873_v34 = vpop.f32.mrf.mxu3 }
 0x4ca   :  { %v7172_v35 = vpack.c.bf16 %v6972_v31, %v6972_v31  ;;  %v6369_v36 = vmax.f32 %v5373_v33, %v5873_v34  ;;  %v4375_v37 = vpop.f32.mrf.mxu0  ;;  %v4875_v38 = vpop.f32.mrf.mxu1 }
 0x4cb   :  { %v6170_v48 = vmax.f32 %v4375_v37, %v4875_v38  ;;  %v9825_v37 = vld [vmem:[%s12510_s0 + $0xbd8] sm:$0xff] }
 0x4cc   :  { %7373 = vst.msk [vmem:[%s12512_s3 + $0x21c] sm:$0xf] %vm7237_vm1, %v7172_v35  ;;  %v6569_v39 = vmax.f32 %v6169_v32, %v6369_v36  ;;  %v9725_v36 = vld [vmem:[%s12510_s0 + $0x8b8] sm:$0xff] }
 0x4ce   :  { %v6773_v40 = vadd.f32 %v11393_v57, %v6569_v39 }
 0x4d0   :  { %v6973_v41 = vmax.f32 %v6773_v40, 0.0 }
 0x4d1   :  { %v5375_v42 = vpop.f32.mrf.mxu2  ;;  %v5875_v44 = vpop.f32.mrf.mxu3 }
 0x4d2   :  { %v7173_v47 = vpack.c.bf16 %v6973_v41, %v6973_v41  ;;  %v6370_v49 = vmax.f32 %v5375_v42, %v5875_v44  ;;  %v4378_v50 = vpop.f32.mrf.mxu0  ;;  %v4878_v51 = vpop.f32.mrf.mxu1 }
 0x4d3   :  { %v6171_v56 = vmax.f32 %v4378_v50, %v4878_v51 }
 0x4d4   :  { %7374 = vst.msk [vmem:[%s12512_s3 + $0x220] sm:$0xf] %vm7237_vm1, %v7173_v47  ;;  %v6570_v54 = vmax.f32 %v6170_v48, %v6370_v49 }
 0x4d5   :  { %9123 = vmatmul.msk.bf16.gmra.mxu0 %vm2823_vm0, %v9523_v45  ;;  %9223 = vmatmul.msk.bf16.gmra.mxu1 %vm2823_vm0, %v9623_v46 }
 0x4d6   :  { %v6774_v43 = vadd.f32 %v11393_v57, %v6570_v54  ;;  %9323 = vmatmul.msk.bf16.gmra.mxu2 %vm2823_vm0, %v9723_v52  ;;  %9423 = vmatmul.msk.bf16.gmra.mxu3 %vm2823_vm0, %v9823_v53  ;;  %v9526_v54 = vld [vmem:[%s12510_s0 + $0x280] sm:$0xff] }
 0x4d8   :  { %v6974_v55 = vmax.f32 %v6774_v43, 0.0  ;;  %v9626_v43 = vld [vmem:[%s12510_s0 + $0x5a0] sm:$0xff] }
 0x4d9   :  { %v5378_v58 = vpop.f32.mrf.mxu2  ;;  %v5878_v59 = vpop.f32.mrf.mxu3 }
 0x4da   :  { %v7174_v60 = vpack.c.bf16 %v6974_v55, %v6974_v55  ;;  %v6371_v61 = vmax.f32 %v5378_v58, %v5878_v59  ;;  %v4380_v62 = vpop.f32.mrf.mxu0  ;;  %v4880_v63 = vpop.f32.mrf.mxu1 }
 0x4db   :  { %v6172_v8 = vmax.f32 %v4380_v62, %v4880_v63  ;;  %v9826_v62 = vld [vmem:[%s12510_s0 + $0xbe0] sm:$0xff] }
 0x4dc   :  { %7375 = vst.msk [vmem:[%s12512_s3 + $0x224] sm:$0xf] %vm7237_vm1, %v7174_v60  ;;  %v6571_v0 = vmax.f32 %v6171_v56, %v6371_v61  ;;  %v9726_v61 = vld [vmem:[%s12510_s0 + $0x8c0] sm:$0xff] }
 0x4de   :  { %v6775_v1 = vadd.f32 %v11393_v57, %v6571_v0  ;;  %v9724_v57 = vld [vmem:[%s12510_s0 + $0x8b0] sm:$0xff] }
 0x4e0   :  { %v6975_v2 = vmax.f32 %v6775_v1, 0.0 }
 0x4e1   :  { %v5380_v3 = vpop.f32.mrf.mxu2  ;;  %v5880_v4 = vpop.f32.mrf.mxu3 }
 0x4e2   :  { %v7175_v7 = vpack.c.bf16 %v6975_v2, %v6975_v2  ;;  %v6372_v9 = vmax.f32 %v5380_v3, %v5880_v4  ;;  %v4383_v10 = vpop.f32.mrf.mxu0  ;;  %v4883_v11 = vpop.f32.mrf.mxu1 }
 0x4e3   :  { %v6173_v17 = vmax.f32 %v4383_v10, %v4883_v11 }
 0x4e4   :  { %7376 = vst.msk [vmem:[%s12512_s3 + $0x228] sm:$0xf] %vm7237_vm1, %v7175_v7  ;;  %v6572_v13 = vmax.f32 %v6172_v8, %v6372_v9 }
 0x4e5   :  { %9124 = vmatmul.msk.bf16.gmra.mxu0 %vm2823_vm0, %v9524_v5  ;;  %9224 = vmatmul.msk.bf16.gmra.mxu1 %vm2823_vm0, %v9624_v6 }
 0x4e6   :  { %v6776_v15 = vadd.f32 %v11859_v14, %v6572_v13  ;;  %9324 = vmatmul.msk.bf16.gmra.mxu2 %vm2823_vm0, %v9724_v57  ;;  %9424 = vmatmul.msk.bf16.gmra.mxu3 %vm2823_vm0, %v9824_v12  ;;  %v9527_v13 = vld [vmem:[%s12510_s0 + $0x288] sm:$0xff] }
 0x4e8   :  { %v6976_v16 = vmax.f32 %v6776_v15, 0.0  ;;  %v9627_v15 = vld [vmem:[%s12510_s0 + $0x5a8] sm:$0xff] }
 0x4e9   :  { %v5383_v18 = vpop.f32.mrf.mxu2  ;;  %v5883_v19 = vpop.f32.mrf.mxu3 }
 0x4ea   :  { %v7176_v20 = vpack.c.bf16 %v6976_v16, %v6976_v16  ;;  %v6373_v21 = vmax.f32 %v5383_v18, %v5883_v19  ;;  %v4385_v22 = vpop.f32.mrf.mxu0  ;;  %v4885_v23 = vpop.f32.mrf.mxu1 }
 0x4eb   :  { %v6174_v32 = vmax.f32 %v4385_v22, %v4885_v23  ;;  %v9827_v22 = vld [vmem:[%s12510_s0 + $0xbe8] sm:$0xff] }
 0x4ec   :  { %7377 = vst.msk [vmem:[%s12512_s3 + $0x22c] sm:$0xf] %vm7237_vm1, %v7176_v20  ;;  %v6573_v24 = vmax.f32 %v6173_v17, %v6373_v21  ;;  %v9727_v21 = vld [vmem:[%s12510_s0 + $0x8c8] sm:$0xff] }
 0x4ee   :  { %v6777_v25 = vadd.f32 %v11859_v14, %v6573_v24 }
 0x4f0   :  { %v6977_v26 = vmax.f32 %v6777_v25, 0.0 }
 0x4f1   :  { %v5385_v27 = vpop.f32.mrf.mxu2  ;;  %v5885_v28 = vpop.f32.mrf.mxu3 }
 0x4f2   :  { %v7177_v31 = vpack.c.bf16 %v6977_v26, %v6977_v26  ;;  %v6374_v33 = vmax.f32 %v5385_v27, %v5885_v28  ;;  %v4388_v34 = vpop.f32.mrf.mxu0  ;;  %v4888_v35 = vpop.f32.mrf.mxu1 }
 0x4f3   :  { %v6175_v41 = vmax.f32 %v4388_v34, %v4888_v35 }
 0x4f4   :  { %7378 = vst.msk [vmem:[%s12512_s3 + $0x230] sm:$0xf] %vm7237_vm1, %v7177_v31  ;;  %v6574_v38 = vmax.f32 %v6174_v32, %v6374_v33 }
 0x4f5   :  { %9125 = vmatmul.msk.bf16.gmra.mxu0 %vm2823_vm0, %v9525_v29  ;;  %9225 = vmatmul.msk.bf16.gmra.mxu1 %vm2823_vm0, %v9625_v30 }
 0x4f6   :  { %v6778_v39 = vadd.f32 %v11859_v14, %v6574_v38  ;;  %9325 = vmatmul.msk.bf16.gmra.mxu2 %vm2823_vm0, %v9725_v36  ;;  %9425 = vmatmul.msk.bf16.gmra.mxu3 %vm2823_vm0, %v9825_v37  ;;  %v9528_v38 = vld [vmem:[%s12510_s0 + $0x290] sm:$0xff] }
 0x4f8   :  { %v6978_v40 = vmax.f32 %v6778_v39, 0.0  ;;  %v9628_v39 = vld [vmem:[%s12510_s0 + $0x5b0] sm:$0xff] }
 0x4f9   :  { %v5388_v42 = vpop.f32.mrf.mxu2  ;;  %v5888_v44 = vpop.f32.mrf.mxu3 }
 0x4fa   :  { %v7178_v45 = vpack.c.bf16 %v6978_v40, %v6978_v40  ;;  %v6375_v46 = vmax.f32 %v5388_v42, %v5888_v44  ;;  %v4390_v47 = vpop.f32.mrf.mxu0  ;;  %v4890_v48 = vpop.f32.mrf.mxu1 }
 0x4fb   :  { %v6176_v56 = vmax.f32 %v4390_v47, %v4890_v48  ;;  %v9828_v47 = vld [vmem:[%s12510_s0 + $0xbf0] sm:$0xff] }
 0x4fc   :  { %7379 = vst.msk [vmem:[%s12512_s3 + $0x234] sm:$0xf] %vm7237_vm1, %v7178_v45  ;;  %v6575_v49 = vmax.f32 %v6175_v41, %v6375_v46  ;;  %v9728_v46 = vld [vmem:[%s12510_s0 + $0x8d0] sm:$0xff] }
 0x4fe   :  { %v6779_v50 = vadd.f32 %v11859_v14, %v6575_v49 }
 0x500   :  { %v6979_v51 = vmax.f32 %v6779_v50, 0.0 }
 0x501   :  { %v5390_v52 = vpop.f32.mrf.mxu2  ;;  %v5890_v53 = vpop.f32.mrf.mxu3 }
 0x502   :  { %v7179_v55 = vpack.c.bf16 %v6979_v51, %v6979_v51  ;;  %v6376_v58 = vmax.f32 %v5390_v52, %v5890_v53  ;;  %v4393_v59 = vpop.f32.mrf.mxu0  ;;  %v4893_v60 = vpop.f32.mrf.mxu1 }
 0x503   :  { %v6177_v2 = vmax.f32 %v4393_v59, %v4893_v60 }
 0x504   :  { %7380 = vst.msk [vmem:[%s12512_s3 + $0x238] sm:$0xf] %vm7237_vm1, %v7179_v55  ;;  %v6576_v63 = vmax.f32 %v6176_v56, %v6376_v58 }
 0x505   :  { %9126 = vmatmul.msk.bf16.gmra.mxu0 %vm2823_vm0, %v9526_v54  ;;  %9226 = vmatmul.msk.bf16.gmra.mxu1 %vm2823_vm0, %v9626_v43 }
 0x506   :  { %v6780_v0 = vadd.f32 %v11859_v14, %v6576_v63  ;;  %9326 = vmatmul.msk.bf16.gmra.mxu2 %vm2823_vm0, %v9726_v61  ;;  %9426 = vmatmul.msk.bf16.gmra.mxu3 %vm2823_vm0, %v9826_v62  ;;  %v9529_v63 = vld [vmem:[%s12510_s0 + $0x298] sm:$0xff] }
 0x508   :  { %v6980_v1 = vmax.f32 %v6780_v0, 0.0  ;;  %v9629_v0 = vld [vmem:[%s12510_s0 + $0x5b8] sm:$0xff] }
 0x509   :  { %v5393_v3 = vpop.f32.mrf.mxu2  ;;  %v5893_v4 = vpop.f32.mrf.mxu3 }
 0x50a   :  { %v7180_v5 = vpack.c.bf16 %v6980_v1, %v6980_v1  ;;  %v6377_v6 = vmax.f32 %v5393_v3, %v5893_v4  ;;  %v4395_v7 = vpop.f32.mrf.mxu0  ;;  %v4895_v8 = vpop.f32.mrf.mxu1 }
 0x50b   :  { %v6178_v17 = vmax.f32 %v4395_v7, %v4895_v8  ;;  %v9829_v7 = vld [vmem:[%s12510_s0 + $0xbf8] sm:$0xff] }
 0x50c   :  { %7381 = vst.msk [vmem:[%s12512_s3 + $0x23c] sm:$0xf] %vm7237_vm1, %v7180_v5  ;;  %v6577_v9 = vmax.f32 %v6177_v2, %v6377_v6  ;;  %v9729_v6 = vld [vmem:[%s12510_s0 + $0x8d8] sm:$0xff] }
 0x50e   :  { %v6781_v10 = vadd.f32 %v11859_v14, %v6577_v9 }
 0x510   :  { %v6981_v11 = vmax.f32 %v6781_v10, 0.0 }
 0x511   :  { %v5395_v57 = vpop.f32.mrf.mxu2  ;;  %v5895_v12 = vpop.f32.mrf.mxu3 }
 0x512   :  { %v7181_v16 = vpack.c.bf16 %v6981_v11, %v6981_v11  ;;  %v6378_v18 = vmax.f32 %v5395_v57, %v5895_v12  ;;  %v4398_v19 = vpop.f32.mrf.mxu0  ;;  %v4898_v20 = vpop.f32.mrf.mxu1 }
 0x513   :  { %v6179_v26 = vmax.f32 %v4398_v19, %v4898_v20 }
 0x514   :  { %7382 = vst.msk [vmem:[%s12512_s3 + $0x240] sm:$0xf] %vm7237_vm1, %v7181_v16  ;;  %v6578_v23 = vmax.f32 %v6178_v17, %v6378_v18 }
 0x515   :  { %9127 = vmatmul.msk.bf16.gmra.mxu0 %vm2823_vm0, %v9527_v13  ;;  %9227 = vmatmul.msk.bf16.gmra.mxu1 %vm2823_vm0, %v9627_v15 }
 0x516   :  { %v6782_v24 = vadd.f32 %v11859_v14, %v6578_v23  ;;  %9327 = vmatmul.msk.bf16.gmra.mxu2 %vm2823_vm0, %v9727_v21  ;;  %9427 = vmatmul.msk.bf16.gmra.mxu3 %vm2823_vm0, %v9827_v22  ;;  %v9530_v23 = vld [vmem:[%s12510_s0 + $0x2a0] sm:$0xff] }
 0x518   :  { %v6982_v25 = vmax.f32 %v6782_v24, 0.0  ;;  %v9630_v24 = vld [vmem:[%s12510_s0 + $0x5c0] sm:$0xff] }
 0x519   :  { %v5398_v27 = vpop.f32.mrf.mxu2  ;;  %v5898_v28 = vpop.f32.mrf.mxu3 }
 0x51a   :  { %v7182_v29 = vpack.c.bf16 %v6982_v25, %v6982_v25  ;;  %v6379_v30 = vmax.f32 %v5398_v27, %v5898_v28  ;;  %v4400_v31 = vpop.f32.mrf.mxu0  ;;  %v4900_v32 = vpop.f32.mrf.mxu1 }
 0x51b   :  { %v6180_v41 = vmax.f32 %v4400_v31, %v4900_v32  ;;  %v9830_v31 = vld [vmem:[%s12510_s0 + $0xc00] sm:$0xff] }
 0x51c   :  { %7383 = vst.msk [vmem:[%s12512_s3 + $0x244] sm:$0xf] %vm7237_vm1, %v7182_v29  ;;  %v6579_v33 = vmax.f32 %v6179_v26, %v6379_v30  ;;  %v9730_v30 = vld [vmem:[%s12510_s0 + $0x8e0] sm:$0xff] }
 0x51e   :  { %v6783_v34 = vadd.f32 %v11859_v14, %v6579_v33 }
 0x520   :  { %v6983_v35 = vmax.f32 %v6783_v34, 0.0 }
 0x521   :  { %v5400_v36 = vpop.f32.mrf.mxu2  ;;  %v5900_v37 = vpop.f32.mrf.mxu3 }
 0x522   :  { %v7183_v40 = vpack.c.bf16 %v6983_v35, %v6983_v35  ;;  %v6380_v42 = vmax.f32 %v5400_v36, %v5900_v37  ;;  %v4403_v44 = vpop.f32.mrf.mxu0  ;;  %v4903_v45 = vpop.f32.mrf.mxu1 }
 0x523   :  { %v6181_v51 = vmax.f32 %v4403_v44, %v4903_v45 }
 0x524   :  { %7384 = vst.msk [vmem:[%s12512_s3 + $0x248] sm:$0xf] %vm7237_vm1, %v7183_v40  ;;  %v6580_v48 = vmax.f32 %v6180_v41, %v6380_v42 }
 0x525   :  { %9128 = vmatmul.msk.bf16.gmra.mxu0 %vm2823_vm0, %v9528_v38  ;;  %9228 = vmatmul.msk.bf16.gmra.mxu1 %vm2823_vm0, %v9628_v39 }
 0x526   :  { %v6784_v49 = vadd.f32 %v11859_v14, %v6580_v48  ;;  %9328 = vmatmul.msk.bf16.gmra.mxu2 %vm2823_vm0, %v9728_v46  ;;  %9428 = vmatmul.msk.bf16.gmra.mxu3 %vm2823_vm0, %v9828_v47  ;;  %v9531_v48 = vld [vmem:[%s12510_s0 + $0x2a8] sm:$0xff] }
 0x528   :  { %v6984_v50 = vmax.f32 %v6784_v49, 0.0  ;;  %v9631_v49 = vld [vmem:[%s12510_s0 + $0x5c8] sm:$0xff] }
 0x529   :  { %v5403_v52 = vpop.f32.mrf.mxu2  ;;  %v5903_v53 = vpop.f32.mrf.mxu3 }
 0x52a   :  { %v7184_v54 = vpack.c.bf16 %v6984_v50, %v6984_v50  ;;  %v6381_v43 = vmax.f32 %v5403_v52, %v5903_v53  ;;  %v4405_v55 = vpop.f32.mrf.mxu0  ;;  %v4905_v56 = vpop.f32.mrf.mxu1 }
 0x52b   :  { %v6182_v2 = vmax.f32 %v4405_v55, %v4905_v56  ;;  %v9831_v55 = vld [vmem:[%s12510_s0 + $0xc08] sm:$0xff] }
 0x52c   :  { %7385 = vst.msk [vmem:[%s12512_s3 + $0x24c] sm:$0xf] %vm7237_vm1, %v7184_v54  ;;  %v6581_v58 = vmax.f32 %v6181_v51, %v6381_v43  ;;  %v9731_v43 = vld [vmem:[%s12510_s0 + $0x8e8] sm:$0xff] }
 0x52e   :  { %v6785_v59 = vadd.f32 %v11859_v14, %v6581_v58 }
 0x530   :  { %v6985_v60 = vmax.f32 %v6785_v59, 0.0 }
 0x531   :  { %v5405_v61 = vpop.f32.mrf.mxu2  ;;  %v5905_v62 = vpop.f32.mrf.mxu3 }
 0x532   :  { %v7185_v1 = vpack.c.bf16 %v6985_v60, %v6985_v60  ;;  %v6382_v3 = vmax.f32 %v5405_v61, %v5905_v62  ;;  %v4408_v4 = vpop.f32.mrf.mxu0  ;;  %v4908_v5 = vpop.f32.mrf.mxu1 }
 0x533   :  { %v6183_v11 = vmax.f32 %v4408_v4, %v4908_v5 }
 0x534   :  { %7386 = vst.msk [vmem:[%s12512_s3 + $0x250] sm:$0xf] %vm7237_vm1, %v7185_v1  ;;  %v6582_v8 = vmax.f32 %v6182_v2, %v6382_v3 }
 0x535   :  { %9129 = vmatmul.msk.bf16.gmra.mxu0 %vm2823_vm0, %v9529_v63  ;;  %9229 = vmatmul.msk.bf16.gmra.mxu1 %vm2823_vm0, %v9629_v0 }
 0x536   :  { %v6786_v9 = vadd.f32 %v11859_v14, %v6582_v8  ;;  %9329 = vmatmul.msk.bf16.gmra.mxu2 %vm2823_vm0, %v9729_v6  ;;  %9429 = vmatmul.msk.bf16.gmra.mxu3 %vm2823_vm0, %v9829_v7  ;;  %v9532_v8 = vld [vmem:[%s12510_s0 + $0x2b0] sm:$0xff] }
 0x538   :  { %v6986_v10 = vmax.f32 %v6786_v9, 0.0  ;;  %v9632_v9 = vld [vmem:[%s12510_s0 + $0x5d0] sm:$0xff] }
 0x539   :  { %v5408_v57 = vpop.f32.mrf.mxu2  ;;  %v5908_v12 = vpop.f32.mrf.mxu3 }
 0x53a   :  { %v7186_v13 = vpack.c.bf16 %v6986_v10, %v6986_v10  ;;  %v6383_v15 = vmax.f32 %v5408_v57, %v5908_v12  ;;  %v4410_v16 = vpop.f32.mrf.mxu0  ;;  %v4910_v17 = vpop.f32.mrf.mxu1 }
 0x53b   :  { %v6184_v26 = vmax.f32 %v4410_v16, %v4910_v17  ;;  %v9832_v16 = vld [vmem:[%s12510_s0 + $0xc10] sm:$0xff] }
 0x53c   :  { %7387 = vst.msk [vmem:[%s12512_s3 + $0x254] sm:$0xf] %vm7237_vm1, %v7186_v13  ;;  %v6583_v18 = vmax.f32 %v6183_v11, %v6383_v15  ;;  %v9732_v15 = vld [vmem:[%s12510_s0 + $0x8f0] sm:$0xff] }
 0x53e   :  { %v6787_v19 = vadd.f32 %v11859_v14, %v6583_v18 }
 0x540   :  { %v6987_v20 = vmax.f32 %v6787_v19, 0.0 }
 0x541   :  { %v5410_v21 = vpop.f32.mrf.mxu2  ;;  %v5910_v22 = vpop.f32.mrf.mxu3 }
 0x542   :  { %v7187_v25 = vpack.c.bf16 %v6987_v20, %v6987_v20  ;;  %v6384_v27 = vmax.f32 %v5410_v21, %v5910_v22  ;;  %v4413_v28 = vpop.f32.mrf.mxu0  ;;  %v4913_v29 = vpop.f32.mrf.mxu1 }
 0x543   :  { %v6185_v35 = vmax.f32 %v4413_v28, %v4913_v29 }
 0x544   :  { %7388 = vst.msk [vmem:[%s12512_s3 + $0x258] sm:$0xf] %vm7237_vm1, %v7187_v25  ;;  %v6584_v32 = vmax.f32 %v6184_v26, %v6384_v27 }
 0x545   :  { %9130 = vmatmul.msk.bf16.gmra.mxu0 %vm2823_vm0, %v9530_v23  ;;  %9230 = vmatmul.msk.bf16.gmra.mxu1 %vm2823_vm0, %v9630_v24 }
 0x546   :  { %v6788_v33 = vadd.f32 %v11859_v14, %v6584_v32  ;;  %9330 = vmatmul.msk.bf16.gmra.mxu2 %vm2823_vm0, %v9730_v30  ;;  %9430 = vmatmul.msk.bf16.gmra.mxu3 %vm2823_vm0, %v9830_v31  ;;  %v9533_v32 = vld [vmem:[%s12510_s0 + $0x2b8] sm:$0xff] }
 0x548   :  { %v6988_v34 = vmax.f32 %v6788_v33, 0.0  ;;  %v9633_v33 = vld [vmem:[%s12510_s0 + $0x5d8] sm:$0xff] }
 0x549   :  { %v5413_v36 = vpop.f32.mrf.mxu2  ;;  %v5913_v37 = vpop.f32.mrf.mxu3 }
 0x54a   :  { %v7188_v38 = vpack.c.bf16 %v6988_v34, %v6988_v34  ;;  %v6385_v39 = vmax.f32 %v5413_v36, %v5913_v37  ;;  %v4415_v40 = vpop.f32.mrf.mxu0  ;;  %v4915_v41 = vpop.f32.mrf.mxu1 }
 0x54b   :  { %v6186_v51 = vmax.f32 %v4415_v40, %v4915_v41  ;;  %v9833_v40 = vld [vmem:[%s12510_s0 + $0xc18] sm:$0xff] }
 0x54c   :  { %7389 = vst.msk [vmem:[%s12512_s3 + $0x25c] sm:$0xf] %vm7237_vm1, %v7188_v38  ;;  %v6585_v42 = vmax.f32 %v6185_v35, %v6385_v39  ;;  %v9733_v39 = vld [vmem:[%s12510_s0 + $0x8f8] sm:$0xff] }
 0x54e   :  { %v6789_v44 = vadd.f32 %v11859_v14, %v6585_v42 }
 0x550   :  { %v6989_v45 = vmax.f32 %v6789_v44, 0.0 }
 0x551   :  { %v5415_v46 = vpop.f32.mrf.mxu2  ;;  %v5915_v47 = vpop.f32.mrf.mxu3 }
 0x552   :  { %v7189_v50 = vpack.c.bf16 %v6989_v45, %v6989_v45  ;;  %v6386_v52 = vmax.f32 %v5415_v46, %v5915_v47  ;;  %v4418_v53 = vpop.f32.mrf.mxu0  ;;  %v4918_v54 = vpop.f32.mrf.mxu1 }
 0x553   :  { %v6187_v60 = vmax.f32 %v4418_v53, %v4918_v54 }
 0x554   :  { %7390 = vst.msk [vmem:[%s12512_s3 + $0x260] sm:$0xf] %vm7237_vm1, %v7189_v50  ;;  %v6586_v56 = vmax.f32 %v6186_v51, %v6386_v52 }
 0x555   :  { %9131 = vmatmul.msk.bf16.gmra.mxu0 %vm2823_vm0, %v9531_v48  ;;  %9231 = vmatmul.msk.bf16.gmra.mxu1 %vm2823_vm0, %v9631_v49 }
 0x556   :  { %v6790_v58 = vadd.f32 %v11859_v14, %v6586_v56  ;;  %9331 = vmatmul.msk.bf16.gmra.mxu2 %vm2823_vm0, %v9731_v43  ;;  %9431 = vmatmul.msk.bf16.gmra.mxu3 %vm2823_vm0, %v9831_v55  ;;  %v9534_v56 = vld [vmem:[%s12510_s0 + $0x2c0] sm:$0xff] }
 0x558   :  { %v6990_v59 = vmax.f32 %v6790_v58, 0.0  ;;  %v9634_v58 = vld [vmem:[%s12510_s0 + $0x5e0] sm:$0xff] }
 0x559   :  { %v5418_v61 = vpop.f32.mrf.mxu2  ;;  %v5918_v62 = vpop.f32.mrf.mxu3 }
 0x55a   :  { %v7190_v63 = vpack.c.bf16 %v6990_v59, %v6990_v59  ;;  %v6387_v0 = vmax.f32 %v5418_v61, %v5918_v62  ;;  %v4420_v1 = vpop.f32.mrf.mxu0  ;;  %v4920_v2 = vpop.f32.mrf.mxu1 }
 0x55b   :  { %v6188_v11 = vmax.f32 %v4420_v1, %v4920_v2  ;;  %v9834_v1 = vld [vmem:[%s12510_s0 + $0xc20] sm:$0xff] }
 0x55c   :  { %7391 = vst.msk [vmem:[%s12512_s3 + $0x264] sm:$0xf] %vm7237_vm1, %v7190_v63  ;;  %v6587_v3 = vmax.f32 %v6187_v60, %v6387_v0  ;;  %v9734_v0 = vld [vmem:[%s12510_s0 + $0x900] sm:$0xff] }
 0x55e   :  { %v6791_v4 = vadd.f32 %v11859_v14, %v6587_v3 }
 0x560   :  { %v6991_v5 = vmax.f32 %v6791_v4, 0.0 }
 0x561   :  { %v5420_v6 = vpop.f32.mrf.mxu2  ;;  %v5920_v7 = vpop.f32.mrf.mxu3 }
 0x562   :  { %v7191_v10 = vpack.c.bf16 %v6991_v5, %v6991_v5  ;;  %v6388_v57 = vmax.f32 %v5420_v6, %v5920_v7  ;;  %v4423_v12 = vpop.f32.mrf.mxu0  ;;  %v4923_v13 = vpop.f32.mrf.mxu1 }
 0x563   :  { %v6189_v20 = vmax.f32 %v4423_v12, %v4923_v13 }
 0x564   :  { %7392 = vst.msk [vmem:[%s12512_s3 + $0x268] sm:$0xf] %vm7237_vm1, %v7191_v10  ;;  %v6588_v17 = vmax.f32 %v6188_v11, %v6388_v57 }
 0x565   :  { %9132 = vmatmul.msk.bf16.gmra.mxu0 %vm2823_vm0, %v9532_v8  ;;  %9232 = vmatmul.msk.bf16.gmra.mxu1 %vm2823_vm0, %v9632_v9 }
 0x566   :  { %v6792_v18 = vadd.f32 %v11859_v14, %v6588_v17  ;;  %9332 = vmatmul.msk.bf16.gmra.mxu2 %vm2823_vm0, %v9732_v15  ;;  %9432 = vmatmul.msk.bf16.gmra.mxu3 %vm2823_vm0, %v9832_v16  ;;  %v9535_v17 = vld [vmem:[%s12510_s0 + $0x2c8] sm:$0xff] }
 0x568   :  { %v6992_v19 = vmax.f32 %v6792_v18, 0.0  ;;  %v9635_v18 = vld [vmem:[%s12510_s0 + $0x5e8] sm:$0xff] }
 0x569   :  { %v5423_v21 = vpop.f32.mrf.mxu2  ;;  %v5923_v22 = vpop.f32.mrf.mxu3 }
 0x56a   :  { %v7192_v23 = vpack.c.bf16 %v6992_v19, %v6992_v19  ;;  %v6389_v24 = vmax.f32 %v5423_v21, %v5923_v22  ;;  %v4425_v25 = vpop.f32.mrf.mxu0  ;;  %v4925_v26 = vpop.f32.mrf.mxu1 }
 0x56b   :  { %v6190_v35 = vmax.f32 %v4425_v25, %v4925_v26  ;;  %v9835_v25 = vld [vmem:[%s12510_s0 + $0xc28] sm:$0xff] }
 0x56c   :  { %7393 = vst.msk [vmem:[%s12512_s3 + $0x26c] sm:$0xf] %vm7237_vm1, %v7192_v23  ;;  %v6589_v27 = vmax.f32 %v6189_v20, %v6389_v24  ;;  %v9735_v24 = vld [vmem:[%s12510_s0 + $0x908] sm:$0xff] }
 0x56e   :  { %v6793_v28 = vadd.f32 %v11859_v14, %v6589_v27 }
 0x570   :  { %v6993_v29 = vmax.f32 %v6793_v28, 0.0 }
 0x571   :  { %v5425_v30 = vpop.f32.mrf.mxu2  ;;  %v5925_v31 = vpop.f32.mrf.mxu3 }
 0x572   :  { %v7193_v34 = vpack.c.bf16 %v6993_v29, %v6993_v29  ;;  %v6390_v36 = vmax.f32 %v5425_v30, %v5925_v31  ;;  %v4428_v37 = vpop.f32.mrf.mxu0  ;;  %v4928_v38 = vpop.f32.mrf.mxu1 }
 0x573   :  { %v6191_v45 = vmax.f32 %v4428_v37, %v4928_v38 }
 0x574   :  { %7394 = vst.msk [vmem:[%s12512_s3 + $0x270] sm:$0xf] %vm7237_vm1, %v7193_v34  ;;  %v6590_v41 = vmax.f32 %v6190_v35, %v6390_v36 }
 0x575   :  { %9133 = vmatmul.msk.bf16.gmra.mxu0 %vm2823_vm0, %v9533_v32  ;;  %9233 = vmatmul.msk.bf16.gmra.mxu1 %vm2823_vm0, %v9633_v33 }
 0x576   :  { %v6794_v42 = vadd.f32 %v11859_v14, %v6590_v41  ;;  %9333 = vmatmul.msk.bf16.gmra.mxu2 %vm2823_vm0, %v9733_v39  ;;  %9433 = vmatmul.msk.bf16.gmra.mxu3 %vm2823_vm0, %v9833_v40  ;;  %v9536_v41 = vld [vmem:[%s12510_s0 + $0x2d0] sm:$0xff] }
 0x578   :  { %v6994_v44 = vmax.f32 %v6794_v42, 0.0  ;;  %v9636_v42 = vld [vmem:[%s12510_s0 + $0x5f0] sm:$0xff] }
 0x579   :  { %v5428_v46 = vpop.f32.mrf.mxu2  ;;  %v5928_v47 = vpop.f32.mrf.mxu3 }
 0x57a   :  { %v7194_v48 = vpack.c.bf16 %v6994_v44, %v6994_v44  ;;  %v6391_v49 = vmax.f32 %v5428_v46, %v5928_v47  ;;  %v4430_v50 = vpop.f32.mrf.mxu0  ;;  %v4930_v51 = vpop.f32.mrf.mxu1 }
 0x57b   :  { %v6192_v60 = vmax.f32 %v4430_v50, %v4930_v51  ;;  %v9836_v50 = vld [vmem:[%s12510_s0 + $0xc30] sm:$0xff] }
 0x57c   :  { %7395 = vst.msk [vmem:[%s12512_s3 + $0x274] sm:$0xf] %vm7237_vm1, %v7194_v48  ;;  %v6591_v52 = vmax.f32 %v6191_v45, %v6391_v49  ;;  %v9736_v49 = vld [vmem:[%s12510_s0 + $0x910] sm:$0xff] }
 0x57e   :  { %v6795_v53 = vadd.f32 %v11859_v14, %v6591_v52 }
 0x580   :  { %v6995_v54 = vmax.f32 %v6795_v53, 0.0 }
 0x581   :  { %v5430_v43 = vpop.f32.mrf.mxu2  ;;  %v5930_v55 = vpop.f32.mrf.mxu3 }
 0x582   :  { %v7195_v59 = vpack.c.bf16 %v6995_v54, %v6995_v54  ;;  %v6392_v61 = vmax.f32 %v5430_v43, %v5930_v55  ;;  %v4433_v62 = vpop.f32.mrf.mxu0  ;;  %v4933_v63 = vpop.f32.mrf.mxu1 }
 0x583   :  { %v6193_v5 = vmax.f32 %v4433_v62, %v4933_v63 }
 0x584   :  { %7396 = vst.msk [vmem:[%s12512_s3 + $0x278] sm:$0xf] %vm7237_vm1, %v7195_v59  ;;  %v6592_v2 = vmax.f32 %v6192_v60, %v6392_v61 }
 0x585   :  { %9134 = vmatmul.msk.bf16.gmra.mxu0 %vm2823_vm0, %v9534_v56  ;;  %9234 = vmatmul.msk.bf16.gmra.mxu1 %vm2823_vm0, %v9634_v58 }
 0x586   :  { %v6796_v3 = vadd.f32 %v11859_v14, %v6592_v2  ;;  %9334 = vmatmul.msk.bf16.gmra.mxu2 %vm2823_vm0, %v9734_v0  ;;  %9434 = vmatmul.msk.bf16.gmra.mxu3 %vm2823_vm0, %v9834_v1  ;;  %v9537_v2 = vld [vmem:[%s12510_s0 + $0x2d8] sm:$0xff] }
 0x588   :  { %v6996_v4 = vmax.f32 %v6796_v3, 0.0  ;;  %v9637_v3 = vld [vmem:[%s12510_s0 + $0x5f8] sm:$0xff] }
 0x589   :  { %v5433_v6 = vpop.f32.mrf.mxu2  ;;  %v5933_v7 = vpop.f32.mrf.mxu3 }
 0x58a   :  { %v7196_v8 = vpack.c.bf16 %v6996_v4, %v6996_v4  ;;  %v6393_v9 = vmax.f32 %v5433_v6, %v5933_v7  ;;  %v4435_v10 = vpop.f32.mrf.mxu0  ;;  %v4935_v11 = vpop.f32.mrf.mxu1 }
 0x58b   :  { %v6194_v20 = vmax.f32 %v4435_v10, %v4935_v11  ;;  %v9837_v10 = vld [vmem:[%s12510_s0 + $0xc38] sm:$0xff] }
 0x58c   :  { %7397 = vst.msk [vmem:[%s12512_s3 + $0x27c] sm:$0xf] %vm7237_vm1, %v7196_v8  ;;  %v6593_v57 = vmax.f32 %v6193_v5, %v6393_v9  ;;  %v9737_v9 = vld [vmem:[%s12510_s0 + $0x918] sm:$0xff] }
 0x58e   :  { %v6797_v12 = vadd.f32 %v11859_v14, %v6593_v57 }
 0x590   :  { %v6997_v13 = vmax.f32 %v6797_v12, 0.0 }
 0x591   :  { %v5435_v15 = vpop.f32.mrf.mxu2  ;;  %v5935_v16 = vpop.f32.mrf.mxu3 }
 0x592   :  { %v7197_v19 = vpack.c.bf16 %v6997_v13, %v6997_v13  ;;  %v6394_v21 = vmax.f32 %v5435_v15, %v5935_v16  ;;  %v4438_v22 = vpop.f32.mrf.mxu0  ;;  %v4938_v23 = vpop.f32.mrf.mxu1 }
 0x593   :  { %v6195_v29 = vmax.f32 %v4438_v22, %v4938_v23 }
 0x594   :  { %7398 = vst.msk [vmem:[%s12512_s3 + $0x280] sm:$0xf] %vm7237_vm1, %v7197_v19  ;;  %v6594_v26 = vmax.f32 %v6194_v20, %v6394_v21 }
 0x595   :  { %9135 = vmatmul.msk.bf16.gmra.mxu0 %vm2823_vm0, %v9535_v17  ;;  %9235 = vmatmul.msk.bf16.gmra.mxu1 %vm2823_vm0, %v9635_v18 }
 0x596   :  { %v6798_v27 = vadd.f32 %v11859_v14, %v6594_v26  ;;  %9335 = vmatmul.msk.bf16.gmra.mxu2 %vm2823_vm0, %v9735_v24  ;;  %9435 = vmatmul.msk.bf16.gmra.mxu3 %vm2823_vm0, %v9835_v25  ;;  %v9538_v26 = vld [vmem:[%s12510_s0 + $0x2e0] sm:$0xff] }
 0x598   :  { %v6998_v28 = vmax.f32 %v6798_v27, 0.0  ;;  %v9638_v27 = vld [vmem:[%s12510_s0 + $0x600] sm:$0xff] }
 0x599   :  { %v5438_v30 = vpop.f32.mrf.mxu2  ;;  %v5938_v31 = vpop.f32.mrf.mxu3 }
 0x59a   :  { %v7198_v32 = vpack.c.bf16 %v6998_v28, %v6998_v28  ;;  %v6395_v33 = vmax.f32 %v5438_v30, %v5938_v31  ;;  %v4440_v34 = vpop.f32.mrf.mxu0  ;;  %v4940_v35 = vpop.f32.mrf.mxu1 }
 0x59b   :  { %v6196_v45 = vmax.f32 %v4440_v34, %v4940_v35  ;;  %v9838_v34 = vld [vmem:[%s12510_s0 + $0xc40] sm:$0xff] }
 0x59c   :  { %7399 = vst.msk [vmem:[%s12512_s3 + $0x284] sm:$0xf] %vm7237_vm1, %v7198_v32  ;;  %v6595_v36 = vmax.f32 %v6195_v29, %v6395_v33  ;;  %v9738_v33 = vld [vmem:[%s12510_s0 + $0x920] sm:$0xff] }
 0x59e   :  { %v6799_v37 = vadd.f32 %v11859_v14, %v6595_v36 }
 0x5a0   :  { %v6999_v38 = vmax.f32 %v6799_v37, 0.0 }
 0x5a1   :  { %v5440_v39 = vpop.f32.mrf.mxu2  ;;  %v5940_v40 = vpop.f32.mrf.mxu3 }
 0x5a2   :  { %v7199_v44 = vpack.c.bf16 %v6999_v38, %v6999_v38  ;;  %v6396_v46 = vmax.f32 %v5440_v39, %v5940_v40  ;;  %v4443_v47 = vpop.f32.mrf.mxu0  ;;  %v4943_v48 = vpop.f32.mrf.mxu1 }
 0x5a3   :  { %v6197_v54 = vmax.f32 %v4443_v47, %v4943_v48 }
 0x5a4   :  { %7400 = vst.msk [vmem:[%s12512_s3 + $0x288] sm:$0xf] %vm7237_vm1, %v7199_v44  ;;  %v6596_v51 = vmax.f32 %v6196_v45, %v6396_v46 }
 0x5a5   :  { %9136 = vmatmul.msk.bf16.gmra.mxu0 %vm2823_vm0, %v9536_v41  ;;  %9236 = vmatmul.msk.bf16.gmra.mxu1 %vm2823_vm0, %v9636_v42 }
 0x5a6   :  { %v6800_v52 = vadd.f32 %v11859_v14, %v6596_v51  ;;  %9336 = vmatmul.msk.bf16.gmra.mxu2 %vm2823_vm0, %v9736_v49  ;;  %9436 = vmatmul.msk.bf16.gmra.mxu3 %vm2823_vm0, %v9836_v50  ;;  %v9539_v51 = vld [vmem:[%s12510_s0 + $0x2e8] sm:$0xff] }
 0x5a8   :  { %v7000_v53 = vmax.f32 %v6800_v52, 0.0  ;;  %v9639_v52 = vld [vmem:[%s12510_s0 + $0x608] sm:$0xff] }
 0x5a9   :  { %v5443_v43 = vpop.f32.mrf.mxu2  ;;  %v5943_v55 = vpop.f32.mrf.mxu3 }
 0x5aa   :  { %v7200_v56 = vpack.c.bf16 %v7000_v53, %v7000_v53  ;;  %v6397_v58 = vmax.f32 %v5443_v43, %v5943_v55  ;;  %v4445_v59 = vpop.f32.mrf.mxu0  ;;  %v4945_v60 = vpop.f32.mrf.mxu1 }
 0x5ab   :  { %v6198_v5 = vmax.f32 %v4445_v59, %v4945_v60  ;;  %v9839_v59 = vld [vmem:[%s12510_s0 + $0xc48] sm:$0xff] }
 0x5ac   :  { %7401 = vst.msk [vmem:[%s12512_s3 + $0x28c] sm:$0xf] %vm7237_vm1, %v7200_v56  ;;  %v6597_v61 = vmax.f32 %v6197_v54, %v6397_v58  ;;  %v9739_v58 = vld [vmem:[%s12510_s0 + $0x928] sm:$0xff] }
 0x5ae   :  { %v6801_v62 = vadd.f32 %v11859_v14, %v6597_v61 }
 0x5b0   :  { %v7001_v63 = vmax.f32 %v6801_v62, 0.0 }
 0x5b1   :  { %v5445_v0 = vpop.f32.mrf.mxu2  ;;  %v5945_v1 = vpop.f32.mrf.mxu3 }
 0x5b2   :  { %v7201_v4 = vpack.c.bf16 %v7001_v63, %v7001_v63  ;;  %v6398_v6 = vmax.f32 %v5445_v0, %v5945_v1  ;;  %v4448_v7 = vpop.f32.mrf.mxu0  ;;  %v4948_v8 = vpop.f32.mrf.mxu1 }
 0x5b3   :  { %v6199_v13 = vmax.f32 %v4448_v7, %v4948_v8 }
 0x5b4   :  { %7402 = vst.msk [vmem:[%s12512_s3 + $0x290] sm:$0xf] %vm7237_vm1, %v7201_v4  ;;  %v6598_v11 = vmax.f32 %v6198_v5, %v6398_v6 }
 0x5b5   :  { %9137 = vmatmul.msk.bf16.gmra.mxu0 %vm2823_vm0, %v9537_v2  ;;  %9237 = vmatmul.msk.bf16.gmra.mxu1 %vm2823_vm0, %v9637_v3 }
 0x5b6   :  { %v6802_v57 = vadd.f32 %v11859_v14, %v6598_v11  ;;  %9337 = vmatmul.msk.bf16.gmra.mxu2 %vm2823_vm0, %v9737_v9  ;;  %9437 = vmatmul.msk.bf16.gmra.mxu3 %vm2823_vm0, %v9837_v10  ;;  %v9540_v11 = vld [vmem:[%s12510_s0 + $0x2f0] sm:$0xff] }
 0x5b8   :  { %v7002_v12 = vmax.f32 %v6802_v57, 0.0  ;;  %v9640_v57 = vld [vmem:[%s12510_s0 + $0x610] sm:$0xff] }
 0x5b9   :  { %v5448_v15 = vpop.f32.mrf.mxu2  ;;  %v5948_v16 = vpop.f32.mrf.mxu3 }
 0x5ba   :  { %v7202_v17 = vpack.c.bf16 %v7002_v12, %v7002_v12  ;;  %v6399_v18 = vmax.f32 %v5448_v15, %v5948_v16  ;;  %v4450_v19 = vpop.f32.mrf.mxu0  ;;  %v4950_v20 = vpop.f32.mrf.mxu1 }
 0x5bb   :  { %v6200_v29 = vmax.f32 %v4450_v19, %v4950_v20  ;;  %v9840_v19 = vld [vmem:[%s12510_s0 + $0xc50] sm:$0xff] }
 0x5bc   :  { %7403 = vst.msk [vmem:[%s12512_s3 + $0x294] sm:$0xf] %vm7237_vm1, %v7202_v17  ;;  %v6599_v21 = vmax.f32 %v6199_v13, %v6399_v18  ;;  %v9740_v18 = vld [vmem:[%s12510_s0 + $0x930] sm:$0xff] }
 0x5be   :  { %v6803_v22 = vadd.f32 %v11859_v14, %v6599_v21 }
 0x5c0   :  { %v7003_v23 = vmax.f32 %v6803_v22, 0.0 }
 0x5c1   :  { %v5450_v24 = vpop.f32.mrf.mxu2  ;;  %v5950_v25 = vpop.f32.mrf.mxu3 }
 0x5c2   :  { %v7203_v28 = vpack.c.bf16 %v7003_v23, %v7003_v23  ;;  %v6400_v30 = vmax.f32 %v5450_v24, %v5950_v25  ;;  %v4453_v31 = vpop.f32.mrf.mxu0  ;;  %v4953_v32 = vpop.f32.mrf.mxu1 }
 0x5c3   :  { %v6201_v38 = vmax.f32 %v4453_v31, %v4953_v32 }
 0x5c4   :  { %7404 = vst.msk [vmem:[%s12512_s3 + $0x298] sm:$0xf] %vm7237_vm1, %v7203_v28  ;;  %v6600_v35 = vmax.f32 %v6200_v29, %v6400_v30 }
 0x5c5   :  { %9138 = vmatmul.msk.bf16.gmra.mxu0 %vm2823_vm0, %v9538_v26  ;;  %9238 = vmatmul.msk.bf16.gmra.mxu1 %vm2823_vm0, %v9638_v27 }
 0x5c6   :  { %v6804_v36 = vadd.f32 %v11859_v14, %v6600_v35  ;;  %9338 = vmatmul.msk.bf16.gmra.mxu2 %vm2823_vm0, %v9738_v33  ;;  %9438 = vmatmul.msk.bf16.gmra.mxu3 %vm2823_vm0, %v9838_v34  ;;  %v9541_v35 = vld [vmem:[%s12510_s0 + $0x2f8] sm:$0xff] }
 0x5c8   :  { %v7004_v37 = vmax.f32 %v6804_v36, 0.0  ;;  %v9641_v36 = vld [vmem:[%s12510_s0 + $0x618] sm:$0xff] }
 0x5c9   :  { %v5453_v39 = vpop.f32.mrf.mxu2  ;;  %v5953_v40 = vpop.f32.mrf.mxu3 }
 0x5ca   :  { %v7204_v41 = vpack.c.bf16 %v7004_v37, %v7004_v37  ;;  %v6401_v42 = vmax.f32 %v5453_v39, %v5953_v40  ;;  %v4455_v44 = vpop.f32.mrf.mxu0  ;;  %v4955_v45 = vpop.f32.mrf.mxu1 }
 0x5cb   :  { %v6202_v54 = vmax.f32 %v4455_v44, %v4955_v45  ;;  %v9841_v44 = vld [vmem:[%s12510_s0 + $0xc58] sm:$0xff] }
 0x5cc   :  { %7405 = vst.msk [vmem:[%s12512_s3 + $0x29c] sm:$0xf] %vm7237_vm1, %v7204_v41  ;;  %v6601_v46 = vmax.f32 %v6201_v38, %v6401_v42  ;;  %v9741_v42 = vld [vmem:[%s12510_s0 + $0x938] sm:$0xff] }
 0x5ce   :  { %v6805_v47 = vadd.f32 %v11859_v14, %v6601_v46 }
 0x5d0   :  { %v7005_v48 = vmax.f32 %v6805_v47, 0.0 }
 0x5d1   :  { %v5455_v49 = vpop.f32.mrf.mxu2  ;;  %v5955_v50 = vpop.f32.mrf.mxu3 }
 0x5d2   :  { %v7205_v53 = vpack.c.bf16 %v7005_v48, %v7005_v48  ;;  %v6402_v43 = vmax.f32 %v5455_v49, %v5955_v50  ;;  %v4458_v55 = vpop.f32.mrf.mxu0  ;;  %v4958_v56 = vpop.f32.mrf.mxu1 }
 0x5d3   :  { %v6203_v63 = vmax.f32 %v4458_v55, %v4958_v56 }
 0x5d4   :  { %7406 = vst.msk [vmem:[%s12512_s3 + $0x2a0] sm:$0xf] %vm7237_vm1, %v7205_v53  ;;  %v6602_v60 = vmax.f32 %v6202_v54, %v6402_v43 }
 0x5d5   :  { %9139 = vmatmul.msk.bf16.gmra.mxu0 %vm2823_vm0, %v9539_v51  ;;  %9239 = vmatmul.msk.bf16.gmra.mxu1 %vm2823_vm0, %v9639_v52 }
 0x5d6   :  { %v6806_v61 = vadd.f32 %v11859_v14, %v6602_v60  ;;  %9339 = vmatmul.msk.bf16.gmra.mxu2 %vm2823_vm0, %v9739_v58  ;;  %9439 = vmatmul.msk.bf16.gmra.mxu3 %vm2823_vm0, %v9839_v59  ;;  %v9542_v60 = vld [vmem:[%s12510_s0 + $0x300] sm:$0xff] }
 0x5d8   :  { %v7006_v62 = vmax.f32 %v6806_v61, 0.0  ;;  %v9642_v61 = vld [vmem:[%s12510_s0 + $0x620] sm:$0xff] }
 0x5d9   :  { %v5458_v0 = vpop.f32.mrf.mxu2  ;;  %v5958_v1 = vpop.f32.mrf.mxu3 }
 0x5da   :  { %v7206_v2 = vpack.c.bf16 %v7006_v62, %v7006_v62  ;;  %v6403_v3 = vmax.f32 %v5458_v0, %v5958_v1  ;;  %v4460_v4 = vpop.f32.mrf.mxu0  ;;  %v4960_v5 = vpop.f32.mrf.mxu1 }
 0x5db   :  { %v6204_v13 = vmax.f32 %v4460_v4, %v4960_v5  ;;  %v9842_v4 = vld [vmem:[%s12510_s0 + $0xc60] sm:$0xff] }
 0x5dc   :  { %7407 = vst.msk [vmem:[%s12512_s3 + $0x2a4] sm:$0xf] %vm7237_vm1, %v7206_v2  ;;  %v6603_v6 = vmax.f32 %v6203_v63, %v6403_v3  ;;  %v9742_v3 = vld [vmem:[%s12510_s0 + $0x940] sm:$0xff] }
 0x5de   :  { %v6807_v7 = vadd.f32 %v11859_v14, %v6603_v6 }
 0x5e0   :  { %v7007_v8 = vmax.f32 %v6807_v7, 0.0 }
 0x5e1   :  { %v5460_v9 = vpop.f32.mrf.mxu2  ;;  %v5960_v10 = vpop.f32.mrf.mxu3 }
 0x5e2   :  { %v7207_v12 = vpack.c.bf16 %v7007_v8, %v7007_v8  ;;  %v6404_v15 = vmax.f32 %v5460_v9, %v5960_v10  ;;  %v4463_v16 = vpop.f32.mrf.mxu0  ;;  %v4963_v17 = vpop.f32.mrf.mxu1 }
 0x5e3   :  { %v6205_v23 = vmax.f32 %v4463_v16, %v4963_v17 }
 0x5e4   :  { %7408 = vst.msk [vmem:[%s12512_s3 + $0x2a8] sm:$0xf] %vm7237_vm1, %v7207_v12  ;;  %v6604_v20 = vmax.f32 %v6204_v13, %v6404_v15 }
 0x5e5   :  { %9140 = vmatmul.msk.bf16.gmra.mxu0 %vm2823_vm0, %v9540_v11  ;;  %9240 = vmatmul.msk.bf16.gmra.mxu1 %vm2823_vm0, %v9640_v57 }
 0x5e6   :  { %v6808_v21 = vadd.f32 %v11859_v14, %v6604_v20  ;;  %9340 = vmatmul.msk.bf16.gmra.mxu2 %vm2823_vm0, %v9740_v18  ;;  %9440 = vmatmul.msk.bf16.gmra.mxu3 %vm2823_vm0, %v9840_v19  ;;  %v9543_v20 = vld [vmem:[%s12510_s0 + $0x308] sm:$0xff] }
 0x5e8   :  { %v7008_v22 = vmax.f32 %v6808_v21, 0.0  ;;  %v9643_v21 = vld [vmem:[%s12510_s0 + $0x628] sm:$0xff] }
 0x5e9   :  { %v5463_v24 = vpop.f32.mrf.mxu2  ;;  %v5963_v25 = vpop.f32.mrf.mxu3 }
 0x5ea   :  { %v7208_v26 = vpack.c.bf16 %v7008_v22, %v7008_v22  ;;  %v6405_v27 = vmax.f32 %v5463_v24, %v5963_v25  ;;  %v4465_v28 = vpop.f32.mrf.mxu0  ;;  %v4965_v29 = vpop.f32.mrf.mxu1 }
 0x5eb   :  { %v6206_v38 = vmax.f32 %v4465_v28, %v4965_v29  ;;  %v9843_v28 = vld [vmem:[%s12510_s0 + $0xc68] sm:$0xff] }
 0x5ec   :  { %7409 = vst.msk [vmem:[%s12512_s3 + $0x2ac] sm:$0xf] %vm7237_vm1, %v7208_v26  ;;  %v6605_v30 = vmax.f32 %v6205_v23, %v6405_v27  ;;  %v9743_v27 = vld [vmem:[%s12510_s0 + $0x948] sm:$0xff] }
 0x5ee   :  { %v6809_v31 = vadd.f32 %v11859_v14, %v6605_v30 }
 0x5f0   :  { %v7009_v32 = vmax.f32 %v6809_v31, 0.0 }
 0x5f1   :  { %v5465_v33 = vpop.f32.mrf.mxu2  ;;  %v5965_v34 = vpop.f32.mrf.mxu3 }
 0x5f2   :  { %v7209_v37 = vpack.c.bf16 %v7009_v32, %v7009_v32  ;;  %v6406_v39 = vmax.f32 %v5465_v33, %v5965_v34  ;;  %v4468_v40 = vpop.f32.mrf.mxu0  ;;  %v4968_v41 = vpop.f32.mrf.mxu1 }
 0x5f3   :  { %v6207_v48 = vmax.f32 %v4468_v40, %v4968_v41 }
 0x5f4   :  { %7410 = vst.msk [vmem:[%s12512_s3 + $0x2b0] sm:$0xf] %vm7237_vm1, %v7209_v37  ;;  %v6606_v45 = vmax.f32 %v6206_v38, %v6406_v39 }
 0x5f5   :  { %9141 = vmatmul.msk.bf16.gmra.mxu0 %vm2823_vm0, %v9541_v35  ;;  %9241 = vmatmul.msk.bf16.gmra.mxu1 %vm2823_vm0, %v9641_v36 }
 0x5f6   :  { %v6810_v46 = vadd.f32 %v11859_v14, %v6606_v45  ;;  %9341 = vmatmul.msk.bf16.gmra.mxu2 %vm2823_vm0, %v9741_v42  ;;  %9441 = vmatmul.msk.bf16.gmra.mxu3 %vm2823_vm0, %v9841_v44  ;;  %v12313_v14 = vld [vmem:[%s12511_s2] ss:$0 sm:$0xff]  ;;  %v9544_v45 = vld [vmem:[%s12510_s0 + $0x310] sm:$0xff] }
 0x5f8   :  { %v7010_v47 = vmax.f32 %v6810_v46, 0.0  ;;  %v9644_v46 = vld [vmem:[%s12510_s0 + $0x630] sm:$0xff] }
 0x5f9   :  { %v5468_v49 = vpop.f32.mrf.mxu2  ;;  %v5968_v50 = vpop.f32.mrf.mxu3 }
 0x5fa   :  { %v7210_v51 = vpack.c.bf16 %v7010_v47, %v7010_v47  ;;  %v6407_v52 = vmax.f32 %v5468_v49, %v5968_v50  ;;  %v4470_v53 = vpop.f32.mrf.mxu0  ;;  %v4970_v54 = vpop.f32.mrf.mxu1 }
 0x5fb   :  { %v6208_v63 = vmax.f32 %v4470_v53, %v4970_v54  ;;  %v9844_v53 = vld [vmem:[%s12510_s0 + $0xc70] sm:$0xff] }
 0x5fc   :  { %7411 = vst.msk [vmem:[%s12512_s3 + $0x2b4] sm:$0xf] %vm7237_vm1, %v7210_v51  ;;  %v6607_v43 = vmax.f32 %v6207_v48, %v6407_v52  ;;  %v9744_v52 = vld [vmem:[%s12510_s0 + $0x950] sm:$0xff] }
 0x5fe   :  { %v6811_v55 = vadd.f32 %v12313_v14, %v6607_v43 }
 0x600   :  { %v7011_v56 = vmax.f32 %v6811_v55, 0.0 }
 0x601   :  { %v5470_v58 = vpop.f32.mrf.mxu2  ;;  %v5970_v59 = vpop.f32.mrf.mxu3 }
 0x602   :  { %v7211_v62 = vpack.c.bf16 %v7011_v56, %v7011_v56  ;;  %v6408_v0 = vmax.f32 %v5470_v58, %v5970_v59  ;;  %v4473_v1 = vpop.f32.mrf.mxu0  ;;  %v4973_v2 = vpop.f32.mrf.mxu1 }
 0x603   :  { %v6209_v8 = vmax.f32 %v4473_v1, %v4973_v2 }
 0x604   :  { %7412 = vst.msk [vmem:[%s12512_s3 + $0x2b8] sm:$0xf] %vm7237_vm1, %v7211_v62  ;;  %v6608_v5 = vmax.f32 %v6208_v63, %v6408_v0 }
 0x605   :  { %9142 = vmatmul.msk.bf16.gmra.mxu0 %vm2823_vm0, %v9542_v60  ;;  %9242 = vmatmul.msk.bf16.gmra.mxu1 %vm2823_vm0, %v9642_v61 }
 0x606   :  { %v6812_v6 = vadd.f32 %v12313_v14, %v6608_v5  ;;  %9342 = vmatmul.msk.bf16.gmra.mxu2 %vm2823_vm0, %v9742_v3  ;;  %9442 = vmatmul.msk.bf16.gmra.mxu3 %vm2823_vm0, %v9842_v4  ;;  %v9545_v5 = vld [vmem:[%s12510_s0 + $0x318] sm:$0xff] }
 0x608   :  { %v7012_v7 = vmax.f32 %v6812_v6, 0.0  ;;  %v9645_v6 = vld [vmem:[%s12510_s0 + $0x638] sm:$0xff] }
 0x609   :  { %v5473_v9 = vpop.f32.mrf.mxu2  ;;  %v5973_v10 = vpop.f32.mrf.mxu3 }
 0x60a   :  { %v7212_v11 = vpack.c.bf16 %v7012_v7, %v7012_v7  ;;  %v6409_v57 = vmax.f32 %v5473_v9, %v5973_v10  ;;  %v4475_v12 = vpop.f32.mrf.mxu0  ;;  %v4975_v13 = vpop.f32.mrf.mxu1 }
 0x60b   :  { %v6210_v23 = vmax.f32 %v4475_v12, %v4975_v13  ;;  %v9845_v12 = vld [vmem:[%s12510_s0 + $0xc78] sm:$0xff] }
 0x60c   :  { %7413 = vst.msk [vmem:[%s12512_s3 + $0x2bc] sm:$0xf] %vm7237_vm1, %v7212_v11  ;;  %v6609_v15 = vmax.f32 %v6209_v8, %v6409_v57  ;;  %v9745_v57 = vld [vmem:[%s12510_s0 + $0x958] sm:$0xff] }
 0x60e   :  { %v6813_v16 = vadd.f32 %v12313_v14, %v6609_v15 }
 0x610   :  { %v7013_v17 = vmax.f32 %v6813_v16, 0.0 }
 0x611   :  { %v5475_v18 = vpop.f32.mrf.mxu2  ;;  %v5975_v19 = vpop.f32.mrf.mxu3 }
 0x612   :  { %v7213_v22 = vpack.c.bf16 %v7013_v17, %v7013_v17  ;;  %v6410_v24 = vmax.f32 %v5475_v18, %v5975_v19  ;;  %v4478_v25 = vpop.f32.mrf.mxu0  ;;  %v4978_v26 = vpop.f32.mrf.mxu1 }
 0x613   :  { %v6211_v32 = vmax.f32 %v4478_v25, %v4978_v26 }
 0x614   :  { %7414 = vst.msk [vmem:[%s12512_s3 + $0x2c0] sm:$0xf] %vm7237_vm1, %v7213_v22  ;;  %v6610_v29 = vmax.f32 %v6210_v23, %v6410_v24 }
 0x615   :  { %9143 = vmatmul.msk.bf16.gmra.mxu0 %vm2823_vm0, %v9543_v20  ;;  %9243 = vmatmul.msk.bf16.gmra.mxu1 %vm2823_vm0, %v9643_v21 }
 0x616   :  { %v6814_v30 = vadd.f32 %v12313_v14, %v6610_v29  ;;  %9343 = vmatmul.msk.bf16.gmra.mxu2 %vm2823_vm0, %v9743_v27  ;;  %9443 = vmatmul.msk.bf16.gmra.mxu3 %vm2823_vm0, %v9843_v28 }
 0x618   :  { %v7014_v31 = vmax.f32 %v6814_v30, 0.0 }
 0x619   :  { %v5478_v33 = vpop.f32.mrf.mxu2  ;;  %v5978_v34 = vpop.f32.mrf.mxu3 }
 0x61a   :  { %v7214_v35 = vpack.c.bf16 %v7014_v31, %v7014_v31  ;;  %v6411_v36 = vmax.f32 %v5478_v33, %v5978_v34  ;;  %v4480_v37 = vpop.f32.mrf.mxu0  ;;  %v4980_v38 = vpop.f32.mrf.mxu1 }
 0x61b   :  { %v6212_v48 = vmax.f32 %v4480_v37, %v4980_v38 }
 0x61c   :  { %7415 = vst.msk [vmem:[%s12512_s3 + $0x2c4] sm:$0xf] %vm7237_vm1, %v7214_v35  ;;  %v6611_v39 = vmax.f32 %v6211_v32, %v6411_v36 }
 0x61e   :  { %v6815_v40 = vadd.f32 %v12313_v14, %v6611_v39 }
 0x620   :  { %v7015_v41 = vmax.f32 %v6815_v40, 0.0 }
 0x621   :  { %v5480_v42 = vpop.f32.mrf.mxu2  ;;  %v5980_v44 = vpop.f32.mrf.mxu3 }
 0x622   :  { %v7215_v47 = vpack.c.bf16 %v7015_v41, %v7015_v41  ;;  %v6412_v49 = vmax.f32 %v5480_v42, %v5980_v44  ;;  %v4483_v50 = vpop.f32.mrf.mxu0  ;;  %v4983_v51 = vpop.f32.mrf.mxu1 }
 0x623   :  { %v6213_v56 = vmax.f32 %v4483_v50, %v4983_v51 }
 0x624   :  { %7416 = vst.msk [vmem:[%s12512_s3 + $0x2c8] sm:$0xf] %vm7237_vm1, %v7215_v47  ;;  %v6612_v54 = vmax.f32 %v6212_v48, %v6412_v49 }
 0x625   :  { %9144 = vmatmul.msk.bf16.gmra.mxu0 %vm2823_vm0, %v9544_v45  ;;  %9244 = vmatmul.msk.bf16.gmra.mxu1 %vm2823_vm0, %v9644_v46 }
 0x626   :  { %v6816_v43 = vadd.f32 %v12313_v14, %v6612_v54  ;;  %9344 = vmatmul.msk.bf16.gmra.mxu2 %vm2823_vm0, %v9744_v52  ;;  %9444 = vmatmul.msk.bf16.gmra.mxu3 %vm2823_vm0, %v9844_v53 }
 0x628   :  { %v7016_v55 = vmax.f32 %v6816_v43, 0.0 }
 0x629   :  { %v5483_v58 = vpop.f32.mrf.mxu2  ;;  %v5983_v59 = vpop.f32.mrf.mxu3 }
 0x62a   :  { %v7216_v60 = vpack.c.bf16 %v7016_v55, %v7016_v55  ;;  %v6413_v61 = vmax.f32 %v5483_v58, %v5983_v59  ;;  %v4485_v62 = vpop.f32.mrf.mxu0  ;;  %v4985_v63 = vpop.f32.mrf.mxu1 }
 0x62b   :  { %v6214_v8 = vmax.f32 %v4485_v62, %v4985_v63 }
 0x62c   :  { %7417 = vst.msk [vmem:[%s12512_s3 + $0x2cc] sm:$0xf] %vm7237_vm1, %v7216_v60  ;;  %v6613_v0 = vmax.f32 %v6213_v56, %v6413_v61 }
 0x62e   :  { %v6817_v1 = vadd.f32 %v12313_v14, %v6613_v0 }
 0x630   :  { %v7017_v2 = vmax.f32 %v6817_v1, 0.0 }
 0x631   :  { %v5485_v3 = vpop.f32.mrf.mxu2  ;;  %v5985_v4 = vpop.f32.mrf.mxu3 }
 0x632   :  { %v7217_v7 = vpack.c.bf16 %v7017_v2, %v7017_v2  ;;  %v6414_v9 = vmax.f32 %v5485_v3, %v5985_v4  ;;  %v4488_v10 = vpop.f32.mrf.mxu0  ;;  %v4988_v11 = vpop.f32.mrf.mxu1 }
 0x633   :  { %v6215_v17 = vmax.f32 %v4488_v10, %v4988_v11 }
 0x634   :  { %7418 = vst.msk [vmem:[%s12512_s3 + $0x2d0] sm:$0xf] %vm7237_vm1, %v7217_v7  ;;  %v6614_v13 = vmax.f32 %v6214_v8, %v6414_v9 }
 0x635   :  { %9145 = vmatmul.msk.bf16.gmra.mxu0 %vm2823_vm0, %v9545_v5  ;;  %9245 = vmatmul.msk.bf16.gmra.mxu1 %vm2823_vm0, %v9645_v6 }
 0x636   :  { %v6818_v15 = vadd.f32 %v12313_v14, %v6614_v13  ;;  %9345 = vmatmul.msk.bf16.gmra.mxu2 %vm2823_vm0, %v9745_v57  ;;  %9445 = vmatmul.msk.bf16.gmra.mxu3 %vm2823_vm0, %v9845_v12 }
 0x638   :  { %v7018_v16 = vmax.f32 %v6818_v15, 0.0 }
 0x639   :  { %v5488_v18 = vpop.f32.mrf.mxu2  ;;  %v5988_v19 = vpop.f32.mrf.mxu3 }
 0x63a   :  { %v7218_v20 = vpack.c.bf16 %v7018_v16, %v7018_v16  ;;  %v6415_v21 = vmax.f32 %v5488_v18, %v5988_v19  ;;  %v4490_v22 = vpop.f32.mrf.mxu0  ;;  %v4990_v23 = vpop.f32.mrf.mxu1 }
 0x63b   :  { %v6216_v30 = vmax.f32 %v4490_v22, %v4990_v23 }
 0x63c   :  { %7419 = vst.msk [vmem:[%s12512_s3 + $0x2d4] sm:$0xf] %vm7237_vm1, %v7218_v20  ;;  %v6615_v24 = vmax.f32 %v6215_v17, %v6415_v21 }
 0x63e   :  { %v6819_v25 = vadd.f32 %v12313_v14, %v6615_v24 }
 0x640   :  { %v7019_v26 = vmax.f32 %v6819_v25, 0.0 }
 0x641   :  { %v5490_v27 = vpop.f32.mrf.mxu2  ;;  %v5990_v28 = vpop.f32.mrf.mxu3 }
 0x642   :  { %v7219_v29 = vpack.c.bf16 %v7019_v26, %v7019_v26  ;;  %v6416_v31 = vmax.f32 %v5490_v27, %v5990_v28  ;;  %v4493_v32 = vpop.f32.mrf.mxu0  ;;  %v4993_v33 = vpop.f32.mrf.mxu1 }
 0x643   :  { %v6217_v37 = vmax.f32 %v4493_v32, %v4993_v33 }
 0x644   :  { %7420 = vst.msk [vmem:[%s12512_s3 + $0x2d8] sm:$0xf] %vm7237_vm1, %v7219_v29  ;;  %v6616_v34 = vmax.f32 %v6216_v30, %v6416_v31 }
 0x646   :  { %v6820_v35 = vadd.f32 %v12313_v14, %v6616_v34 }
 0x648   :  { %v7020_v36 = vmax.f32 %v6820_v35, 0.0 }
 0x649   :  { %v5493_v38 = vpop.f32.mrf.mxu2  ;;  %v5993_v39 = vpop.f32.mrf.mxu3 }
 0x64a   :  { %v7220_v40 = vpack.c.bf16 %v7020_v36, %v7020_v36  ;;  %v6417_v41 = vmax.f32 %v5493_v38, %v5993_v39  ;;  %v4495_v42 = vpop.f32.mrf.mxu0  ;;  %v4995_v44 = vpop.f32.mrf.mxu1 }
 0x64b   :  { %v6218_v51 = vmax.f32 %v4495_v42, %v4995_v44 }
 0x64c   :  { %7421 = vst.msk [vmem:[%s12512_s3 + $0x2dc] sm:$0xf] %vm7237_vm1, %v7220_v40  ;;  %v6617_v45 = vmax.f32 %v6217_v37, %v6417_v41 }
 0x64e   :  { %v6821_v46 = vadd.f32 %v12313_v14, %v6617_v45 }
 0x650   :  { %v7021_v47 = vmax.f32 %v6821_v46, 0.0 }
 0x651   :  { %v5495_v48 = vpop.f32.mrf.mxu2  ;;  %v5995_v49 = vpop.f32.mrf.mxu3 }
 0x652   :  { %v7221_v50 = vpack.c.bf16 %v7021_v47, %v7021_v47  ;;  %v6418_v52 = vmax.f32 %v5495_v48, %v5995_v49  ;;  %v4498_v53 = vpop.f32.mrf.mxu0  ;;  %v4998_v54 = vpop.f32.mrf.mxu1 }
 0x653   :  { %v6219_v58 = vmax.f32 %v4498_v53, %v4998_v54 }
 0x654   :  { %7422 = vst.msk [vmem:[%s12512_s3 + $0x2e0] sm:$0xf] %vm7237_vm1, %v7221_v50  ;;  %v6618_v43 = vmax.f32 %v6218_v51, %v6418_v52 }
 0x656   :  { %v6822_v55 = vadd.f32 %v12313_v14, %v6618_v43 }
 0x658   :  { %v7022_v56 = vmax.f32 %v6822_v55, 0.0 }
 0x659   :  { %v5498_v59 = vpop.f32.mrf.mxu2  ;;  %v5998_v60 = vpop.f32.mrf.mxu3 }
 0x65a   :  { %v7222_v61 = vpack.c.bf16 %v7022_v56, %v7022_v56  ;;  %v6419_v62 = vmax.f32 %v5498_v59, %v5998_v60  ;;  %v4500_v63 = vpop.f32.mrf.mxu0  ;;  %v5000_v0 = vpop.f32.mrf.mxu1 }
 0x65b   :  { %v6220_v7 = vmax.f32 %v4500_v63, %v5000_v0 }
 0x65c   :  { %7423 = vst.msk [vmem:[%s12512_s3 + $0x2e4] sm:$0xf] %vm7237_vm1, %v7222_v61  ;;  %v6619_v1 = vmax.f32 %v6219_v58, %v6419_v62 }
 0x65e   :  { %v6823_v2 = vadd.f32 %v12313_v14, %v6619_v1 }
 0x660   :  { %v7023_v3 = vmax.f32 %v6823_v2, 0.0 }
 0x661   :  { %v5500_v4 = vpop.f32.mrf.mxu2  ;;  %v6000_v5 = vpop.f32.mrf.mxu3 }
 0x662   :  { %v7223_v6 = vpack.c.bf16 %v7023_v3, %v7023_v3  ;;  %v6420_v8 = vmax.f32 %v5500_v4, %v6000_v5  ;;  %v4503_v9 = vpop.f32.mrf.mxu0  ;;  %v5003_v10 = vpop.f32.mrf.mxu1 }
 0x663   :  { %v6221_v13 = vmax.f32 %v4503_v9, %v5003_v10 }
 0x664   :  { %7424 = vst.msk [vmem:[%s12512_s3 + $0x2e8] sm:$0xf] %vm7237_vm1, %v7223_v6  ;;  %v6620_v11 = vmax.f32 %v6220_v7, %v6420_v8 }
 0x666   :  { %v6824_v57 = vadd.f32 %v12313_v14, %v6620_v11 }
 0x668   :  { %v7024_v12 = vmax.f32 %v6824_v57, 0.0 }
 0x669   :  { %v5503_v15 = vpop.f32.mrf.mxu2  ;;  %v6003_v16 = vpop.f32.mrf.mxu3 }
 0x66a   :  { %v7224_v17 = vpack.c.bf16 %v7024_v12, %v7024_v12  ;;  %v6421_v18 = vmax.f32 %v5503_v15, %v6003_v16  ;;  %v4505_v19 = vpop.f32.mrf.mxu0  ;;  %v5005_v20 = vpop.f32.mrf.mxu1 }
 0x66b   :  { %v6222_v27 = vmax.f32 %v4505_v19, %v5005_v20 }
 0x66c   :  { %7425 = vst.msk [vmem:[%s12512_s3 + $0x2ec] sm:$0xf] %vm7237_vm1, %v7224_v17  ;;  %v6621_v21 = vmax.f32 %v6221_v13, %v6421_v18 }
 0x66e   :  { %v6825_v22 = vadd.f32 %v12313_v14, %v6621_v21 }
 0x670   :  { %v7025_v23 = vmax.f32 %v6825_v22, 0.0 }
 0x671   :  { %v5505_v24 = vpop.f32.mrf.mxu2  ;;  %v6005_v25 = vpop.f32.mrf.mxu3 }
 0x672   :  { %v7225_v26 = vpack.c.bf16 %v7025_v23, %v7025_v23  ;;  %v6422_v28 = vmax.f32 %v5505_v24, %v6005_v25  ;;  %v4508_v29 = vpop.f32.mrf.mxu0  ;;  %v5008_v30 = vpop.f32.mrf.mxu1 }
 0x673   :  { %v6223_v34 = vmax.f32 %v4508_v29, %v5008_v30 }
 0x674   :  { %7426 = vst.msk [vmem:[%s12512_s3 + $0x2f0] sm:$0xf] %vm7237_vm1, %v7225_v26  ;;  %v6622_v31 = vmax.f32 %v6222_v27, %v6422_v28 }
 0x676   :  { %v6826_v32 = vadd.f32 %v12313_v14, %v6622_v31 }
 0x678   :  { %v7026_v33 = vmax.f32 %v6826_v32, 0.0 }
 0x679   :  { %v5508_v35 = vpop.f32.mrf.mxu2  ;;  %v6008_v36 = vpop.f32.mrf.mxu3 }
 0x67a   :  { %v7226_v37 = vpack.c.bf16 %v7026_v33, %v7026_v33  ;;  %v6423_v38 = vmax.f32 %v5508_v35, %v6008_v36  ;;  %v4510_v39 = vpop.f32.mrf.mxu0  ;;  %v5010_v40 = vpop.f32.mrf.mxu1 }
 0x67b   :  { %v6224_v48 = vmax.f32 %v4510_v39, %v5010_v40 }
 0x67c   :  { %7427 = vst.msk [vmem:[%s12512_s3 + $0x2f4] sm:$0xf] %vm7237_vm1, %v7226_v37  ;;  %v6623_v41 = vmax.f32 %v6223_v34, %v6423_v38 }
 0x67e   :  { %v6827_v42 = vadd.f32 %v12313_v14, %v6623_v41 }
 0x680   :  { %v7027_v44 = vmax.f32 %v6827_v42, 0.0 }
 0x681   :  { %v5510_v45 = vpop.f32.mrf.mxu2  ;;  %v6010_v46 = vpop.f32.mrf.mxu3 }
 0x682   :  { %v7227_v47 = vpack.c.bf16 %v7027_v44, %v7027_v44  ;;  %v6424_v49 = vmax.f32 %v5510_v45, %v6010_v46  ;;  %v4513_v50 = vpop.f32.mrf.mxu0  ;;  %v5013_v51 = vpop.f32.mrf.mxu1 }
 0x683   :  { %v6225_v43 = vmax.f32 %v4513_v50, %v5013_v51 }
 0x684   :  { %7428 = vst.msk [vmem:[%s12512_s3 + $0x2f8] sm:$0xf] %vm7237_vm1, %v7227_v47  ;;  %v6624_v52 = vmax.f32 %v6224_v48, %v6424_v49 }
 0x686   :  { %v6828_v53 = vadd.f32 %v12313_v14, %v6624_v52 }
 0x688   :  { %v7028_v54 = vmax.f32 %v6828_v53, 0.0 }
 0x689   :  { %v5513_v55 = vpop.f32.mrf.mxu2  ;;  %v6013_v56 = vpop.f32.mrf.mxu3 }
 0x68a   :  { %v7228_v58 = vpack.c.bf16 %v7028_v54, %v7028_v54  ;;  %v6425_v59 = vmax.f32 %v5513_v55, %v6013_v56  ;;  %v4515_v60 = vpop.f32.mrf.mxu0  ;;  %v5015_v61 = vpop.f32.mrf.mxu1 }
 0x68b   :  { %v6226_v4 = vmax.f32 %v4515_v60, %v5015_v61 }
 0x68c   :  { %7429 = vst.msk [vmem:[%s12512_s3 + $0x2fc] sm:$0xf] %vm7237_vm1, %v7228_v58  ;;  %v6625_v62 = vmax.f32 %v6225_v43, %v6425_v59 }
 0x68e   :  { %v6829_v63 = vadd.f32 %v12313_v14, %v6625_v62 }
 0x690   :  { %v7029_v0 = vmax.f32 %v6829_v63, 0.0 }
 0x691   :  { %v5515_v1 = vpop.f32.mrf.mxu2  ;;  %v6015_v2 = vpop.f32.mrf.mxu3 }
 0x692   :  { %v7229_v3 = vpack.c.bf16 %v7029_v0, %v7029_v0  ;;  %v6426_v5 = vmax.f32 %v5515_v1, %v6015_v2  ;;  %v4518_v6 = vpop.f32.mrf.mxu0  ;;  %v5018_v7 = vpop.f32.mrf.mxu1 }
 0x693   :  { %v6227_v11 = vmax.f32 %v4518_v6, %v5018_v7 }
 0x694   :  { %7430 = vst.msk [vmem:[%s12512_s3 + $0x300] sm:$0xf] %vm7237_vm1, %v7229_v3  ;;  %v6626_v8 = vmax.f32 %v6226_v4, %v6426_v5 }
 0x696   :  { %v6830_v9 = vadd.f32 %v12313_v14, %v6626_v8 }
 0x698   :  { %v7030_v10 = vmax.f32 %v6830_v9, 0.0 }
 0x699   :  { %v5518_v57 = vpop.f32.mrf.mxu2  ;;  %v6018_v12 = vpop.f32.mrf.mxu3 }
 0x69a   :  { %v7230_v13 = vpack.c.bf16 %v7030_v10, %v7030_v10  ;;  %v6427_v15 = vmax.f32 %v5518_v57, %v6018_v12  ;;  %v4520_v16 = vpop.f32.mrf.mxu0  ;;  %v5020_v17 = vpop.f32.mrf.mxu1 }
 0x69b   :  { %v6228_v24 = vmax.f32 %v4520_v16, %v5020_v17 }
 0x69c   :  { %7431 = vst.msk [vmem:[%s12512_s3 + $0x304] sm:$0xf] %vm7237_vm1, %v7230_v13  ;;  %v6627_v18 = vmax.f32 %v6227_v11, %v6427_v15 }
 0x69e   :  { %v6831_v19 = vadd.f32 %v12313_v14, %v6627_v18 }
 0x6a0   :  { %v7031_v20 = vmax.f32 %v6831_v19, 0.0 }
 0x6a1   :  { %v5520_v21 = vpop.f32.mrf.mxu2  ;;  %v6020_v22 = vpop.f32.mrf.mxu3 }
 0x6a2   :  { %v7231_v23 = vpack.c.bf16 %v7031_v20, %v7031_v20  ;;  %v6428_v25 = vmax.f32 %v5520_v21, %v6020_v22  ;;  %v4523_v26 = vpop.f32.mrf.mxu0  ;;  %v5023_v27 = vpop.f32.mrf.mxu1 }
 0x6a3   :  { %v6229_v31 = vmax.f32 %v4523_v26, %v5023_v27 }
 0x6a4   :  { %7432 = vst.msk [vmem:[%s12512_s3 + $0x308] sm:$0xf] %vm7237_vm1, %v7231_v23  ;;  %v6628_v28 = vmax.f32 %v6228_v24, %v6428_v25 }
 0x6a6   :  { %v6832_v29 = vadd.f32 %v12313_v14, %v6628_v28 }
 0x6a8   :  { %v7032_v30 = vmax.f32 %v6832_v29, 0.0 }
 0x6a9   :  { %v5523_v32 = vpop.f32.mrf.mxu2  ;;  %v6023_v33 = vpop.f32.mrf.mxu3 }
 0x6aa   :  { %v7232_v34 = vpack.c.bf16 %v7032_v30, %v7032_v30  ;;  %v6429_v35 = vmax.f32 %v5523_v32, %v6023_v33  ;;  %v4525_v36 = vpop.f32.mrf.mxu0  ;;  %v5025_v37 = vpop.f32.mrf.mxu1 }
 0x6ab   :  { %v6230_v45 = vmax.f32 %v4525_v36, %v5025_v37 }
 0x6ac   :  { %7433 = vst.msk [vmem:[%s12512_s3 + $0x30c] sm:$0xf] %vm7237_vm1, %v7232_v34  ;;  %v6629_v38 = vmax.f32 %v6229_v31, %v6429_v35 }
 0x6ae   :  { %v6833_v39 = vadd.f32 %v12313_v14, %v6629_v38 }
 0x6b0   :  { %v7033_v40 = vmax.f32 %v6833_v39, 0.0 }
 0x6b1   :  { %v5525_v41 = vpop.f32.mrf.mxu2  ;;  %v6025_v42 = vpop.f32.mrf.mxu3 }
 0x6b2   :  { %v7233_v44 = vpack.c.bf16 %v7033_v40, %v7033_v40  ;;  %v6430_v46 = vmax.f32 %v5525_v41, %v6025_v42  ;;  %v4528_v48 = vpop.f32.mrf.mxu0  ;;  %v5028_v49 = vpop.f32.mrf.mxu1 }
 0x6b3   :  { %v6231_v52 = vmax.f32 %v4528_v48, %v5028_v49 }
 0x6b4   :  { %7434 = vst.msk [vmem:[%s12512_s3 + $0x310] sm:$0xf] %vm7237_vm1, %v7233_v44  ;;  %v6630_v47 = vmax.f32 %v6230_v45, %v6430_v46 }
 0x6b6   :  { %v6834_v50 = vadd.f32 %v12313_v14, %v6630_v47 }
 0x6b8   :  { %v7034_v51 = vmax.f32 %v6834_v50, 0.0 }
 0x6b9   :  { %v5528_v53 = vpop.f32.mrf.mxu2  ;;  %v6028_v54 = vpop.f32.mrf.mxu3 }
 0x6ba   :  { %v7234_v43 = vpack.c.bf16 %v7034_v51, %v7034_v51  ;;  %v6431_v55 = vmax.f32 %v5528_v53, %v6028_v54  ;;  %v4530_v59 = vpop.f32.mrf.mxu0  ;;  %v5030_v60 = vpop.f32.mrf.mxu1 }
 0x6bb   :  { %v6232_v1 = vmax.f32 %v4530_v59, %v5030_v60 }
 0x6bc   :  { %7435 = vst.msk [vmem:[%s12512_s3 + $0x314] sm:$0xf] %vm7237_vm1, %v7234_v43  ;;  %v6631_v56 = vmax.f32 %v6231_v52, %v6431_v55 }
 0x6be   :  { %v6835_v58 = vadd.f32 %v12313_v14, %v6631_v56 }
 0x6c0   :  { %v7035_v61 = vmax.f32 %v6835_v58, 0.0 }
 0x6c1   :  { %v5530_v62 = vpop.f32.mrf.mxu2  ;;  %v6030_v63 = vpop.f32.mrf.mxu3 }
 0x6c2   :  { %v7235_v0 = vpack.c.bf16 %v7035_v61, %v7035_v61  ;;  %v6432_v2 = vmax.f32 %v5530_v62, %v6030_v63 }
 0x6c4   :  { %7436 = vst.msk [vmem:[%s12512_s3 + $0x318] sm:$0xf] %vm7237_vm1, %v7235_v0  ;;  %v6632_v3 = vmax.f32 %v6232_v1, %v6432_v2 }
 0x6c6   :  { %v6836_v4 = vadd.f32 %v12313_v14, %v6632_v3 }
 0x6c8   :  { %v7036_v5 = vmax.f32 %v6836_v4, 0.0 }
 0x6ca   :  { %v7236_v6 = vpack.c.bf16 %v7036_v5, %v7036_v5 }
 0x6cc   :  { %7437 = vst.msk [vmem:[%s12512_s3 + $0x31c] sm:$0xf] %vm7237_vm1, %v7236_v6 }

// kernel: mnist_forward.4
= control target key start
LH: loop header
LB: loop body
LE: loop exit
PB: predicated region body
PF: predicated region fallthrough
CT: control target
= control target key end

     0   :  { %vm2287_vm0 = vcmask 261120   ;;  %vm4671_vm1 = vcmask 519168   ;;  %s10091_s1 = inlined_call_operand.vmem [shape: bf16[288,64], index: 1, kind: input, shape index: {}]   ;;  %s10092_s0 = inlined_call_operand.vmem [shape: bf16[1792,288], index: 0, kind: input, shape index: {}]   ;;  %s10093_s2 = inlined_call_operand.vmem [shape: f32[1,64], index: 2, kind: input, shape index: {}]   ;;  %s10094_s3 = inlined_call_operand.vmem [shape: bf16[448,64], index: 3, kind: output, shape index: {}]  }
   0x1   :  { %v6603_v0 = vld [vmem:[%s10091_s1 + $0x38] sm:$0xff]  ;;  %v6663_v2 = vld [vmem:[%s10091_s1 + $0x88] sm:$0xff]  ;;  %v6602_v3 = vld [vmem:[%s10091_s1 + $0x30] sm:$0xff] }
   0x2   :  { %v6611_v1 = vld [vmem:[%s10091_s1 + $0x78] sm:$0xff]  ;;  %2624 = vmatpush.bf16.msra.mxu0 %v6603_v0  ;;  %6614 = vmatpush.bf16.msra.mxu3 %v6603_v0  ;;  %v6610_v4 = vld [vmem:[%s10091_s1 + $0x70] sm:$0xff]  ;;  %v6675_v5 = vld [vmem:[%s10091_s1 + $0x80] sm:$0xff] }
   0x3   :  { %3193 = vmatpush.bf16.msra.mxu1 %v6611_v1  ;;  %3768 = vmatpush.bf16.msra.mxu2 %v6663_v2  ;;  %v4742_v6 = vld [vmem:[%s10092_s0 + $0x8] sm:$0xf]  ;;  %v6262_v7 = vld [vmem:[%s10092_s0 + $0x10] sm:$0xf0]  ;;  %v6600_v11 = vld [vmem:[%s10091_s1 + $0x20] sm:$0xff] }
   0x4   :  { %v4743_v8 = vor.u32 %v6262_v7, %v4742_v6  ;;  %v6601_v9 = vld [vmem:[%s10091_s1 + $0x28] sm:$0xff]  ;;  %v6608_v12 = vld [vmem:[%s10091_s1 + $0x60] sm:$0xff]  ;;  %v6599_v13 = vld [vmem:[%s10091_s1 + $0x18] sm:$0xff] }
   0x5   :  { %v6609_v10 = vld [vmem:[%s10091_s1 + $0x68] sm:$0xff]  ;;  %v6607_v14 = vld [vmem:[%s10091_s1 + $0x58] sm:$0xff]  ;;  %v6598_v15 = vld [vmem:[%s10091_s1 + $0x10] sm:$0xff] }
   0x6   :  { %2625 = vmatpush.bf16.msra.mxu0 %v6602_v3  ;;  %6615 = vmatpush.bf16.msra.mxu3 %v6602_v3  ;;  %v6606_v16 = vld [vmem:[%s10091_s1 + $0x50] sm:$0xff]  ;;  %v4754_v17 = vld [vmem:[%s10092_s0 + $0x20] sm:$0xf]  ;;  %v6265_v18 = vld [vmem:[%s10092_s0 + $0x28] sm:$0xf0] }
   0x7   :  { %3194 = vmatpush.bf16.msra.mxu1 %v6610_v4  ;;  %3769 = vmatpush.bf16.msra.mxu2 %v6675_v5  ;;  %v4755_v19 = vor.u32 %v6265_v18, %v4754_v17  ;;  %v6597_v20 = vld [vmem:[%s10091_s1 + $0x8] sm:$0xff]  ;;  %v6596_v22 = vld [vmem:[%s10091_s1] sm:$0xff]  ;;  %v4736_v29 = vld [vmem:[%s10092_s0 + $0xc] sm:$0xf0] }
   0x8   :  { %v6605_v21 = vld [vmem:[%s10091_s1 + $0x48] sm:$0xff]  ;;  %v6604_v23 = vld [vmem:[%s10091_s1 + $0x40] sm:$0xff]  ;;  %v4766_v33 = vld [vmem:[%s10092_s0 + $0x38] sm:$0xf] }
   0x9   :  { %v4734_v24 = vld [vmem:[%s10092_s0] sm:$0xf]  ;;  %v6261_v25 = vld [vmem:[%s10092_s0 + $0x8] sm:$0xf0]  ;;  %v6260_v28 = vld [vmem:[%s10092_s0 + $0x4] sm:$0xf] }
   0xa   :  { %6148 = vmatmul.msk.bf16.vlgmr.msra.gmra.mxu2 %vm2287_vm0, %v4743_v8  ;;  %2626 = vmatpush.bf16.msra.mxu0 %v6601_v9  ;;  %v5742_v26 = vld [vmem:[%s10092_s0 + $0x7e0] sm:$0xf]  ;;  %v6513_v27 = vld [vmem:[%s10092_s0 + $0x7e8] sm:$0xf0]  ;;  %v4735_v30 = vor.u32 %v6261_v25, %v4734_v24  ;;  %v4739_v32 = vor.u32 %v6260_v28, %v4736_v29  ;;  %v6268_v34 = vld [vmem:[%s10092_s0 + $0x40] sm:$0xf0] }
   0xb   :  { %6616 = vmatpush.bf16.msra.mxu3 %v6601_v9  ;;  %3195 = vmatpush.bf16.msra.mxu1 %v6609_v10  ;;  %v5743_v31 = vor.u32 %v6513_v27, %v5742_v26  ;;  %v4767_v35 = vor.u32 %v6268_v34, %v4766_v33  ;;  %v4746_v36 = vld [vmem:[%s10092_s0 + $0x18] sm:$0xf]  ;;  %v6264_v37 = vld [vmem:[%s10092_s0 + $0x20] sm:$0xf0]  ;;  %v6263_v40 = vld [vmem:[%s10092_s0 + $0x1c] sm:$0xf] }
   0xc   :  { %v5754_v38 = vld [vmem:[%s10092_s0 + $0x7f8] sm:$0xf]  ;;  %v6516_v39 = vld [vmem:[%s10092_s0 + $0x800] sm:$0xf0]  ;;  %v4748_v41 = vld [vmem:[%s10092_s0 + $0x24] sm:$0xf0]  ;;  %v4747_v42 = vor.u32 %v6264_v37, %v4746_v36 }
   0xd   :  { %v5755_v43 = vor.u32 %v6516_v39, %v5754_v38  ;;  %v4751_v44 = vor.u32 %v6263_v40, %v4748_v41  ;;  %v4778_v45 = vld [vmem:[%s10092_s0 + $0x50] sm:$0xf]  ;;  %v6271_v46 = vld [vmem:[%s10092_s0 + $0x58] sm:$0xf0]  ;;  %v6266_v52 = vld [vmem:[%s10092_s0 + $0x34] sm:$0xf] }
   0xe   :  { %2627 = vmatpush.bf16.msra.mxu0 %v6600_v11  ;;  %v4779_v47 = vor.u32 %v6271_v46, %v4778_v45  ;;  %v4758_v48 = vld [vmem:[%s10092_s0 + $0x30] sm:$0xf]  ;;  %v6267_v49 = vld [vmem:[%s10092_s0 + $0x38] sm:$0xf0]  ;;  %v4760_v53 = vld [vmem:[%s10092_s0 + $0x3c] sm:$0xf0] }
   0xf   :  { %6617 = vmatpush.bf16.msra.mxu3 %v6600_v11  ;;  %3196 = vmatpush.bf16.msra.mxu1 %v6608_v12  ;;  %v5766_v50 = vld [vmem:[%s10092_s0 + $0x810] sm:$0xf]  ;;  %v6519_v51 = vld [vmem:[%s10092_s0 + $0x818] sm:$0xf0]  ;;  %v4759_v54 = vor.u32 %v6267_v49, %v4758_v48  ;;  %v4763_v56 = vor.u32 %v6266_v52, %v4760_v53  ;;  %v4790_v57 = vld [vmem:[%s10092_s0 + $0x68] sm:$0xf] }
  0x10   :  { %v5767_v55 = vor.u32 %v6519_v51, %v5766_v50  ;;  %v6274_v58 = vld [vmem:[%s10092_s0 + $0x70] sm:$0xf0]  ;;  %v4770_v60 = vld [vmem:[%s10092_s0 + $0x48] sm:$0xf]  ;;  %v6269_v0 = vld [vmem:[%s10092_s0 + $0x4c] sm:$0xf] }
  0x11   :  { %v4791_v59 = vor.u32 %v6274_v58, %v4790_v57  ;;  %v6270_v61 = vld [vmem:[%s10092_s0 + $0x50] sm:$0xf0]  ;;  %v5778_v62 = vld [vmem:[%s10092_s0 + $0x828] sm:$0xf]  ;;  %v6277_v6 = vld [vmem:[%s10092_s0 + $0x88] sm:$0xf0] }
  0x12   :  { %2628 = vmatpush.bf16.msra.mxu0 %v6599_v13  ;;  %v6522_v63 = vld [vmem:[%s10092_s0 + $0x830] sm:$0xf0]  ;;  %v4782_v8 = vld [vmem:[%s10092_s0 + $0x60] sm:$0xf]  ;;  %v6273_v9 = vld [vmem:[%s10092_s0 + $0x68] sm:$0xf0] }
  0x13   :  { %6618 = vmatpush.bf16.msra.mxu3 %v6599_v13  ;;  %3197 = vmatpush.bf16.msra.mxu1 %v6607_v14  ;;  %v5779_v3 = vor.u32 %v6522_v63, %v5778_v62  ;;  %v6525_v11 = vld [vmem:[%s10092_s0 + $0x848] sm:$0xf0]  ;;  %v4784_v13 = vld [vmem:[%s10092_s0 + $0x6c] sm:$0xf0]  ;;  %v4814_v17 = vld [vmem:[%s10092_s0 + $0x98] sm:$0xf] }
  0x14   :  { %v6280_v18 = vld [vmem:[%s10092_s0 + $0xa0] sm:$0xf0]  ;;  %v6275_v24 = vld [vmem:[%s10092_s0 + $0x7c] sm:$0xf]  ;;  %v4796_v25 = vld [vmem:[%s10092_s0 + $0x84] sm:$0xf0] }
  0x15   :  { %v4799_v28 = vor.u32 %v6275_v24, %v4796_v25  ;;  %v4826_v29 = vld [vmem:[%s10092_s0 + $0xb0] sm:$0xf]  ;;  %v6279_v33 = vld [vmem:[%s10092_s0 + $0x98] sm:$0xf0]  ;;  %v6278_v36 = vld [vmem:[%s10092_s0 + $0x94] sm:$0xf] }
  0x16   :  { %2629 = vmatpush.bf16.msra.mxu0 %v6598_v15  ;;  %v5814_v34 = vld [vmem:[%s10092_s0 + $0x870] sm:$0xf]  ;;  %v4808_v37 = vld [vmem:[%s10092_s0 + $0x9c] sm:$0xf0]  ;;  %v4838_v41 = vld [vmem:[%s10092_s0 + $0xc8] sm:$0xf] }
  0x17   :  { %6619 = vmatpush.bf16.msra.mxu3 %v6598_v15  ;;  %3198 = vmatpush.bf16.msra.mxu1 %v6606_v16  ;;  %v4811_v40 = vor.u32 %v6278_v36, %v4808_v37  ;;  %v6282_v45 = vld [vmem:[%s10092_s0 + $0xb0] sm:$0xf0]  ;;  %v5826_v46 = vld [vmem:[%s10092_s0 + $0x888] sm:$0xf]  ;;  %v6281_v48 = vld [vmem:[%s10092_s0 + $0xac] sm:$0xf] }
  0x18   :  { %v4820_v49 = vld [vmem:[%s10092_s0 + $0xb4] sm:$0xf0]  ;;  %v4830_v58 = vld [vmem:[%s10092_s0 + $0xc0] sm:$0xf]  ;;  %v6284_v62 = vld [vmem:[%s10092_s0 + $0xc4] sm:$0xf] }
  0x19   :  { %v4823_v53 = vor.u32 %v6281_v48, %v4820_v49  ;;  %v4832_v63 = vld [vmem:[%s10092_s0 + $0xcc] sm:$0xf0] }
  0x1a   :  { %6149 = vmatmul.msk.bf16.gmra.mxu2 %vm2287_vm0, %v4755_v19  ;;  %2630 = vmatpush.bf16.msra.mxu0 %v6597_v20  ;;  %v4815_v19 = vor.u32 %v6280_v18, %v4814_v17  ;;  %v4842_v17 = vld [vmem:[%s10092_s0 + $0xd8] sm:$0xf]  ;;  %v6288_v18 = vld [vmem:[%s10092_s0 + $0xe0] sm:$0xf0] }
  0x1b   :  { %6620 = vmatpush.bf16.msra.mxu3 %v6597_v20  ;;  %3199 = vmatpush.bf16.msra.mxu1 %v6605_v21  ;;  %v4794_v20 = vld [vmem:[%s10092_s0 + $0x78] sm:$0xf]  ;;  %v4843_v25 = vor.u32 %v6288_v18, %v4842_v17 }
  0x1e   :  { %2631 = vmatpush.bf16.msra.mxu0 %v6596_v22 }
  0x1f   :  { %6621 = vmatpush.bf16.msra.mxu3 %v6596_v22  ;;  %3200 = vmatpush.bf16.msra.mxu1 %v6604_v23  ;;  %v5802_v22 = vld [vmem:[%s10092_s0 + $0x858] sm:$0xf] }
  0x21   :  { %2632 = vmatmul.bf16.vlgmr.msra.gmra.mxu0 %v4735_v30  ;;  %v6283_v30 = vld [vmem:[%s10092_s0 + $0xb8] sm:$0xf0] }
  0x22   :  { %3052 = vmatmul.bf16.vlgmr.msra.gmra.mxu3 %v5743_v31  ;;  %3201 = vmatmul.bf16.vlgmr.msra.gmra.mxu1 %v4739_v32  ;;  %v4827_v31 = vor.u32 %v6283_v30, %v4826_v29  ;;  %v4806_v32 = vld [vmem:[%s10092_s0 + $0x90] sm:$0xf] }
  0x23   :  { %6622 = vmatpush.bf16.msrb.mxu3 %v6611_v1  ;;  %v4772_v1 = vld [vmem:[%s10092_s0 + $0x54] sm:$0xf0]  ;;  %v4807_v38 = vor.u32 %v6279_v33, %v4806_v32  ;;  %v4874_v32 = vld [vmem:[%s10092_s0 + $0x110] sm:$0xf]  ;;  %v6295_v33 = vld [vmem:[%s10092_s0 + $0x118] sm:$0xf0] }
  0x24   :  { %v4875_v37 = vor.u32 %v6295_v33, %v4874_v32  ;;  %v5886_v32 = vld [vmem:[%s10092_s0 + $0x900] sm:$0xf]  ;;  %v6549_v33 = vld [vmem:[%s10092_s0 + $0x908] sm:$0xf0] }
  0x27   :  { %6623 = vmatpush.bf16.msrb.mxu3 %v6610_v4  ;;  %v4775_v4 = vor.u32 %v6269_v0, %v4772_v1 }
  0x2a   :  { %6150 = vmatmul.msk.bf16.gmra.mxu2 %vm2287_vm0, %v4767_v35  ;;  %v6531_v35 = vld [vmem:[%s10092_s0 + $0x878] sm:$0xf0] }
  0x2b   :  { %6624 = vmatpush.bf16.msrb.mxu3 %v6609_v10  ;;  %v5790_v10 = vld [vmem:[%s10092_s0 + $0x840] sm:$0xf]  ;;  %v5815_v39 = vor.u32 %v6531_v35, %v5814_v34 }
  0x2c   :  { %v5791_v15 = vor.u32 %v6525_v11, %v5790_v10 }
  0x2f   :  { %6625 = vmatpush.bf16.msrb.mxu3 %v6608_v12  ;;  %v6272_v12 = vld [vmem:[%s10092_s0 + $0x64] sm:$0xf] }
  0x31   :  { %2637 = vmatmul.bf16.gmra.mxu0 %v4747_v42  ;;  %v6286_v42 = vld [vmem:[%s10092_s0 + $0xd0] sm:$0xf0] }
  0x32   :  { %3057 = vmatmul.bf16.gmra.mxu3 %v5755_v43  ;;  %3206 = vmatmul.bf16.gmra.mxu1 %v4751_v44  ;;  %v4839_v43 = vor.u32 %v6286_v42, %v4838_v41  ;;  %v4818_v44 = vld [vmem:[%s10092_s0 + $0xa8] sm:$0xf]  ;;  %v4854_v41 = vld [vmem:[%s10092_s0 + $0xf0] sm:$0xf]  ;;  %v6291_v42 = vld [vmem:[%s10092_s0 + $0xf8] sm:$0xf0] }
  0x33   :  { %6626 = vmatpush.bf16.msrb.mxu3 %v6607_v14  ;;  %v4783_v14 = vor.u32 %v6273_v9, %v4782_v8  ;;  %v4819_v51 = vor.u32 %v6282_v45, %v4818_v44  ;;  %v4862_v8 = vld [vmem:[%s10092_s0 + $0xf8] sm:$0xf]  ;;  %v6292_v9 = vld [vmem:[%s10092_s0 + $0x100] sm:$0xf0]  ;;  %v6543_v44 = vld [vmem:[%s10092_s0 + $0x8d8] sm:$0xf0]  ;;  %v4855_v49 = vor.u32 %v6291_v42, %v4854_v41  ;;  %v5887_v42 = vor.u32 %v6549_v33, %v5886_v32 }
  0x34   :  { %v6290_v45 = vld [vmem:[%s10092_s0 + $0xf4] sm:$0xf]  ;;  %v6555_v32 = vld [vmem:[%s10092_s0 + $0x938] sm:$0xf0] }
  0x35   :  { %v6302_v33 = vld [vmem:[%s10092_s0 + $0x154] sm:$0xf] }
  0x37   :  { %6627 = vmatpush.bf16.msrb.mxu3 %v6606_v16  ;;  %v4787_v16 = vor.u32 %v6272_v12, %v4784_v13  ;;  %v4863_v13 = vor.u32 %v6292_v9, %v4862_v8 }
  0x3a   :  { %6151 = vmatmul.msk.bf16.gmra.mxu2 %vm2287_vm0, %v4779_v47  ;;  %v6534_v47 = vld [vmem:[%s10092_s0 + $0x890] sm:$0xf0] }
  0x3b   :  { %6628 = vmatpush.bf16.msrb.mxu3 %v6605_v21  ;;  %v6276_v21 = vld [vmem:[%s10092_s0 + $0x80] sm:$0xf0]  ;;  %v5827_v52 = vor.u32 %v6534_v47, %v5826_v46  ;;  %v4856_v46 = vld [vmem:[%s10092_s0 + $0xfc] sm:$0xf0] }
  0x3c   :  { %v4795_v26 = vor.u32 %v6276_v21, %v4794_v20  ;;  %v6540_v20 = vld [vmem:[%s10092_s0 + $0x8c0] sm:$0xf0]  ;;  %v6287_v21 = vld [vmem:[%s10092_s0 + $0xdc] sm:$0xf] }
  0x3f   :  { %6629 = vmatpush.bf16.msrb.mxu3 %v6604_v23  ;;  %v6528_v23 = vld [vmem:[%s10092_s0 + $0x860] sm:$0xf0] }
  0x40   :  { %v5803_v27 = vor.u32 %v6528_v23, %v5802_v22  ;;  %v4844_v22 = vld [vmem:[%s10092_s0 + $0xe4] sm:$0xf0] }
  0x41   :  { %2642 = vmatmul.bf16.gmra.mxu0 %v4759_v54  ;;  %v4850_v54 = vld [vmem:[%s10092_s0 + $0xe0] sm:$0xf] }
  0x42   :  { %3062 = vmatmul.bf16.gmra.mxu3 %v5767_v55  ;;  %3211 = vmatmul.bf16.gmra.mxu1 %v4763_v56  ;;  %v6289_v55 = vld [vmem:[%s10092_s0 + $0xe8] sm:$0xf0] }
  0x43   :  { %6630 = vmatpush.bf16.msra.mxu3 %v6663_v2  ;;  %v4771_v2 = vor.u32 %v6270_v61, %v4770_v60  ;;  %v4851_v57 = vor.u32 %v6289_v55, %v4850_v54  ;;  %v5838_v60 = vld [vmem:[%s10092_s0 + $0x8a0] sm:$0xf]  ;;  %v6537_v61 = vld [vmem:[%s10092_s0 + $0x8a8] sm:$0xf0] }
  0x47   :  { %6631 = vmatpush.bf16.msra.mxu3 %v6675_v5  ;;  %v4802_v5 = vld [vmem:[%s10092_s0 + $0x80] sm:$0xf] }
  0x48   :  { %v4803_v7 = vor.u32 %v6277_v6, %v4802_v5 }
  0x4a   :  { %6152 = vmatmul.msk.bf16.gmra.mxu2 %vm2287_vm0, %v4791_v59  ;;  %v6285_v59 = vld [vmem:[%s10092_s0 + $0xc8] sm:$0xf0] }
  0x4b   :  { %v4831_v1 = vor.u32 %v6285_v59, %v4830_v58 }
  0x51   :  { %2647 = vmatmul.bf16.gmra.mxu0 %v4771_v2 }
  0x52   :  { %3067 = vmatmul.bf16.gmra.mxu3 %v5779_v3  ;;  %3216 = vmatmul.bf16.gmra.mxu1 %v4775_v4  ;;  %v5839_v3 = vor.u32 %v6537_v61, %v5838_v60  ;;  %v4835_v4 = vor.u32 %v6284_v62, %v4832_v63 }
  0x5a   :  { %6153 = vmatmul.msk.bf16.gmra.mxu2 %vm2287_vm0, %v4803_v7 }
  0x61   :  { %2652 = vmatmul.bf16.gmra.mxu0 %v4783_v14 }
  0x62   :  { %3072 = vmatmul.bf16.gmra.mxu3 %v5791_v15  ;;  %3221 = vmatmul.bf16.gmra.mxu1 %v4787_v16 }
  0x6a   :  { %6154 = vmatmul.msk.bf16.gmra.mxu2 %vm2287_vm0, %v4815_v19  ;;  %v5850_v19 = vld [vmem:[%s10092_s0 + $0x8b8] sm:$0xf] }
  0x71   :  { %2657 = vmatmul.bf16.gmra.mxu0 %v4795_v26 }
  0x72   :  { %3077 = vmatmul.bf16.gmra.mxu3 %v5803_v27  ;;  %3226 = vmatmul.bf16.gmra.mxu1 %v4799_v28  ;;  %v5851_v27 = vor.u32 %v6540_v20, %v5850_v19  ;;  %v4847_v28 = vor.u32 %v6287_v21, %v4844_v22  ;;  %v4898_v19 = vld [vmem:[%s10092_s0 + $0x140] sm:$0xf]  ;;  %v6301_v20 = vld [vmem:[%s10092_s0 + $0x148] sm:$0xf0] }
  0x7a   :  { %6155 = vmatmul.msk.bf16.gmra.mxu2 %vm2287_vm0, %v4827_v31 }
  0x81   :  { %2662 = vmatmul.bf16.gmra.mxu0 %v4807_v38 }
  0x82   :  { %3082 = vmatmul.bf16.gmra.mxu3 %v5815_v39  ;;  %3231 = vmatmul.bf16.gmra.mxu1 %v4811_v40 }
  0x8a   :  { %6156 = vmatmul.msk.bf16.gmra.mxu2 %vm2287_vm0, %v4839_v43  ;;  %v5862_v43 = vld [vmem:[%s10092_s0 + $0x8d0] sm:$0xf] }
  0x8d   :  { %v3771_v50 = vpop.f32.mrf.mxu2 }
  0x91   :  { %2667 = vmatmul.bf16.gmra.mxu0 %v4819_v51  ;;  %v5863_v51 = vor.u32 %v6543_v44, %v5862_v43 }
  0x92   :  { %3087 = vmatmul.bf16.gmra.mxu3 %v5827_v52  ;;  %3236 = vmatmul.bf16.gmra.mxu1 %v4823_v53  ;;  %v4859_v52 = vor.u32 %v6290_v45, %v4856_v46 }
  0x95   :  { %v3773_v56 = vpop.f32.mrf.mxu2 }
  0x9a   :  { %6157 = vmatmul.msk.bf16.gmra.mxu2 %vm2287_vm0, %v4851_v57  ;;  %v6298_v57 = vld [vmem:[%s10092_s0 + $0x130] sm:$0xf0] }
  0x9d   :  { %v3776_v0 = vpop.f32.mrf.mxu2 }
  0x9e   :  { %v2633_v2 = vpop.f32.mrf.mxu0 }
  0x9f   :  { %v3202_v5 = vpop.f32.mrf.mxu1 }
  0xa0   :  { %v3203_v6 = vadd.f32 %v3202_v5, %v2633_v2  ;;  %v6294_v2 = vld [vmem:[%s10092_s0 + $0x110] sm:$0xf0]  ;;  %v6293_v5 = vld [vmem:[%s10092_s0 + $0x10c] sm:$0xf] }
  0xa1   :  { %2672 = vmatmul.bf16.gmra.mxu0 %v4831_v1  ;;  %v4866_v1 = vld [vmem:[%s10092_s0 + $0x108] sm:$0xf] }
  0xa2   :  { %v6948_v7 = vadd.f32 %v3771_v50, %v3203_v6  ;;  %3092 = vmatmul.bf16.gmra.mxu3 %v5839_v3  ;;  %3241 = vmatmul.bf16.gmra.mxu1 %v4835_v4  ;;  %v5874_v3 = vld [vmem:[%s10092_s0 + $0x8e8] sm:$0xf]  ;;  %v6546_v4 = vld [vmem:[%s10092_s0 + $0x8f0] sm:$0xf0]  ;;  %v4868_v6 = vld [vmem:[%s10092_s0 + $0x114] sm:$0xf0] }
  0xa4   :  { %10187 = vst [vmem:[#allocation2_spill] sm:$0xff] %v6948_v7 }
  0xa5   :  { %v6956_v10 = vpop.f32.mrf.mxu3  ;;  %v3778_v11 = vpop.f32.mrf.mxu2 }
  0xa6   :  { %10188 = vst [vmem:[#allocation3_spill] sm:$0xff] %v6956_v10  ;;  %v2635_v12 = vpop.f32.mrf.mxu0 }
  0xa7   :  { %v3204_v14 = vpop.f32.mrf.mxu1 }
  0xa8   :  { %v3205_v15 = vadd.f32 %v3204_v14, %v2635_v12  ;;  %v4871_v14 = vor.u32 %v6293_v5, %v4868_v6 }
  0xaa   :  { %v6958_v16 = vadd.f32 %v3773_v56, %v3205_v15  ;;  %6158 = vmatmul.msk.bf16.gmra.mxu2 %vm2287_vm0, %v4863_v13  ;;  %v4886_v56 = vld [vmem:[%s10092_s0 + $0x128] sm:$0xf]  ;;  %v5875_v13 = vor.u32 %v6546_v4, %v5874_v3 }
  0xab   :  { %v4887_v61 = vor.u32 %v6298_v57, %v4886_v56 }
  0xac   :  { %10189 = vst [vmem:[#allocation4_spill] sm:$0xff] %v6958_v16  ;;  %v5234_v16 = vld [vmem:[%s10092_s0 + $0x3e0] sm:$0xf] }
  0xad   :  { %v6979_v23 = vpop.f32.mrf.mxu3  ;;  %v3781_v24 = vpop.f32.mrf.mxu2 }
  0xae   :  { %10190 = vst [vmem:[#allocation5_spill] sm:$0xff] %v6979_v23  ;;  %v2638_v26 = vpop.f32.mrf.mxu0 }
  0xaf   :  { %v3207_v29 = vpop.f32.mrf.mxu1 }
  0xb0   :  { %v3208_v30 = vadd.f32 %v3207_v29, %v2638_v26  ;;  %v4878_v29 = vld [vmem:[%s10092_s0 + $0x120] sm:$0xf] }
  0xb1   :  { %2677 = vmatmul.bf16.gmra.mxu0 %v4843_v25  ;;  %v4899_v25 = vor.u32 %v6301_v20, %v4898_v19 }
  0xb2   :  { %v6981_v31 = vadd.f32 %v3776_v0, %v3208_v30  ;;  %3097 = vmatmul.bf16.gmra.mxu3 %v5851_v27  ;;  %3246 = vmatmul.bf16.gmra.mxu1 %v4847_v28  ;;  %v6297_v30 = vld [vmem:[%s10092_s0 + $0x128] sm:$0xf0] }
  0xb4   :  { %10191 = vst [vmem:[#allocation6_spill] sm:$0xff] %v6981_v31 }
  0xb5   :  { %v6989_v34 = vpop.f32.mrf.mxu3  ;;  %v3783_v35 = vpop.f32.mrf.mxu2 }
  0xb6   :  { %10192 = vst [vmem:[#allocation7_spill] sm:$0xff] %v6989_v34  ;;  %v2640_v36 = vpop.f32.mrf.mxu0  ;;  %v6328_v34 = vld [vmem:[%s10092_s0 + $0x220] sm:$0xf0] }
  0xb7   :  { %v3209_v38 = vpop.f32.mrf.mxu1 }
  0xb8   :  { %v3210_v39 = vadd.f32 %v3209_v38, %v2640_v36  ;;  %v4880_v36 = vld [vmem:[%s10092_s0 + $0x12c] sm:$0xf0] }
  0xba   :  { %v6991_v40 = vadd.f32 %v3778_v11, %v3210_v39  ;;  %6159 = vmatmul.msk.bf16.gmra.mxu2 %vm2287_vm0, %v4875_v37  ;;  %v4867_v11 = vor.u32 %v6294_v2, %v4866_v1  ;;  %v4879_v39 = vor.u32 %v6297_v30, %v4878_v29  ;;  %v4892_v1 = vld [vmem:[%s10092_s0 + $0x144] sm:$0xf0]  ;;  %v6303_v29 = vld [vmem:[%s10092_s0 + $0x158] sm:$0xf0]  ;;  %v5910_v30 = vld [vmem:[%s10092_s0 + $0x930] sm:$0xf] }
  0xbc   :  { %10193 = vst [vmem:[#allocation8_spill] sm:$0xff] %v6991_v40 }
  0xbd   :  { %v7012_v47 = vpop.f32.mrf.mxu3  ;;  %v3786_v48 = vpop.f32.mrf.mxu2 }
  0xbe   :  { %10194 = vst [vmem:[#allocation9_spill] sm:$0xff] %v7012_v47  ;;  %v2643_v50 = vpop.f32.mrf.mxu0  ;;  %v5006_v47 = vld [vmem:[%s10092_s0 + $0x218] sm:$0xf] }
  0xbf   :  { %v3212_v53 = vpop.f32.mrf.mxu1 }
  0xc0   :  { %v3213_v54 = vadd.f32 %v3212_v53, %v2643_v50 }
  0xc1   :  { %2682 = vmatmul.bf16.gmra.mxu0 %v4855_v49  ;;  %v6304_v49 = vld [vmem:[%s10092_s0 + $0x160] sm:$0xf0] }
  0xc2   :  { %v7014_v55 = vadd.f32 %v3781_v24, %v3213_v54  ;;  %3102 = vmatmul.bf16.gmra.mxu3 %v5863_v51  ;;  %3251 = vmatmul.bf16.gmra.mxu1 %v4859_v52 }
  0xc5   :  { %v7022_v58 = vpop.f32.mrf.mxu3  ;;  %v3788_v59 = vpop.f32.mrf.mxu2 }
  0xc6   :  { %10195 = vst [vmem:[#allocation10_spill] sm:$0xff] %v7022_v58  ;;  %v2645_v60 = vpop.f32.mrf.mxu0  ;;  %v5138_v58 = vld [vmem:[%s10092_s0 + $0x320] sm:$0xf] }
  0xc7   :  { %v3214_v62 = vpop.f32.mrf.mxu1 }
  0xc8   :  { %v3215_v63 = vadd.f32 %v3214_v62, %v2645_v60  ;;  %v6300_v60 = vld [vmem:[%s10092_s0 + $0x140] sm:$0xf0] }
  0xc9   :  { %v6552_v62 = vld [vmem:[%s10092_s0 + $0x920] sm:$0xf0] }
  0xca   :  { %v7024_v0 = vadd.f32 %v3783_v35, %v3215_v63  ;;  %6160 = vmatmul.msk.bf16.gmra.mxu2 %vm2287_vm0, %v4887_v61  ;;  %v6296_v35 = vld [vmem:[%s10092_s0 + $0x124] sm:$0xf]  ;;  %v5898_v61 = vld [vmem:[%s10092_s0 + $0x918] sm:$0xf]  ;;  %v6299_v63 = vld [vmem:[%s10092_s0 + $0x13c] sm:$0xf] }
  0xcb   :  { %v4883_v43 = vor.u32 %v6296_v35, %v4880_v36  ;;  %v5899_v6 = vor.u32 %v6552_v62, %v5898_v61  ;;  %v4904_v35 = vld [vmem:[%s10092_s0 + $0x15c] sm:$0xf0]  ;;  %v4914_v62 = vld [vmem:[%s10092_s0 + $0x168] sm:$0xf] }
  0xcd   :  { %v7045_v8 = vpop.f32.mrf.mxu3  ;;  %v3791_v9 = vpop.f32.mrf.mxu2 }
  0xce   :  { %10196 = vst [vmem:[#allocation11_spill] sm:$0xff] %v7045_v8  ;;  %v2648_v12 = vpop.f32.mrf.mxu0 }
  0xcf   :  { %v3217_v15 = vpop.f32.mrf.mxu1 }
  0xd0   :  { %v3218_v17 = vadd.f32 %v3217_v15, %v2648_v12  ;;  %v6307_v15 = vld [vmem:[%s10092_s0 + $0x178] sm:$0xf0] }
  0xd1   :  { %2687 = vmatmul.bf16.gmra.mxu0 %v4867_v11 }
  0xd2   :  { %v7047_v18 = vadd.f32 %v3786_v48, %v3218_v17  ;;  %3107 = vmatmul.bf16.gmra.mxu3 %v5875_v13  ;;  %3256 = vmatmul.bf16.gmra.mxu1 %v4871_v14  ;;  %v4910_v48 = vld [vmem:[%s10092_s0 + $0x158] sm:$0xf]  ;;  %v4922_v14 = vld [vmem:[%s10092_s0 + $0x170] sm:$0xf] }
  0xd3   :  { %v4911_v53 = vor.u32 %v6304_v49, %v4910_v48  ;;  %v4934_v49 = vld [vmem:[%s10092_s0 + $0x188] sm:$0xf] }
  0xd4   :  { %10197 = vst [vmem:[#allocation12_spill] sm:$0xff] %v7047_v18 }
  0xd5   :  { %v7055_v21 = vpop.f32.mrf.mxu3  ;;  %v3793_v22 = vpop.f32.mrf.mxu2 }
  0xd6   :  { %10198 = vst [vmem:[#allocation13_spill] sm:$0xff] %v7055_v21  ;;  %v2650_v24 = vpop.f32.mrf.mxu0  ;;  %v5126_v21 = vld [vmem:[%s10092_s0 + $0x308] sm:$0xf] }
  0xd7   :  { %v3219_v26 = vpop.f32.mrf.mxu1 }
  0xd8   :  { %v3220_v27 = vadd.f32 %v3219_v26, %v2650_v24 }
  0xda   :  { %v7057_v28 = vadd.f32 %v3788_v59, %v3220_v27  ;;  %6161 = vmatmul.msk.bf16.gmra.mxu2 %vm2287_vm0, %v4899_v25  ;;  %v4890_v59 = vld [vmem:[%s10092_s0 + $0x138] sm:$0xf]  ;;  %v4902_v27 = vld [vmem:[%s10092_s0 + $0x150] sm:$0xf] }
  0xdb   :  { %v4891_v4 = vor.u32 %v6300_v60, %v4890_v59 }
  0xdd   :  { %v7078_v37 = vpop.f32.mrf.mxu3  ;;  %v3796_v38 = vpop.f32.mrf.mxu2 }
  0xde   :  { %10199 = vst [vmem:[#allocation14_spill] sm:$0xff] %v7078_v37  ;;  %v2653_v41 = vpop.f32.mrf.mxu0 }
  0xdf   :  { %v3222_v44 = vpop.f32.mrf.mxu1 }
  0xe0   :  { %v3223_v45 = vadd.f32 %v3222_v44, %v2653_v41 }
  0xe1   :  { %2692 = vmatmul.bf16.gmra.mxu0 %v4879_v39  ;;  %v4903_v39 = vor.u32 %v6303_v29, %v4902_v27 }
  0xe2   :  { %v7080_v46 = vadd.f32 %v3791_v9, %v3223_v45  ;;  %3112 = vmatmul.bf16.gmra.mxu3 %v5887_v42  ;;  %3261 = vmatmul.bf16.gmra.mxu1 %v4883_v43  ;;  %v4895_v9 = vor.u32 %v6299_v63, %v4892_v1  ;;  %v5911_v42 = vor.u32 %v6555_v32, %v5910_v30  ;;  %v6306_v63 = vld [vmem:[%s10092_s0 + $0x170] sm:$0xf0]  ;;  %v5922_v1 = vld [vmem:[%s10092_s0 + $0x948] sm:$0xf] }
  0xe3   :  { %v4907_v43 = vor.u32 %v6302_v33, %v4904_v35 }
  0xe4   :  { %10200 = vst [vmem:[#allocation15_spill] sm:$0xff] %v7080_v46 }
  0xe5   :  { %v7088_v50 = vpop.f32.mrf.mxu3  ;;  %v3798_v51 = vpop.f32.mrf.mxu2 }
  0xe6   :  { %10201 = vst [vmem:[#allocation16_spill] sm:$0xff] %v7088_v50  ;;  %v2655_v52 = vpop.f32.mrf.mxu0  ;;  %v5114_v50 = vld [vmem:[%s10092_s0 + $0x2f0] sm:$0xf] }
  0xe7   :  { %v3224_v54 = vpop.f32.mrf.mxu1 }
  0xe8   :  { %v3225_v56 = vadd.f32 %v3224_v54, %v2655_v52 }
  0xea   :  { %v7090_v57 = vadd.f32 %v3793_v22, %v3225_v56  ;;  %6162 = vmatmul.msk.bf16.gmra.mxu2 %vm2287_vm0, %v4911_v53  ;;  %v4923_v22 = vor.u32 %v6307_v15, %v4922_v14 }
  0xed   :  { %v7111_v2 = vpop.f32.mrf.mxu3  ;;  %v3801_v3 = vpop.f32.mrf.mxu2 }
  0xee   :  { %10202 = vst [vmem:[#allocation17_spill] sm:$0xff] %v7111_v2  ;;  %v2658_v5 = vpop.f32.mrf.mxu0 }
  0xef   :  { %v3227_v11 = vpop.f32.mrf.mxu1 }
  0xf0   :  { %v3228_v12 = vadd.f32 %v3227_v11, %v2658_v5  ;;  %v4916_v5 = vld [vmem:[%s10092_s0 + $0x174] sm:$0xf0]  ;;  %v4915_v11 = vor.u32 %v6306_v63, %v4914_v62 }
  0xf1   :  { %2697 = vmatmul.bf16.gmra.mxu0 %v4891_v4  ;;  %v6305_v4 = vld [vmem:[%s10092_s0 + $0x16c] sm:$0xf] }
  0xf2   :  { %v7113_v13 = vadd.f32 %v3796_v38, %v3228_v12  ;;  %3117 = vmatmul.bf16.gmra.mxu3 %v5899_v6  ;;  %3266 = vmatmul.bf16.gmra.mxu1 %v4895_v9  ;;  %v4919_v15 = vor.u32 %v6305_v4, %v4916_v5 }
  0xf4   :  { %10203 = vst [vmem:[#allocation18_spill] sm:$0xff] %v7113_v13 }
  0xf5   :  { %v7121_v17 = vpop.f32.mrf.mxu3  ;;  %v3803_v19 = vpop.f32.mrf.mxu2 }
  0xf6   :  { %10204 = vst [vmem:[#allocation19_spill] sm:$0xff] %v7121_v17  ;;  %v2660_v20 = vpop.f32.mrf.mxu0  ;;  %v5102_v17 = vld [vmem:[%s10092_s0 + $0x2d8] sm:$0xf] }
  0xf7   :  { %v3229_v24 = vpop.f32.mrf.mxu1 }
  0xf8   :  { %v3230_v25 = vadd.f32 %v3229_v24, %v2660_v20  ;;  %v4946_v24 = vld [vmem:[%s10092_s0 + $0x1a0] sm:$0xf] }
  0xfa   :  { %v7123_v26 = vadd.f32 %v3798_v51, %v3230_v25  ;;  %6163 = vmatmul.msk.bf16.gmra.mxu2 %vm2287_vm0, %v4923_v22  ;;  %v6310_v51 = vld [vmem:[%s10092_s0 + $0x190] sm:$0xf0]  ;;  %v6313_v25 = vld [vmem:[%s10092_s0 + $0x1a8] sm:$0xf0] }
  0xfb   :  { %v4935_v56 = vor.u32 %v6310_v51, %v4934_v49  ;;  %v4947_v32 = vor.u32 %v6313_v25, %v4946_v24  ;;  %v5946_v24 = vld [vmem:[%s10092_s0 + $0x978] sm:$0xf]  ;;  %v6564_v25 = vld [vmem:[%s10092_s0 + $0x980] sm:$0xf0] }
  0xfd   :  { %v7144_v36 = vpop.f32.mrf.mxu3  ;;  %v3806_v38 = vpop.f32.mrf.mxu2 }
  0xfe   :  { %10205 = vst [vmem:[#allocation20_spill] sm:$0xff] %v7144_v36  ;;  %v2663_v41 = vpop.f32.mrf.mxu0 }
  0xff   :  { %v3232_v44 = vpop.f32.mrf.mxu1 }
 0x100   :  { %v3233_v45 = vadd.f32 %v3232_v44, %v2663_v41  ;;  %v6309_v41 = vld [vmem:[%s10092_s0 + $0x188] sm:$0xf0]  ;;  %v6308_v44 = vld [vmem:[%s10092_s0 + $0x184] sm:$0xf] }
 0x101   :  { %2702 = vmatmul.bf16.gmra.mxu0 %v4903_v39 }
 0x102   :  { %v7146_v48 = vadd.f32 %v3801_v3, %v3233_v45  ;;  %3122 = vmatmul.bf16.gmra.mxu3 %v5911_v42  ;;  %3271 = vmatmul.bf16.gmra.mxu1 %v4907_v43  ;;  %v6558_v3 = vld [vmem:[%s10092_s0 + $0x950] sm:$0xf0]  ;;  %v5934_v42 = vld [vmem:[%s10092_s0 + $0x960] sm:$0xf]  ;;  %v6561_v43 = vld [vmem:[%s10092_s0 + $0x968] sm:$0xf0] }
 0x103   :  { %v5923_v14 = vor.u32 %v6558_v3, %v5922_v1  ;;  %v4928_v45 = vld [vmem:[%s10092_s0 + $0x18c] sm:$0xf0]  ;;  %v4958_v1 = vld [vmem:[%s10092_s0 + $0x1b8] sm:$0xf]  ;;  %v6316_v3 = vld [vmem:[%s10092_s0 + $0x1c0] sm:$0xf0] }
 0x104   :  { %10206 = vst [vmem:[#allocation21_spill] sm:$0xff] %v7146_v48 }
 0x105   :  { %v7154_v52 = vpop.f32.mrf.mxu3  ;;  %v3808_v53 = vpop.f32.mrf.mxu2 }
 0x106   :  { %10207 = vst [vmem:[#allocation22_spill] sm:$0xff] %v7154_v52  ;;  %v2665_v54 = vpop.f32.mrf.mxu0  ;;  %v5090_v52 = vld [vmem:[%s10092_s0 + $0x2c0] sm:$0xf] }
 0x107   :  { %v3234_v59 = vpop.f32.mrf.mxu1 }
 0x108   :  { %v3235_v60 = vadd.f32 %v3234_v59, %v2665_v54  ;;  %v4931_v59 = vor.u32 %v6308_v44, %v4928_v45 }
 0x10a   :  { %v7156_v61 = vadd.f32 %v3803_v19, %v3235_v60  ;;  %6164 = vmatmul.msk.bf16.gmra.mxu2 %vm2287_vm0, %v4935_v56  ;;  %v5935_v56 = vor.u32 %v6561_v43, %v5934_v42 }
 0x10d   :  { %v7177_v6 = vpop.f32.mrf.mxu3  ;;  %v3811_v9 = vpop.f32.mrf.mxu2 }
 0x10e   :  { %10208 = vst [vmem:[#allocation23_spill] sm:$0xff] %v7177_v6  ;;  %v2668_v12 = vpop.f32.mrf.mxu0 }
 0x10f   :  { %v3237_v19 = vpop.f32.mrf.mxu1 }
 0x110   :  { %v3238_v20 = vadd.f32 %v3237_v19, %v2668_v12  ;;  %v4959_v12 = vor.u32 %v6316_v3, %v4958_v1 }
 0x111   :  { %2707 = vmatmul.bf16.gmra.mxu0 %v4915_v11 }
 0x112   :  { %v7179_v22 = vadd.f32 %v3806_v38, %v3238_v20  ;;  %3127 = vmatmul.bf16.gmra.mxu3 %v5923_v14  ;;  %3276 = vmatmul.bf16.gmra.mxu1 %v4919_v15  ;;  %v4926_v38 = vld [vmem:[%s10092_s0 + $0x180] sm:$0xf]  ;;  %v6312_v20 = vld [vmem:[%s10092_s0 + $0x1a0] sm:$0xf0] }
 0x114   :  { %10209 = vst [vmem:[#allocation24_spill] sm:$0xff] %v7179_v22 }
 0x115   :  { %v7187_v27 = vpop.f32.mrf.mxu3  ;;  %v3813_v29 = vpop.f32.mrf.mxu2 }
 0x116   :  { %10210 = vst [vmem:[#allocation25_spill] sm:$0xff] %v7187_v27  ;;  %v2670_v30 = vpop.f32.mrf.mxu0  ;;  %v5078_v27 = vld [vmem:[%s10092_s0 + $0x2a8] sm:$0xf] }
 0x117   :  { %v3239_v33 = vpop.f32.mrf.mxu1 }
 0x118   :  { %v3240_v35 = vadd.f32 %v3239_v33, %v2670_v30  ;;  %v4940_v30 = vld [vmem:[%s10092_s0 + $0x1a4] sm:$0xf0] }
 0x11a   :  { %v7189_v39 = vadd.f32 %v3808_v53, %v3240_v35  ;;  %6165 = vmatmul.msk.bf16.gmra.mxu2 %vm2287_vm0, %v4947_v32  ;;  %v4927_v53 = vor.u32 %v6309_v41, %v4926_v38  ;;  %v5947_v41 = vor.u32 %v6564_v25, %v5946_v24 }
 0x11d   :  { %v7210_v49 = vpop.f32.mrf.mxu3  ;;  %v3816_v51 = vpop.f32.mrf.mxu2 }
 0x11e   :  { %10211 = vst [vmem:[#allocation26_spill] sm:$0xff] %v7210_v49  ;;  %v2673_v54 = vpop.f32.mrf.mxu0 }
 0x11f   :  { %v3242_v60 = vpop.f32.mrf.mxu1 }
 0x120   :  { %v3243_v62 = vadd.f32 %v3242_v60, %v2673_v54  ;;  %v6319_v54 = vld [vmem:[%s10092_s0 + $0x1d8] sm:$0xf0] }
 0x121   :  { %2712 = vmatmul.bf16.gmra.mxu0 %v4927_v53  ;;  %v4970_v53 = vld [vmem:[%s10092_s0 + $0x1d0] sm:$0xf] }
 0x122   :  { %v7212_v63 = vadd.f32 %v3811_v9, %v3243_v62  ;;  %3132 = vmatmul.bf16.gmra.mxu3 %v5935_v56  ;;  %3281 = vmatmul.bf16.gmra.mxu1 %v4931_v59  ;;  %v4938_v9 = vld [vmem:[%s10092_s0 + $0x198] sm:$0xf]  ;;  %v4971_v62 = vor.u32 %v6319_v54, %v4970_v53 }
 0x123   :  { %v4939_v35 = vor.u32 %v6312_v20, %v4938_v9  ;;  %v4952_v9 = vld [vmem:[%s10092_s0 + $0x1bc] sm:$0xf0] }
 0x124   :  { %10212 = vst [vmem:[#allocation27_spill] sm:$0xff] %v7212_v63 }
 0x125   :  { %v7220_v4 = vpop.f32.mrf.mxu3  ;;  %v3818_v5 = vpop.f32.mrf.mxu2 }
 0x126   :  { %10213 = vst [vmem:[#allocation28_spill] sm:$0xff] %v7220_v4  ;;  %v2675_v11 = vpop.f32.mrf.mxu0  ;;  %v5066_v4 = vld [vmem:[%s10092_s0 + $0x290] sm:$0xf] }
 0x127   :  { %v3244_v14 = vpop.f32.mrf.mxu1 }
 0x128   :  { %v3245_v15 = vadd.f32 %v3244_v14, %v2675_v11  ;;  %v5958_v14 = vld [vmem:[%s10092_s0 + $0x990] sm:$0xf] }
 0x12a   :  { %v7222_v19 = vadd.f32 %v3813_v29, %v3245_v15  ;;  %6166 = vmatmul.msk.bf16.gmra.mxu2 %vm2287_vm0, %v4959_v12  ;;  %v6311_v29 = vld [vmem:[%s10092_s0 + $0x19c] sm:$0xf] }
 0x12b   :  { %v4943_v42 = vor.u32 %v6311_v29, %v4940_v30  ;;  %v6315_v12 = vld [vmem:[%s10092_s0 + $0x1b8] sm:$0xf0] }
 0x12c   :  { %v6567_v15 = vld [vmem:[%s10092_s0 + $0x998] sm:$0xf0] }
 0x12d   :  { %v7243_v32 = vpop.f32.mrf.mxu3  ;;  %v3821_v33 = vpop.f32.mrf.mxu2  ;;  %v5959_v30 = vor.u32 %v6567_v15, %v5958_v14  ;;  %v5970_v14 = vld [vmem:[%s10092_s0 + $0x9a8] sm:$0xf]  ;;  %v6570_v15 = vld [vmem:[%s10092_s0 + $0x9b0] sm:$0xf0] }
 0x12e   :  { %10214 = vst [vmem:[#allocation29_spill] sm:$0xff] %v7243_v32  ;;  %v2678_v38 = vpop.f32.mrf.mxu0 }
 0x12f   :  { %v3247_v43 = vpop.f32.mrf.mxu1 }
 0x130   :  { %v3248_v44 = vadd.f32 %v3247_v43, %v2678_v38  ;;  %v4982_v43 = vld [vmem:[%s10092_s0 + $0x1e8] sm:$0xf] }
 0x131   :  { %2717 = vmatmul.bf16.gmra.mxu0 %v4939_v35 }
 0x132   :  { %v7245_v45 = vadd.f32 %v3816_v51, %v3248_v44  ;;  %3137 = vmatmul.bf16.gmra.mxu3 %v5947_v41  ;;  %3286 = vmatmul.bf16.gmra.mxu1 %v4943_v42  ;;  %v4950_v51 = vld [vmem:[%s10092_s0 + $0x1b0] sm:$0xf]  ;;  %v6322_v44 = vld [vmem:[%s10092_s0 + $0x1f0] sm:$0xf0] }
 0x133   :  { %v4951_v25 = vor.u32 %v6315_v12, %v4950_v51  ;;  %v6318_v12 = vld [vmem:[%s10092_s0 + $0x1d0] sm:$0xf0] }
 0x134   :  { %10215 = vst [vmem:[#allocation30_spill] sm:$0xff] %v7245_v45 }
 0x135   :  { %v7253_v56 = vpop.f32.mrf.mxu3  ;;  %v3823_v59 = vpop.f32.mrf.mxu2 }
 0x136   :  { %10216 = vst [vmem:[#allocation31_spill] sm:$0xff] %v7253_v56  ;;  %v2680_v60 = vpop.f32.mrf.mxu0  ;;  %v5054_v56 = vld [vmem:[%s10092_s0 + $0x278] sm:$0xf] }
 0x137   :  { %v3249_v1 = vpop.f32.mrf.mxu1 }
 0x138   :  { %v3250_v3 = vadd.f32 %v3249_v1, %v2680_v60 }
 0x13a   :  { %v7255_v11 = vadd.f32 %v3818_v5, %v3250_v3  ;;  %6167 = vmatmul.msk.bf16.gmra.mxu2 %vm2287_vm0, %v4971_v62  ;;  %v6314_v5 = vld [vmem:[%s10092_s0 + $0x1b4] sm:$0xf]  ;;  %v4983_v62 = vor.u32 %v6322_v44, %v4982_v43 }
 0x13b   :  { %v4955_v35 = vor.u32 %v6314_v5, %v4952_v9  ;;  %v4964_v5 = vld [vmem:[%s10092_s0 + $0x1d4] sm:$0xf0] }
 0x13d   :  { %v7276_v20 = vpop.f32.mrf.mxu3  ;;  %v3826_v24 = vpop.f32.mrf.mxu2 }
 0x13e   :  { %10217 = vst [vmem:[#allocation32_spill] sm:$0xff] %v7276_v20  ;;  %v2683_v29 = vpop.f32.mrf.mxu0 }
 0x13f   :  { %v3252_v38 = vpop.f32.mrf.mxu1 }
 0x140   :  { %v3253_v41 = vadd.f32 %v3252_v38, %v2683_v29 }
 0x141   :  { %2722 = vmatmul.bf16.gmra.mxu0 %v4951_v25 }
 0x142   :  { %v7278_v42 = vadd.f32 %v3821_v33, %v3253_v41  ;;  %3142 = vmatmul.bf16.gmra.mxu3 %v5959_v30  ;;  %3291 = vmatmul.bf16.gmra.mxu1 %v4955_v35  ;;  %v4962_v33 = vld [vmem:[%s10092_s0 + $0x1c8] sm:$0xf]  ;;  %v5971_v35 = vor.u32 %v6570_v15, %v5970_v14 }
 0x143   :  { %v4963_v29 = vor.u32 %v6318_v12, %v4962_v33 }
 0x144   :  { %10218 = vst [vmem:[#allocation33_spill] sm:$0xff] %v7278_v42 }
 0x145   :  { %v7286_v53 = vpop.f32.mrf.mxu3  ;;  %v3828_v54 = vpop.f32.mrf.mxu2 }
 0x146   :  { %10219 = vst [vmem:[#allocation34_spill] sm:$0xff] %v7286_v53  ;;  %v2685_v60 = vpop.f32.mrf.mxu0  ;;  %v5042_v53 = vld [vmem:[%s10092_s0 + $0x260] sm:$0xf] }
 0x147   :  { %v3254_v1 = vpop.f32.mrf.mxu1 }
 0x148   :  { %v3255_v3 = vadd.f32 %v3254_v1, %v2685_v60  ;;  %v4994_v60 = vld [vmem:[%s10092_s0 + $0x200] sm:$0xf] }
 0x14a   :  { %v7288_v51 = vadd.f32 %v3823_v59, %v3255_v3  ;;  %6168 = vmatmul.msk.bf16.gmra.mxu2 %vm2287_vm0, %v4983_v62  ;;  %v6317_v59 = vld [vmem:[%s10092_s0 + $0x1cc] sm:$0xf] }
 0x14b   :  { %v4967_v38 = vor.u32 %v6317_v59, %v4964_v5  ;;  %v6325_v62 = vld [vmem:[%s10092_s0 + $0x208] sm:$0xf0] }
 0x14c   :  { %v4995_v12 = vor.u32 %v6325_v62, %v4994_v60  ;;  %v6321_v5 = vld [vmem:[%s10092_s0 + $0x1e8] sm:$0xf0] }
 0x14d   :  { %v7309_v9 = vpop.f32.mrf.mxu3  ;;  %v3831_v25 = vpop.f32.mrf.mxu2 }
 0x14e   :  { %10220 = vst [vmem:[#allocation35_spill] sm:$0xff] %v7309_v9  ;;  %v2688_v30 = vpop.f32.mrf.mxu0 }
 0x14f   :  { %v3257_v41 = vpop.f32.mrf.mxu1 }
 0x150   :  { %v3258_v43 = vadd.f32 %v3257_v41, %v2688_v30  ;;  %v6573_v30 = vld [vmem:[%s10092_s0 + $0x9c8] sm:$0xf0] }
 0x151   :  { %2727 = vmatmul.bf16.gmra.mxu0 %v4963_v29  ;;  %v5982_v29 = vld [vmem:[%s10092_s0 + $0x9c0] sm:$0xf] }
 0x152   :  { %v7311_v44 = vadd.f32 %v3826_v24, %v3258_v43  ;;  %3147 = vmatmul.bf16.gmra.mxu3 %v5971_v35  ;;  %3296 = vmatmul.bf16.gmra.mxu1 %v4967_v38  ;;  %v4974_v24 = vld [vmem:[%s10092_s0 + $0x1e0] sm:$0xf]  ;;  %v4976_v35 = vld [vmem:[%s10092_s0 + $0x1ec] sm:$0xf0]  ;;  %v5983_v62 = vor.u32 %v6573_v30, %v5982_v29  ;;  %v5007_v29 = vor.u32 %v6328_v34, %v5006_v47  ;;  %v6576_v34 = vld [vmem:[%s10092_s0 + $0x9e0] sm:$0xf0] }
 0x153   :  { %v4975_v43 = vor.u32 %v6321_v5, %v4974_v24  ;;  %v6323_v47 = vld [vmem:[%s10092_s0 + $0x1fc] sm:$0xf] }
 0x154   :  { %10221 = vst [vmem:[#allocation36_spill] sm:$0xff] %v7311_v44 }
 0x155   :  { %v7319_v1 = vpop.f32.mrf.mxu3  ;;  %v3833_v3 = vpop.f32.mrf.mxu2 }
 0x156   :  { %10222 = vst [vmem:[#allocation37_spill] sm:$0xff] %v7319_v1  ;;  %v2690_v33 = vpop.f32.mrf.mxu0  ;;  %v5030_v1 = vld [vmem:[%s10092_s0 + $0x248] sm:$0xf] }
 0x157   :  { %v3259_v14 = vpop.f32.mrf.mxu1 }
 0x158   :  { %v3260_v15 = vadd.f32 %v3259_v14, %v2690_v33 }
 0x15a   :  { %v7321_v59 = vadd.f32 %v3828_v54, %v3260_v15  ;;  %6169 = vmatmul.msk.bf16.gmra.mxu2 %vm2287_vm0, %v4995_v12  ;;  %v6320_v54 = vld [vmem:[%s10092_s0 + $0x1e4] sm:$0xf] }
 0x15b   :  { %v4979_v33 = vor.u32 %v6320_v54, %v4976_v35 }
 0x15d   :  { %v7342_v38 = vpop.f32.mrf.mxu3  ;;  %v3836_v41 = vpop.f32.mrf.mxu2 }
 0x15e   :  { %10223 = vst [vmem:[#allocation38_spill] sm:$0xff] %v7342_v38  ;;  %v2693_v60 = vpop.f32.mrf.mxu0 }
 0x15f   :  { %v3262_v12 = vpop.f32.mrf.mxu1 }
 0x160   :  { %v3263_v14 = vadd.f32 %v3262_v12, %v2693_v60  ;;  %v5994_v60 = vld [vmem:[%s10092_s0 + $0x9d8] sm:$0xf] }
 0x161   :  { %2732 = vmatmul.bf16.gmra.mxu0 %v4975_v43  ;;  %v6324_v43 = vld [vmem:[%s10092_s0 + $0x200] sm:$0xf0] }
 0x162   :  { %v7344_v15 = vadd.f32 %v3831_v25, %v3263_v14  ;;  %3152 = vmatmul.bf16.gmra.mxu3 %v5983_v62  ;;  %3301 = vmatmul.bf16.gmra.mxu1 %v4979_v33  ;;  %v4986_v25 = vld [vmem:[%s10092_s0 + $0x1f8] sm:$0xf] }
 0x163   :  { %v4987_v12 = vor.u32 %v6324_v43, %v4986_v25 }
 0x164   :  { %10224 = vst [vmem:[#allocation39_spill] sm:$0xff] %v7344_v15 }
 0x165   :  { %v7352_v23 = vpop.f32.mrf.mxu3  ;;  %v3838_v24 = vpop.f32.mrf.mxu2 }
 0x166   :  { %10225 = vst [vmem:[#allocation40_spill] sm:$0xff] %v7352_v23  ;;  %v2695_v5 = vpop.f32.mrf.mxu0  ;;  %v5018_v23 = vld [vmem:[%s10092_s0 + $0x230] sm:$0xf] }
 0x167   :  { %v3264_v30 = vpop.f32.mrf.mxu1 }
 0x168   :  { %v3265_v54 = vadd.f32 %v3264_v30, %v2695_v5  ;;  %v5995_v5 = vor.u32 %v6576_v34, %v5994_v60 }
 0x16a   :  { %v7354_v35 = vadd.f32 %v3833_v3, %v3265_v54  ;;  %6170 = vmatmul.msk.bf16.gmra.mxu2 %vm2287_vm0, %v5007_v29  ;;  %v4988_v3 = vld [vmem:[%s10092_s0 + $0x204] sm:$0xf0] }
 0x16b   :  { %v4991_v29 = vor.u32 %v6323_v47, %v4988_v3 }
 0x16d   :  { %v7375_v62 = vpop.f32.mrf.mxu3  ;;  %v3841_v33 = vpop.f32.mrf.mxu2 }
 0x16e   :  { %10226 = vst [vmem:[#allocation41_spill] sm:$0xff] %v7375_v62  ;;  %v2698_v14 = vpop.f32.mrf.mxu0  ;;  %v6331_v62 = vld [vmem:[%s10092_s0 + $0x238] sm:$0xf0] }
 0x16f   :  { %v3267_v30 = vpop.f32.mrf.mxu1  ;;  %v5019_v60 = vor.u32 %v6331_v62, %v5018_v23  ;;  %v6579_v23 = vld [vmem:[%s10092_s0 + $0x9f8] sm:$0xf0]  ;;  %v5000_v62 = vld [vmem:[%s10092_s0 + $0x21c] sm:$0xf0] }
 0x170   :  { %v3268_v54 = vadd.f32 %v3267_v30, %v2698_v14  ;;  %v6006_v14 = vld [vmem:[%s10092_s0 + $0x9f0] sm:$0xf] }
 0x171   :  { %2737 = vmatmul.bf16.gmra.mxu0 %v4987_v12  ;;  %v6327_v12 = vld [vmem:[%s10092_s0 + $0x218] sm:$0xf0] }
 0x172   :  { %v7377_v10 = vadd.f32 %v3836_v41, %v3268_v54  ;;  %3157 = vmatmul.bf16.gmra.mxu3 %v5995_v5  ;;  %3306 = vmatmul.bf16.gmra.mxu1 %v4991_v29  ;;  %v4998_v41 = vld [vmem:[%s10092_s0 + $0x210] sm:$0xf] }
 0x173   :  { %v4999_v30 = vor.u32 %v6327_v12, %v4998_v41 }
 0x174   :  { %10227 = vst [vmem:[#allocation42_spill] sm:$0xff] %v7377_v10 }
 0x175   :  { %v7385_v38 = vpop.f32.mrf.mxu3  ;;  %v3843_v25 = vpop.f32.mrf.mxu2 }
 0x176   :  { %10228 = vst [vmem:[#allocation43_spill] sm:$0xff] %v7385_v38  ;;  %v2700_v43 = vpop.f32.mrf.mxu0 }
 0x177   :  { %v3269_v34 = vpop.f32.mrf.mxu1 }
 0x178   :  { %v3270_v47 = vadd.f32 %v3269_v34, %v2700_v43  ;;  %v6007_v43 = vor.u32 %v6579_v23, %v6006_v14 }
 0x17a   :  { %v7387_v3 = vadd.f32 %v3838_v24, %v3270_v47  ;;  %6171 = vmatmul.msk.bf16.gmra.mxu2 %vm2287_vm0, %v5019_v60  ;;  %v6326_v24 = vld [vmem:[%s10092_s0 + $0x214] sm:$0xf] }
 0x17b   :  { %v5003_v60 = vor.u32 %v6326_v24, %v5000_v62 }
 0x17d   :  { %v7408_v5 = vpop.f32.mrf.mxu3  ;;  %v3846_v29 = vpop.f32.mrf.mxu2 }
 0x17e   :  { %10229 = vst [vmem:[#allocation44_spill] sm:$0xff] %v7408_v5  ;;  %v2703_v54 = vpop.f32.mrf.mxu0  ;;  %v6334_v5 = vld [vmem:[%s10092_s0 + $0x250] sm:$0xf0] }
 0x17f   :  { %v3272_v34 = vpop.f32.mrf.mxu1  ;;  %v5031_v14 = vor.u32 %v6334_v5, %v5030_v1  ;;  %v6582_v1 = vld [vmem:[%s10092_s0 + $0xa10] sm:$0xf0]  ;;  %v5012_v5 = vld [vmem:[%s10092_s0 + $0x234] sm:$0xf0] }
 0x180   :  { %v3273_v47 = vadd.f32 %v3272_v34, %v2703_v54  ;;  %v6018_v54 = vld [vmem:[%s10092_s0 + $0xa08] sm:$0xf] }
 0x181   :  { %2742 = vmatmul.bf16.gmra.mxu0 %v4999_v30  ;;  %v6330_v30 = vld [vmem:[%s10092_s0 + $0x230] sm:$0xf0] }
 0x182   :  { %v7410_v38 = vadd.f32 %v3841_v33, %v3273_v47  ;;  %3162 = vmatmul.bf16.gmra.mxu3 %v6007_v43  ;;  %3311 = vmatmul.bf16.gmra.mxu1 %v5003_v60  ;;  %v5010_v33 = vld [vmem:[%s10092_s0 + $0x228] sm:$0xf] }
 0x183   :  { %v5011_v34 = vor.u32 %v6330_v30, %v5010_v33 }
 0x184   :  { %10230 = vst [vmem:[#allocation45_spill] sm:$0xff] %v7410_v38 }
 0x185   :  { %v7418_v9 = vpop.f32.mrf.mxu3  ;;  %v3848_v41 = vpop.f32.mrf.mxu2 }
 0x186   :  { %10231 = vst [vmem:[#allocation46_spill] sm:$0xff] %v7418_v9  ;;  %v2705_v12 = vpop.f32.mrf.mxu0 }
 0x187   :  { %v3274_v23 = vpop.f32.mrf.mxu1 }
 0x188   :  { %v3275_v24 = vadd.f32 %v3274_v23, %v2705_v12  ;;  %v6019_v12 = vor.u32 %v6582_v1, %v6018_v54 }
 0x18a   :  { %v7420_v62 = vadd.f32 %v3843_v25, %v3275_v24  ;;  %6172 = vmatmul.msk.bf16.gmra.mxu2 %vm2287_vm0, %v5031_v14  ;;  %v6329_v25 = vld [vmem:[%s10092_s0 + $0x22c] sm:$0xf] }
 0x18b   :  { %v5015_v14 = vor.u32 %v6329_v25, %v5012_v5 }
 0x18d   :  { %v7441_v43 = vpop.f32.mrf.mxu3  ;;  %v3851_v60 = vpop.f32.mrf.mxu2 }
 0x18e   :  { %10232 = vst [vmem:[#allocation47_spill] sm:$0xff] %v7441_v43  ;;  %v2708_v47 = vpop.f32.mrf.mxu0  ;;  %v6337_v43 = vld [vmem:[%s10092_s0 + $0x268] sm:$0xf0] }
 0x18f   :  { %v3277_v23 = vpop.f32.mrf.mxu1  ;;  %v5043_v54 = vor.u32 %v6337_v43, %v5042_v53  ;;  %v6585_v53 = vld [vmem:[%s10092_s0 + $0xa28] sm:$0xf0]  ;;  %v5024_v43 = vld [vmem:[%s10092_s0 + $0x24c] sm:$0xf0] }
 0x190   :  { %v3278_v24 = vadd.f32 %v3277_v23, %v2708_v47  ;;  %v6030_v47 = vld [vmem:[%s10092_s0 + $0xa20] sm:$0xf] }
 0x191   :  { %2747 = vmatmul.bf16.gmra.mxu0 %v5011_v34  ;;  %v6333_v34 = vld [vmem:[%s10092_s0 + $0x248] sm:$0xf0] }
 0x192   :  { %v7443_v9 = vadd.f32 %v3846_v29, %v3278_v24  ;;  %3167 = vmatmul.bf16.gmra.mxu3 %v6019_v12  ;;  %3316 = vmatmul.bf16.gmra.mxu1 %v5015_v14  ;;  %v5022_v29 = vld [vmem:[%s10092_s0 + $0x240] sm:$0xf] }
 0x193   :  { %v5023_v23 = vor.u32 %v6333_v34, %v5022_v29 }
 0x194   :  { %10233 = vst [vmem:[#allocation48_spill] sm:$0xff] %v7443_v9 }
 0x195   :  { %v7451_v20 = vpop.f32.mrf.mxu3  ;;  %v3853_v33 = vpop.f32.mrf.mxu2 }
 0x196   :  { %10234 = vst [vmem:[#allocation49_spill] sm:$0xff] %v7451_v20  ;;  %v2710_v30 = vpop.f32.mrf.mxu0 }
 0x197   :  { %v3279_v1 = vpop.f32.mrf.mxu1 }
 0x198   :  { %v3280_v25 = vadd.f32 %v3279_v1, %v2710_v30  ;;  %v6031_v30 = vor.u32 %v6585_v53, %v6030_v47 }
 0x19a   :  { %v7453_v5 = vadd.f32 %v3848_v41, %v3280_v25  ;;  %6173 = vmatmul.msk.bf16.gmra.mxu2 %vm2287_vm0, %v5043_v54  ;;  %v6332_v41 = vld [vmem:[%s10092_s0 + $0x244] sm:$0xf] }
 0x19b   :  { %v5027_v54 = vor.u32 %v6332_v41, %v5024_v43 }
 0x19d   :  { %v7474_v12 = vpop.f32.mrf.mxu3  ;;  %v3856_v14 = vpop.f32.mrf.mxu2 }
 0x19e   :  { %10235 = vst [vmem:[#allocation50_spill] sm:$0xff] %v7474_v12  ;;  %v2713_v24 = vpop.f32.mrf.mxu0  ;;  %v6340_v12 = vld [vmem:[%s10092_s0 + $0x280] sm:$0xf0] }
 0x19f   :  { %v3282_v1 = vpop.f32.mrf.mxu1  ;;  %v5055_v47 = vor.u32 %v6340_v12, %v5054_v56  ;;  %v6588_v56 = vld [vmem:[%s10092_s0 + $0xa40] sm:$0xf0]  ;;  %v5036_v12 = vld [vmem:[%s10092_s0 + $0x264] sm:$0xf0] }
 0x1a0   :  { %v3283_v25 = vadd.f32 %v3282_v1, %v2713_v24  ;;  %v6042_v24 = vld [vmem:[%s10092_s0 + $0xa38] sm:$0xf] }
 0x1a1   :  { %2752 = vmatmul.bf16.gmra.mxu0 %v5023_v23  ;;  %v6336_v23 = vld [vmem:[%s10092_s0 + $0x260] sm:$0xf0] }
 0x1a2   :  { %v7476_v20 = vadd.f32 %v3851_v60, %v3283_v25  ;;  %3172 = vmatmul.bf16.gmra.mxu3 %v6031_v30  ;;  %3321 = vmatmul.bf16.gmra.mxu1 %v5027_v54  ;;  %v5034_v60 = vld [vmem:[%s10092_s0 + $0x258] sm:$0xf] }
 0x1a3   :  { %v5035_v1 = vor.u32 %v6336_v23, %v5034_v60 }
 0x1a4   :  { %10236 = vst [vmem:[#allocation51_spill] sm:$0xff] %v7476_v20 }
 0x1a5   :  { %v7484_v32 = vpop.f32.mrf.mxu3  ;;  %v3858_v29 = vpop.f32.mrf.mxu2 }
 0x1a6   :  { %10237 = vst [vmem:[#allocation52_spill] sm:$0xff] %v7484_v32  ;;  %v2715_v34 = vpop.f32.mrf.mxu0 }
 0x1a7   :  { %v3284_v53 = vpop.f32.mrf.mxu1 }
 0x1a8   :  { %v3285_v41 = vadd.f32 %v3284_v53, %v2715_v34  ;;  %v6043_v34 = vor.u32 %v6588_v56, %v6042_v24 }
 0x1aa   :  { %v7486_v43 = vadd.f32 %v3853_v33, %v3285_v41  ;;  %6174 = vmatmul.msk.bf16.gmra.mxu2 %vm2287_vm0, %v5055_v47  ;;  %v6335_v33 = vld [vmem:[%s10092_s0 + $0x25c] sm:$0xf] }
 0x1ab   :  { %v5039_v47 = vor.u32 %v6335_v33, %v5036_v12 }
 0x1ad   :  { %v7507_v30 = vpop.f32.mrf.mxu3  ;;  %v3861_v54 = vpop.f32.mrf.mxu2 }
 0x1ae   :  { %10238 = vst [vmem:[#allocation53_spill] sm:$0xff] %v7507_v30  ;;  %v2718_v25 = vpop.f32.mrf.mxu0  ;;  %v6343_v30 = vld [vmem:[%s10092_s0 + $0x298] sm:$0xf0] }
 0x1af   :  { %v3287_v53 = vpop.f32.mrf.mxu1  ;;  %v5067_v24 = vor.u32 %v6343_v30, %v5066_v4  ;;  %v6591_v4 = vld [vmem:[%s10092_s0 + $0xa58] sm:$0xf0]  ;;  %v5048_v30 = vld [vmem:[%s10092_s0 + $0x27c] sm:$0xf0] }
 0x1b0   :  { %v3288_v41 = vadd.f32 %v3287_v53, %v2718_v25  ;;  %v6054_v25 = vld [vmem:[%s10092_s0 + $0xa50] sm:$0xf] }
 0x1b1   :  { %2757 = vmatmul.bf16.gmra.mxu0 %v5035_v1  ;;  %v6339_v1 = vld [vmem:[%s10092_s0 + $0x278] sm:$0xf0] }
 0x1b2   :  { %v7509_v32 = vadd.f32 %v3856_v14, %v3288_v41  ;;  %3177 = vmatmul.bf16.gmra.mxu3 %v6043_v34  ;;  %3326 = vmatmul.bf16.gmra.mxu1 %v5039_v47  ;;  %v5046_v14 = vld [vmem:[%s10092_s0 + $0x270] sm:$0xf] }
 0x1b3   :  { %v5047_v53 = vor.u32 %v6339_v1, %v5046_v14 }
 0x1b4   :  { %10239 = vst [vmem:[#allocation54_spill] sm:$0xff] %v7509_v32 }
 0x1b5   :  { %v7517_v49 = vpop.f32.mrf.mxu3  ;;  %v3863_v60 = vpop.f32.mrf.mxu2 }
 0x1b6   :  { %10240 = vst [vmem:[#allocation55_spill] sm:$0xff] %v7517_v49  ;;  %v2720_v23 = vpop.f32.mrf.mxu0 }
 0x1b7   :  { %v3289_v56 = vpop.f32.mrf.mxu1 }
 0x1b8   :  { %v3290_v33 = vadd.f32 %v3289_v56, %v2720_v23  ;;  %v6055_v23 = vor.u32 %v6591_v4, %v6054_v25 }
 0x1ba   :  { %v7519_v12 = vadd.f32 %v3858_v29, %v3290_v33  ;;  %6175 = vmatmul.msk.bf16.gmra.mxu2 %vm2287_vm0, %v5067_v24  ;;  %v6338_v29 = vld [vmem:[%s10092_s0 + $0x274] sm:$0xf] }
 0x1bb   :  { %v5051_v24 = vor.u32 %v6338_v29, %v5048_v30 }
 0x1bd   :  { %v7540_v34 = vpop.f32.mrf.mxu3  ;;  %v3866_v47 = vpop.f32.mrf.mxu2 }
 0x1be   :  { %10241 = vst [vmem:[#allocation56_spill] sm:$0xff] %v7540_v34  ;;  %v2723_v41 = vpop.f32.mrf.mxu0  ;;  %v6346_v34 = vld [vmem:[%s10092_s0 + $0x2b0] sm:$0xf0] }
 0x1bf   :  { %v3292_v56 = vpop.f32.mrf.mxu1  ;;  %v5079_v25 = vor.u32 %v6346_v34, %v5078_v27  ;;  %v6594_v27 = vld [vmem:[%s10092_s0 + $0xa70] sm:$0xf0]  ;;  %v5060_v34 = vld [vmem:[%s10092_s0 + $0x294] sm:$0xf0] }
 0x1c0   :  { %v3293_v33 = vadd.f32 %v3292_v56, %v2723_v41  ;;  %v6066_v41 = vld [vmem:[%s10092_s0 + $0xa68] sm:$0xf] }
 0x1c1   :  { %2762 = vmatmul.bf16.gmra.mxu0 %v5047_v53  ;;  %v6342_v53 = vld [vmem:[%s10092_s0 + $0x290] sm:$0xf0] }
 0x1c2   :  { %v7542_v49 = vadd.f32 %v3861_v54, %v3293_v33  ;;  %3182 = vmatmul.bf16.gmra.mxu3 %v6055_v23  ;;  %3331 = vmatmul.bf16.gmra.mxu1 %v5051_v24  ;;  %v5058_v54 = vld [vmem:[%s10092_s0 + $0x288] sm:$0xf] }
 0x1c3   :  { %v5059_v56 = vor.u32 %v6342_v53, %v5058_v54 }
 0x1c4   :  { %10242 = vst [vmem:[#allocation57_spill] sm:$0xff] %v7542_v49 }
 0x1c5   :  { %v7550_v6 = vpop.f32.mrf.mxu3  ;;  %v3868_v14 = vpop.f32.mrf.mxu2 }
 0x1c6   :  { %10243 = vst [vmem:[#allocation58_spill] sm:$0xff] %v7550_v6  ;;  %v2725_v1 = vpop.f32.mrf.mxu0 }
 0x1c7   :  { %v3294_v4 = vpop.f32.mrf.mxu1 }
 0x1c8   :  { %v3295_v29 = vadd.f32 %v3294_v4, %v2725_v1  ;;  %v6067_v1 = vor.u32 %v6594_v27, %v6066_v41 }
 0x1ca   :  { %v7552_v30 = vadd.f32 %v3863_v60, %v3295_v29  ;;  %6176 = vmatmul.msk.bf16.gmra.mxu2 %vm2287_vm0, %v5079_v25  ;;  %v6341_v60 = vld [vmem:[%s10092_s0 + $0x28c] sm:$0xf] }
 0x1cb   :  { %v5063_v25 = vor.u32 %v6341_v60, %v5060_v34 }
 0x1cd   :  { %v7573_v23 = vpop.f32.mrf.mxu3  ;;  %v3871_v24 = vpop.f32.mrf.mxu2 }
 0x1ce   :  { %10244 = vst [vmem:[#allocation59_spill] sm:$0xff] %v7573_v23  ;;  %v2728_v33 = vpop.f32.mrf.mxu0  ;;  %v6349_v23 = vld [vmem:[%s10092_s0 + $0x2c8] sm:$0xf0] }
 0x1cf   :  { %v3297_v4 = vpop.f32.mrf.mxu1  ;;  %v5091_v41 = vor.u32 %v6349_v23, %v5090_v52  ;;  %v5072_v52 = vld [vmem:[%s10092_s0 + $0x2ac] sm:$0xf0] }
 0x1d0   :  { %v3298_v29 = vadd.f32 %v3297_v4, %v2728_v33  ;;  %v6344_v33 = vld [vmem:[%s10092_s0 + $0x2a4] sm:$0xf]  ;;  %v5744_v23 = vld [vmem:[%s10092_s0 + $0x7ec] sm:$0xf0] }
 0x1d1   :  { %2767 = vmatmul.bf16.gmra.mxu0 %v5059_v56  ;;  %v6345_v56 = vld [vmem:[%s10092_s0 + $0x2a8] sm:$0xf0] }
 0x1d2   :  { %v7575_v6 = vadd.f32 %v3866_v47, %v3298_v29  ;;  %3187 = vmatmul.bf16.gmra.mxu3 %v6067_v1  ;;  %3336 = vmatmul.bf16.gmra.mxu1 %v5063_v25  ;;  %v5070_v47 = vld [vmem:[%s10092_s0 + $0x2a0] sm:$0xf] }
 0x1d3   :  { %v5071_v4 = vor.u32 %v6345_v56, %v5070_v47 }
 0x1d4   :  { %10245 = vst [vmem:[#allocation60_spill] sm:$0xff] %v7575_v6 }
 0x1d5   :  { %v7583_v36 = vpop.f32.mrf.mxu3  ;;  %v3873_v54 = vpop.f32.mrf.mxu2 }
 0x1d6   :  { %10246 = vst [vmem:[#allocation61_spill] sm:$0xff] %v7583_v36  ;;  %v2730_v53 = vpop.f32.mrf.mxu0 }
 0x1d7   :  { %v3299_v27 = vpop.f32.mrf.mxu1 }
 0x1d8   :  { %v3300_v60 = vadd.f32 %v3299_v27, %v2730_v53  ;;  %v5075_v53 = vor.u32 %v6344_v33, %v5072_v52 }
 0x1da   :  { %v7585_v34 = vadd.f32 %v3868_v14, %v3300_v60  ;;  %6177 = vmatmul.msk.bf16.gmra.mxu2 %vm2287_vm0, %v5091_v41  ;;  %v6512_v14 = vld [vmem:[%s10092_s0 + $0x7e4] sm:$0xf] }
 0x1db   :  { %v5747_v41 = vor.u32 %v6512_v14, %v5744_v23 }
 0x1dc   :  { %10247 = vst [vmem:[#allocation62_spill] sm:$0xff] %v7585_v34 }
 0x1dd   :  { %v7606_v1 = vpop.f32.mrf.mxu3  ;;  %v3876_v25 = vpop.f32.mrf.mxu2 }
 0x1de   :  { %10248 = vst [vmem:[#allocation63_spill] sm:$0xff] %v7606_v1  ;;  %v2733_v29 = vpop.f32.mrf.mxu0  ;;  %v6352_v1 = vld [vmem:[%s10092_s0 + $0x2e0] sm:$0xf0] }
 0x1df   :  { %v3302_v27 = vpop.f32.mrf.mxu1  ;;  %v5103_v33 = vor.u32 %v6352_v1, %v5102_v17  ;;  %v5084_v17 = vld [vmem:[%s10092_s0 + $0x2c4] sm:$0xf0] }
 0x1e0   :  { %v3303_v60 = vadd.f32 %v3302_v27, %v2733_v29  ;;  %v6347_v29 = vld [vmem:[%s10092_s0 + $0x2bc] sm:$0xf]  ;;  %v5756_v1 = vld [vmem:[%s10092_s0 + $0x804] sm:$0xf0] }
 0x1e1   :  { %2772 = vmatmul.bf16.gmra.mxu0 %v5071_v4  ;;  %v6348_v4 = vld [vmem:[%s10092_s0 + $0x2c0] sm:$0xf0] }
 0x1e2   :  { %v7608_v36 = vadd.f32 %v3871_v24, %v3303_v60  ;;  %3341 = vmatmul.bf16.gmra.mxu1 %v5075_v53  ;;  %3621 = vmatmul.bf16.vlgmr.msrb.gmra.mxu3 %v5747_v41  ;;  %v5082_v24 = vld [vmem:[%s10092_s0 + $0x2b8] sm:$0xf] }
 0x1e3   :  { %v5083_v27 = vor.u32 %v6348_v4, %v5082_v24 }
 0x1e4   :  { %10249 = vst [vmem:[#allocation64_spill] sm:$0xff] %v7608_v36 }
 0x1e5   :  { %v7616_v2 = vpop.f32.mrf.mxu3  ;;  %v3878_v47 = vpop.f32.mrf.mxu2 }
 0x1e6   :  { %10250 = vst [vmem:[#allocation65_spill] sm:$0xff] %v7616_v2  ;;  %v2735_v56 = vpop.f32.mrf.mxu0 }
 0x1e7   :  { %v3304_v52 = vpop.f32.mrf.mxu1 }
 0x1e8   :  { %v3305_v14 = vadd.f32 %v3304_v52, %v2735_v56  ;;  %v5087_v56 = vor.u32 %v6347_v29, %v5084_v17 }
 0x1ea   :  { %v7618_v23 = vadd.f32 %v3873_v54, %v3305_v14  ;;  %6178 = vmatmul.msk.bf16.gmra.mxu2 %vm2287_vm0, %v5103_v33  ;;  %v6515_v54 = vld [vmem:[%s10092_s0 + $0x7fc] sm:$0xf] }
 0x1eb   :  { %v5759_v33 = vor.u32 %v6515_v54, %v5756_v1 }
 0x1ec   :  { %10251 = vst [vmem:[#allocation66_spill] sm:$0xff] %v7618_v23 }
 0x1ed   :  { %v7639_v53 = vpop.f32.mrf.mxu3  ;;  %v3881_v41 = vpop.f32.mrf.mxu2 }
 0x1ee   :  { %10252 = vst [vmem:[#allocation67_spill] sm:$0xff] %v7639_v53  ;;  %v2738_v60 = vpop.f32.mrf.mxu0  ;;  %v6355_v53 = vld [vmem:[%s10092_s0 + $0x2f8] sm:$0xf0] }
 0x1ef   :  { %v3307_v52 = vpop.f32.mrf.mxu1  ;;  %v5115_v29 = vor.u32 %v6355_v53, %v5114_v50  ;;  %v5096_v50 = vld [vmem:[%s10092_s0 + $0x2dc] sm:$0xf0] }
 0x1f0   :  { %v3308_v14 = vadd.f32 %v3307_v52, %v2738_v60  ;;  %v6350_v60 = vld [vmem:[%s10092_s0 + $0x2d4] sm:$0xf]  ;;  %v5768_v53 = vld [vmem:[%s10092_s0 + $0x81c] sm:$0xf0] }
 0x1f1   :  { %2777 = vmatmul.bf16.gmra.mxu0 %v5083_v27  ;;  %v6351_v27 = vld [vmem:[%s10092_s0 + $0x2d8] sm:$0xf0] }
 0x1f2   :  { %v7641_v2 = vadd.f32 %v3876_v25, %v3308_v14  ;;  %3346 = vmatmul.bf16.gmra.mxu1 %v5087_v56  ;;  %3626 = vmatmul.bf16.gmra.mxu3 %v5759_v33  ;;  %v5094_v25 = vld [vmem:[%s10092_s0 + $0x2d0] sm:$0xf] }
 0x1f3   :  { %v5095_v52 = vor.u32 %v6351_v27, %v5094_v25 }
 0x1f4   :  { %10253 = vst [vmem:[#allocation68_spill] sm:$0xff] %v7641_v2 }
 0x1f5   :  { %v7649_v37 = vpop.f32.mrf.mxu3  ;;  %v3883_v24 = vpop.f32.mrf.mxu2 }
 0x1f6   :  { %10254 = vst [vmem:[#allocation69_spill] sm:$0xff] %v7649_v37  ;;  %v2740_v4 = vpop.f32.mrf.mxu0 }
 0x1f7   :  { %v3309_v17 = vpop.f32.mrf.mxu1 }
 0x1f8   :  { %v3310_v54 = vadd.f32 %v3309_v17, %v2740_v4  ;;  %v5099_v4 = vor.u32 %v6350_v60, %v5096_v50 }
 0x1fa   :  { %v7651_v1 = vadd.f32 %v3878_v47, %v3310_v54  ;;  %6179 = vmatmul.msk.bf16.gmra.mxu2 %vm2287_vm0, %v5115_v29  ;;  %v6518_v47 = vld [vmem:[%s10092_s0 + $0x814] sm:$0xf] }
 0x1fb   :  { %v5771_v29 = vor.u32 %v6518_v47, %v5768_v53 }
 0x1fc   :  { %10255 = vst [vmem:[#allocation70_spill] sm:$0xff] %v7651_v1  ;;  %v5474_v1 = vld [vmem:[%s10092_s0 + $0x5c0] sm:$0xf] }
 0x1fd   :  { %v7672_v56 = vpop.f32.mrf.mxu3  ;;  %v3886_v33 = vpop.f32.mrf.mxu2 }
 0x1fe   :  { %10256 = vst [vmem:[#allocation71_spill] sm:$0xff] %v7672_v56  ;;  %v2743_v14 = vpop.f32.mrf.mxu0  ;;  %v6358_v56 = vld [vmem:[%s10092_s0 + $0x310] sm:$0xf0] }
 0x1ff   :  { %v3312_v17 = vpop.f32.mrf.mxu1  ;;  %v5127_v60 = vor.u32 %v6358_v56, %v5126_v21  ;;  %v5108_v21 = vld [vmem:[%s10092_s0 + $0x2f4] sm:$0xf0] }
 0x200   :  { %v3313_v54 = vadd.f32 %v3312_v17, %v2743_v14  ;;  %v6353_v14 = vld [vmem:[%s10092_s0 + $0x2ec] sm:$0xf]  ;;  %v5780_v56 = vld [vmem:[%s10092_s0 + $0x834] sm:$0xf0] }
 0x201   :  { %2782 = vmatmul.bf16.gmra.mxu0 %v5095_v52  ;;  %v6354_v52 = vld [vmem:[%s10092_s0 + $0x2f0] sm:$0xf0] }
 0x202   :  { %v7674_v37 = vadd.f32 %v3881_v41, %v3313_v54  ;;  %3351 = vmatmul.bf16.gmra.mxu1 %v5099_v4  ;;  %3631 = vmatmul.bf16.gmra.mxu3 %v5771_v29  ;;  %v5106_v41 = vld [vmem:[%s10092_s0 + $0x2e8] sm:$0xf] }
 0x203   :  { %v5107_v17 = vor.u32 %v6354_v52, %v5106_v41 }
 0x204   :  { %10257 = vst [vmem:[#allocation72_spill] sm:$0xff] %v7674_v37 }
 0x205   :  { %v7682_v8 = vpop.f32.mrf.mxu3  ;;  %v3888_v25 = vpop.f32.mrf.mxu2 }
 0x206   :  { %10258 = vst [vmem:[#allocation73_spill] sm:$0xff] %v7682_v8  ;;  %v2745_v27 = vpop.f32.mrf.mxu0 }
 0x207   :  { %v3314_v50 = vpop.f32.mrf.mxu1 }
 0x208   :  { %v3315_v47 = vadd.f32 %v3314_v50, %v2745_v27  ;;  %v5111_v27 = vor.u32 %v6353_v14, %v5108_v21 }
 0x20a   :  { %v7684_v53 = vadd.f32 %v3883_v24, %v3315_v47  ;;  %6180 = vmatmul.msk.bf16.gmra.mxu2 %vm2287_vm0, %v5127_v60  ;;  %v6521_v24 = vld [vmem:[%s10092_s0 + $0x82c] sm:$0xf] }
 0x20b   :  { %v5783_v60 = vor.u32 %v6521_v24, %v5780_v56 }
 0x20c   :  { %10259 = vst [vmem:[#allocation74_spill] sm:$0xff] %v7684_v53 }
 0x20d   :  { %v7705_v4 = vpop.f32.mrf.mxu3  ;;  %v3891_v29 = vpop.f32.mrf.mxu2 }
 0x20e   :  { %10260 = vst [vmem:[#allocation75_spill] sm:$0xff] %v7705_v4  ;;  %v2748_v54 = vpop.f32.mrf.mxu0  ;;  %v6361_v4 = vld [vmem:[%s10092_s0 + $0x328] sm:$0xf0] }
 0x20f   :  { %v3317_v50 = vpop.f32.mrf.mxu1  ;;  %v5139_v14 = vor.u32 %v6361_v4, %v5138_v58  ;;  %v5120_v58 = vld [vmem:[%s10092_s0 + $0x30c] sm:$0xf0] }
 0x210   :  { %v3318_v47 = vadd.f32 %v3317_v50, %v2748_v54  ;;  %v6356_v54 = vld [vmem:[%s10092_s0 + $0x304] sm:$0xf]  ;;  %v5792_v4 = vld [vmem:[%s10092_s0 + $0x84c] sm:$0xf0] }
 0x211   :  { %2787 = vmatmul.bf16.gmra.mxu0 %v5107_v17  ;;  %v6357_v17 = vld [vmem:[%s10092_s0 + $0x308] sm:$0xf0] }
 0x212   :  { %v7707_v8 = vadd.f32 %v3886_v33, %v3318_v47  ;;  %3356 = vmatmul.bf16.gmra.mxu1 %v5111_v27  ;;  %3636 = vmatmul.bf16.gmra.mxu3 %v5783_v60  ;;  %v5118_v33 = vld [vmem:[%s10092_s0 + $0x300] sm:$0xf] }
 0x213   :  { %v5119_v50 = vor.u32 %v6357_v17, %v5118_v33 }
 0x214   :  { %10261 = vst [vmem:[#allocation76_spill] sm:$0xff] %v7707_v8 }
 0x215   :  { %v7715_v53 = vpop.f32.mrf.mxu3  ;;  %v3893_v41 = vpop.f32.mrf.mxu2 }
 0x216   :  { %10262 = vst [vmem:[#allocation77_spill] sm:$0xff] %v7715_v53  ;;  %v2750_v52 = vpop.f32.mrf.mxu0 }
 0x217   :  { %v3319_v21 = vpop.f32.mrf.mxu1 }
 0x218   :  { %v3320_v24 = vadd.f32 %v3319_v21, %v2750_v52  ;;  %v5123_v52 = vor.u32 %v6356_v54, %v5120_v58 }
 0x21a   :  { %v7717_v56 = vadd.f32 %v3888_v25, %v3320_v24  ;;  %6181 = vmatmul.msk.bf16.gmra.mxu2 %vm2287_vm0, %v5139_v14  ;;  %v6524_v25 = vld [vmem:[%s10092_s0 + $0x844] sm:$0xf] }
 0x21b   :  { %v5795_v14 = vor.u32 %v6524_v25, %v5792_v4 }
 0x21c   :  { %10263 = vst [vmem:[#allocation78_spill] sm:$0xff] %v7717_v56  ;;  %v5150_v56 = vld [vmem:[%s10092_s0 + $0x338] sm:$0xf] }
 0x21d   :  { %v7738_v27 = vpop.f32.mrf.mxu3  ;;  %v3896_v60 = vpop.f32.mrf.mxu2 }
 0x21e   :  { %10264 = vst [vmem:[#allocation79_spill] sm:$0xff] %v7738_v27  ;;  %v2753_v47 = vpop.f32.mrf.mxu0  ;;  %v6364_v27 = vld [vmem:[%s10092_s0 + $0x340] sm:$0xf0] }
 0x21f   :  { %v3322_v21 = vpop.f32.mrf.mxu1  ;;  %v5151_v54 = vor.u32 %v6364_v27, %v5150_v56  ;;  %v5132_v56 = vld [vmem:[%s10092_s0 + $0x324] sm:$0xf0] }
 0x220   :  { %v3323_v24 = vadd.f32 %v3322_v21, %v2753_v47  ;;  %v6359_v47 = vld [vmem:[%s10092_s0 + $0x31c] sm:$0xf]  ;;  %v5804_v27 = vld [vmem:[%s10092_s0 + $0x864] sm:$0xf0] }
 0x221   :  { %2792 = vmatmul.bf16.gmra.mxu0 %v5119_v50  ;;  %v6360_v50 = vld [vmem:[%s10092_s0 + $0x320] sm:$0xf0] }
 0x222   :  { %v7740_v53 = vadd.f32 %v3891_v29, %v3323_v24  ;;  %3361 = vmatmul.bf16.gmra.mxu1 %v5123_v52  ;;  %3641 = vmatmul.bf16.gmra.mxu3 %v5795_v14  ;;  %v5130_v29 = vld [vmem:[%s10092_s0 + $0x318] sm:$0xf] }
 0x223   :  { %v5131_v21 = vor.u32 %v6360_v50, %v5130_v29 }
 0x224   :  { %10265 = vst [vmem:[#allocation80_spill] sm:$0xff] %v7740_v53 }
 0x225   :  { %v7748_v8 = vpop.f32.mrf.mxu3  ;;  %v3898_v33 = vpop.f32.mrf.mxu2 }
 0x226   :  { %10266 = vst [vmem:[#allocation81_spill] sm:$0xff] %v7748_v8  ;;  %v2755_v17 = vpop.f32.mrf.mxu0 }
 0x227   :  { %v3324_v58 = vpop.f32.mrf.mxu1 }
 0x228   :  { %v3325_v25 = vadd.f32 %v3324_v58, %v2755_v17  ;;  %v5135_v17 = vor.u32 %v6359_v47, %v5132_v56 }
 0x22a   :  { %v7750_v4 = vadd.f32 %v3893_v41, %v3325_v25  ;;  %6182 = vmatmul.msk.bf16.gmra.mxu2 %vm2287_vm0, %v5151_v54  ;;  %v6527_v41 = vld [vmem:[%s10092_s0 + $0x85c] sm:$0xf] }
 0x22b   :  { %v5807_v54 = vor.u32 %v6527_v41, %v5804_v27 }
 0x22c   :  { %10267 = vst [vmem:[#allocation82_spill] sm:$0xff] %v7750_v4  ;;  %v5162_v4 = vld [vmem:[%s10092_s0 + $0x350] sm:$0xf] }
 0x22d   :  { %v7771_v52 = vpop.f32.mrf.mxu3  ;;  %v3901_v14 = vpop.f32.mrf.mxu2 }
 0x22e   :  { %10268 = vst [vmem:[#allocation83_spill] sm:$0xff] %v7771_v52  ;;  %v2758_v24 = vpop.f32.mrf.mxu0  ;;  %v6367_v52 = vld [vmem:[%s10092_s0 + $0x358] sm:$0xf0] }
 0x22f   :  { %v3327_v58 = vpop.f32.mrf.mxu1  ;;  %v5163_v47 = vor.u32 %v6367_v52, %v5162_v4  ;;  %v5144_v4 = vld [vmem:[%s10092_s0 + $0x33c] sm:$0xf0] }
 0x230   :  { %v3328_v25 = vadd.f32 %v3327_v58, %v2758_v24  ;;  %v6362_v24 = vld [vmem:[%s10092_s0 + $0x334] sm:$0xf]  ;;  %v5816_v52 = vld [vmem:[%s10092_s0 + $0x87c] sm:$0xf0] }
 0x231   :  { %2797 = vmatmul.bf16.gmra.mxu0 %v5131_v21  ;;  %v6363_v21 = vld [vmem:[%s10092_s0 + $0x338] sm:$0xf0] }
 0x232   :  { %v7773_v8 = vadd.f32 %v3896_v60, %v3328_v25  ;;  %3366 = vmatmul.bf16.gmra.mxu1 %v5135_v17  ;;  %3646 = vmatmul.bf16.gmra.mxu3 %v5807_v54  ;;  %v5142_v60 = vld [vmem:[%s10092_s0 + $0x330] sm:$0xf] }
 0x233   :  { %v5143_v58 = vor.u32 %v6363_v21, %v5142_v60 }
 0x234   :  { %10269 = vst [vmem:[#allocation84_spill] sm:$0xff] %v7773_v8 }
 0x235   :  { %v7781_v53 = vpop.f32.mrf.mxu3  ;;  %v3903_v29 = vpop.f32.mrf.mxu2 }
 0x236   :  { %10270 = vst [vmem:[#allocation85_spill] sm:$0xff] %v7781_v53  ;;  %v2760_v50 = vpop.f32.mrf.mxu0 }
 0x237   :  { %v3329_v56 = vpop.f32.mrf.mxu1 }
 0x238   :  { %v3330_v41 = vadd.f32 %v3329_v56, %v2760_v50  ;;  %v5147_v50 = vor.u32 %v6362_v24, %v5144_v4 }
 0x23a   :  { %v7783_v27 = vadd.f32 %v3898_v33, %v3330_v41  ;;  %6183 = vmatmul.msk.bf16.gmra.mxu2 %vm2287_vm0, %v5163_v47  ;;  %v6530_v33 = vld [vmem:[%s10092_s0 + $0x874] sm:$0xf] }
 0x23b   :  { %v5819_v47 = vor.u32 %v6530_v33, %v5816_v52 }
 0x23c   :  { %10271 = vst [vmem:[#allocation86_spill] sm:$0xff] %v7783_v27  ;;  %v5174_v27 = vld [vmem:[%s10092_s0 + $0x368] sm:$0xf] }
 0x23d   :  { %v7804_v17 = vpop.f32.mrf.mxu3  ;;  %v3906_v54 = vpop.f32.mrf.mxu2 }
 0x23e   :  { %10272 = vst [vmem:[#allocation87_spill] sm:$0xff] %v7804_v17  ;;  %v2763_v25 = vpop.f32.mrf.mxu0  ;;  %v6370_v17 = vld [vmem:[%s10092_s0 + $0x370] sm:$0xf0] }
 0x23f   :  { %v3332_v56 = vpop.f32.mrf.mxu1  ;;  %v5175_v24 = vor.u32 %v6370_v17, %v5174_v27  ;;  %v5156_v27 = vld [vmem:[%s10092_s0 + $0x354] sm:$0xf0] }
 0x240   :  { %v3333_v41 = vadd.f32 %v3332_v56, %v2763_v25  ;;  %v6365_v25 = vld [vmem:[%s10092_s0 + $0x34c] sm:$0xf]  ;;  %v5828_v17 = vld [vmem:[%s10092_s0 + $0x894] sm:$0xf0] }
 0x241   :  { %2802 = vmatmul.bf16.gmra.mxu0 %v5143_v58  ;;  %v6366_v58 = vld [vmem:[%s10092_s0 + $0x350] sm:$0xf0] }
 0x242   :  { %v7806_v53 = vadd.f32 %v3901_v14, %v3333_v41  ;;  %3371 = vmatmul.bf16.gmra.mxu1 %v5147_v50  ;;  %3651 = vmatmul.bf16.gmra.mxu3 %v5819_v47  ;;  %v5154_v14 = vld [vmem:[%s10092_s0 + $0x348] sm:$0xf] }
 0x243   :  { %v5155_v56 = vor.u32 %v6366_v58, %v5154_v14 }
 0x244   :  { %10273 = vst [vmem:[#allocation88_spill] sm:$0xff] %v7806_v53 }
 0x245   :  { %v7814_v8 = vpop.f32.mrf.mxu3  ;;  %v3908_v60 = vpop.f32.mrf.mxu2 }
 0x246   :  { %10274 = vst [vmem:[#allocation89_spill] sm:$0xff] %v7814_v8  ;;  %v2765_v21 = vpop.f32.mrf.mxu0 }
 0x247   :  { %v3334_v4 = vpop.f32.mrf.mxu1 }
 0x248   :  { %v3335_v33 = vadd.f32 %v3334_v4, %v2765_v21  ;;  %v5159_v21 = vor.u32 %v6365_v25, %v5156_v27 }
 0x24a   :  { %v7816_v52 = vadd.f32 %v3903_v29, %v3335_v33  ;;  %6184 = vmatmul.msk.bf16.gmra.mxu2 %vm2287_vm0, %v5175_v24  ;;  %v6533_v29 = vld [vmem:[%s10092_s0 + $0x88c] sm:$0xf] }
 0x24b   :  { %v5831_v24 = vor.u32 %v6533_v29, %v5828_v17 }
 0x24c   :  { %10275 = vst [vmem:[#allocation90_spill] sm:$0xff] %v7816_v52  ;;  %v5186_v52 = vld [vmem:[%s10092_s0 + $0x380] sm:$0xf] }
 0x24d   :  { %v7837_v50 = vpop.f32.mrf.mxu3  ;;  %v3911_v47 = vpop.f32.mrf.mxu2 }
 0x24e   :  { %10276 = vst [vmem:[#allocation91_spill] sm:$0xff] %v7837_v50  ;;  %v2768_v41 = vpop.f32.mrf.mxu0  ;;  %v6373_v50 = vld [vmem:[%s10092_s0 + $0x388] sm:$0xf0] }
 0x24f   :  { %v3337_v4 = vpop.f32.mrf.mxu1  ;;  %v5187_v25 = vor.u32 %v6373_v50, %v5186_v52  ;;  %v5168_v52 = vld [vmem:[%s10092_s0 + $0x36c] sm:$0xf0] }
 0x250   :  { %v3338_v33 = vadd.f32 %v3337_v4, %v2768_v41  ;;  %v6368_v41 = vld [vmem:[%s10092_s0 + $0x364] sm:$0xf]  ;;  %v5840_v50 = vld [vmem:[%s10092_s0 + $0x8ac] sm:$0xf0] }
 0x251   :  { %2807 = vmatmul.bf16.gmra.mxu0 %v5155_v56  ;;  %v6369_v56 = vld [vmem:[%s10092_s0 + $0x368] sm:$0xf0] }
 0x252   :  { %v7839_v8 = vadd.f32 %v3906_v54, %v3338_v33  ;;  %3376 = vmatmul.bf16.gmra.mxu1 %v5159_v21  ;;  %3656 = vmatmul.bf16.gmra.mxu3 %v5831_v24  ;;  %v5166_v54 = vld [vmem:[%s10092_s0 + $0x360] sm:$0xf] }
 0x253   :  { %v5167_v4 = vor.u32 %v6369_v56, %v5166_v54 }
 0x254   :  { %10277 = vst [vmem:[#allocation92_spill] sm:$0xff] %v7839_v8  ;;  %v5210_v8 = vld [vmem:[%s10092_s0 + $0x3b0] sm:$0xf] }
 0x255   :  { %v7847_v53 = vpop.f32.mrf.mxu3  ;;  %v3913_v14 = vpop.f32.mrf.mxu2 }
 0x256   :  { %10278 = vst [vmem:[#allocation93_spill] sm:$0xff] %v7847_v53  ;;  %v2770_v58 = vpop.f32.mrf.mxu0 }
 0x257   :  { %v3339_v27 = vpop.f32.mrf.mxu1 }
 0x258   :  { %v3340_v29 = vadd.f32 %v3339_v27, %v2770_v58  ;;  %v5171_v58 = vor.u32 %v6368_v41, %v5168_v52 }
 0x25a   :  { %v7849_v17 = vadd.f32 %v3908_v60, %v3340_v29  ;;  %6185 = vmatmul.msk.bf16.gmra.mxu2 %vm2287_vm0, %v5187_v25  ;;  %v6536_v60 = vld [vmem:[%s10092_s0 + $0x8a4] sm:$0xf] }
 0x25b   :  { %v5843_v25 = vor.u32 %v6536_v60, %v5840_v50 }
 0x25c   :  { %10279 = vst [vmem:[#allocation94_spill] sm:$0xff] %v7849_v17  ;;  %v5198_v17 = vld [vmem:[%s10092_s0 + $0x398] sm:$0xf] }
 0x25d   :  { %v7870_v21 = vpop.f32.mrf.mxu3  ;;  %v3916_v24 = vpop.f32.mrf.mxu2 }
 0x25e   :  { %10280 = vst [vmem:[#allocation95_spill] sm:$0xff] %v7870_v21  ;;  %v2773_v33 = vpop.f32.mrf.mxu0  ;;  %v6376_v21 = vld [vmem:[%s10092_s0 + $0x3a0] sm:$0xf0] }
 0x25f   :  { %v3342_v27 = vpop.f32.mrf.mxu1  ;;  %v5199_v60 = vor.u32 %v6376_v21, %v5198_v17  ;;  %v5180_v17 = vld [vmem:[%s10092_s0 + $0x384] sm:$0xf0] }
 0x260   :  { %v3343_v29 = vadd.f32 %v3342_v27, %v2773_v33  ;;  %v5178_v33 = vld [vmem:[%s10092_s0 + $0x378] sm:$0xf]  ;;  %v5852_v21 = vld [vmem:[%s10092_s0 + $0x8c4] sm:$0xf0]  ;;  %v6379_v27 = vld [vmem:[%s10092_s0 + $0x3b8] sm:$0xf0] }
 0x261   :  { %2812 = vmatmul.bf16.gmra.mxu0 %v5167_v4 }
 0x262   :  { %v7872_v53 = vadd.f32 %v3911_v47, %v3343_v29  ;;  %3381 = vmatmul.bf16.gmra.mxu1 %v5171_v58  ;;  %3661 = vmatmul.bf16.gmra.mxu3 %v5843_v25  ;;  %v6372_v58 = vld [vmem:[%s10092_s0 + $0x380] sm:$0xf0]  ;;  %v6371_v25 = vld [vmem:[%s10092_s0 + $0x37c] sm:$0xf] }
 0x264   :  { %10281 = vst [vmem:[#allocation96_spill] sm:$0xff] %v7872_v53 }
 0x265   :  { %v7882_v56 = vpop.f32.mrf.mxu3  ;;  %v3918_v41 = vpop.f32.mrf.mxu2 }
 0x266   :  { %10282 = vst [vmem:[#allocation97_spill] sm:$0xff] %v7882_v56  ;;  %v2775_v52 = vpop.f32.mrf.mxu0 }
 0x267   :  { %v3344_v47 = vpop.f32.mrf.mxu1 }
 0x268   :  { %v3345_v50 = vadd.f32 %v3344_v47, %v2775_v52 }
 0x26a   :  { %v7884_v4 = vadd.f32 %v3913_v14, %v3345_v50  ;;  %6186 = vmatmul.msk.bf16.gmra.mxu2 %vm2287_vm0, %v5199_v60  ;;  %v6539_v14 = vld [vmem:[%s10092_s0 + $0x8bc] sm:$0xf]  ;;  %v5179_v60 = vor.u32 %v6372_v58, %v5178_v33  ;;  %v5183_v50 = vor.u32 %v6371_v25, %v5180_v17  ;;  %v5211_v17 = vor.u32 %v6379_v27, %v5210_v8  ;;  %v5192_v8 = vld [vmem:[%s10092_s0 + $0x39c] sm:$0xf0] }
 0x26b   :  { %v5855_v54 = vor.u32 %v6539_v14, %v5852_v21  ;;  %v6375_v21 = vld [vmem:[%s10092_s0 + $0x398] sm:$0xf0]  ;;  %v5864_v27 = vld [vmem:[%s10092_s0 + $0x8dc] sm:$0xf0] }
 0x26c   :  { %10283 = vst [vmem:[#allocation98_spill] sm:$0xff] %v7884_v4  ;;  %v5222_v4 = vld [vmem:[%s10092_s0 + $0x3c8] sm:$0xf] }
 0x26d   :  { %v7907_v29 = vpop.f32.mrf.mxu3  ;;  %v3921_v52 = vpop.f32.mrf.mxu2 }
 0x26e   :  { %10284 = vst [vmem:[#allocation99_spill] sm:$0xff] %v7907_v29  ;;  %v2778_v47 = vpop.f32.mrf.mxu0 }
 0x26f   :  { %v3347_v53 = vpop.f32.mrf.mxu1 }
 0x270   :  { %v3348_v7 = vadd.f32 %v3347_v53, %v2778_v47  ;;  %v6382_v47 = vld [vmem:[%s10092_s0 + $0x3d0] sm:$0xf0] }
 0x271   :  { %2817 = vmatmul.bf16.gmra.mxu0 %v5179_v60  ;;  %v6374_v60 = vld [vmem:[%s10092_s0 + $0x394] sm:$0xf] }
 0x272   :  { %v7909_v56 = vadd.f32 %v3916_v24, %v3348_v7  ;;  %3386 = vmatmul.bf16.gmra.mxu1 %v5183_v50  ;;  %3666 = vmatmul.bf16.gmra.mxu3 %v5855_v54  ;;  %v5190_v54 = vld [vmem:[%s10092_s0 + $0x390] sm:$0xf] }
 0x274   :  { %10285 = vst [vmem:[#allocation100_spill] sm:$0xff] %v7909_v56 }
 0x275   :  { %v7919_v58 = vpop.f32.mrf.mxu3  ;;  %v3923_v25 = vpop.f32.mrf.mxu2 }
 0x276   :  { %10286 = vst [vmem:[#allocation101_spill] sm:$0xff] %v7919_v58  ;;  %v2780_v53 = vpop.f32.mrf.mxu0 }
 0x277   :  { %v3349_v7 = vpop.f32.mrf.mxu1 }
 0x278   :  { %v3350_v24 = vadd.f32 %v3349_v7, %v2780_v53 }
 0x27a   :  { %v7921_v14 = vadd.f32 %v3918_v41, %v3350_v24  ;;  %6187 = vmatmul.msk.bf16.gmra.mxu2 %vm2287_vm0, %v5211_v17  ;;  %v6542_v41 = vld [vmem:[%s10092_s0 + $0x8d4] sm:$0xf]  ;;  %v5191_v17 = vor.u32 %v6375_v21, %v5190_v54  ;;  %v5195_v24 = vor.u32 %v6374_v60, %v5192_v8  ;;  %v5223_v8 = vor.u32 %v6382_v47, %v5222_v4  ;;  %v5204_v4 = vld [vmem:[%s10092_s0 + $0x3b4] sm:$0xf0] }
 0x27b   :  { %v5867_v33 = vor.u32 %v6542_v41, %v5864_v27  ;;  %v6378_v27 = vld [vmem:[%s10092_s0 + $0x3b0] sm:$0xf0]  ;;  %v5876_v47 = vld [vmem:[%s10092_s0 + $0x8f4] sm:$0xf0] }
 0x27c   :  { %10287 = vst [vmem:[#allocation102_spill] sm:$0xff] %v7921_v14 }
 0x27d   :  { %v7944_v50 = vpop.f32.mrf.mxu3  ;;  %v3926_v53 = vpop.f32.mrf.mxu2 }
 0x27e   :  { %10288 = vst [vmem:[#allocation103_spill] sm:$0xff] %v7944_v50  ;;  %v2783_v7 = vpop.f32.mrf.mxu0 }
 0x27f   :  { %v3352_v56 = vpop.f32.mrf.mxu1 }
 0x280   :  { %v3353_v31 = vadd.f32 %v3352_v56, %v2783_v7  ;;  %v6385_v7 = vld [vmem:[%s10092_s0 + $0x3e8] sm:$0xf0] }
 0x281   :  { %2822 = vmatmul.bf16.gmra.mxu0 %v5191_v17  ;;  %v6377_v17 = vld [vmem:[%s10092_s0 + $0x3ac] sm:$0xf] }
 0x282   :  { %v7946_v58 = vadd.f32 %v3921_v52, %v3353_v31  ;;  %3391 = vmatmul.bf16.gmra.mxu1 %v5195_v24  ;;  %3671 = vmatmul.bf16.gmra.mxu3 %v5867_v33  ;;  %v5202_v33 = vld [vmem:[%s10092_s0 + $0x3a8] sm:$0xf] }
 0x285   :  { %v7956_v21 = vpop.f32.mrf.mxu3  ;;  %v3928_v60 = vpop.f32.mrf.mxu2 }
 0x286   :  { %v2785_v56 = vpop.f32.mrf.mxu0 }
 0x287   :  { %v3354_v31 = vpop.f32.mrf.mxu1 }
 0x288   :  { %v3355_v52 = vadd.f32 %v3354_v31, %v2785_v56 }
 0x28a   :  { %v7958_v41 = vadd.f32 %v3923_v25, %v3355_v52  ;;  %6188 = vmatmul.msk.bf16.gmra.mxu2 %vm2287_vm0, %v5223_v8  ;;  %v6545_v25 = vld [vmem:[%s10092_s0 + $0x8ec] sm:$0xf]  ;;  %v5203_v8 = vor.u32 %v6378_v27, %v5202_v33  ;;  %v5207_v52 = vor.u32 %v6377_v17, %v5204_v4  ;;  %v5235_v4 = vor.u32 %v6385_v7, %v5234_v16  ;;  %v5216_v16 = vld [vmem:[%s10092_s0 + $0x3cc] sm:$0xf0] }
 0x28b   :  { %v5879_v54 = vor.u32 %v6545_v25, %v5876_v47  ;;  %v6381_v47 = vld [vmem:[%s10092_s0 + $0x3c8] sm:$0xf0]  ;;  %v5888_v7 = vld [vmem:[%s10092_s0 + $0x90c] sm:$0xf0] }
 0x28d   :  { %v7981_v24 = vpop.f32.mrf.mxu3  ;;  %v3931_v56 = vpop.f32.mrf.mxu2 }
 0x28e   :  { %v2788_v31 = vpop.f32.mrf.mxu0 }
 0x28f   :  { %v3357_v14 = vpop.f32.mrf.mxu1 }
 0x290   :  { %v3358_v40 = vadd.f32 %v3357_v14, %v2788_v31  ;;  %v6388_v31 = vld [vmem:[%s10092_s0 + $0x400] sm:$0xf0] }
 0x291   :  { %2827 = vmatmul.bf16.gmra.mxu0 %v5203_v8  ;;  %v6380_v8 = vld [vmem:[%s10092_s0 + $0x3c4] sm:$0xf] }
 0x292   :  { %v7983_v50 = vadd.f32 %v3926_v53, %v3358_v40  ;;  %3396 = vmatmul.bf16.gmra.mxu1 %v5207_v52  ;;  %3676 = vmatmul.bf16.gmra.mxu3 %v5879_v54  ;;  %v5214_v54 = vld [vmem:[%s10092_s0 + $0x3c0] sm:$0xf] }
 0x294   :  { %10289 = vst [vmem:[#allocation104_spill] sm:$0xff] %v7983_v50 }
 0x295   :  { %v7993_v27 = vpop.f32.mrf.mxu3  ;;  %v3933_v17 = vpop.f32.mrf.mxu2 }
 0x296   :  { %10290 = vst [vmem:[#allocation105_spill] sm:$0xff] %v7993_v27  ;;  %v2790_v14 = vpop.f32.mrf.mxu0  ;;  %v5246_v27 = vld [vmem:[%s10092_s0 + $0x3f8] sm:$0xf] }
 0x297   :  { %v3359_v40 = vpop.f32.mrf.mxu1 }
 0x298   :  { %v3360_v53 = vadd.f32 %v3359_v40, %v2790_v14 }
 0x29a   :  { %v7995_v25 = vadd.f32 %v3928_v60, %v3360_v53  ;;  %6189 = vmatmul.msk.bf16.gmra.mxu2 %vm2287_vm0, %v5235_v4  ;;  %v6548_v60 = vld [vmem:[%s10092_s0 + $0x904] sm:$0xf]  ;;  %v5215_v4 = vor.u32 %v6381_v47, %v5214_v54  ;;  %v5219_v53 = vor.u32 %v6380_v8, %v5216_v16  ;;  %v5247_v16 = vor.u32 %v6388_v31, %v5246_v27  ;;  %v5228_v27 = vld [vmem:[%s10092_s0 + $0x3e4] sm:$0xf0] }
 0x29b   :  { %v5891_v33 = vor.u32 %v6548_v60, %v5888_v7  ;;  %v6384_v7 = vld [vmem:[%s10092_s0 + $0x3e0] sm:$0xf0]  ;;  %v5900_v31 = vld [vmem:[%s10092_s0 + $0x924] sm:$0xf0] }
 0x29c   :  { %10291 = vst [vmem:[#allocation106_spill] sm:$0xff] %v7995_v25  ;;  %v5258_v25 = vld [vmem:[%s10092_s0 + $0x410] sm:$0xf] }
 0x29d   :  { %v8018_v52 = vpop.f32.mrf.mxu3  ;;  %v3936_v14 = vpop.f32.mrf.mxu2 }
 0x29e   :  { %v2793_v40 = vpop.f32.mrf.mxu0 }
 0x29f   :  { %v3362_v29 = vpop.f32.mrf.mxu1 }
 0x2a0   :  { %v3363_v50 = vadd.f32 %v3362_v29, %v2793_v40  ;;  %v6391_v40 = vld [vmem:[%s10092_s0 + $0x418] sm:$0xf0] }
 0x2a1   :  { %2832 = vmatmul.bf16.gmra.mxu0 %v5215_v4  ;;  %v6383_v4 = vld [vmem:[%s10092_s0 + $0x3dc] sm:$0xf] }
 0x2a2   :  { %v8020_v18 = vadd.f32 %v3931_v56, %v3363_v50  ;;  %3401 = vmatmul.bf16.gmra.mxu1 %v5219_v53  ;;  %3681 = vmatmul.bf16.gmra.mxu3 %v5891_v33  ;;  %v5226_v33 = vld [vmem:[%s10092_s0 + $0x3d8] sm:$0xf] }
 0x2a4   :  { %10292 = vst [vmem:[#allocation107_spill] sm:$0xff] %v8020_v18 }
 0x2a5   :  { %v8030_v47 = vpop.f32.mrf.mxu3  ;;  %v3938_v8 = vpop.f32.mrf.mxu2 }
 0x2a6   :  { %10293 = vst [vmem:[#allocation108_spill] sm:$0xff] %v8030_v47  ;;  %v2795_v29 = vpop.f32.mrf.mxu0 }
 0x2a7   :  { %v3364_v50 = vpop.f32.mrf.mxu1 }
 0x2a8   :  { %v3365_v56 = vadd.f32 %v3364_v50, %v2795_v29 }
 0x2aa   :  { %v8032_v60 = vadd.f32 %v3933_v17, %v3365_v56  ;;  %6190 = vmatmul.msk.bf16.gmra.mxu2 %vm2287_vm0, %v5247_v16  ;;  %v6551_v17 = vld [vmem:[%s10092_s0 + $0x91c] sm:$0xf]  ;;  %v5227_v16 = vor.u32 %v6384_v7, %v5226_v33  ;;  %v5231_v56 = vor.u32 %v6383_v4, %v5228_v27  ;;  %v5259_v27 = vor.u32 %v6391_v40, %v5258_v25  ;;  %v5240_v25 = vld [vmem:[%s10092_s0 + $0x3fc] sm:$0xf0] }
 0x2ab   :  { %v5903_v54 = vor.u32 %v6551_v17, %v5900_v31  ;;  %v6387_v31 = vld [vmem:[%s10092_s0 + $0x3f8] sm:$0xf0]  ;;  %v5912_v40 = vld [vmem:[%s10092_s0 + $0x93c] sm:$0xf0] }
 0x2ac   :  { %10294 = vst [vmem:[#allocation109_spill] sm:$0xff] %v8032_v60  ;;  %v5270_v60 = vld [vmem:[%s10092_s0 + $0x428] sm:$0xf] }
 0x2ad   :  { %v8055_v53 = vpop.f32.mrf.mxu3  ;;  %v3941_v29 = vpop.f32.mrf.mxu2 }
 0x2ae   :  { %v2798_v50 = vpop.f32.mrf.mxu0 }
 0x2af   :  { %v3367_v18 = vpop.f32.mrf.mxu1 }
 0x2b0   :  { %v3368_v46 = vadd.f32 %v3367_v18, %v2798_v50  ;;  %v6394_v50 = vld [vmem:[%s10092_s0 + $0x430] sm:$0xf0] }
 0x2b1   :  { %2837 = vmatmul.bf16.gmra.mxu0 %v5227_v16  ;;  %v6386_v16 = vld [vmem:[%s10092_s0 + $0x3f4] sm:$0xf] }
 0x2b2   :  { %v8057_v47 = vadd.f32 %v3936_v14, %v3368_v46  ;;  %3406 = vmatmul.bf16.gmra.mxu1 %v5231_v56  ;;  %3686 = vmatmul.bf16.gmra.mxu3 %v5903_v54  ;;  %v5238_v54 = vld [vmem:[%s10092_s0 + $0x3f0] sm:$0xf] }
 0x2b4   :  { %10295 = vst [vmem:[#allocation110_spill] sm:$0xff] %v8057_v47 }
 0x2b5   :  { %v8067_v7 = vpop.f32.mrf.mxu3  ;;  %v3943_v4 = vpop.f32.mrf.mxu2 }
 0x2b6   :  { %10296 = vst [vmem:[#allocation111_spill] sm:$0xff] %v8067_v7  ;;  %v2800_v18 = vpop.f32.mrf.mxu0 }
 0x2b7   :  { %v3369_v46 = vpop.f32.mrf.mxu1 }
 0x2b8   :  { %v3370_v14 = vadd.f32 %v3369_v46, %v2800_v18 }
 0x2ba   :  { %v8069_v17 = vadd.f32 %v3938_v8, %v3370_v14  ;;  %6191 = vmatmul.msk.bf16.gmra.mxu2 %vm2287_vm0, %v5259_v27  ;;  %v6554_v8 = vld [vmem:[%s10092_s0 + $0x934] sm:$0xf]  ;;  %v5239_v27 = vor.u32 %v6387_v31, %v5238_v54  ;;  %v5243_v14 = vor.u32 %v6386_v16, %v5240_v25  ;;  %v5271_v25 = vor.u32 %v6394_v50, %v5270_v60  ;;  %v5252_v60 = vld [vmem:[%s10092_s0 + $0x414] sm:$0xf0] }
 0x2bb   :  { %v5915_v33 = vor.u32 %v6554_v8, %v5912_v40  ;;  %v6390_v40 = vld [vmem:[%s10092_s0 + $0x410] sm:$0xf0]  ;;  %v5924_v50 = vld [vmem:[%s10092_s0 + $0x954] sm:$0xf0] }
 0x2bc   :  { %10297 = vst [vmem:[#allocation112_spill] sm:$0xff] %v8069_v17  ;;  %v5282_v17 = vld [vmem:[%s10092_s0 + $0x440] sm:$0xf] }
 0x2bd   :  { %v8092_v56 = vpop.f32.mrf.mxu3  ;;  %v3946_v18 = vpop.f32.mrf.mxu2 }
 0x2be   :  { %v2803_v46 = vpop.f32.mrf.mxu0 }
 0x2bf   :  { %v3372_v47 = vpop.f32.mrf.mxu1 }
 0x2c0   :  { %v3373_v13 = vadd.f32 %v3372_v47, %v2803_v46  ;;  %v6397_v46 = vld [vmem:[%s10092_s0 + $0x448] sm:$0xf0] }
 0x2c1   :  { %2842 = vmatmul.bf16.gmra.mxu0 %v5239_v27  ;;  %v6389_v27 = vld [vmem:[%s10092_s0 + $0x40c] sm:$0xf] }
 0x2c2   :  { %v8094_v7 = vadd.f32 %v3941_v29, %v3373_v13  ;;  %3411 = vmatmul.bf16.gmra.mxu1 %v5243_v14  ;;  %3691 = vmatmul.bf16.gmra.mxu3 %v5915_v33  ;;  %v5250_v33 = vld [vmem:[%s10092_s0 + $0x408] sm:$0xf] }
 0x2c4   :  { %10298 = vst [vmem:[#allocation113_spill] sm:$0xff] %v8094_v7 }
 0x2c5   :  { %v8104_v31 = vpop.f32.mrf.mxu3  ;;  %v3948_v16 = vpop.f32.mrf.mxu2 }
 0x2c6   :  { %10299 = vst [vmem:[#allocation114_spill] sm:$0xff] %v8104_v31  ;;  %v2805_v47 = vpop.f32.mrf.mxu0 }
 0x2c7   :  { %v3374_v13 = vpop.f32.mrf.mxu1 }
 0x2c8   :  { %v3375_v29 = vadd.f32 %v3374_v13, %v2805_v47 }
 0x2ca   :  { %v8106_v8 = vadd.f32 %v3943_v4, %v3375_v29  ;;  %6192 = vmatmul.msk.bf16.gmra.mxu2 %vm2287_vm0, %v5271_v25  ;;  %v6557_v4 = vld [vmem:[%s10092_s0 + $0x94c] sm:$0xf]  ;;  %v5251_v25 = vor.u32 %v6390_v40, %v5250_v33  ;;  %v5255_v29 = vor.u32 %v6389_v27, %v5252_v60  ;;  %v5283_v60 = vor.u32 %v6397_v46, %v5282_v17  ;;  %v5264_v17 = vld [vmem:[%s10092_s0 + $0x42c] sm:$0xf0] }
 0x2cb   :  { %v5927_v54 = vor.u32 %v6557_v4, %v5924_v50  ;;  %v6393_v50 = vld [vmem:[%s10092_s0 + $0x428] sm:$0xf0]  ;;  %v5936_v46 = vld [vmem:[%s10092_s0 + $0x96c] sm:$0xf0] }
 0x2cc   :  { %10300 = vst [vmem:[#allocation115_spill] sm:$0xff] %v8106_v8  ;;  %v5294_v8 = vld [vmem:[%s10092_s0 + $0x458] sm:$0xf] }
 0x2cd   :  { %v8129_v14 = vpop.f32.mrf.mxu3  ;;  %v3951_v47 = vpop.f32.mrf.mxu2 }
 0x2ce   :  { %v2808_v13 = vpop.f32.mrf.mxu0 }
 0x2cf   :  { %v3377_v7 = vpop.f32.mrf.mxu1 }
 0x2d0   :  { %v3378_v48 = vadd.f32 %v3377_v7, %v2808_v13  ;;  %v6400_v13 = vld [vmem:[%s10092_s0 + $0x460] sm:$0xf0] }
 0x2d1   :  { %2847 = vmatmul.bf16.gmra.mxu0 %v5251_v25  ;;  %v6392_v25 = vld [vmem:[%s10092_s0 + $0x424] sm:$0xf] }
 0x2d2   :  { %v8131_v31 = vadd.f32 %v3946_v18, %v3378_v48  ;;  %3416 = vmatmul.bf16.gmra.mxu1 %v5255_v29  ;;  %3696 = vmatmul.bf16.gmra.mxu3 %v5927_v54  ;;  %v5262_v54 = vld [vmem:[%s10092_s0 + $0x420] sm:$0xf] }
 0x2d4   :  { %10301 = vst [vmem:[#allocation116_spill] sm:$0xff] %v8131_v31 }
 0x2d5   :  { %v8141_v40 = vpop.f32.mrf.mxu3  ;;  %v3953_v27 = vpop.f32.mrf.mxu2 }
 0x2d6   :  { %10302 = vst [vmem:[#allocation117_spill] sm:$0xff] %v8141_v40  ;;  %v2810_v7 = vpop.f32.mrf.mxu0 }
 0x2d7   :  { %v3379_v48 = vpop.f32.mrf.mxu1 }
 0x2d8   :  { %v3380_v18 = vadd.f32 %v3379_v48, %v2810_v7 }
 0x2da   :  { %v8143_v4 = vadd.f32 %v3948_v16, %v3380_v18  ;;  %6193 = vmatmul.msk.bf16.gmra.mxu2 %vm2287_vm0, %v5283_v60  ;;  %v6560_v16 = vld [vmem:[%s10092_s0 + $0x964] sm:$0xf]  ;;  %v5263_v60 = vor.u32 %v6393_v50, %v5262_v54  ;;  %v5267_v18 = vor.u32 %v6392_v25, %v5264_v17  ;;  %v5295_v17 = vor.u32 %v6400_v13, %v5294_v8  ;;  %v5276_v8 = vld [vmem:[%s10092_s0 + $0x444] sm:$0xf0] }
 0x2db   :  { %v5939_v33 = vor.u32 %v6560_v16, %v5936_v46  ;;  %v6396_v46 = vld [vmem:[%s10092_s0 + $0x440] sm:$0xf0]  ;;  %v5948_v13 = vld [vmem:[%s10092_s0 + $0x984] sm:$0xf0] }
 0x2dc   :  { %10303 = vst [vmem:[#allocation118_spill] sm:$0xff] %v8143_v4  ;;  %v5306_v4 = vld [vmem:[%s10092_s0 + $0x470] sm:$0xf] }
 0x2dd   :  { %v8166_v29 = vpop.f32.mrf.mxu3  ;;  %v3956_v7 = vpop.f32.mrf.mxu2 }
 0x2de   :  { %v2813_v48 = vpop.f32.mrf.mxu0 }
 0x2df   :  { %v3382_v31 = vpop.f32.mrf.mxu1 }
 0x2e0   :  { %v3383_v22 = vadd.f32 %v3382_v31, %v2813_v48  ;;  %v6403_v48 = vld [vmem:[%s10092_s0 + $0x478] sm:$0xf0] }
 0x2e1   :  { %2852 = vmatmul.bf16.gmra.mxu0 %v5263_v60  ;;  %v6395_v60 = vld [vmem:[%s10092_s0 + $0x43c] sm:$0xf] }
 0x2e2   :  { %v8168_v40 = vadd.f32 %v3951_v47, %v3383_v22  ;;  %3421 = vmatmul.bf16.gmra.mxu1 %v5267_v18  ;;  %3701 = vmatmul.bf16.gmra.mxu3 %v5939_v33  ;;  %v5274_v33 = vld [vmem:[%s10092_s0 + $0x438] sm:$0xf] }
 0x2e4   :  { %10304 = vst [vmem:[#allocation119_spill] sm:$0xff] %v8168_v40 }
 0x2e5   :  { %v8178_v50 = vpop.f32.mrf.mxu3  ;;  %v3958_v25 = vpop.f32.mrf.mxu2 }
 0x2e6   :  { %10305 = vst [vmem:[#allocation120_spill] sm:$0xff] %v8178_v50  ;;  %v2815_v31 = vpop.f32.mrf.mxu0 }
 0x2e7   :  { %v3384_v22 = vpop.f32.mrf.mxu1 }
 0x2e8   :  { %v3385_v47 = vadd.f32 %v3384_v22, %v2815_v31 }
 0x2ea   :  { %v8180_v16 = vadd.f32 %v3953_v27, %v3385_v47  ;;  %6194 = vmatmul.msk.bf16.gmra.mxu2 %vm2287_vm0, %v5295_v17  ;;  %v6563_v27 = vld [vmem:[%s10092_s0 + $0x97c] sm:$0xf]  ;;  %v5275_v17 = vor.u32 %v6396_v46, %v5274_v33  ;;  %v5279_v47 = vor.u32 %v6395_v60, %v5276_v8  ;;  %v5307_v8 = vor.u32 %v6403_v48, %v5306_v4  ;;  %v5288_v4 = vld [vmem:[%s10092_s0 + $0x45c] sm:$0xf0] }
 0x2eb   :  { %v5951_v54 = vor.u32 %v6563_v27, %v5948_v13  ;;  %v6399_v13 = vld [vmem:[%s10092_s0 + $0x458] sm:$0xf0]  ;;  %v5960_v48 = vld [vmem:[%s10092_s0 + $0x99c] sm:$0xf0] }
 0x2ec   :  { %10306 = vst [vmem:[#allocation121_spill] sm:$0xff] %v8180_v16  ;;  %v5318_v16 = vld [vmem:[%s10092_s0 + $0x488] sm:$0xf] }
 0x2ed   :  { %v8203_v18 = vpop.f32.mrf.mxu3  ;;  %v3961_v31 = vpop.f32.mrf.mxu2 }
 0x2ee   :  { %v2818_v22 = vpop.f32.mrf.mxu0 }
 0x2ef   :  { %v3387_v40 = vpop.f32.mrf.mxu1 }
 0x2f0   :  { %v3388_v63 = vadd.f32 %v3387_v40, %v2818_v22  ;;  %v6406_v22 = vld [vmem:[%s10092_s0 + $0x490] sm:$0xf0] }
 0x2f1   :  { %2857 = vmatmul.bf16.gmra.mxu0 %v5275_v17  ;;  %v6398_v17 = vld [vmem:[%s10092_s0 + $0x454] sm:$0xf] }
 0x2f2   :  { %v8205_v50 = vadd.f32 %v3956_v7, %v3388_v63  ;;  %3426 = vmatmul.bf16.gmra.mxu1 %v5279_v47  ;;  %3706 = vmatmul.bf16.gmra.mxu3 %v5951_v54  ;;  %v5286_v54 = vld [vmem:[%s10092_s0 + $0x450] sm:$0xf] }
 0x2f4   :  { %10307 = vst [vmem:[#allocation122_spill] sm:$0xff] %v8205_v50 }
 0x2f5   :  { %v8215_v46 = vpop.f32.mrf.mxu3  ;;  %v3963_v60 = vpop.f32.mrf.mxu2 }
 0x2f6   :  { %10308 = vst [vmem:[#allocation123_spill] sm:$0xff] %v8215_v46  ;;  %v2820_v40 = vpop.f32.mrf.mxu0 }
 0x2f7   :  { %v3389_v63 = vpop.f32.mrf.mxu1 }
 0x2f8   :  { %v3390_v7 = vadd.f32 %v3389_v63, %v2820_v40 }
 0x2fa   :  { %v8217_v27 = vadd.f32 %v3958_v25, %v3390_v7  ;;  %6195 = vmatmul.msk.bf16.gmra.mxu2 %vm2287_vm0, %v5307_v8  ;;  %v6566_v25 = vld [vmem:[%s10092_s0 + $0x994] sm:$0xf]  ;;  %v5287_v8 = vor.u32 %v6399_v13, %v5286_v54  ;;  %v5291_v7 = vor.u32 %v6398_v17, %v5288_v4  ;;  %v5319_v4 = vor.u32 %v6406_v22, %v5318_v16  ;;  %v5300_v16 = vld [vmem:[%s10092_s0 + $0x474] sm:$0xf0] }
 0x2fb   :  { %v5963_v33 = vor.u32 %v6566_v25, %v5960_v48  ;;  %v6402_v48 = vld [vmem:[%s10092_s0 + $0x470] sm:$0xf0]  ;;  %v5972_v22 = vld [vmem:[%s10092_s0 + $0x9b4] sm:$0xf0] }
 0x2fc   :  { %10309 = vst [vmem:[#allocation124_spill] sm:$0xff] %v8217_v27  ;;  %v5330_v27 = vld [vmem:[%s10092_s0 + $0x4a0] sm:$0xf] }
 0x2fd   :  { %v8240_v47 = vpop.f32.mrf.mxu3  ;;  %v3966_v40 = vpop.f32.mrf.mxu2 }
 0x2fe   :  { %v2823_v63 = vpop.f32.mrf.mxu0 }
 0x2ff   :  { %v3392_v50 = vpop.f32.mrf.mxu1 }
 0x300   :  { %v3393_v45 = vadd.f32 %v3392_v50, %v2823_v63  ;;  %v6409_v63 = vld [vmem:[%s10092_s0 + $0x4a8] sm:$0xf0] }
 0x301   :  { %2862 = vmatmul.bf16.gmra.mxu0 %v5287_v8  ;;  %v6401_v8 = vld [vmem:[%s10092_s0 + $0x46c] sm:$0xf] }
 0x302   :  { %v8242_v46 = vadd.f32 %v3961_v31, %v3393_v45  ;;  %3431 = vmatmul.bf16.gmra.mxu1 %v5291_v7  ;;  %3711 = vmatmul.bf16.gmra.mxu3 %v5963_v33  ;;  %v5298_v33 = vld [vmem:[%s10092_s0 + $0x468] sm:$0xf] }
 0x304   :  { %10310 = vst [vmem:[#allocation125_spill] sm:$0xff] %v8242_v46 }
 0x305   :  { %v8252_v13 = vpop.f32.mrf.mxu3  ;;  %v3968_v17 = vpop.f32.mrf.mxu2 }
 0x306   :  { %10311 = vst [vmem:[#allocation126_spill] sm:$0xff] %v8252_v13  ;;  %v2825_v50 = vpop.f32.mrf.mxu0 }
 0x307   :  { %v3394_v45 = vpop.f32.mrf.mxu1 }
 0x308   :  { %v3395_v31 = vadd.f32 %v3394_v45, %v2825_v50 }
 0x30a   :  { %v8254_v25 = vadd.f32 %v3963_v60, %v3395_v31  ;;  %6196 = vmatmul.msk.bf16.gmra.mxu2 %vm2287_vm0, %v5319_v4  ;;  %v6569_v60 = vld [vmem:[%s10092_s0 + $0x9ac] sm:$0xf]  ;;  %v5299_v4 = vor.u32 %v6402_v48, %v5298_v33  ;;  %v5303_v31 = vor.u32 %v6401_v8, %v5300_v16  ;;  %v5331_v16 = vor.u32 %v6409_v63, %v5330_v27  ;;  %v5312_v27 = vld [vmem:[%s10092_s0 + $0x48c] sm:$0xf0] }
 0x30b   :  { %v5975_v54 = vor.u32 %v6569_v60, %v5972_v22  ;;  %v6405_v22 = vld [vmem:[%s10092_s0 + $0x488] sm:$0xf0]  ;;  %v5984_v63 = vld [vmem:[%s10092_s0 + $0x9cc] sm:$0xf0] }
 0x30c   :  { %10312 = vst [vmem:[#allocation127_spill] sm:$0xff] %v8254_v25  ;;  %v5342_v25 = vld [vmem:[%s10092_s0 + $0x4b8] sm:$0xf] }
 0x30d   :  { %v8277_v7 = vpop.f32.mrf.mxu3  ;;  %v3971_v50 = vpop.f32.mrf.mxu2 }
 0x30e   :  { %v2828_v45 = vpop.f32.mrf.mxu0 }
 0x30f   :  { %v3397_v46 = vpop.f32.mrf.mxu1 }
 0x310   :  { %v3398_v42 = vadd.f32 %v3397_v46, %v2828_v45  ;;  %v6412_v45 = vld [vmem:[%s10092_s0 + $0x4c0] sm:$0xf0] }
 0x311   :  { %2867 = vmatmul.bf16.gmra.mxu0 %v5299_v4  ;;  %v6404_v4 = vld [vmem:[%s10092_s0 + $0x484] sm:$0xf] }
 0x312   :  { %v8279_v13 = vadd.f32 %v3966_v40, %v3398_v42  ;;  %3436 = vmatmul.bf16.gmra.mxu1 %v5303_v31  ;;  %3716 = vmatmul.bf16.gmra.mxu3 %v5975_v54  ;;  %v5310_v54 = vld [vmem:[%s10092_s0 + $0x480] sm:$0xf] }
 0x314   :  { %10313 = vst [vmem:[#allocation128_spill] sm:$0xff] %v8279_v13 }
 0x315   :  { %v8289_v48 = vpop.f32.mrf.mxu3  ;;  %v3973_v8 = vpop.f32.mrf.mxu2 }
 0x316   :  { %10314 = vst [vmem:[#allocation129_spill] sm:$0xff] %v8289_v48  ;;  %v2830_v46 = vpop.f32.mrf.mxu0 }
 0x317   :  { %v3399_v42 = vpop.f32.mrf.mxu1 }
 0x318   :  { %v3400_v40 = vadd.f32 %v3399_v42, %v2830_v46 }
 0x31a   :  { %v8291_v60 = vadd.f32 %v3968_v17, %v3400_v40  ;;  %6197 = vmatmul.msk.bf16.gmra.mxu2 %vm2287_vm0, %v5331_v16  ;;  %v6572_v17 = vld [vmem:[%s10092_s0 + $0x9c4] sm:$0xf]  ;;  %v5311_v16 = vor.u32 %v6405_v22, %v5310_v54  ;;  %v5315_v40 = vor.u32 %v6404_v4, %v5312_v27  ;;  %v5343_v27 = vor.u32 %v6412_v45, %v5342_v25  ;;  %v5324_v25 = vld [vmem:[%s10092_s0 + $0x4a4] sm:$0xf0] }
 0x31b   :  { %v5987_v33 = vor.u32 %v6572_v17, %v5984_v63  ;;  %v6408_v63 = vld [vmem:[%s10092_s0 + $0x4a0] sm:$0xf0]  ;;  %v5996_v45 = vld [vmem:[%s10092_s0 + $0x9e4] sm:$0xf0] }
 0x31c   :  { %10315 = vst [vmem:[#allocation130_spill] sm:$0xff] %v8291_v60  ;;  %v5354_v60 = vld [vmem:[%s10092_s0 + $0x4d0] sm:$0xf] }
 0x31d   :  { %v8314_v31 = vpop.f32.mrf.mxu3  ;;  %v3976_v46 = vpop.f32.mrf.mxu2 }
 0x31e   :  { %v2833_v42 = vpop.f32.mrf.mxu0 }
 0x31f   :  { %v3402_v13 = vpop.f32.mrf.mxu1 }
 0x320   :  { %v3403_v44 = vadd.f32 %v3402_v13, %v2833_v42  ;;  %v6415_v42 = vld [vmem:[%s10092_s0 + $0x4d8] sm:$0xf0] }
 0x321   :  { %2872 = vmatmul.bf16.gmra.mxu0 %v5311_v16  ;;  %v6407_v16 = vld [vmem:[%s10092_s0 + $0x49c] sm:$0xf] }
 0x322   :  { %v8316_v48 = vadd.f32 %v3971_v50, %v3403_v44  ;;  %3441 = vmatmul.bf16.gmra.mxu1 %v5315_v40  ;;  %3721 = vmatmul.bf16.gmra.mxu3 %v5987_v33  ;;  %v5322_v33 = vld [vmem:[%s10092_s0 + $0x498] sm:$0xf] }
 0x324   :  { %10316 = vst [vmem:[#allocation131_spill] sm:$0xff] %v8316_v48 }
 0x325   :  { %v8326_v22 = vpop.f32.mrf.mxu3  ;;  %v3978_v4 = vpop.f32.mrf.mxu2 }
 0x326   :  { %10317 = vst [vmem:[#allocation132_spill] sm:$0xff] %v8326_v22  ;;  %v2835_v13 = vpop.f32.mrf.mxu0 }
 0x327   :  { %v3404_v44 = vpop.f32.mrf.mxu1 }
 0x328   :  { %v3405_v50 = vadd.f32 %v3404_v44, %v2835_v13 }
 0x32a   :  { %v8328_v17 = vadd.f32 %v3973_v8, %v3405_v50  ;;  %6198 = vmatmul.msk.bf16.gmra.mxu2 %vm2287_vm0, %v5343_v27  ;;  %v6575_v8 = vld [vmem:[%s10092_s0 + $0x9dc] sm:$0xf]  ;;  %v5323_v27 = vor.u32 %v6408_v63, %v5322_v33  ;;  %v5327_v50 = vor.u32 %v6407_v16, %v5324_v25  ;;  %v5355_v25 = vor.u32 %v6415_v42, %v5354_v60  ;;  %v5336_v60 = vld [vmem:[%s10092_s0 + $0x4bc] sm:$0xf0] }
 0x32b   :  { %v5999_v54 = vor.u32 %v6575_v8, %v5996_v45  ;;  %v6411_v45 = vld [vmem:[%s10092_s0 + $0x4b8] sm:$0xf0]  ;;  %v6008_v42 = vld [vmem:[%s10092_s0 + $0x9fc] sm:$0xf0] }
 0x32c   :  { %10318 = vst [vmem:[#allocation133_spill] sm:$0xff] %v8328_v17  ;;  %v5366_v17 = vld [vmem:[%s10092_s0 + $0x4e8] sm:$0xf] }
 0x32d   :  { %v8351_v40 = vpop.f32.mrf.mxu3  ;;  %v3981_v13 = vpop.f32.mrf.mxu2 }
 0x32e   :  { %v2838_v44 = vpop.f32.mrf.mxu0 }
 0x32f   :  { %v3407_v48 = vpop.f32.mrf.mxu1 }
 0x330   :  { %v3408_v15 = vadd.f32 %v3407_v48, %v2838_v44  ;;  %v6418_v44 = vld [vmem:[%s10092_s0 + $0x4f0] sm:$0xf0] }
 0x331   :  { %2877 = vmatmul.bf16.gmra.mxu0 %v5323_v27  ;;  %v6410_v27 = vld [vmem:[%s10092_s0 + $0x4b4] sm:$0xf] }
 0x332   :  { %v8353_v22 = vadd.f32 %v3976_v46, %v3408_v15  ;;  %3446 = vmatmul.bf16.gmra.mxu1 %v5327_v50  ;;  %3726 = vmatmul.bf16.gmra.mxu3 %v5999_v54  ;;  %v5334_v54 = vld [vmem:[%s10092_s0 + $0x4b0] sm:$0xf] }
 0x334   :  { %10319 = vst [vmem:[#allocation134_spill] sm:$0xff] %v8353_v22 }
 0x335   :  { %v8363_v63 = vpop.f32.mrf.mxu3  ;;  %v3983_v16 = vpop.f32.mrf.mxu2 }
 0x336   :  { %10320 = vst [vmem:[#allocation135_spill] sm:$0xff] %v8363_v63  ;;  %v2840_v48 = vpop.f32.mrf.mxu0 }
 0x337   :  { %v3409_v15 = vpop.f32.mrf.mxu1 }
 0x338   :  { %v3410_v46 = vadd.f32 %v3409_v15, %v2840_v48 }
 0x33a   :  { %v8365_v8 = vadd.f32 %v3978_v4, %v3410_v46  ;;  %6199 = vmatmul.msk.bf16.gmra.mxu2 %vm2287_vm0, %v5355_v25  ;;  %v6578_v4 = vld [vmem:[%s10092_s0 + $0x9f4] sm:$0xf]  ;;  %v5335_v25 = vor.u32 %v6411_v45, %v5334_v54  ;;  %v5339_v46 = vor.u32 %v6410_v27, %v5336_v60  ;;  %v5367_v60 = vor.u32 %v6418_v44, %v5366_v17  ;;  %v5348_v17 = vld [vmem:[%s10092_s0 + $0x4d4] sm:$0xf0] }
 0x33b   :  { %v6011_v33 = vor.u32 %v6578_v4, %v6008_v42  ;;  %v6414_v42 = vld [vmem:[%s10092_s0 + $0x4d0] sm:$0xf0]  ;;  %v6020_v44 = vld [vmem:[%s10092_s0 + $0xa14] sm:$0xf0] }
 0x33c   :  { %10321 = vst [vmem:[#allocation136_spill] sm:$0xff] %v8365_v8  ;;  %v5378_v8 = vld [vmem:[%s10092_s0 + $0x500] sm:$0xf] }
 0x33d   :  { %v8388_v50 = vpop.f32.mrf.mxu3  ;;  %v3986_v48 = vpop.f32.mrf.mxu2 }
 0x33e   :  { %v2843_v15 = vpop.f32.mrf.mxu0 }
 0x33f   :  { %v3412_v22 = vpop.f32.mrf.mxu1 }
 0x340   :  { %v3413_v10 = vadd.f32 %v3412_v22, %v2843_v15  ;;  %v6421_v15 = vld [vmem:[%s10092_s0 + $0x508] sm:$0xf0] }
 0x341   :  { %2882 = vmatmul.bf16.gmra.mxu0 %v5335_v25  ;;  %v6413_v25 = vld [vmem:[%s10092_s0 + $0x4cc] sm:$0xf] }
 0x342   :  { %v8390_v63 = vadd.f32 %v3981_v13, %v3413_v10  ;;  %3451 = vmatmul.bf16.gmra.mxu1 %v5339_v46  ;;  %3731 = vmatmul.bf16.gmra.mxu3 %v6011_v33  ;;  %v5346_v33 = vld [vmem:[%s10092_s0 + $0x4c8] sm:$0xf] }
 0x344   :  { %10322 = vst [vmem:[#allocation137_spill] sm:$0xff] %v8390_v63 }
 0x345   :  { %v8400_v45 = vpop.f32.mrf.mxu3  ;;  %v3988_v27 = vpop.f32.mrf.mxu2 }
 0x346   :  { %10323 = vst [vmem:[#allocation138_spill] sm:$0xff] %v8400_v45  ;;  %v2845_v22 = vpop.f32.mrf.mxu0 }
 0x347   :  { %v3414_v10 = vpop.f32.mrf.mxu1 }
 0x348   :  { %v3415_v13 = vadd.f32 %v3414_v10, %v2845_v22 }
 0x34a   :  { %v8402_v4 = vadd.f32 %v3983_v16, %v3415_v13  ;;  %6200 = vmatmul.msk.bf16.gmra.mxu2 %vm2287_vm0, %v5367_v60  ;;  %v6581_v16 = vld [vmem:[%s10092_s0 + $0xa0c] sm:$0xf]  ;;  %v5347_v60 = vor.u32 %v6414_v42, %v5346_v33  ;;  %v5351_v13 = vor.u32 %v6413_v25, %v5348_v17  ;;  %v5379_v17 = vor.u32 %v6421_v15, %v5378_v8  ;;  %v5360_v8 = vld [vmem:[%s10092_s0 + $0x4ec] sm:$0xf0] }
 0x34b   :  { %v6023_v54 = vor.u32 %v6581_v16, %v6020_v44  ;;  %v6417_v44 = vld [vmem:[%s10092_s0 + $0x4e8] sm:$0xf0]  ;;  %v6032_v15 = vld [vmem:[%s10092_s0 + $0xa2c] sm:$0xf0] }
 0x34c   :  { %10324 = vst [vmem:[#allocation139_spill] sm:$0xff] %v8402_v4  ;;  %v5390_v4 = vld [vmem:[%s10092_s0 + $0x518] sm:$0xf] }
 0x34d   :  { %v8425_v46 = vpop.f32.mrf.mxu3  ;;  %v3991_v22 = vpop.f32.mrf.mxu2 }
 0x34e   :  { %v2848_v10 = vpop.f32.mrf.mxu0 }
 0x34f   :  { %v3417_v63 = vpop.f32.mrf.mxu1 }
 0x350   :  { %v3418_v38 = vadd.f32 %v3417_v63, %v2848_v10  ;;  %v6424_v10 = vld [vmem:[%s10092_s0 + $0x520] sm:$0xf0] }
 0x351   :  { %2887 = vmatmul.bf16.gmra.mxu0 %v5347_v60  ;;  %v6416_v60 = vld [vmem:[%s10092_s0 + $0x4e4] sm:$0xf] }
 0x352   :  { %v8427_v45 = vadd.f32 %v3986_v48, %v3418_v38  ;;  %3456 = vmatmul.bf16.gmra.mxu1 %v5351_v13  ;;  %3736 = vmatmul.bf16.gmra.mxu3 %v6023_v54  ;;  %v5358_v54 = vld [vmem:[%s10092_s0 + $0x4e0] sm:$0xf] }
 0x354   :  { %10325 = vst [vmem:[#allocation140_spill] sm:$0xff] %v8427_v45 }
 0x355   :  { %v8437_v42 = vpop.f32.mrf.mxu3  ;;  %v3993_v25 = vpop.f32.mrf.mxu2 }
 0x356   :  { %10326 = vst [vmem:[#allocation141_spill] sm:$0xff] %v8437_v42  ;;  %v2850_v63 = vpop.f32.mrf.mxu0 }
 0x357   :  { %v3419_v38 = vpop.f32.mrf.mxu1 }
 0x358   :  { %v3420_v48 = vadd.f32 %v3419_v38, %v2850_v63 }
 0x35a   :  { %v8439_v16 = vadd.f32 %v3988_v27, %v3420_v48  ;;  %6201 = vmatmul.msk.bf16.gmra.mxu2 %vm2287_vm0, %v5379_v17  ;;  %v6584_v27 = vld [vmem:[%s10092_s0 + $0xa24] sm:$0xf]  ;;  %v5359_v17 = vor.u32 %v6417_v44, %v5358_v54  ;;  %v5363_v48 = vor.u32 %v6416_v60, %v5360_v8  ;;  %v5391_v8 = vor.u32 %v6424_v10, %v5390_v4  ;;  %v5372_v4 = vld [vmem:[%s10092_s0 + $0x504] sm:$0xf0] }
 0x35b   :  { %v6035_v33 = vor.u32 %v6584_v27, %v6032_v15  ;;  %v6420_v15 = vld [vmem:[%s10092_s0 + $0x500] sm:$0xf0]  ;;  %v6044_v10 = vld [vmem:[%s10092_s0 + $0xa44] sm:$0xf0] }
 0x35c   :  { %10327 = vst [vmem:[#allocation142_spill] sm:$0xff] %v8439_v16  ;;  %v5402_v16 = vld [vmem:[%s10092_s0 + $0x530] sm:$0xf] }
 0x35d   :  { %v8462_v13 = vpop.f32.mrf.mxu3  ;;  %v3996_v63 = vpop.f32.mrf.mxu2 }
 0x35e   :  { %v2853_v38 = vpop.f32.mrf.mxu0 }
 0x35f   :  { %v3422_v45 = vpop.f32.mrf.mxu1 }
 0x360   :  { %v3423_v9 = vadd.f32 %v3422_v45, %v2853_v38  ;;  %v6427_v38 = vld [vmem:[%s10092_s0 + $0x538] sm:$0xf0] }
 0x361   :  { %2892 = vmatmul.bf16.gmra.mxu0 %v5359_v17  ;;  %v6419_v17 = vld [vmem:[%s10092_s0 + $0x4fc] sm:$0xf] }
 0x362   :  { %v8464_v42 = vadd.f32 %v3991_v22, %v3423_v9  ;;  %3461 = vmatmul.bf16.gmra.mxu1 %v5363_v48  ;;  %3741 = vmatmul.bf16.gmra.mxu3 %v6035_v33  ;;  %v5370_v33 = vld [vmem:[%s10092_s0 + $0x4f8] sm:$0xf] }
 0x364   :  { %10328 = vst [vmem:[#allocation143_spill] sm:$0xff] %v8464_v42 }
 0x365   :  { %v8474_v44 = vpop.f32.mrf.mxu3  ;;  %v3998_v60 = vpop.f32.mrf.mxu2 }
 0x366   :  { %10329 = vst [vmem:[#allocation144_spill] sm:$0xff] %v8474_v44  ;;  %v2855_v45 = vpop.f32.mrf.mxu0 }
 0x367   :  { %v3424_v9 = vpop.f32.mrf.mxu1 }
 0x368   :  { %v3425_v22 = vadd.f32 %v3424_v9, %v2855_v45 }
 0x36a   :  { %v8476_v27 = vadd.f32 %v3993_v25, %v3425_v22  ;;  %6202 = vmatmul.msk.bf16.gmra.mxu2 %vm2287_vm0, %v5391_v8  ;;  %v6587_v25 = vld [vmem:[%s10092_s0 + $0xa3c] sm:$0xf]  ;;  %v5371_v8 = vor.u32 %v6420_v15, %v5370_v33  ;;  %v5375_v22 = vor.u32 %v6419_v17, %v5372_v4  ;;  %v5403_v4 = vor.u32 %v6427_v38, %v5402_v16  ;;  %v5384_v16 = vld [vmem:[%s10092_s0 + $0x51c] sm:$0xf0] }
 0x36b   :  { %v6047_v54 = vor.u32 %v6587_v25, %v6044_v10  ;;  %v6423_v10 = vld [vmem:[%s10092_s0 + $0x518] sm:$0xf0]  ;;  %v6056_v38 = vld [vmem:[%s10092_s0 + $0xa5c] sm:$0xf0] }
 0x36c   :  { %10330 = vst [vmem:[#allocation145_spill] sm:$0xff] %v8476_v27  ;;  %v5414_v27 = vld [vmem:[%s10092_s0 + $0x548] sm:$0xf] }
 0x36d   :  { %v8499_v48 = vpop.f32.mrf.mxu3  ;;  %v4001_v45 = vpop.f32.mrf.mxu2 }
 0x36e   :  { %v2858_v9 = vpop.f32.mrf.mxu0 }
 0x36f   :  { %v3427_v42 = vpop.f32.mrf.mxu1 }
 0x370   :  { %v3428_v20 = vadd.f32 %v3427_v42, %v2858_v9  ;;  %v6430_v9 = vld [vmem:[%s10092_s0 + $0x550] sm:$0xf0] }
 0x371   :  { %2897 = vmatmul.bf16.gmra.mxu0 %v5371_v8  ;;  %v6422_v8 = vld [vmem:[%s10092_s0 + $0x514] sm:$0xf] }
 0x372   :  { %v8501_v44 = vadd.f32 %v3996_v63, %v3428_v20  ;;  %3466 = vmatmul.bf16.gmra.mxu1 %v5375_v22  ;;  %3746 = vmatmul.bf16.gmra.mxu3 %v6047_v54  ;;  %v5382_v54 = vld [vmem:[%s10092_s0 + $0x510] sm:$0xf] }
 0x374   :  { %10331 = vst [vmem:[#allocation146_spill] sm:$0xff] %v8501_v44 }
 0x375   :  { %v8511_v15 = vpop.f32.mrf.mxu3  ;;  %v4003_v17 = vpop.f32.mrf.mxu2 }
 0x376   :  { %10332 = vst [vmem:[#allocation147_spill] sm:$0xff] %v8511_v15  ;;  %v2860_v42 = vpop.f32.mrf.mxu0 }
 0x377   :  { %v3429_v20 = vpop.f32.mrf.mxu1 }
 0x378   :  { %v3430_v63 = vadd.f32 %v3429_v20, %v2860_v42 }
 0x37a   :  { %v8513_v25 = vadd.f32 %v3998_v60, %v3430_v63  ;;  %6203 = vmatmul.msk.bf16.gmra.mxu2 %vm2287_vm0, %v5403_v4  ;;  %v6590_v60 = vld [vmem:[%s10092_s0 + $0xa54] sm:$0xf]  ;;  %v5383_v4 = vor.u32 %v6423_v10, %v5382_v54  ;;  %v5387_v63 = vor.u32 %v6422_v8, %v5384_v16  ;;  %v5415_v16 = vor.u32 %v6430_v9, %v5414_v27  ;;  %v5396_v27 = vld [vmem:[%s10092_s0 + $0x534] sm:$0xf0] }
 0x37b   :  { %v6059_v33 = vor.u32 %v6590_v60, %v6056_v38  ;;  %v6426_v38 = vld [vmem:[%s10092_s0 + $0x530] sm:$0xf0]  ;;  %v6068_v9 = vld [vmem:[%s10092_s0 + $0xa74] sm:$0xf0] }
 0x37c   :  { %10333 = vst [vmem:[#allocation148_spill] sm:$0xff] %v8513_v25  ;;  %v5426_v25 = vld [vmem:[%s10092_s0 + $0x560] sm:$0xf] }
 0x37d   :  { %v8536_v22 = vpop.f32.mrf.mxu3  ;;  %v4006_v42 = vpop.f32.mrf.mxu2 }
 0x37e   :  { %v2863_v20 = vpop.f32.mrf.mxu0 }
 0x37f   :  { %v3432_v44 = vpop.f32.mrf.mxu1 }
 0x380   :  { %v3433_v32 = vadd.f32 %v3432_v44, %v2863_v20  ;;  %v6433_v20 = vld [vmem:[%s10092_s0 + $0x568] sm:$0xf0] }
 0x381   :  { %2902 = vmatmul.bf16.gmra.mxu0 %v5383_v4  ;;  %v6425_v4 = vld [vmem:[%s10092_s0 + $0x52c] sm:$0xf] }
 0x382   :  { %v8538_v15 = vadd.f32 %v4001_v45, %v3433_v32  ;;  %3471 = vmatmul.bf16.gmra.mxu1 %v5387_v63  ;;  %3751 = vmatmul.bf16.gmra.mxu3 %v6059_v33  ;;  %v5394_v33 = vld [vmem:[%s10092_s0 + $0x528] sm:$0xf] }
 0x384   :  { %10334 = vst [vmem:[#allocation149_spill] sm:$0xff] %v8538_v15 }
 0x385   :  { %v8548_v10 = vpop.f32.mrf.mxu3  ;;  %v4008_v8 = vpop.f32.mrf.mxu2 }
 0x386   :  { %10335 = vst [vmem:[#allocation150_spill] sm:$0xff] %v8548_v10  ;;  %v2865_v44 = vpop.f32.mrf.mxu0 }
 0x387   :  { %v3434_v32 = vpop.f32.mrf.mxu1 }
 0x388   :  { %v3435_v45 = vadd.f32 %v3434_v32, %v2865_v44 }
 0x38a   :  { %v8550_v60 = vadd.f32 %v4003_v17, %v3435_v45  ;;  %6204 = vmatmul.msk.bf16.gmra.mxu2 %vm2287_vm0, %v5415_v16  ;;  %v6593_v17 = vld [vmem:[%s10092_s0 + $0xa6c] sm:$0xf]  ;;  %v5395_v16 = vor.u32 %v6426_v38, %v5394_v33  ;;  %v5399_v45 = vor.u32 %v6425_v4, %v5396_v27  ;;  %v5427_v27 = vor.u32 %v6433_v20, %v5426_v25  ;;  %v5408_v25 = vld [vmem:[%s10092_s0 + $0x54c] sm:$0xf0]  ;;  %v6520_v20 = vld [vmem:[%s10092_s0 + $0x820] sm:$0xf0] }
 0x38b   :  { %v6071_v54 = vor.u32 %v6593_v17, %v6068_v9  ;;  %v6429_v9 = vld [vmem:[%s10092_s0 + $0x548] sm:$0xf0] }
 0x38c   :  { %10336 = vst [vmem:[#allocation151_spill] sm:$0xff] %v8550_v60  ;;  %v5438_v60 = vld [vmem:[%s10092_s0 + $0x578] sm:$0xf] }
 0x38d   :  { %v8573_v63 = vpop.f32.mrf.mxu3  ;;  %v4011_v44 = vpop.f32.mrf.mxu2 }
 0x38e   :  { %v2868_v32 = vpop.f32.mrf.mxu0 }
 0x38f   :  { %v3437_v15 = vpop.f32.mrf.mxu1 }
 0x390   :  { %v3438_v49 = vadd.f32 %v3437_v15, %v2868_v32  ;;  %v6436_v32 = vld [vmem:[%s10092_s0 + $0x580] sm:$0xf0] }
 0x391   :  { %2907 = vmatmul.bf16.gmra.mxu0 %v5395_v16  ;;  %v6428_v16 = vld [vmem:[%s10092_s0 + $0x544] sm:$0xf] }
 0x392   :  { %v8575_v10 = vadd.f32 %v4006_v42, %v3438_v49  ;;  %3476 = vmatmul.bf16.gmra.mxu1 %v5399_v45  ;;  %3756 = vmatmul.bf16.gmra.mxu3 %v6071_v54  ;;  %v5406_v54 = vld [vmem:[%s10092_s0 + $0x540] sm:$0xf] }
 0x394   :  { %10337 = vst [vmem:[#allocation152_spill] sm:$0xff] %v8575_v10 }
 0x395   :  { %v8585_v38 = vpop.f32.mrf.mxu3  ;;  %v4013_v4 = vpop.f32.mrf.mxu2 }
 0x396   :  { %10338 = vst [vmem:[#allocation153_spill] sm:$0xff] %v8585_v38  ;;  %v2870_v15 = vpop.f32.mrf.mxu0 }
 0x397   :  { %v3439_v49 = vpop.f32.mrf.mxu1 }
 0x398   :  { %v3440_v42 = vadd.f32 %v3439_v49, %v2870_v15 }
 0x39a   :  { %v8587_v17 = vadd.f32 %v4008_v8, %v3440_v42  ;;  %6205 = vmatmul.msk.bf16.gmra.mxu2 %vm2287_vm0, %v5427_v27  ;;  %v5774_v8 = vld [vmem:[%s10092_s0 + $0x818] sm:$0xf]  ;;  %v5407_v27 = vor.u32 %v6429_v9, %v5406_v54  ;;  %v5411_v42 = vor.u32 %v6428_v16, %v5408_v25 }
 0x39b   :  { %v5775_v33 = vor.u32 %v6520_v20, %v5774_v8  ;;  %v6432_v20 = vld [vmem:[%s10092_s0 + $0x560] sm:$0xf0] }
 0x39c   :  { %10339 = vst [vmem:[#allocation154_spill] sm:$0xff] %v8587_v17  ;;  %v5450_v17 = vld [vmem:[%s10092_s0 + $0x590] sm:$0xf] }
 0x39d   :  { %v8610_v45 = vpop.f32.mrf.mxu3  ;;  %v4016_v15 = vpop.f32.mrf.mxu2 }
 0x39e   :  { %v2873_v49 = vpop.f32.mrf.mxu0 }
 0x39f   :  { %v3442_v10 = vpop.f32.mrf.mxu1 }
 0x3a0   :  { %v3443_v6 = vadd.f32 %v3442_v10, %v2873_v49  ;;  %v6439_v49 = vld [vmem:[%s10092_s0 + $0x598] sm:$0xf0] }
 0x3a1   :  { %2912 = vmatmul.bf16.gmra.mxu0 %v5407_v27  ;;  %v6431_v27 = vld [vmem:[%s10092_s0 + $0x55c] sm:$0xf] }
 0x3a2   :  { %v8612_v38 = vadd.f32 %v4011_v44, %v3443_v6  ;;  %3481 = vmatmul.bf16.gmra.mxu1 %v5411_v42  ;;  %6234 = vmatmul.msk.bf16.vlgmr.msra.gmra.mxu3 %vm2287_vm0, %v5775_v33  ;;  %v5439_v6 = vor.u32 %v6436_v32, %v5438_v60  ;;  %v5418_v33 = vld [vmem:[%s10092_s0 + $0x558] sm:$0xf]  ;;  %v5420_v60 = vld [vmem:[%s10092_s0 + $0x564] sm:$0xf0]  ;;  %v6523_v32 = vld [vmem:[%s10092_s0 + $0x838] sm:$0xf0] }
 0x3a4   :  { %10340 = vst [vmem:[#allocation155_spill] sm:$0xff] %v8612_v38 }
 0x3a5   :  { %v8623_v9 = vpop.f32.mrf.mxu3  ;;  %v4018_v10 = vpop.f32.mrf.mxu2 }
 0x3a6   :  { %10341 = vst [vmem:[#allocation156_spill] sm:$0xff] %v8623_v9  ;;  %v2875_v16 = vpop.f32.mrf.mxu0 }
 0x3a7   :  { %v3444_v44 = vpop.f32.mrf.mxu1 }
 0x3a8   :  { %v3445_v25 = vadd.f32 %v3444_v44, %v2875_v16 }
 0x3aa   :  { %v8625_v8 = vadd.f32 %v4013_v4, %v3445_v25  ;;  %6206 = vmatmul.msk.bf16.gmra.mxu2 %vm2287_vm0, %v5439_v6  ;;  %v5786_v4 = vld [vmem:[%s10092_s0 + $0x830] sm:$0xf]  ;;  %v5419_v6 = vor.u32 %v6432_v20, %v5418_v33  ;;  %v5423_v25 = vor.u32 %v6431_v27, %v5420_v60 }
 0x3ab   :  { %v5787_v54 = vor.u32 %v6523_v32, %v5786_v4  ;;  %v6435_v32 = vld [vmem:[%s10092_s0 + $0x578] sm:$0xf0] }
 0x3ac   :  { %10342 = vst [vmem:[#allocation157_spill] sm:$0xff] %v8625_v8  ;;  %v5462_v8 = vld [vmem:[%s10092_s0 + $0x5a8] sm:$0xf] }
 0x3ad   :  { %v8648_v42 = vpop.f32.mrf.mxu3  ;;  %v4021_v16 = vpop.f32.mrf.mxu2 }
 0x3ae   :  { %10343 = vst [vmem:[#allocation158_spill] sm:$0xff] %v8648_v42  ;;  %v2878_v44 = vpop.f32.mrf.mxu0  ;;  %v5558_v42 = vld [vmem:[%s10092_s0 + $0x668] sm:$0xf] }
 0x3af   :  { %v3447_v38 = vpop.f32.mrf.mxu1 }
 0x3b0   :  { %v3448_v36 = vadd.f32 %v3447_v38, %v2878_v44  ;;  %v6442_v44 = vld [vmem:[%s10092_s0 + $0x5b0] sm:$0xf0] }
 0x3b1   :  { %2917 = vmatmul.bf16.gmra.mxu0 %v5419_v6  ;;  %v6434_v6 = vld [vmem:[%s10092_s0 + $0x574] sm:$0xf] }
 0x3b2   :  { %v8650_v9 = vadd.f32 %v4016_v15, %v3448_v36  ;;  %3486 = vmatmul.bf16.gmra.mxu1 %v5423_v25  ;;  %6235 = vmatmul.msk.bf16.gmra.mxu3 %vm2287_vm0, %v5787_v54  ;;  %v5451_v36 = vor.u32 %v6439_v49, %v5450_v17  ;;  %v5430_v54 = vld [vmem:[%s10092_s0 + $0x570] sm:$0xf]  ;;  %v5432_v17 = vld [vmem:[%s10092_s0 + $0x57c] sm:$0xf0]  ;;  %v6526_v49 = vld [vmem:[%s10092_s0 + $0x850] sm:$0xf0] }
 0x3b4   :  { %10344 = vst [vmem:[#allocation159_spill] sm:$0xff] %v8650_v9 }
 0x3b5   :  { %v8661_v20 = vpop.f32.mrf.mxu3  ;;  %v4023_v38 = vpop.f32.mrf.mxu2 }
 0x3b6   :  { %10345 = vst [vmem:[#allocation160_spill] sm:$0xff] %v8661_v20  ;;  %v2880_v27 = vpop.f32.mrf.mxu0 }
 0x3b7   :  { %v3449_v15 = vpop.f32.mrf.mxu1 }
 0x3b8   :  { %v3450_v60 = vadd.f32 %v3449_v15, %v2880_v27 }
 0x3ba   :  { %v8663_v4 = vadd.f32 %v4018_v10, %v3450_v60  ;;  %6207 = vmatmul.msk.bf16.gmra.mxu2 %vm2287_vm0, %v5451_v36  ;;  %v5798_v10 = vld [vmem:[%s10092_s0 + $0x848] sm:$0xf]  ;;  %v5431_v36 = vor.u32 %v6435_v32, %v5430_v54  ;;  %v5435_v60 = vor.u32 %v6434_v6, %v5432_v17 }
 0x3bb   :  { %v5799_v33 = vor.u32 %v6526_v49, %v5798_v10  ;;  %v6438_v49 = vld [vmem:[%s10092_s0 + $0x590] sm:$0xf0] }
 0x3bc   :  { %10346 = vst [vmem:[#allocation161_spill] sm:$0xff] %v8663_v4 }
 0x3bd   :  { %v8686_v25 = vpop.f32.mrf.mxu3  ;;  %v4026_v27 = vpop.f32.mrf.mxu2 }
 0x3be   :  { %10347 = vst [vmem:[#allocation162_spill] sm:$0xff] %v8686_v25  ;;  %v2883_v15 = vpop.f32.mrf.mxu0 }
 0x3bf   :  { %v3452_v9 = vpop.f32.mrf.mxu1 }
 0x3c0   :  { %v3453_v2 = vadd.f32 %v3452_v9, %v2883_v15 }
 0x3c1   :  { %2922 = vmatmul.bf16.gmra.mxu0 %v5431_v36  ;;  %v6437_v36 = vld [vmem:[%s10092_s0 + $0x58c] sm:$0xf] }
 0x3c2   :  { %v8688_v20 = vadd.f32 %v4021_v16, %v3453_v2  ;;  %3491 = vmatmul.bf16.gmra.mxu1 %v5435_v60  ;;  %6236 = vmatmul.msk.bf16.gmra.mxu3 %vm2287_vm0, %v5799_v33  ;;  %v5463_v2 = vor.u32 %v6442_v44, %v5462_v8  ;;  %v5442_v33 = vld [vmem:[%s10092_s0 + $0x588] sm:$0xf]  ;;  %v5444_v8 = vld [vmem:[%s10092_s0 + $0x594] sm:$0xf0]  ;;  %v6529_v44 = vld [vmem:[%s10092_s0 + $0x868] sm:$0xf0] }
 0x3c3   :  { %v5447_v54 = vor.u32 %v6437_v36, %v5444_v8  ;;  %v6445_v60 = vld [vmem:[%s10092_s0 + $0x5c8] sm:$0xf0] }
 0x3c4   :  { %10348 = vst [vmem:[#allocation163_spill] sm:$0xff] %v8688_v20 }
 0x3c5   :  { %v8699_v32 = vpop.f32.mrf.mxu3  ;;  %v4028_v9 = vpop.f32.mrf.mxu2 }
 0x3c6   :  { %10349 = vst [vmem:[#allocation164_spill] sm:$0xff] %v8699_v32  ;;  %v2885_v6 = vpop.f32.mrf.mxu0 }
 0x3c7   :  { %v3454_v16 = vpop.f32.mrf.mxu1 }
 0x3c8   :  { %v3455_v17 = vadd.f32 %v3454_v16, %v2885_v6  ;;  %v5443_v16 = vor.u32 %v6438_v49, %v5442_v33 }
 0x3ca   :  { %v8701_v10 = vadd.f32 %v4023_v38, %v3455_v17  ;;  %6208 = vmatmul.msk.bf16.gmra.mxu2 %vm2287_vm0, %v5463_v2  ;;  %v5810_v38 = vld [vmem:[%s10092_s0 + $0x860] sm:$0xf] }
 0x3cb   :  { %v5811_v20 = vor.u32 %v6529_v44, %v5810_v38  ;;  %v6441_v44 = vld [vmem:[%s10092_s0 + $0x5a8] sm:$0xf0] }
 0x3cc   :  { %10350 = vst [vmem:[#allocation165_spill] sm:$0xff] %v8701_v10 }
 0x3cd   :  { %v8724_v6 = vpop.f32.mrf.mxu3  ;;  %v4031_v2 = vpop.f32.mrf.mxu2 }
 0x3ce   :  { %10352 = vst [vmem:[#allocation166_spill] sm:$0xff] %v8724_v6  ;;  %v2888_v17 = vpop.f32.mrf.mxu0  ;;  %v5486_v6 = vld [vmem:[%s10092_s0 + $0x5d8] sm:$0xf] }
 0x3cf   :  { %v3457_v37 = vpop.f32.mrf.mxu1 }
 0x3d0   :  { %v3458_v32 = vadd.f32 %v3457_v37, %v2888_v17 }
 0x3d1   :  { %2927 = vmatmul.bf16.gmra.mxu0 %v5443_v16  ;;  %v6440_v16 = vld [vmem:[%s10092_s0 + $0x5a4] sm:$0xf] }
 0x3d2   :  { %v8726_v4 = vadd.f32 %v4026_v27, %v3458_v32  ;;  %3496 = vmatmul.bf16.gmra.mxu1 %v5447_v54  ;;  %6237 = vmatmul.msk.bf16.gmra.mxu3 %vm2287_vm0, %v5811_v20  ;;  %v5475_v27 = vor.u32 %v6445_v60, %v5474_v1  ;;  %v5454_v20 = vld [vmem:[%s10092_s0 + $0x5a0] sm:$0xf]  ;;  %v5456_v1 = vld [vmem:[%s10092_s0 + $0x5ac] sm:$0xf0]  ;;  %v6532_v60 = vld [vmem:[%s10092_s0 + $0x880] sm:$0xf0] }
 0x3d4   :  { %10353 = vst [vmem:[#allocation167_spill] sm:$0xff] %v8726_v4  ;;  %v5459_v4 = vor.u32 %v6440_v16, %v5456_v1 }
 0x3d5   :  { %v8737_v36 = vpop.f32.mrf.mxu3  ;;  %v4033_v37 = vpop.f32.mrf.mxu2 }
 0x3d6   :  { %10355 = vst [vmem:[#allocation168_spill] sm:$0xff] %v8737_v36  ;;  %v2890_v8 = vpop.f32.mrf.mxu0 }
 0x3d7   :  { %v3459_v32 = vpop.f32.mrf.mxu1 }
 0x3d8   :  { %v3460_v54 = vadd.f32 %v3459_v32, %v2890_v8  ;;  %v6448_v8 = vld [vmem:[%s10092_s0 + $0x5e0] sm:$0xf0] }
 0x3da   :  { %v8739_v38 = vadd.f32 %v4028_v9, %v3460_v54  ;;  %6209 = vmatmul.msk.bf16.gmra.mxu2 %vm2287_vm0, %v5475_v27  ;;  %v5822_v9 = vld [vmem:[%s10092_s0 + $0x878] sm:$0xf]  ;;  %v5455_v54 = vor.u32 %v6441_v44, %v5454_v20 }
 0x3db   :  { %v5823_v33 = vor.u32 %v6532_v60, %v5822_v9  ;;  %v6444_v9 = vld [vmem:[%s10092_s0 + $0x5c0] sm:$0xf0]  ;;  %v6443_v60 = vld [vmem:[%s10092_s0 + $0x5bc] sm:$0xf] }
 0x3dc   :  { %10356 = vst [vmem:[#allocation169_spill] sm:$0xff] %v8739_v38 }
 0x3dd   :  { %v8762_v27 = vpop.f32.mrf.mxu3  ;;  %v4036_v32 = vpop.f32.mrf.mxu2 }
 0x3de   :  { %10358 = vst [vmem:[#allocation170_spill] sm:$0xff] %v8762_v27  ;;  %v2893_v49 = vpop.f32.mrf.mxu0  ;;  %v5498_v27 = vld [vmem:[%s10092_s0 + $0x5f0] sm:$0xf] }
 0x3df   :  { %v3462_v36 = vpop.f32.mrf.mxu1 }
 0x3e0   :  { %v3463_v10 = vadd.f32 %v3462_v36, %v2893_v49 }
 0x3e1   :  { %2932 = vmatmul.bf16.gmra.mxu0 %v5455_v54 }
 0x3e2   :  { %v8764_v15 = vadd.f32 %v4031_v2, %v3463_v10  ;;  %3501 = vmatmul.bf16.gmra.mxu1 %v5459_v4  ;;  %6238 = vmatmul.msk.bf16.gmra.mxu3 %vm2287_vm0, %v5823_v33  ;;  %v5487_v10 = vor.u32 %v6448_v8, %v5486_v6  ;;  %v5466_v33 = vld [vmem:[%s10092_s0 + $0x5b8] sm:$0xf]  ;;  %v5468_v6 = vld [vmem:[%s10092_s0 + $0x5c4] sm:$0xf0]  ;;  %v6535_v8 = vld [vmem:[%s10092_s0 + $0x898] sm:$0xf0] }
 0x3e4   :  { %10359 = vst [vmem:[#allocation171_spill] sm:$0xff] %v8764_v15  ;;  %v5471_v15 = vor.u32 %v6443_v60, %v5468_v6 }
 0x3e5   :  { %v8775_v16 = vpop.f32.mrf.mxu3  ;;  %v4038_v49 = vpop.f32.mrf.mxu2 }
 0x3e6   :  { %10361 = vst [vmem:[#allocation172_spill] sm:$0xff] %v8775_v16  ;;  %v2895_v36 = vpop.f32.mrf.mxu0 }
 0x3e7   :  { %v3464_v2 = vpop.f32.mrf.mxu1 }
 0x3e8   :  { %v3465_v4 = vadd.f32 %v3464_v2, %v2895_v36  ;;  %v6451_v36 = vld [vmem:[%s10092_s0 + $0x5f8] sm:$0xf0] }
 0x3ea   :  { %v8777_v1 = vadd.f32 %v4033_v37, %v3465_v4  ;;  %6210 = vmatmul.msk.bf16.gmra.mxu2 %vm2287_vm0, %v5487_v10  ;;  %v5834_v37 = vld [vmem:[%s10092_s0 + $0x890] sm:$0xf]  ;;  %v5467_v4 = vor.u32 %v6444_v9, %v5466_v33 }
 0x3eb   :  { %v5835_v20 = vor.u32 %v6535_v8, %v5834_v37  ;;  %v6447_v37 = vld [vmem:[%s10092_s0 + $0x5d8] sm:$0xf0]  ;;  %v6446_v8 = vld [vmem:[%s10092_s0 + $0x5d4] sm:$0xf] }
 0x3ec   :  { %10362 = vst [vmem:[#allocation173_spill] sm:$0xff] %v8777_v1 }
 0x3ed   :  { %v8800_v10 = vpop.f32.mrf.mxu3  ;;  %v4041_v2 = vpop.f32.mrf.mxu2 }
 0x3ee   :  { %10364 = vst [vmem:[#allocation174_spill] sm:$0xff] %v8800_v10  ;;  %v2898_v44 = vpop.f32.mrf.mxu0  ;;  %v5510_v10 = vld [vmem:[%s10092_s0 + $0x608] sm:$0xf] }
 0x3ef   :  { %v3467_v16 = vpop.f32.mrf.mxu1 }
 0x3f0   :  { %v3468_v38 = vadd.f32 %v3467_v16, %v2898_v44 }
 0x3f1   :  { %2937 = vmatmul.bf16.gmra.mxu0 %v5467_v4 }
 0x3f2   :  { %v8802_v17 = vadd.f32 %v4036_v32, %v3468_v38  ;;  %3506 = vmatmul.bf16.gmra.mxu1 %v5471_v15  ;;  %6239 = vmatmul.msk.bf16.gmra.mxu3 %vm2287_vm0, %v5835_v20  ;;  %v5499_v38 = vor.u32 %v6451_v36, %v5498_v27  ;;  %v5478_v20 = vld [vmem:[%s10092_s0 + $0x5d0] sm:$0xf]  ;;  %v5480_v27 = vld [vmem:[%s10092_s0 + $0x5dc] sm:$0xf0]  ;;  %v6538_v36 = vld [vmem:[%s10092_s0 + $0x8b0] sm:$0xf0] }
 0x3f4   :  { %10365 = vst [vmem:[#allocation175_spill] sm:$0xff] %v8802_v17  ;;  %v5483_v17 = vor.u32 %v6446_v8, %v5480_v27 }
 0x3f5   :  { %v8813_v60 = vpop.f32.mrf.mxu3  ;;  %v4043_v44 = vpop.f32.mrf.mxu2 }
 0x3f6   :  { %10367 = vst [vmem:[#allocation176_spill] sm:$0xff] %v8813_v60  ;;  %v2900_v16 = vpop.f32.mrf.mxu0 }
 0x3f7   :  { %v3469_v32 = vpop.f32.mrf.mxu1 }
 0x3f8   :  { %v3470_v15 = vadd.f32 %v3469_v32, %v2900_v16  ;;  %v6454_v16 = vld [vmem:[%s10092_s0 + $0x610] sm:$0xf0] }
 0x3fa   :  { %v8815_v6 = vadd.f32 %v4038_v49, %v3470_v15  ;;  %6211 = vmatmul.msk.bf16.gmra.mxu2 %vm2287_vm0, %v5499_v38  ;;  %v5846_v49 = vld [vmem:[%s10092_s0 + $0x8a8] sm:$0xf]  ;;  %v5479_v15 = vor.u32 %v6447_v37, %v5478_v20 }
 0x3fb   :  { %v5847_v33 = vor.u32 %v6538_v36, %v5846_v49  ;;  %v6450_v49 = vld [vmem:[%s10092_s0 + $0x5f0] sm:$0xf0]  ;;  %v6449_v36 = vld [vmem:[%s10092_s0 + $0x5ec] sm:$0xf] }
 0x3fc   :  { %10368 = vst [vmem:[#allocation177_spill] sm:$0xff] %v8815_v6 }
 0x3fd   :  { %v8838_v38 = vpop.f32.mrf.mxu3  ;;  %v4046_v32 = vpop.f32.mrf.mxu2 }
 0x3fe   :  { %10370 = vst [vmem:[#allocation178_spill] sm:$0xff] %v8838_v38  ;;  %v2903_v9 = vpop.f32.mrf.mxu0  ;;  %v5522_v38 = vld [vmem:[%s10092_s0 + $0x620] sm:$0xf] }
 0x3ff   :  { %v3472_v60 = vpop.f32.mrf.mxu1 }
 0x400   :  { %v3473_v1 = vadd.f32 %v3472_v60, %v2903_v9 }
 0x401   :  { %2942 = vmatmul.bf16.gmra.mxu0 %v5479_v15 }
 0x402   :  { %v8840_v54 = vadd.f32 %v4041_v2, %v3473_v1  ;;  %3511 = vmatmul.bf16.gmra.mxu1 %v5483_v17  ;;  %6240 = vmatmul.msk.bf16.gmra.mxu3 %vm2287_vm0, %v5847_v33  ;;  %v5511_v1 = vor.u32 %v6454_v16, %v5510_v10  ;;  %v5490_v33 = vld [vmem:[%s10092_s0 + $0x5e8] sm:$0xf]  ;;  %v5492_v10 = vld [vmem:[%s10092_s0 + $0x5f4] sm:$0xf0]  ;;  %v6541_v16 = vld [vmem:[%s10092_s0 + $0x8c8] sm:$0xf0] }
 0x404   :  { %10371 = vst [vmem:[#allocation179_spill] sm:$0xff] %v8840_v54  ;;  %v5495_v54 = vor.u32 %v6449_v36, %v5492_v10 }
 0x405   :  { %v8851_v8 = vpop.f32.mrf.mxu3  ;;  %v4048_v9 = vpop.f32.mrf.mxu2 }
 0x406   :  { %10373 = vst [vmem:[#allocation180_spill] sm:$0xff] %v8851_v8  ;;  %v2905_v60 = vpop.f32.mrf.mxu0 }
 0x407   :  { %v3474_v2 = vpop.f32.mrf.mxu1 }
 0x408   :  { %v3475_v17 = vadd.f32 %v3474_v2, %v2905_v60  ;;  %v6457_v60 = vld [vmem:[%s10092_s0 + $0x628] sm:$0xf0] }
 0x40a   :  { %v8853_v27 = vadd.f32 %v4043_v44, %v3475_v17  ;;  %6212 = vmatmul.msk.bf16.gmra.mxu2 %vm2287_vm0, %v5511_v1  ;;  %v5858_v44 = vld [vmem:[%s10092_s0 + $0x8c0] sm:$0xf]  ;;  %v5491_v17 = vor.u32 %v6450_v49, %v5490_v33 }
 0x40b   :  { %v5859_v20 = vor.u32 %v6541_v16, %v5858_v44  ;;  %v6453_v44 = vld [vmem:[%s10092_s0 + $0x608] sm:$0xf0]  ;;  %v6452_v16 = vld [vmem:[%s10092_s0 + $0x604] sm:$0xf] }
 0x40c   :  { %10374 = vst [vmem:[#allocation181_spill] sm:$0xff] %v8853_v27 }
 0x40d   :  { %v8876_v1 = vpop.f32.mrf.mxu3  ;;  %v4051_v2 = vpop.f32.mrf.mxu2 }
 0x40e   :  { %10376 = vst [vmem:[#allocation182_spill] sm:$0xff] %v8876_v1  ;;  %v2908_v37 = vpop.f32.mrf.mxu0  ;;  %v5534_v1 = vld [vmem:[%s10092_s0 + $0x638] sm:$0xf] }
 0x40f   :  { %v3477_v8 = vpop.f32.mrf.mxu1 }
 0x410   :  { %v3478_v6 = vadd.f32 %v3477_v8, %v2908_v37 }
 0x411   :  { %2947 = vmatmul.bf16.gmra.mxu0 %v5491_v17 }
 0x412   :  { %v8878_v4 = vadd.f32 %v4046_v32, %v3478_v6  ;;  %3516 = vmatmul.bf16.gmra.mxu1 %v5495_v54  ;;  %6241 = vmatmul.msk.bf16.gmra.mxu3 %vm2287_vm0, %v5859_v20  ;;  %v5523_v6 = vor.u32 %v6457_v60, %v5522_v38  ;;  %v5502_v20 = vld [vmem:[%s10092_s0 + $0x600] sm:$0xf]  ;;  %v5504_v38 = vld [vmem:[%s10092_s0 + $0x60c] sm:$0xf0]  ;;  %v6544_v60 = vld [vmem:[%s10092_s0 + $0x8e0] sm:$0xf0] }
 0x414   :  { %10377 = vst [vmem:[#allocation183_spill] sm:$0xff] %v8878_v4  ;;  %v5507_v4 = vor.u32 %v6452_v16, %v5504_v38 }
 0x415   :  { %v8889_v36 = vpop.f32.mrf.mxu3  ;;  %v4053_v37 = vpop.f32.mrf.mxu2 }
 0x416   :  { %10379 = vst [vmem:[#allocation184_spill] sm:$0xff] %v8889_v36  ;;  %v2910_v8 = vpop.f32.mrf.mxu0 }
 0x417   :  { %v3479_v32 = vpop.f32.mrf.mxu1 }
 0x418   :  { %v3480_v54 = vadd.f32 %v3479_v32, %v2910_v8  ;;  %v6460_v8 = vld [vmem:[%s10092_s0 + $0x640] sm:$0xf0] }
 0x419   :  { %v5535_v38 = vor.u32 %v6460_v8, %v5534_v1  ;;  %v5516_v1 = vld [vmem:[%s10092_s0 + $0x624] sm:$0xf0] }
 0x41a   :  { %v8891_v10 = vadd.f32 %v4048_v9, %v3480_v54  ;;  %6213 = vmatmul.msk.bf16.gmra.mxu2 %vm2287_vm0, %v5523_v6  ;;  %v5870_v9 = vld [vmem:[%s10092_s0 + $0x8d8] sm:$0xf]  ;;  %v5503_v54 = vor.u32 %v6453_v44, %v5502_v20 }
 0x41b   :  { %v5871_v33 = vor.u32 %v6544_v60, %v5870_v9 }
 0x41c   :  { %10380 = vst [vmem:[#allocation185_spill] sm:$0xff] %v8891_v10 }
 0x41d   :  { %v8914_v6 = vpop.f32.mrf.mxu3  ;;  %v4056_v32 = vpop.f32.mrf.mxu2 }
 0x41e   :  { %10382 = vst [vmem:[#allocation186_spill] sm:$0xff] %v8914_v6  ;;  %v2913_v49 = vpop.f32.mrf.mxu0  ;;  %v6463_v6 = vld [vmem:[%s10092_s0 + $0x658] sm:$0xf0] }
 0x41f   :  { %v3482_v36 = vpop.f32.mrf.mxu1 }
 0x420   :  { %v3483_v27 = vadd.f32 %v3482_v36, %v2913_v49 }
 0x421   :  { %2952 = vmatmul.bf16.gmra.mxu0 %v5503_v54 }
 0x422   :  { %v8916_v15 = vadd.f32 %v4051_v2, %v3483_v27  ;;  %3521 = vmatmul.bf16.gmra.mxu1 %v5507_v4  ;;  %6242 = vmatmul.msk.bf16.gmra.mxu3 %vm2287_vm0, %v5871_v33  ;;  %v5514_v4 = vld [vmem:[%s10092_s0 + $0x618] sm:$0xf]  ;;  %v6456_v27 = vld [vmem:[%s10092_s0 + $0x620] sm:$0xf0]  ;;  %v6455_v2 = vld [vmem:[%s10092_s0 + $0x61c] sm:$0xf] }
 0x423   :  { %v5882_v33 = vld [vmem:[%s10092_s0 + $0x8f0] sm:$0xf]  ;;  %v5515_v54 = vor.u32 %v6456_v27, %v5514_v4 }
 0x424   :  { %10383 = vst [vmem:[#allocation187_spill] sm:$0xff] %v8916_v15 }
 0x425   :  { %v4058_v20 = vpop.f32.mrf.mxu2  ;;  %v4201_v44 = vpop.f32.mrf.mxu3 }
 0x426   :  { %v2915_v16 = vpop.f32.mrf.mxu0 }
 0x427   :  { %v3484_v9 = vpop.f32.mrf.mxu1 }
 0x428   :  { %v3485_v49 = vadd.f32 %v3484_v9, %v2915_v16 }
 0x42a   :  { %v8925_v36 = vadd.f32 %v4053_v37, %v3485_v49  ;;  %6214 = vmatmul.msk.bf16.gmra.mxu2 %vm2287_vm0, %v5535_v38  ;;  %v6547_v37 = vld [vmem:[%s10092_s0 + $0x8f8] sm:$0xf0]  ;;  %v5519_v38 = vor.u32 %v6455_v2, %v5516_v1 }
 0x42b   :  { %v5883_v9 = vor.u32 %v6547_v37, %v5882_v33 }
 0x42c   :  { %10384 = vst [vmem:[#allocation188_spill] sm:$0xff] %v8925_v36  ;;  %v5546_v36 = vld [vmem:[%s10092_s0 + $0x650] sm:$0xf] }
 0x42d   :  { %v4061_v60 = vpop.f32.mrf.mxu2  ;;  %v4203_v8 = vpop.f32.mrf.mxu3  ;;  %v5547_v1 = vor.u32 %v6463_v6, %v5546_v36  ;;  %v5528_v6 = vld [vmem:[%s10092_s0 + $0x63c] sm:$0xf0]  ;;  %v6550_v36 = vld [vmem:[%s10092_s0 + $0x910] sm:$0xf0] }
 0x42e   :  { %v2918_v16 = vpop.f32.mrf.mxu0 }
 0x42f   :  { %v3487_v49 = vpop.f32.mrf.mxu1 }
 0x430   :  { %v3488_v10 = vadd.f32 %v3487_v49, %v2918_v16  ;;  %v6458_v16 = vld [vmem:[%s10092_s0 + $0x634] sm:$0xf] }
 0x431   :  { %2957 = vmatmul.bf16.gmra.mxu0 %v5515_v54  ;;  %v6459_v54 = vld [vmem:[%s10092_s0 + $0x638] sm:$0xf0] }
 0x432   :  { %v8946_v17 = vadd.f32 %v4056_v32, %v3488_v10  ;;  %3526 = vmatmul.bf16.gmra.mxu1 %v5519_v38  ;;  %6243 = vmatmul.msk.bf16.gmra.mxu3 %vm2287_vm0, %v5883_v9  ;;  %v5526_v32 = vld [vmem:[%s10092_s0 + $0x630] sm:$0xf] }
 0x433   :  { %v5527_v49 = vor.u32 %v6459_v54, %v5526_v32  ;;  %v6466_v32 = vld [vmem:[%s10092_s0 + $0x670] sm:$0xf0] }
 0x434   :  { %10385 = vst [vmem:[#allocation189_spill] sm:$0xff] %v8946_v17 }
 0x435   :  { %v4063_v4 = vpop.f32.mrf.mxu2  ;;  %v8955_v27 = vpop.f32.mrf.mxu3 }
 0x436   :  { %v2920_v2 = vpop.f32.mrf.mxu0 }
 0x437   :  { %v3489_v33 = vpop.f32.mrf.mxu1 }
 0x438   :  { %v3490_v37 = vadd.f32 %v3489_v33, %v2920_v2 }
 0x43a   :  { %v8957_v10 = vadd.f32 %v4058_v20, %v3490_v37  ;;  %6215 = vmatmul.msk.bf16.gmra.mxu2 %vm2287_vm0, %v5547_v1  ;;  %v5894_v20 = vld [vmem:[%s10092_s0 + $0x908] sm:$0xf]  ;;  %v5531_v1 = vor.u32 %v6458_v16, %v5528_v6  ;;  %v5559_v16 = vor.u32 %v6466_v32, %v5558_v42  ;;  %v5906_v42 = vld [vmem:[%s10092_s0 + $0x920] sm:$0xf] }
 0x43b   :  { %v5895_v33 = vor.u32 %v6550_v36, %v5894_v20  ;;  %v10389_v20 = vld [vmem:[#allocation11_spill] sm:$0xff] }
 0x43c   :  { %10386 = vst [vmem:[#allocation190_spill] sm:$0xff] %v8957_v10  ;;  %v10387_v10 = vld [vmem:[#allocation10_spill] sm:$0xff]  ;;  %v3635_v36 = vadd.f32 %v7981_v24, %v10389_v20  ;;  %v5540_v24 = vld [vmem:[%s10092_s0 + $0x654] sm:$0xf0] }
 0x43d   :  { %v4066_v38 = vpop.f32.mrf.mxu2  ;;  %v8978_v9 = vpop.f32.mrf.mxu3  ;;  %v3633_v17 = vadd.f32 %v7956_v21, %v10387_v10  ;;  %v8992_v21 = vld [vmem:[%s10093_s2] ss:$0 sm:$0xff] }
 0x43e   :  { %v2923_v2 = vpop.f32.mrf.mxu0 }
 0x43f   :  { %v3492_v37 = vpop.f32.mrf.mxu1  ;;  %v4202_v25 = vadd.f32 %v4201_v44, %v3633_v17 }
 0x440   :  { %v3493_v15 = vadd.f32 %v3492_v37, %v2923_v2  ;;  %v4204_v2 = vadd.f32 %v4203_v8, %v3635_v36  ;;  %v6553_v8 = vld [vmem:[%s10092_s0 + $0x928] sm:$0xf0] }
 0x441   :  { %2962 = vmatmul.bf16.gmra.mxu0 %v5527_v49  ;;  %v5538_v49 = vld [vmem:[%s10092_s0 + $0x648] sm:$0xf]  ;;  %v5907_v20 = vor.u32 %v6553_v8, %v5906_v42 }
 0x442   :  { %v4062_v23 = vadd.f32 %v4061_v60, %v3493_v15  ;;  %3531 = vmatmul.bf16.gmra.mxu1 %v5531_v1  ;;  %6244 = vmatmul.msk.bf16.gmra.mxu3 %vm2287_vm0, %v5895_v33  ;;  %v10388_v15 = vmax.f32 %v7014_v55, %v7946_v58  ;;  %v6462_v55 = vld [vmem:[%s10092_s0 + $0x650] sm:$0xf0]  ;;  %v6461_v58 = vld [vmem:[%s10092_s0 + $0x64c] sm:$0xf] }
 0x444   :  { %v4391_v54 = vmax.f32 %v4062_v23, %v4202_v25 }
 0x445   :  { %v4068_v10 = vpop.f32.mrf.mxu2  ;;  %v8994_v17 = vpop.f32.mrf.mxu3 }
 0x446   :  { %v4447_v44 = vmax.f32 %v10388_v15, %v4391_v54  ;;  %v2925_v60 = vpop.f32.mrf.mxu0  ;;  %v5539_v15 = vor.u32 %v6462_v55, %v5538_v49 }
 0x447   :  { %v3494_v6 = vpop.f32.mrf.mxu1 }
 0x448   :  { %v4507_v23 = vadd.f32 %v8992_v21, %v4447_v44  ;;  %v3495_v25 = vadd.f32 %v3494_v6, %v2925_v60  ;;  %v10390_v44 = vmax.f32 %v7024_v0, %v7958_v41  ;;  %v5543_v6 = vor.u32 %v6461_v58, %v5540_v24  ;;  %v5570_v0 = vld [vmem:[%s10092_s0 + $0x680] sm:$0xf]  ;;  %v6469_v41 = vld [vmem:[%s10092_s0 + $0x688] sm:$0xf0] }
 0x44a   :  { %v4563_v1 = vmax.f32 %v4507_v23, 0.0  ;;  %v4064_v33 = vadd.f32 %v4063_v4, %v3495_v25  ;;  %6216 = vmatmul.msk.bf16.gmra.mxu2 %vm2287_vm0, %v5559_v16  ;;  %v10391_v23 = vld [vmem:[#allocation13_spill] sm:$0xff] }
 0x44b   :  { %v10392_v25 = vld [vmem:[#allocation105_spill] sm:$0xff] }
 0x44c   :  { %v4619_v4 = vpack.c.bf16 %v4563_v1, %v4563_v1  ;;  %v4392_v37 = vmax.f32 %v4064_v33, %v4204_v2  ;;  %v3638_v2 = vadd.f32 %v10392_v25, %v10391_v23 }
 0x44d   :  { %v4071_v32 = vpop.f32.mrf.mxu2  ;;  %v9021_v54 = vpop.f32.mrf.mxu3 }
 0x44e   :  { %4676 = vst.msk [vmem:[%s10094_s3 + $0x10] sm:$0xf] %vm4671_vm1, %v4619_v4  ;;  %v4448_v60 = vmax.f32 %v10390_v44, %v4392_v37  ;;  %v2928_v16 = vpop.f32.mrf.mxu0  ;;  %v4207_v49 = vadd.f32 %v8955_v27, %v3638_v2  ;;  %v10393_v27 = vld [vmem:[#allocation12_spill] sm:$0xff]  ;;  %v5571_v44 = vor.u32 %v6469_v41, %v5570_v0 }
 0x44f   :  { %v3497_v36 = vpop.f32.mrf.mxu1 }
 0x450   :  { %v4508_v1 = vadd.f32 %v8992_v21, %v4448_v60  ;;  %v3498_v33 = vadd.f32 %v3497_v36, %v2928_v16  ;;  %v10396_v16 = vld [vmem:[#allocation14_spill] sm:$0xff] }
 0x451   :  { %2967 = vmatmul.bf16.gmra.mxu0 %v5539_v15  ;;  %v5550_v36 = vld [vmem:[%s10092_s0 + $0x660] sm:$0xf] }
 0x452   :  { %v4564_v55 = vmax.f32 %v4508_v1, 0.0  ;;  %v4067_v34 = vadd.f32 %v4066_v38, %v3498_v33  ;;  %3536 = vmatmul.bf16.gmra.mxu1 %v5543_v6  ;;  %6245 = vmatmul.msk.bf16.gmra.mxu3 %vm2287_vm0, %v5907_v20  ;;  %v10394_v38 = vld [vmem:[#allocation104_spill] sm:$0xff]  ;;  %v3640_v6 = vadd.f32 %v8018_v52, %v10396_v16  ;;  %v6465_v1 = vld [vmem:[%s10092_s0 + $0x668] sm:$0xf0]  ;;  %v6464_v52 = vld [vmem:[%s10092_s0 + $0x664] sm:$0xf] }
 0x453   :  { %v10395_v4 = vmax.f32 %v10393_v27, %v10394_v38  ;;  %v5552_v33 = vld [vmem:[%s10092_s0 + $0x66c] sm:$0xf0] }
 0x454   :  { %v4620_v58 = vpack.c.bf16 %v4564_v55, %v4564_v55  ;;  %v4393_v24 = vmax.f32 %v4067_v34, %v4207_v49  ;;  %v4209_v23 = vadd.f32 %v8978_v9, %v3640_v6  ;;  %v5918_v9 = vld [vmem:[%s10092_s0 + $0x938] sm:$0xf]  ;;  %v10400_v16 = vld [vmem:[#allocation108_spill] sm:$0xff] }
 0x455   :  { %v4073_v42 = vpop.f32.mrf.mxu2  ;;  %v9041_v8 = vpop.f32.mrf.mxu3 }
 0x456   :  { %4677 = vst.msk [vmem:[%s10094_s3 + $0x14] sm:$0xf] %vm4671_vm1, %v4620_v58  ;;  %v4449_v37 = vmax.f32 %v10395_v4, %v4393_v24  ;;  %v2930_v15 = vpop.f32.mrf.mxu0  ;;  %v5551_v58 = vor.u32 %v6465_v1, %v5550_v36  ;;  %v10397_v24 = vld [vmem:[#allocation106_spill] sm:$0xff] }
 0x457   :  { %v3499_v60 = vpop.f32.mrf.mxu1  ;;  %v10398_v27 = vmax.f32 %v7057_v28, %v10397_v24  ;;  %v5582_v28 = vld [vmem:[%s10092_s0 + $0x698] sm:$0xf] }
 0x458   :  { %v4509_v34 = vadd.f32 %v8992_v21, %v4449_v37  ;;  %v3500_v20 = vadd.f32 %v3499_v60, %v2930_v15  ;;  %v5555_v37 = vor.u32 %v6464_v52, %v5552_v33  ;;  %v10399_v60 = vld [vmem:[#allocation16_spill] sm:$0xff] }
 0x459   :  { %v3643_v6 = vadd.f32 %v10400_v16, %v10399_v60 }
 0x45a   :  { %v4565_v25 = vmax.f32 %v4509_v34, 0.0  ;;  %v4069_v2 = vadd.f32 %v4068_v10, %v3500_v20  ;;  %6217 = vmatmul.msk.bf16.gmra.mxu2 %vm2287_vm0, %v5571_v44  ;;  %v6556_v10 = vld [vmem:[%s10092_s0 + $0x940] sm:$0xf0] }
 0x45b   :  { %v5919_v15 = vor.u32 %v6556_v10, %v5918_v9  ;;  %v4212_v36 = vadd.f32 %v8994_v17, %v3643_v6  ;;  %v10401_v17 = vld [vmem:[#allocation15_spill] sm:$0xff]  ;;  %v6468_v6 = vld [vmem:[%s10092_s0 + $0x680] sm:$0xf0] }
 0x45c   :  { %v4621_v49 = vpack.c.bf16 %v4565_v25, %v4565_v25  ;;  %v4394_v55 = vmax.f32 %v4069_v2, %v4209_v23  ;;  %v6472_v2 = vld [vmem:[%s10092_s0 + $0x6a0] sm:$0xf0] }
 0x45d   :  { %v4076_v0 = vpop.f32.mrf.mxu2  ;;  %v9073_v41 = vpop.f32.mrf.mxu3 }
 0x45e   :  { %4678 = vst.msk [vmem:[%s10094_s3 + $0x18] sm:$0xf] %vm4671_vm1, %v4621_v49  ;;  %v4450_v38 = vmax.f32 %v10398_v27, %v4394_v55  ;;  %v2933_v4 = vpop.f32.mrf.mxu0  ;;  %v10404_v27 = vld [vmem:[#allocation17_spill] sm:$0xff] }
 0x45f   :  { %v3502_v44 = vpop.f32.mrf.mxu1 }
 0x460   :  { %v4510_v34 = vadd.f32 %v8992_v21, %v4450_v38  ;;  %v3503_v20 = vadd.f32 %v3502_v44, %v2933_v4  ;;  %v3645_v38 = vadd.f32 %v8055_v53, %v10404_v27  ;;  %v6467_v53 = vld [vmem:[%s10092_s0 + $0x67c] sm:$0xf] }
 0x461   :  { %2972 = vmatmul.bf16.gmra.mxu0 %v5551_v58  ;;  %v5583_v58 = vor.u32 %v6472_v2, %v5582_v28  ;;  %v10405_v2 = vld [vmem:[#allocation109_spill] sm:$0xff] }
 0x462   :  { %v4566_v23 = vmax.f32 %v4510_v34, 0.0  ;;  %v4072_v25 = vadd.f32 %v4071_v32, %v3503_v20  ;;  %3541 = vmatmul.bf16.gmra.mxu1 %v5555_v37  ;;  %6246 = vmatmul.msk.bf16.gmra.mxu3 %vm2287_vm0, %v5919_v15  ;;  %v10402_v32 = vld [vmem:[#allocation107_spill] sm:$0xff]  ;;  %v5562_v15 = vld [vmem:[%s10092_s0 + $0x678] sm:$0xf]  ;;  %v4214_v44 = vadd.f32 %v9021_v54, %v3645_v38  ;;  %v5930_v54 = vld [vmem:[%s10092_s0 + $0x950] sm:$0xf] }
 0x463   :  { %v10403_v10 = vmax.f32 %v10401_v17, %v10402_v32  ;;  %v5564_v34 = vld [vmem:[%s10092_s0 + $0x684] sm:$0xf0]  ;;  %v5563_v28 = vor.u32 %v6468_v6, %v5562_v15 }
 0x464   :  { %v4622_v1 = vpack.c.bf16 %v4566_v23, %v4566_v23  ;;  %v4395_v52 = vmax.f32 %v4072_v25, %v4212_v36  ;;  %v5567_v32 = vor.u32 %v6467_v53, %v5564_v34 }
 0x465   :  { %v4078_v33 = vpop.f32.mrf.mxu2  ;;  %v9093_v9 = vpop.f32.mrf.mxu3 }
 0x466   :  { %4679 = vst.msk [vmem:[%s10094_s3 + $0x1c] sm:$0xf] %vm4671_vm1, %v4622_v1  ;;  %v4451_v49 = vmax.f32 %v10403_v10, %v4395_v52  ;;  %v2935_v55 = vpop.f32.mrf.mxu0  ;;  %v10406_v1 = vmax.f32 %v7090_v57, %v10405_v2  ;;  %v5594_v57 = vld [vmem:[%s10092_s0 + $0x6b0] sm:$0xf] }
 0x467   :  { %v3504_v24 = vpop.f32.mrf.mxu1 }
 0x468   :  { %v4511_v4 = vadd.f32 %v8992_v21, %v4451_v49  ;;  %v3505_v37 = vadd.f32 %v3504_v24, %v2935_v55  ;;  %v10407_v55 = vld [vmem:[#allocation19_spill] sm:$0xff] }
 0x46a   :  { %v4567_v60 = vmax.f32 %v4511_v4, 0.0  ;;  %v4074_v16 = vadd.f32 %v4073_v42, %v3505_v37  ;;  %6218 = vmatmul.msk.bf16.gmra.mxu2 %vm2287_vm0, %v5583_v58  ;;  %v6559_v42 = vld [vmem:[%s10092_s0 + $0x958] sm:$0xf0]  ;;  %v10408_v58 = vld [vmem:[#allocation111_spill] sm:$0xff] }
 0x46b   :  { %v5931_v10 = vor.u32 %v6559_v42, %v5930_v54  ;;  %v3648_v24 = vadd.f32 %v10408_v58, %v10407_v55  ;;  %v6471_v55 = vld [vmem:[%s10092_s0 + $0x698] sm:$0xf0]  ;;  %v5576_v58 = vld [vmem:[%s10092_s0 + $0x69c] sm:$0xf0] }
 0x46c   :  { %v4623_v20 = vpack.c.bf16 %v4567_v60, %v4567_v60  ;;  %v4396_v36 = vmax.f32 %v4074_v16, %v4214_v44  ;;  %v6475_v44 = vld [vmem:[%s10092_s0 + $0x6b8] sm:$0xf0] }
 0x46d   :  { %v4081_v23 = vpop.f32.mrf.mxu2  ;;  %v9125_v25 = vpop.f32.mrf.mxu3  ;;  %v4217_v4 = vadd.f32 %v9041_v8, %v3648_v24  ;;  %v10409_v8 = vld [vmem:[#allocation18_spill] sm:$0xff] }
 0x46e   :  { %4680 = vst.msk [vmem:[%s10094_s3 + $0x20] sm:$0xf] %vm4671_vm1, %v4623_v20  ;;  %v4452_v52 = vmax.f32 %v10406_v1, %v4396_v36  ;;  %v2938_v17 = vpop.f32.mrf.mxu0  ;;  %v5595_v20 = vor.u32 %v6475_v44, %v5594_v57 }
 0x46f   :  { %v3507_v49 = vpop.f32.mrf.mxu1 }
 0x470   :  { %v4512_v27 = vadd.f32 %v8992_v21, %v4452_v52  ;;  %v3508_v38 = vadd.f32 %v3507_v49, %v2938_v17  ;;  %v5574_v17 = vld [vmem:[%s10092_s0 + $0x690] sm:$0xf] }
 0x471   :  { %2977 = vmatmul.bf16.gmra.mxu0 %v5563_v28  ;;  %v10412_v28 = vld [vmem:[#allocation20_spill] sm:$0xff] }
 0x472   :  { %v4568_v37 = vmax.f32 %v4512_v27, 0.0  ;;  %v4077_v15 = vadd.f32 %v4076_v0, %v3508_v38  ;;  %3546 = vmatmul.bf16.gmra.mxu1 %v5567_v32  ;;  %6247 = vmatmul.msk.bf16.gmra.mxu3 %vm2287_vm0, %v5931_v10  ;;  %v10410_v0 = vld [vmem:[#allocation110_spill] sm:$0xff]  ;;  %v3650_v2 = vadd.f32 %v8092_v56, %v10412_v28  ;;  %v6470_v56 = vld [vmem:[%s10092_s0 + $0x694] sm:$0xf] }
 0x473   :  { %v10411_v34 = vmax.f32 %v10409_v8, %v10410_v0 }
 0x474   :  { %v4624_v60 = vpack.c.bf16 %v4568_v37, %v4568_v37  ;;  %v4397_v16 = vmax.f32 %v4077_v15, %v4217_v4  ;;  %v4219_v32 = vadd.f32 %v9073_v41, %v3650_v2  ;;  %v5942_v41 = vld [vmem:[%s10092_s0 + $0x968] sm:$0xf]  ;;  %v5575_v37 = vor.u32 %v6471_v55, %v5574_v17  ;;  %v10413_v15 = vld [vmem:[#allocation112_spill] sm:$0xff] }
 0x475   :  { %v4083_v6 = vpop.f32.mrf.mxu2  ;;  %v9145_v53 = vpop.f32.mrf.mxu3  ;;  %v10414_v57 = vmax.f32 %v7123_v26, %v10413_v15  ;;  %v5606_v26 = vld [vmem:[%s10092_s0 + $0x6c8] sm:$0xf] }
 0x476   :  { %4681 = vst.msk [vmem:[%s10094_s3 + $0x24] sm:$0xf] %vm4671_vm1, %v4624_v60  ;;  %v4453_v54 = vmax.f32 %v10411_v34, %v4397_v16  ;;  %v2940_v42 = vpop.f32.mrf.mxu0  ;;  %v5579_v16 = vor.u32 %v6470_v56, %v5576_v58  ;;  %v10415_v34 = vld [vmem:[#allocation22_spill] sm:$0xff] }
 0x477   :  { %v3509_v36 = vpop.f32.mrf.mxu1 }
 0x478   :  { %v4513_v1 = vadd.f32 %v8992_v21, %v4453_v54  ;;  %v3510_v52 = vadd.f32 %v3509_v36, %v2940_v42  ;;  %v10416_v54 = vld [vmem:[#allocation114_spill] sm:$0xff] }
 0x479   :  { %v3653_v42 = vadd.f32 %v10416_v54, %v10415_v34 }
 0x47a   :  { %v4569_v10 = vmax.f32 %v4513_v1, 0.0  ;;  %v4079_v49 = vadd.f32 %v4078_v33, %v3510_v52  ;;  %6219 = vmatmul.msk.bf16.gmra.mxu2 %vm2287_vm0, %v5595_v20  ;;  %v6562_v33 = vld [vmem:[%s10092_s0 + $0x970] sm:$0xf0] }
 0x47b   :  { %v5943_v8 = vor.u32 %v6562_v33, %v5942_v41  ;;  %v4222_v28 = vadd.f32 %v9093_v9, %v3653_v42  ;;  %v6478_v52 = vld [vmem:[%s10092_s0 + $0x6d0] sm:$0xf0]  ;;  %v10417_v9 = vld [vmem:[#allocation21_spill] sm:$0xff] }
 0x47c   :  { %v4625_v24 = vpack.c.bf16 %v4569_v10, %v4569_v10  ;;  %v4398_v27 = vmax.f32 %v4079_v49, %v4219_v32  ;;  %v5607_v41 = vor.u32 %v6478_v52, %v5606_v26 }
 0x47d   :  { %v4086_v38 = vpop.f32.mrf.mxu2  ;;  %v9177_v4 = vpop.f32.mrf.mxu3 }
 0x47e   :  { %4682 = vst.msk [vmem:[%s10094_s3 + $0x28] sm:$0xf] %vm4671_vm1, %v4625_v24  ;;  %v4454_v44 = vmax.f32 %v10414_v57, %v4398_v27  ;;  %v2943_v60 = vpop.f32.mrf.mxu0  ;;  %v10420_v24 = vld [vmem:[#allocation23_spill] sm:$0xff] }
 0x47f   :  { %v3512_v0 = vpop.f32.mrf.mxu1  ;;  %v3655_v27 = vadd.f32 %v8129_v14, %v10420_v24  ;;  %v5586_v57 = vld [vmem:[%s10092_s0 + $0x6a8] sm:$0xf]  ;;  %v6473_v14 = vld [vmem:[%s10092_s0 + $0x6ac] sm:$0xf] }
 0x480   :  { %v4514_v20 = vadd.f32 %v8992_v21, %v4454_v44  ;;  %v3513_v36 = vadd.f32 %v3512_v0, %v2943_v60  ;;  %v5588_v0 = vld [vmem:[%s10092_s0 + $0x6b4] sm:$0xf0] }
 0x481   :  { %2982 = vmatmul.bf16.gmra.mxu0 %v5575_v37  ;;  %v4224_v44 = vadd.f32 %v9125_v25, %v3655_v27  ;;  %v5954_v25 = vld [vmem:[%s10092_s0 + $0x980] sm:$0xf]  ;;  %v5591_v52 = vor.u32 %v6473_v14, %v5588_v0  ;;  %v6481_v27 = vld [vmem:[%s10092_s0 + $0x6e8] sm:$0xf0] }
 0x482   :  { %v4570_v2 = vmax.f32 %v4514_v20, 0.0  ;;  %v4082_v1 = vadd.f32 %v4081_v23, %v3513_v36  ;;  %3551 = vmatmul.bf16.gmra.mxu1 %v5579_v16  ;;  %6248 = vmatmul.msk.bf16.gmra.mxu3 %vm2287_vm0, %v5943_v8  ;;  %v10418_v23 = vld [vmem:[#allocation113_spill] sm:$0xff]  ;;  %v6474_v8 = vld [vmem:[%s10092_s0 + $0x6b0] sm:$0xf0] }
 0x483   :  { %v10419_v55 = vmax.f32 %v10417_v9, %v10418_v23  ;;  %v5587_v36 = vor.u32 %v6474_v8, %v5586_v57  ;;  %v10423_v9 = vld [vmem:[#allocation25_spill] sm:$0xff] }
 0x484   :  { %v4626_v17 = vpack.c.bf16 %v4570_v2, %v4570_v2  ;;  %v4399_v32 = vmax.f32 %v4082_v1, %v4222_v28  ;;  %v10421_v28 = vld [vmem:[#allocation115_spill] sm:$0xff]  ;;  %v10424_v23 = vld [vmem:[#allocation117_spill] sm:$0xff] }
 0x485   :  { %v4088_v10 = vpop.f32.mrf.mxu2  ;;  %v9197_v49 = vpop.f32.mrf.mxu3  ;;  %v10422_v2 = vmax.f32 %v7156_v61, %v10421_v28  ;;  %v5618_v61 = vld [vmem:[%s10092_s0 + $0x6e0] sm:$0xf] }
 0x486   :  { %4683 = vst.msk [vmem:[%s10094_s3 + $0x2c] sm:$0xf] %vm4671_vm1, %v4626_v17  ;;  %v4455_v56 = vmax.f32 %v10419_v55, %v4399_v32  ;;  %v2945_v58 = vpop.f32.mrf.mxu0  ;;  %v3658_v55 = vadd.f32 %v10424_v23, %v10423_v9  ;;  %v5619_v14 = vor.u32 %v6481_v27, %v5618_v61 }
 0x487   :  { %v3514_v33 = vpop.f32.mrf.mxu1 }
 0x488   :  { %v4515_v37 = vadd.f32 %v8992_v21, %v4455_v56  ;;  %v3515_v15 = vadd.f32 %v3514_v33, %v2945_v58 }
 0x48a   :  { %v4571_v60 = vmax.f32 %v4515_v37, 0.0  ;;  %v4084_v16 = vadd.f32 %v4083_v6, %v3515_v15  ;;  %6220 = vmatmul.msk.bf16.gmra.mxu2 %vm2287_vm0, %v5607_v41  ;;  %v6565_v6 = vld [vmem:[%s10092_s0 + $0x988] sm:$0xf0]  ;;  %v4227_v41 = vadd.f32 %v9145_v53, %v3658_v55  ;;  %v10425_v53 = vld [vmem:[#allocation24_spill] sm:$0xff] }
 0x48b   :  { %v5955_v17 = vor.u32 %v6565_v6, %v5954_v25  ;;  %v10428_v25 = vld [vmem:[#allocation26_spill] sm:$0xff] }
 0x48c   :  { %v4627_v34 = vpack.c.bf16 %v4571_v60, %v4571_v60  ;;  %v4400_v54 = vmax.f32 %v4084_v16, %v4224_v44  ;;  %v3660_v6 = vadd.f32 %v8166_v29, %v10428_v25  ;;  %v6476_v29 = vld [vmem:[%s10092_s0 + $0x6c4] sm:$0xf] }
 0x48d   :  { %v4091_v42 = vpop.f32.mrf.mxu2  ;;  %v9229_v20 = vpop.f32.mrf.mxu3 }
 0x48e   :  { %4684 = vst.msk [vmem:[%s10094_s3 + $0x30] sm:$0xf] %vm4671_vm1, %v4627_v34  ;;  %v4456_v1 = vmax.f32 %v10422_v2, %v4400_v54  ;;  %v2948_v26 = vpop.f32.mrf.mxu0  ;;  %v4229_v28 = vadd.f32 %v9177_v4, %v3660_v6  ;;  %v5966_v4 = vld [vmem:[%s10092_s0 + $0x998] sm:$0xf] }
 0x48f   :  { %v3517_v32 = vpop.f32.mrf.mxu1 }
 0x490   :  { %v4516_v56 = vadd.f32 %v8992_v21, %v4456_v1  ;;  %v3518_v58 = vadd.f32 %v3517_v32, %v2948_v26  ;;  %v6477_v26 = vld [vmem:[%s10092_s0 + $0x6c8] sm:$0xf0] }
 0x491   :  { %2987 = vmatmul.bf16.gmra.mxu0 %v5587_v36  ;;  %v5598_v36 = vld [vmem:[%s10092_s0 + $0x6c0] sm:$0xf] }
 0x492   :  { %v4572_v33 = vmax.f32 %v4516_v56, 0.0  ;;  %v4087_v24 = vadd.f32 %v4086_v38, %v3518_v58  ;;  %3556 = vmatmul.bf16.gmra.mxu1 %v5591_v52  ;;  %6249 = vmatmul.msk.bf16.gmra.mxu3 %vm2287_vm0, %v5955_v17  ;;  %v10426_v38 = vld [vmem:[#allocation116_spill] sm:$0xff]  ;;  %v5599_v55 = vor.u32 %v6477_v26, %v5598_v36  ;;  %v10429_v56 = vld [vmem:[#allocation118_spill] sm:$0xff] }
 0x493   :  { %v10427_v60 = vmax.f32 %v10425_v53, %v10426_v38  ;;  %v5600_v52 = vld [vmem:[%s10092_s0 + $0x6cc] sm:$0xf0]  ;;  %v10430_v58 = vmax.f32 %v7189_v39, %v10429_v56  ;;  %v5630_v39 = vld [vmem:[%s10092_s0 + $0x6f8] sm:$0xf] }
 0x494   :  { %v4628_v37 = vpack.c.bf16 %v4572_v33, %v4572_v33  ;;  %v4401_v15 = vmax.f32 %v4087_v24, %v4227_v41  ;;  %v5603_v24 = vor.u32 %v6476_v29, %v5600_v52  ;;  %v10436_v29 = vld [vmem:[#allocation29_spill] sm:$0xff] }
 0x495   :  { %v4093_v57 = vpop.f32.mrf.mxu2  ;;  %v9249_v44 = vpop.f32.mrf.mxu3  ;;  %v3665_v52 = vadd.f32 %v8203_v18, %v10436_v29  ;;  %v6479_v18 = vld [vmem:[%s10092_s0 + $0x6dc] sm:$0xf] }
 0x496   :  { %4685 = vst.msk [vmem:[%s10094_s3 + $0x34] sm:$0xf] %vm4671_vm1, %v4628_v37  ;;  %v4457_v16 = vmax.f32 %v10427_v60, %v4401_v15  ;;  %v2950_v8 = vpop.f32.mrf.mxu0  ;;  %v10431_v37 = vld [vmem:[#allocation28_spill] sm:$0xff] }
 0x497   :  { %v3519_v0 = vpop.f32.mrf.mxu1  ;;  %v10432_v15 = vld [vmem:[#allocation120_spill] sm:$0xff] }
 0x498   :  { %v4517_v34 = vadd.f32 %v8992_v21, %v4457_v16  ;;  %v3520_v54 = vadd.f32 %v3519_v0, %v2950_v8  ;;  %v3663_v53 = vadd.f32 %v10432_v15, %v10431_v37  ;;  %v6484_v0 = vld [vmem:[%s10092_s0 + $0x700] sm:$0xf0]  ;;  %v10437_v15 = vld [vmem:[#allocation121_spill] sm:$0xff] }
 0x49a   :  { %v4573_v2 = vmax.f32 %v4517_v34, 0.0  ;;  %v4089_v1 = vadd.f32 %v4088_v10, %v3520_v54  ;;  %6221 = vmatmul.msk.bf16.gmra.mxu2 %vm2287_vm0, %v5619_v14  ;;  %v6568_v10 = vld [vmem:[%s10092_s0 + $0x9a0] sm:$0xf0]  ;;  %v4232_v16 = vadd.f32 %v9197_v49, %v3663_v53  ;;  %v10433_v49 = vld [vmem:[#allocation27_spill] sm:$0xff]  ;;  %v10438_v53 = vmax.f32 %v7222_v19, %v10437_v15  ;;  %v5642_v19 = vld [vmem:[%s10092_s0 + $0x710] sm:$0xf] }
 0x49b   :  { %v5967_v61 = vor.u32 %v6568_v10, %v5966_v4  ;;  %v5624_v15 = vld [vmem:[%s10092_s0 + $0x6fc] sm:$0xf0] }
 0x49c   :  { %v4629_v17 = vpack.c.bf16 %v4573_v2, %v4573_v2  ;;  %v4402_v32 = vmax.f32 %v4089_v1, %v4229_v28  ;;  %v5631_v1 = vor.u32 %v6484_v0, %v5630_v39  ;;  %v10439_v39 = vld [vmem:[#allocation31_spill] sm:$0xff] }
 0x49d   :  { %v4096_v9 = vpop.f32.mrf.mxu2  ;;  %v9281_v23 = vpop.f32.mrf.mxu3  ;;  %v10440_v0 = vld [vmem:[#allocation123_spill] sm:$0xff] }
 0x49e   :  { %4686 = vst.msk [vmem:[%s10094_s3 + $0x38] sm:$0xf] %vm4671_vm1, %v4629_v17  ;;  %v4458_v41 = vmax.f32 %v10430_v58, %v4402_v32  ;;  %v2953_v33 = vpop.f32.mrf.mxu0  ;;  %v5610_v17 = vld [vmem:[%s10092_s0 + $0x6d8] sm:$0xf]  ;;  %v4234_v32 = vadd.f32 %v9229_v20, %v3665_v52  ;;  %v6480_v58 = vld [vmem:[%s10092_s0 + $0x6e0] sm:$0xf0] }
 0x49f   :  { %v3522_v27 = vpop.f32.mrf.mxu1  ;;  %v5978_v20 = vld [vmem:[%s10092_s0 + $0x9b0] sm:$0xf]  ;;  %v5611_v37 = vor.u32 %v6480_v58, %v5610_v17 }
 0x4a0   :  { %v4518_v38 = vadd.f32 %v8992_v21, %v4458_v41  ;;  %v3523_v60 = vadd.f32 %v3522_v27, %v2953_v33  ;;  %v5612_v41 = vld [vmem:[%s10092_s0 + $0x6e4] sm:$0xf0] }
 0x4a1   :  { %2992 = vmatmul.bf16.gmra.mxu0 %v5599_v55 }
 0x4a2   :  { %v4574_v8 = vmax.f32 %v4518_v38, 0.0  ;;  %v4092_v14 = vadd.f32 %v4091_v42, %v3523_v60  ;;  %3561 = vmatmul.bf16.gmra.mxu1 %v5603_v24  ;;  %6250 = vmatmul.msk.bf16.gmra.mxu3 %vm2287_vm0, %v5967_v61  ;;  %v10434_v42 = vld [vmem:[#allocation119_spill] sm:$0xff] }
 0x4a3   :  { %v10435_v36 = vmax.f32 %v10433_v49, %v10434_v42 }
 0x4a4   :  { %v4630_v25 = vpack.c.bf16 %v4574_v8, %v4574_v8  ;;  %v4403_v6 = vmax.f32 %v4092_v14, %v4232_v16  ;;  %v5615_v16 = vor.u32 %v6479_v18, %v5612_v41 }
 0x4a5   :  { %v4098_v34 = vpop.f32.mrf.mxu2  ;;  %v9301_v54 = vpop.f32.mrf.mxu3 }
 0x4a6   :  { %4687 = vst.msk [vmem:[%s10094_s3 + $0x3c] sm:$0xf] %vm4671_vm1, %v4630_v25  ;;  %v4459_v28 = vmax.f32 %v10435_v36, %v4403_v6  ;;  %v2955_v2 = vpop.f32.mrf.mxu0  ;;  %v3668_v25 = vadd.f32 %v10440_v0, %v10439_v39 }
 0x4a7   :  { %v3524_v26 = vpop.f32.mrf.mxu1 }
 0x4a8   :  { %v4519_v4 = vadd.f32 %v8992_v21, %v4459_v28  ;;  %v3525_v10 = vadd.f32 %v3524_v26, %v2955_v2  ;;  %v4237_v42 = vadd.f32 %v9249_v44, %v3668_v25  ;;  %v6487_v2 = vld [vmem:[%s10092_s0 + $0x718] sm:$0xf0]  ;;  %v10441_v44 = vld [vmem:[#allocation30_spill] sm:$0xff] }
 0x4aa   :  { %v4575_v55 = vmax.f32 %v4519_v4, 0.0  ;;  %v4094_v56 = vadd.f32 %v4093_v57, %v3525_v10  ;;  %6222 = vmatmul.msk.bf16.gmra.mxu2 %vm2287_vm0, %v5631_v1  ;;  %v6571_v57 = vld [vmem:[%s10092_s0 + $0x9b8] sm:$0xf0] }
 0x4ab   :  { %v5979_v8 = vor.u32 %v6571_v57, %v5978_v20  ;;  %v5622_v20 = vld [vmem:[%s10092_s0 + $0x6f0] sm:$0xf] }
 0x4ac   :  { %v4631_v33 = vpack.c.bf16 %v4575_v55, %v4575_v55  ;;  %v4404_v24 = vmax.f32 %v4094_v56, %v4234_v32  ;;  %v5643_v32 = vor.u32 %v6487_v2, %v5642_v19  ;;  %v10444_v56 = vld [vmem:[#allocation32_spill] sm:$0xff] }
 0x4ad   :  { %v4101_v61 = vpop.f32.mrf.mxu2  ;;  %v9333_v27 = vpop.f32.mrf.mxu3  ;;  %v3670_v58 = vadd.f32 %v8240_v47, %v10444_v56  ;;  %v6482_v47 = vld [vmem:[%s10092_s0 + $0x6f4] sm:$0xf] }
 0x4ae   :  { %4688 = vst.msk [vmem:[%s10094_s3 + $0x40] sm:$0xf] %vm4671_vm1, %v4631_v33  ;;  %v4460_v38 = vmax.f32 %v10438_v53, %v4404_v24  ;;  %v2958_v60 = vpop.f32.mrf.mxu0 }
 0x4af   :  { %v3527_v14 = vpop.f32.mrf.mxu1  ;;  %v4239_v57 = vadd.f32 %v9281_v23, %v3670_v58  ;;  %v5990_v23 = vld [vmem:[%s10092_s0 + $0x9c8] sm:$0xf] }
 0x4b0   :  { %v4520_v6 = vadd.f32 %v8992_v21, %v4460_v38  ;;  %v3528_v49 = vadd.f32 %v3527_v14, %v2958_v60  ;;  %v10445_v14 = vld [vmem:[#allocation124_spill] sm:$0xff] }
 0x4b1   :  { %2997 = vmatmul.bf16.gmra.mxu0 %v5611_v37  ;;  %v6483_v37 = vld [vmem:[%s10092_s0 + $0x6f8] sm:$0xf0]  ;;  %v10446_v39 = vmax.f32 %v7255_v11, %v10445_v14  ;;  %v5654_v11 = vld [vmem:[%s10092_s0 + $0x728] sm:$0xf] }
 0x4b2   :  { %v4576_v36 = vmax.f32 %v4520_v6, 0.0  ;;  %v4097_v28 = vadd.f32 %v4096_v9, %v3528_v49  ;;  %3566 = vmatmul.bf16.gmra.mxu1 %v5615_v16  ;;  %6251 = vmatmul.msk.bf16.gmra.mxu3 %vm2287_vm0, %v5979_v8  ;;  %v10442_v9 = vld [vmem:[#allocation122_spill] sm:$0xff]  ;;  %v5623_v8 = vor.u32 %v6483_v37, %v5622_v20  ;;  %v5627_v6 = vor.u32 %v6482_v47, %v5624_v15  ;;  %v5634_v47 = vld [vmem:[%s10092_s0 + $0x708] sm:$0xf] }
 0x4b3   :  { %v10443_v4 = vmax.f32 %v10441_v44, %v10442_v9 }
 0x4b4   :  { %v4632_v1 = vpack.c.bf16 %v4576_v36, %v4576_v36  ;;  %v4405_v26 = vmax.f32 %v4097_v28, %v4237_v42  ;;  %v10447_v36 = vld [vmem:[#allocation34_spill] sm:$0xff] }
 0x4b5   :  { %v4103_v29 = vpop.f32.mrf.mxu2  ;;  %v9353_v52 = vpop.f32.mrf.mxu3  ;;  %v10448_v28 = vld [vmem:[#allocation126_spill] sm:$0xff] }
 0x4b6   :  { %4689 = vst.msk [vmem:[%s10094_s3 + $0x44] sm:$0xf] %vm4671_vm1, %v4632_v1  ;;  %v4461_v10 = vmax.f32 %v10443_v4, %v4405_v26  ;;  %v2960_v17 = vpop.f32.mrf.mxu0  ;;  %v3673_v19 = vadd.f32 %v10448_v28, %v10447_v36  ;;  %v6490_v4 = vld [vmem:[%s10092_s0 + $0x730] sm:$0xf0] }
 0x4b7   :  { %v3529_v55 = vpop.f32.mrf.mxu1 }
 0x4b8   :  { %v4521_v18 = vadd.f32 %v8992_v21, %v4461_v10  ;;  %v3530_v41 = vadd.f32 %v3529_v55, %v2960_v17  ;;  %v4242_v26 = vadd.f32 %v9301_v54, %v3673_v19  ;;  %v10449_v54 = vld [vmem:[#allocation33_spill] sm:$0xff] }
 0x4ba   :  { %v4577_v33 = vmax.f32 %v4521_v18, 0.0  ;;  %v4099_v24 = vadd.f32 %v4098_v34, %v3530_v41  ;;  %6223 = vmatmul.msk.bf16.gmra.mxu2 %vm2287_vm0, %v5643_v32  ;;  %v6574_v34 = vld [vmem:[%s10092_s0 + $0x9d0] sm:$0xf0]  ;;  %v5655_v41 = vor.u32 %v6490_v4, %v5654_v11 }
 0x4bb   :  { %v5991_v49 = vor.u32 %v6574_v34, %v5990_v23 }
 0x4bc   :  { %v4633_v53 = vpack.c.bf16 %v4577_v33, %v4577_v33  ;;  %v4406_v38 = vmax.f32 %v4099_v24, %v4239_v57  ;;  %v10452_v57 = vld [vmem:[#allocation35_spill] sm:$0xff] }
 0x4bd   :  { %v4106_v60 = vpop.f32.mrf.mxu2  ;;  %v9385_v16 = vpop.f32.mrf.mxu3  ;;  %v3675_v33 = vadd.f32 %v8277_v7, %v10452_v57  ;;  %v6485_v7 = vld [vmem:[%s10092_s0 + $0x70c] sm:$0xf] }
 0x4be   :  { %4690 = vst.msk [vmem:[%s10094_s3 + $0x48] sm:$0xf] %vm4671_vm1, %v4633_v53  ;;  %v4462_v0 = vmax.f32 %v10446_v39, %v4406_v38  ;;  %v2963_v25 = vpop.f32.mrf.mxu0  ;;  %v6486_v53 = vld [vmem:[%s10092_s0 + $0x710] sm:$0xf0]  ;;  %v5636_v38 = vld [vmem:[%s10092_s0 + $0x714] sm:$0xf0] }
 0x4bf   :  { %v3532_v42 = vpop.f32.mrf.mxu1  ;;  %v4244_v15 = vadd.f32 %v9333_v27, %v3675_v33  ;;  %v6002_v27 = vld [vmem:[%s10092_s0 + $0x9e0] sm:$0xf]  ;;  %v5639_v28 = vor.u32 %v6485_v7, %v5636_v38 }
 0x4c0   :  { %v4522_v2 = vadd.f32 %v8992_v21, %v4462_v0  ;;  %v3533_v1 = vadd.f32 %v3532_v42, %v2963_v25  ;;  %v5635_v25 = vor.u32 %v6486_v53, %v5634_v47 }
 0x4c1   :  { %3002 = vmatmul.bf16.gmra.mxu0 %v5623_v8 }
 0x4c2   :  { %v4578_v44 = vmax.f32 %v4522_v2, 0.0  ;;  %v4102_v9 = vadd.f32 %v4101_v61, %v3533_v1  ;;  %3571 = vmatmul.bf16.gmra.mxu1 %v5627_v6  ;;  %6252 = vmatmul.msk.bf16.gmra.mxu3 %vm2287_vm0, %v5991_v49  ;;  %v10450_v61 = vld [vmem:[#allocation125_spill] sm:$0xff]  ;;  %v10453_v6 = vld [vmem:[#allocation127_spill] sm:$0xff] }
 0x4c3   :  { %v10451_v56 = vmax.f32 %v10449_v54, %v10450_v61  ;;  %v10454_v49 = vmax.f32 %v7288_v51, %v10453_v6  ;;  %v10455_v1 = vld [vmem:[#allocation37_spill] sm:$0xff]  ;;  %v5666_v51 = vld [vmem:[%s10092_s0 + $0x740] sm:$0xf]  ;;  %v6493_v54 = vld [vmem:[%s10092_s0 + $0x748] sm:$0xf0] }
 0x4c4   :  { %v4634_v10 = vpack.c.bf16 %v4578_v44, %v4578_v44  ;;  %v4407_v17 = vmax.f32 %v4102_v9, %v4242_v26  ;;  %v10456_v26 = vld [vmem:[#allocation129_spill] sm:$0xff]  ;;  %v5667_v33 = vor.u32 %v6493_v54, %v5666_v51 }
 0x4c5   :  { %v4108_v32 = vpop.f32.mrf.mxu2  ;;  %v9405_v55 = vpop.f32.mrf.mxu3  ;;  %v3678_v44 = vadd.f32 %v10456_v26, %v10455_v1 }
 0x4c6   :  { %4691 = vst.msk [vmem:[%s10094_s3 + $0x4c] sm:$0xf] %vm4671_vm1, %v4634_v10  ;;  %v4463_v58 = vmax.f32 %v10451_v56, %v4407_v17  ;;  %v2965_v18 = vpop.f32.mrf.mxu0 }
 0x4c7   :  { %v3534_v20 = vpop.f32.mrf.mxu1  ;;  %v4247_v4 = vadd.f32 %v9353_v52, %v3678_v44  ;;  %v10457_v52 = vld [vmem:[#allocation36_spill] sm:$0xff] }
 0x4c8   :  { %v4523_v24 = vadd.f32 %v8992_v21, %v4463_v58  ;;  %v3535_v37 = vadd.f32 %v3534_v20, %v2965_v18  ;;  %v10463_v44 = vld [vmem:[#allocation40_spill] sm:$0xff] }
 0x4ca   :  { %v4579_v23 = vmax.f32 %v4523_v24, 0.0  ;;  %v4104_v34 = vadd.f32 %v4103_v29, %v3535_v37  ;;  %6224 = vmatmul.msk.bf16.gmra.mxu2 %vm2287_vm0, %v5655_v41  ;;  %v6577_v29 = vld [vmem:[%s10092_s0 + $0x9e8] sm:$0xf0]  ;;  %v10460_v37 = vld [vmem:[#allocation38_spill] sm:$0xff] }
 0x4cb   :  { %v6003_v19 = vor.u32 %v6577_v29, %v6002_v27  ;;  %v3680_v47 = vadd.f32 %v8314_v31, %v10460_v37  ;;  %v6489_v27 = vld [vmem:[%s10092_s0 + $0x728] sm:$0xf0]  ;;  %v6488_v31 = vld [vmem:[%s10092_s0 + $0x724] sm:$0xf]  ;;  %v5648_v29 = vld [vmem:[%s10092_s0 + $0x72c] sm:$0xf0] }
 0x4cc   :  { %v4635_v8 = vpack.c.bf16 %v4579_v23, %v4579_v23  ;;  %v4408_v14 = vmax.f32 %v4104_v34, %v4244_v15  ;;  %v5646_v34 = vld [vmem:[%s10092_s0 + $0x720] sm:$0xf] }
 0x4cd   :  { %v4111_v39 = vpop.f32.mrf.mxu2  ;;  %v9437_v0 = vpop.f32.mrf.mxu3  ;;  %v4249_v53 = vadd.f32 %v9385_v16, %v3680_v47  ;;  %v6014_v16 = vld [vmem:[%s10092_s0 + $0x9f8] sm:$0xf] }
 0x4ce   :  { %4692 = vst.msk [vmem:[%s10094_s3 + $0x50] sm:$0xf] %vm4671_vm1, %v4635_v8  ;;  %v4464_v42 = vmax.f32 %v10454_v49, %v4408_v14  ;;  %v2968_v36 = vpop.f32.mrf.mxu0  ;;  %v5647_v49 = vor.u32 %v6489_v27, %v5646_v34  ;;  %v10468_v47 = vld [vmem:[#allocation41_spill] sm:$0xff] }
 0x4cf   :  { %v3537_v2 = vpop.f32.mrf.mxu1 }
 0x4d0   :  { %v4524_v9 = vadd.f32 %v8992_v21, %v4464_v42  ;;  %v3538_v11 = vadd.f32 %v3537_v2, %v2968_v36  ;;  %v10461_v42 = vld [vmem:[#allocation130_spill] sm:$0xff]  ;;  %v5651_v2 = vor.u32 %v6488_v31, %v5648_v29  ;;  %v5660_v29 = vld [vmem:[%s10092_s0 + $0x744] sm:$0xf0] }
 0x4d1   :  { %3007 = vmatmul.bf16.gmra.mxu0 %v5635_v25  ;;  %v10462_v36 = vmax.f32 %v7321_v59, %v10461_v42  ;;  %v5678_v59 = vld [vmem:[%s10092_s0 + $0x758] sm:$0xf]  ;;  %v6492_v31 = vld [vmem:[%s10092_s0 + $0x740] sm:$0xf0] }
 0x4d2   :  { %v4580_v10 = vmax.f32 %v4524_v9, 0.0  ;;  %v4107_v17 = vadd.f32 %v4106_v60, %v3538_v11  ;;  %3576 = vmatmul.bf16.gmra.mxu1 %v5639_v28  ;;  %6253 = vmatmul.msk.bf16.gmra.mxu3 %vm2287_vm0, %v6003_v19  ;;  %v10458_v60 = vld [vmem:[#allocation128_spill] sm:$0xff]  ;;  %v10469_v42 = vld [vmem:[#allocation133_spill] sm:$0xff] }
 0x4d3   :  { %v10459_v41 = vmax.f32 %v10457_v52, %v10458_v60  ;;  %v10464_v9 = vld [vmem:[#allocation132_spill] sm:$0xff] }
 0x4d4   :  { %v4636_v61 = vpack.c.bf16 %v4580_v10, %v4580_v10  ;;  %v4409_v56 = vmax.f32 %v4107_v17, %v4247_v4  ;;  %v3683_v11 = vadd.f32 %v10464_v9, %v10463_v44  ;;  %v10471_v44 = vld [vmem:[#allocation43_spill] sm:$0xff] }
 0x4d5   :  { %v4113_v58 = vpop.f32.mrf.mxu2  ;;  %v9457_v18 = vpop.f32.mrf.mxu3  ;;  %v10472_v9 = vld [vmem:[#allocation135_spill] sm:$0xff] }
 0x4d6   :  { %4693 = vst.msk [vmem:[%s10094_s3 + $0x54] sm:$0xf] %vm4671_vm1, %v4636_v61  ;;  %v4465_v20 = vmax.f32 %v10459_v41, %v4409_v56  ;;  %v2970_v57 = vpop.f32.mrf.mxu0  ;;  %v4252_v17 = vadd.f32 %v9405_v55, %v3683_v11  ;;  %v6496_v61 = vld [vmem:[%s10092_s0 + $0x760] sm:$0xf0]  ;;  %v10465_v55 = vld [vmem:[#allocation39_spill] sm:$0xff]  ;;  %v3688_v11 = vadd.f32 %v10472_v9, %v10471_v44 }
 0x4d7   :  { %v3539_v24 = vpop.f32.mrf.mxu1  ;;  %v9607_v44 = vld [vmem:[%s10093_s2] ss:$0 sm:$0xff] }
 0x4d8   :  { %v4525_v15 = vadd.f32 %v8992_v21, %v4465_v20  ;;  %v3540_v23 = vadd.f32 %v3539_v24, %v2970_v57  ;;  %v5679_v24 = vor.u32 %v6496_v61, %v5678_v59  ;;  %v6499_v59 = vld [vmem:[%s10092_s0 + $0x778] sm:$0xf0] }
 0x4da   :  { %v4581_v7 = vmax.f32 %v4525_v15, 0.0  ;;  %v4109_v38 = vadd.f32 %v4108_v32, %v3540_v23  ;;  %6225 = vmatmul.msk.bf16.gmra.mxu2 %vm2287_vm0, %v5667_v33  ;;  %v6580_v32 = vld [vmem:[%s10092_s0 + $0xa00] sm:$0xf0]  ;;  %v3685_v15 = vadd.f32 %v8351_v40, %v10468_v47  ;;  %v6491_v40 = vld [vmem:[%s10092_s0 + $0x73c] sm:$0xf] }
 0x4db   :  { %v6015_v1 = vor.u32 %v6580_v32, %v6014_v16 }
 0x4dc   :  { %v4637_v8 = vpack.c.bf16 %v4581_v7, %v4581_v7  ;;  %v4410_v14 = vmax.f32 %v4109_v38, %v4249_v53  ;;  %v5658_v53 = vld [vmem:[%s10092_s0 + $0x738] sm:$0xf]  ;;  %v4254_v7 = vadd.f32 %v9437_v0, %v3685_v15  ;;  %v6026_v0 = vld [vmem:[%s10092_s0 + $0xa10] sm:$0xf] }
 0x4dd   :  { %v4116_v25 = vpop.f32.mrf.mxu2  ;;  %v9489_v6 = vpop.f32.mrf.mxu3 }
 0x4de   :  { %4694 = vst.msk [vmem:[%s10094_s3 + $0x58] sm:$0xf] %vm4671_vm1, %v4637_v8  ;;  %v4466_v28 = vmax.f32 %v10462_v36, %v4410_v14  ;;  %v2973_v19 = vpop.f32.mrf.mxu0  ;;  %v10470_v36 = vmax.f32 %v7354_v35, %v10469_v42  ;;  %v5690_v35 = vld [vmem:[%s10092_s0 + $0x770] sm:$0xf] }
 0x4df   :  { %v3542_v26 = vpop.f32.mrf.mxu1 }
 0x4e0   :  { %v4526_v4 = vadd.f32 %v8992_v21, %v4466_v28  ;;  %v3543_v10 = vadd.f32 %v3542_v26, %v2973_v19 }
 0x4e1   :  { %3012 = vmatmul.bf16.gmra.mxu0 %v5647_v49  ;;  %v5659_v49 = vor.u32 %v6492_v31, %v5658_v53 }
 0x4e2   :  { %v4582_v51 = vmax.f32 %v4526_v4, 0.0  ;;  %v4112_v54 = vadd.f32 %v4111_v39, %v3543_v10  ;;  %3581 = vmatmul.bf16.gmra.mxu1 %v5651_v2  ;;  %6254 = vmatmul.msk.bf16.gmra.mxu3 %vm2287_vm0, %v6015_v1  ;;  %v10466_v39 = vld [vmem:[#allocation131_spill] sm:$0xff]  ;;  %v5663_v2 = vor.u32 %v6491_v40, %v5660_v29 }
 0x4e3   :  { %v10467_v20 = vmax.f32 %v10465_v55, %v10466_v39 }
 0x4e4   :  { %v4638_v56 = vpack.c.bf16 %v4582_v51, %v4582_v51  ;;  %v4411_v52 = vmax.f32 %v4112_v54, %v4252_v17  ;;  %v4257_v17 = vadd.f32 %v9457_v18, %v3688_v11  ;;  %v10473_v18 = vld [vmem:[#allocation42_spill] sm:$0xff] }
 0x4e5   :  { %v4118_v60 = vpop.f32.mrf.mxu2  ;;  %v9509_v41 = vpop.f32.mrf.mxu3 }
 0x4e6   :  { %4695 = vst.msk [vmem:[%s10094_s3 + $0x5c] sm:$0xf] %vm4671_vm1, %v4638_v56  ;;  %v4467_v57 = vmax.f32 %v10467_v20, %v4411_v52  ;;  %v2975_v33 = vpop.f32.mrf.mxu0 }
 0x4e7   :  { %v3544_v37 = vpop.f32.mrf.mxu1 }
 0x4e8   :  { %v4527_v23 = vadd.f32 %v8992_v21, %v4467_v57  ;;  %v3545_v34 = vadd.f32 %v3544_v37, %v2975_v33  ;;  %v5691_v33 = vor.u32 %v6499_v59, %v5690_v35  ;;  %v10476_v37 = vld [vmem:[#allocation44_spill] sm:$0xff] }
 0x4e9   :  { %v3690_v47 = vadd.f32 %v8388_v50, %v10476_v37  ;;  %v6494_v50 = vld [vmem:[%s10092_s0 + $0x754] sm:$0xf] }
 0x4ea   :  { %v4583_v38 = vmax.f32 %v4527_v23, 0.0  ;;  %v4114_v27 = vadd.f32 %v4113_v58, %v3545_v34  ;;  %6226 = vmatmul.msk.bf16.gmra.mxu2 %vm2287_vm0, %v5679_v24  ;;  %v6583_v58 = vld [vmem:[%s10092_s0 + $0xa18] sm:$0xf0]  ;;  %v5670_v34 = vld [vmem:[%s10092_s0 + $0x750] sm:$0xf] }
 0x4eb   :  { %v6027_v1 = vor.u32 %v6583_v58, %v6026_v0  ;;  %v4259_v53 = vadd.f32 %v9489_v6, %v3690_v47  ;;  %v6038_v6 = vld [vmem:[%s10092_s0 + $0xa28] sm:$0xf] }
 0x4ec   :  { %v4639_v16 = vpack.c.bf16 %v4583_v38, %v4583_v38  ;;  %v4412_v32 = vmax.f32 %v4114_v27, %v4254_v7  ;;  %v6495_v27 = vld [vmem:[%s10092_s0 + $0x758] sm:$0xf0]  ;;  %v5682_v47 = vld [vmem:[%s10092_s0 + $0x768] sm:$0xf] }
 0x4ed   :  { %v4121_v8 = vpop.f32.mrf.mxu2  ;;  %v9541_v14 = vpop.f32.mrf.mxu3  ;;  %v5671_v58 = vor.u32 %v6495_v27, %v5670_v34 }
 0x4ee   :  { %4696 = vst.msk [vmem:[%s10094_s3 + $0x60] sm:$0xf] %vm4671_vm1, %v4639_v16  ;;  %v4468_v28 = vmax.f32 %v10470_v36, %v4412_v32  ;;  %v2978_v19 = vpop.f32.mrf.mxu0  ;;  %v10477_v16 = vld [vmem:[#allocation136_spill] sm:$0xff] }
 0x4ef   :  { %v3547_v26 = vpop.f32.mrf.mxu1  ;;  %v10478_v32 = vmax.f32 %v7387_v3, %v10477_v16 }
 0x4f0   :  { %v4528_v4 = vadd.f32 %v8992_v21, %v4468_v28  ;;  %v3548_v10 = vadd.f32 %v3547_v26, %v2978_v19 }
 0x4f1   :  { %3017 = vmatmul.bf16.gmra.mxu0 %v5659_v49 }
 0x4f2   :  { %v4584_v51 = vmax.f32 %v4528_v4, 0.0  ;;  %v4117_v54 = vadd.f32 %v4116_v25, %v3548_v10  ;;  %3586 = vmatmul.bf16.gmra.mxu1 %v5663_v2  ;;  %6255 = vmatmul.msk.bf16.gmra.mxu3 %vm2287_vm0, %v6027_v1  ;;  %v10474_v25 = vld [vmem:[#allocation134_spill] sm:$0xff] }
 0x4f3   :  { %v10475_v39 = vmax.f32 %v10473_v18, %v10474_v25  ;;  %v10479_v2 = vld [vmem:[#allocation46_spill] sm:$0xff] }
 0x4f4   :  { %v4640_v61 = vpack.c.bf16 %v4584_v51, %v4584_v51  ;;  %v4413_v56 = vmax.f32 %v4117_v54, %v4257_v17  ;;  %v10480_v1 = vld [vmem:[#allocation138_spill] sm:$0xff]  ;;  %v5702_v17 = vld [vmem:[%s10092_s0 + $0x788] sm:$0xf]  ;;  %v6502_v51 = vld [vmem:[%s10092_s0 + $0x790] sm:$0xf0] }
 0x4f5   :  { %v4123_v52 = vpop.f32.mrf.mxu2  ;;  %v9561_v55 = vpop.f32.mrf.mxu3  ;;  %v3693_v26 = vadd.f32 %v10480_v1, %v10479_v2 }
 0x4f6   :  { %4697 = vst.msk [vmem:[%s10094_s3 + $0x64] sm:$0xf] %vm4671_vm1, %v4640_v61  ;;  %v4469_v20 = vmax.f32 %v10475_v39, %v4413_v56  ;;  %v2980_v57 = vpop.f32.mrf.mxu0  ;;  %v5703_v39 = vor.u32 %v6502_v51, %v5702_v17 }
 0x4f7   :  { %v3549_v24 = vpop.f32.mrf.mxu1  ;;  %v4262_v4 = vadd.f32 %v9509_v41, %v3693_v26  ;;  %v10481_v41 = vld [vmem:[#allocation45_spill] sm:$0xff] }
 0x4f8   :  { %v4529_v15 = vadd.f32 %v8992_v21, %v4469_v20  ;;  %v3550_v23 = vadd.f32 %v3549_v24, %v2980_v57  ;;  %v5672_v21 = vld [vmem:[%s10092_s0 + $0x75c] sm:$0xf0]  ;;  %v10484_v57 = vld [vmem:[#allocation47_spill] sm:$0xff] }
 0x4f9   :  { %v5675_v36 = vor.u32 %v6494_v50, %v5672_v21 }
 0x4fa   :  { %v4585_v7 = vmax.f32 %v4529_v15, 0.0  ;;  %v4119_v38 = vadd.f32 %v4118_v60, %v3550_v23  ;;  %6227 = vmatmul.msk.bf16.gmra.mxu2 %vm2287_vm0, %v5691_v33  ;;  %v6586_v60 = vld [vmem:[%s10092_s0 + $0xa30] sm:$0xf0]  ;;  %v3695_v33 = vadd.f32 %v8425_v46, %v10484_v57  ;;  %v6497_v46 = vld [vmem:[%s10092_s0 + $0x76c] sm:$0xf] }
 0x4fb   :  { %v6039_v28 = vor.u32 %v6586_v60, %v6038_v6  ;;  %v10485_v60 = vld [vmem:[#allocation139_spill] sm:$0xff] }
 0x4fc   :  { %v4641_v31 = vpack.c.bf16 %v4585_v7, %v4585_v7  ;;  %v4414_v40 = vmax.f32 %v4119_v38, %v4259_v53  ;;  %v4264_v15 = vadd.f32 %v9541_v14, %v3695_v33  ;;  %v6498_v53 = vld [vmem:[%s10092_s0 + $0x770] sm:$0xf0]  ;;  %v5684_v7 = vld [vmem:[%s10092_s0 + $0x774] sm:$0xf0]  ;;  %v6050_v14 = vld [vmem:[%s10092_s0 + $0xa40] sm:$0xf] }
 0x4fd   :  { %v4126_v29 = vpop.f32.mrf.mxu2  ;;  %v9593_v0 = vpop.f32.mrf.mxu3  ;;  %v5683_v6 = vor.u32 %v6498_v53, %v5682_v47  ;;  %v5687_v16 = vor.u32 %v6497_v46, %v5684_v7  ;;  %v5696_v47 = vld [vmem:[%s10092_s0 + $0x78c] sm:$0xf0]  ;;  %v10493_v7 = vld [vmem:[#allocation142_spill] sm:$0xff] }
 0x4fe   :  { %4698 = vst.msk [vmem:[%s10094_s3 + $0x68] sm:$0xf] %vm4671_vm1, %v4641_v31  ;;  %v4470_v49 = vmax.f32 %v10478_v32, %v4414_v40  ;;  %v2983_v42 = vpop.f32.mrf.mxu0  ;;  %v10486_v31 = vmax.f32 %v7420_v62, %v10485_v60  ;;  %v5714_v62 = vld [vmem:[%s10092_s0 + $0x7a0] sm:$0xf] }
 0x4ff   :  { %v3552_v19 = vpop.f32.mrf.mxu1 }
 0x500   :  { %v4530_v9 = vadd.f32 %v9607_v44, %v4470_v49  ;;  %v3553_v11 = vadd.f32 %v3552_v19, %v2983_v42  ;;  %v10487_v42 = vld [vmem:[#allocation49_spill] sm:$0xff] }
 0x501   :  { %3022 = vmatmul.bf16.gmra.mxu0 %v5671_v58 }
 0x502   :  { %v4586_v3 = vmax.f32 %v4530_v9, 0.0  ;;  %v4122_v10 = vadd.f32 %v4121_v8, %v3553_v11  ;;  %3591 = vmatmul.bf16.gmra.mxu1 %v5675_v36  ;;  %6256 = vmatmul.msk.bf16.gmra.mxu3 %vm2287_vm0, %v6039_v28  ;;  %v10482_v8 = vld [vmem:[#allocation137_spill] sm:$0xff]  ;;  %v6505_v11 = vld [vmem:[%s10092_s0 + $0x7a8] sm:$0xf0] }
 0x503   :  { %v10483_v56 = vmax.f32 %v10481_v41, %v10482_v8  ;;  %v10488_v36 = vld [vmem:[#allocation141_spill] sm:$0xff]  ;;  %v5715_v41 = vor.u32 %v6505_v11, %v5714_v62 }
 0x504   :  { %v4642_v54 = vpack.c.bf16 %v4586_v3, %v4586_v3  ;;  %v4415_v35 = vmax.f32 %v4122_v10, %v4262_v4  ;;  %v3698_v28 = vadd.f32 %v10488_v36, %v10487_v42 }
 0x505   :  { %v4128_v59 = vpop.f32.mrf.mxu2  ;;  %v9618_v61 = vpop.f32.mrf.mxu3 }
 0x506   :  { %4699 = vst.msk [vmem:[%s10094_s3 + $0x6c] sm:$0xf] %vm4671_vm1, %v4642_v54  ;;  %v4471_v18 = vmax.f32 %v10483_v56, %v4415_v35  ;;  %v2985_v25 = vpop.f32.mrf.mxu0  ;;  %v4267_v1 = vadd.f32 %v9561_v55, %v3698_v28  ;;  %v10489_v55 = vld [vmem:[#allocation48_spill] sm:$0xff]  ;;  %v10492_v56 = vld [vmem:[#allocation50_spill] sm:$0xff] }
 0x507   :  { %v3554_v20 = vpop.f32.mrf.mxu1  ;;  %v6508_v28 = vld [vmem:[%s10092_s0 + $0x7c0] sm:$0xf0] }
 0x508   :  { %v4531_v24 = vadd.f32 %v9607_v44, %v4471_v18  ;;  %v3555_v37 = vadd.f32 %v3554_v20, %v2985_v25  ;;  %v3700_v18 = vadd.f32 %v8462_v13, %v10492_v56  ;;  %v5694_v20 = vld [vmem:[%s10092_s0 + $0x780] sm:$0xf]  ;;  %v6500_v13 = vld [vmem:[%s10092_s0 + $0x784] sm:$0xf] }
 0x50a   :  { %v4587_v23 = vmax.f32 %v4531_v24, 0.0  ;;  %v4124_v34 = vadd.f32 %v4123_v52, %v3555_v37  ;;  %6228 = vmatmul.msk.bf16.gmra.mxu2 %vm2287_vm0, %v5703_v39  ;;  %v6589_v52 = vld [vmem:[%s10092_s0 + $0xa48] sm:$0xf0]  ;;  %v4269_v57 = vadd.f32 %v9593_v0, %v3700_v18  ;;  %v6062_v0 = vld [vmem:[%s10092_s0 + $0xa58] sm:$0xf] }
 0x50b   :  { %v6051_v32 = vor.u32 %v6589_v52, %v6050_v14  ;;  %v6501_v37 = vld [vmem:[%s10092_s0 + $0x788] sm:$0xf0]  ;;  %v10494_v14 = vmax.f32 %v7453_v5, %v10493_v7  ;;  %v5726_v5 = vld [vmem:[%s10092_s0 + $0x7b8] sm:$0xf]  ;;  %v6504_v18 = vld [vmem:[%s10092_s0 + $0x7a0] sm:$0xf0] }
 0x50c   :  { %v4643_v38 = vpack.c.bf16 %v4587_v23, %v4587_v23  ;;  %v4416_v27 = vmax.f32 %v4124_v34, %v4264_v15  ;;  %v5695_v46 = vor.u32 %v6501_v37, %v5694_v20  ;;  %v10501_v37 = vld [vmem:[#allocation145_spill] sm:$0xff]  ;;  %v10504_v7 = vld [vmem:[#allocation147_spill] sm:$0xff] }
 0x50d   :  { %v4131_v50 = vpop.f32.mrf.mxu2  ;;  %v9650_v21 = vpop.f32.mrf.mxu3 }
 0x50e   :  { %4700 = vst.msk [vmem:[%s10094_s3 + $0x70] sm:$0xf] %vm4671_vm1, %v4643_v38  ;;  %v4472_v40 = vmax.f32 %v10486_v31, %v4416_v27  ;;  %v2988_v58 = vpop.f32.mrf.mxu0  ;;  %v5699_v27 = vor.u32 %v6500_v13, %v5696_v47  ;;  %v10495_v31 = vld [vmem:[#allocation52_spill] sm:$0xff]  ;;  %v10502_v13 = vmax.f32 %v7486_v43, %v10501_v37 }
 0x50f   :  { %v3557_v49 = vpop.f32.mrf.mxu1  ;;  %v5738_v43 = vld [vmem:[%s10092_s0 + $0x7d0] sm:$0xf] }
 0x510   :  { %v4532_v19 = vadd.f32 %v9607_v44, %v4472_v40  ;;  %v3558_v2 = vadd.f32 %v3557_v49, %v2988_v58  ;;  %v10496_v40 = vld [vmem:[#allocation144_spill] sm:$0xff] }
 0x511   :  { %3027 = vmatmul.bf16.gmra.mxu0 %v5683_v6  ;;  %v3703_v58 = vadd.f32 %v10496_v40, %v10495_v31  ;;  %v6511_v31 = vld [vmem:[%s10092_s0 + $0x7d8] sm:$0xf0] }
 0x512   :  { %v4588_v26 = vmax.f32 %v4532_v19, 0.0  ;;  %v4127_v9 = vadd.f32 %v4126_v29, %v3558_v2  ;;  %3596 = vmatmul.bf16.gmra.mxu1 %v5687_v16  ;;  %6257 = vmatmul.msk.bf16.gmra.mxu3 %vm2287_vm0, %v6051_v32  ;;  %v10490_v29 = vld [vmem:[#allocation140_spill] sm:$0xff] }
 0x513   :  { %v10491_v51 = vmax.f32 %v10489_v55, %v10490_v29  ;;  %v4272_v49 = vadd.f32 %v9618_v61, %v3703_v58  ;;  %v10497_v61 = vld [vmem:[#allocation51_spill] sm:$0xff]  ;;  %v10500_v55 = vld [vmem:[#allocation53_spill] sm:$0xff] }
 0x514   :  { %v4644_v4 = vpack.c.bf16 %v4588_v26, %v4588_v26  ;;  %v4417_v3 = vmax.f32 %v4127_v9, %v4267_v1  ;;  %v3705_v29 = vadd.f32 %v8499_v48, %v10500_v55  ;;  %v6503_v48 = vld [vmem:[%s10092_s0 + $0x79c] sm:$0xf] }
 0x515   :  { %v4133_v10 = vpop.f32.mrf.mxu2  ;;  %v9670_v17 = vpop.f32.mrf.mxu3 }
 0x516   :  { %4701 = vst.msk [vmem:[%s10094_s3 + $0x74] sm:$0xf] %vm4671_vm1, %v4644_v4  ;;  %v4473_v54 = vmax.f32 %v10491_v51, %v4417_v3  ;;  %v2990_v35 = vpop.f32.mrf.mxu0  ;;  %v5727_v4 = vor.u32 %v6508_v28, %v5726_v5  ;;  %v5739_v5 = vor.u32 %v6511_v31, %v5738_v43 }
 0x517   :  { %v3559_v8 = vpop.f32.mrf.mxu1 }
 0x518   :  { %v4533_v25 = vadd.f32 %v9607_v44, %v4473_v54  ;;  %v3560_v39 = vadd.f32 %v3559_v8, %v2990_v35  ;;  %v5706_v35 = vld [vmem:[%s10092_s0 + $0x798] sm:$0xf] }
 0x51a   :  { %v4589_v33 = vmax.f32 %v4533_v25, 0.0  ;;  %v4129_v24 = vadd.f32 %v4128_v59, %v3560_v39  ;;  %6229 = vmatmul.msk.bf16.gmra.mxu2 %vm2287_vm0, %v5715_v41  ;;  %v6592_v59 = vld [vmem:[%s10092_s0 + $0xa60] sm:$0xf0]  ;;  %v4274_v41 = vadd.f32 %v9650_v21, %v3705_v29  ;;  %v5708_v25 = vld [vmem:[%s10092_s0 + $0x7a4] sm:$0xf0] }
 0x51b   :  { %v6063_v6 = vor.u32 %v6592_v59, %v6062_v0  ;;  %v6074_v21 = vld [vmem:[%s10092_s0 + $0xa70] sm:$0xf]  ;;  %v5711_v59 = vor.u32 %v6503_v48, %v5708_v25  ;;  %v10511_v25 = vld [vmem:[#allocation58_spill] sm:$0xff] }
 0x51c   :  { %v4645_v15 = vpack.c.bf16 %v4589_v33, %v4589_v33  ;;  %v4418_v23 = vmax.f32 %v4129_v24, %v4269_v57  ;;  %v5707_v24 = vor.u32 %v6504_v18, %v5706_v35  ;;  %v10509_v35 = vld [vmem:[#allocation148_spill] sm:$0xff] }
 0x51d   :  { %v4136_v34 = vpop.f32.mrf.mxu2  ;;  %v9702_v53 = vpop.f32.mrf.mxu3 }
 0x51e   :  { %4702 = vst.msk [vmem:[%s10094_s3 + $0x78] sm:$0xf] %vm4671_vm1, %v4645_v15  ;;  %v4474_v52 = vmax.f32 %v10494_v14, %v4418_v23  ;;  %v2993_v38 = vpop.f32.mrf.mxu0 }
 0x51f   :  { %v3562_v60 = vpop.f32.mrf.mxu1 }
 0x520   :  { %v4534_v16 = vadd.f32 %v9607_v44, %v4474_v52  ;;  %v3563_v32 = vadd.f32 %v3562_v60, %v2993_v38 }
 0x521   :  { %3032 = vmatmul.bf16.gmra.mxu0 %v5695_v46  ;;  %v10503_v46 = vld [vmem:[#allocation55_spill] sm:$0xff] }
 0x522   :  { %v4590_v42 = vmax.f32 %v4534_v16, 0.0  ;;  %v4132_v36 = vadd.f32 %v4131_v50, %v3563_v32  ;;  %3601 = vmatmul.bf16.gmra.mxu1 %v5699_v27  ;;  %6258 = vmatmul.msk.bf16.gmra.mxu3 %vm2287_vm0, %v6063_v6  ;;  %v10498_v50 = vld [vmem:[#allocation143_spill] sm:$0xff]  ;;  %v3708_v14 = vadd.f32 %v10504_v7, %v10503_v46 }
 0x523   :  { %v10499_v9 = vmax.f32 %v10497_v61, %v10498_v50 }
 0x524   :  { %v4646_v19 = vpack.c.bf16 %v4590_v42, %v4590_v42  ;;  %v4419_v2 = vmax.f32 %v4132_v36, %v4272_v49  ;;  %v4277_v27 = vadd.f32 %v9670_v17, %v3708_v14  ;;  %v10505_v17 = vld [vmem:[#allocation54_spill] sm:$0xff] }
 0x525   :  { %v4138_v1 = vpop.f32.mrf.mxu2  ;;  %v9722_v26 = vpop.f32.mrf.mxu3 }
 0x526   :  { %4703 = vst.msk [vmem:[%s10094_s3 + $0x7c] sm:$0xf] %vm4671_vm1, %v4646_v19  ;;  %v4475_v62 = vmax.f32 %v10499_v9, %v4419_v2  ;;  %v2995_v11 = vpop.f32.mrf.mxu0  ;;  %v10508_v19 = vld [vmem:[#allocation56_spill] sm:$0xff] }
 0x527   :  { %v3564_v3 = vpop.f32.mrf.mxu1  ;;  %v3710_v2 = vadd.f32 %v8536_v22, %v10508_v19  ;;  %v6506_v22 = vld [vmem:[%s10092_s0 + $0x7b4] sm:$0xf] }
 0x528   :  { %v4535_v51 = vadd.f32 %v9607_v44, %v4475_v62  ;;  %v3565_v54 = vadd.f32 %v3564_v3, %v2995_v11  ;;  %v6507_v3 = vld [vmem:[%s10092_s0 + $0x7b8] sm:$0xf0] }
 0x529   :  { %v4279_v9 = vadd.f32 %v9702_v53, %v3710_v2  ;;  %v5720_v53 = vld [vmem:[%s10092_s0 + $0x7bc] sm:$0xf0] }
 0x52a   :  { %v4591_v8 = vmax.f32 %v4535_v51, 0.0  ;;  %v4134_v56 = vadd.f32 %v4133_v10, %v3565_v54  ;;  %6230 = vmatmul.msk.bf16.gmra.mxu2 %vm2287_vm0, %v5727_v4  ;;  %v6595_v10 = vld [vmem:[%s10092_s0 + $0xa78] sm:$0xf0]  ;;  %v5718_v4 = vld [vmem:[%s10092_s0 + $0x7b0] sm:$0xf]  ;;  %v5723_v18 = vor.u32 %v6506_v22, %v5720_v53 }
 0x52b   :  { %v6075_v15 = vor.u32 %v6595_v10, %v6074_v21  ;;  %v5719_v54 = vor.u32 %v6507_v3, %v5718_v4  ;;  %v10512_v21 = vld [vmem:[#allocation150_spill] sm:$0xff] }
 0x52c   :  { %v4647_v39 = vpack.c.bf16 %v4591_v8, %v4591_v8  ;;  %v4420_v20 = vmax.f32 %v4134_v56, %v4274_v41  ;;  %v10510_v41 = vmax.f32 %v7519_v12, %v10509_v35  ;;  %v3713_v10 = vadd.f32 %v10512_v21, %v10511_v25  ;;  %v5750_v12 = vld [vmem:[%s10092_s0 + $0x7e8] sm:$0xf] }
 0x52d   :  { %v4141_v57 = vpop.f32.mrf.mxu2  ;;  %v9754_v33 = vpop.f32.mrf.mxu3 }
 0x52e   :  { %4704 = vst.msk [vmem:[%s10094_s3 + $0x80] sm:$0xf] %vm4671_vm1, %v4647_v39  ;;  %v4476_v47 = vmax.f32 %v10502_v13, %v4420_v20  ;;  %v2998_v0 = vpop.f32.mrf.mxu0 }
 0x52f   :  { %v3567_v23 = vpop.f32.mrf.mxu1 }
 0x530   :  { %v4536_v52 = vadd.f32 %v9607_v44, %v4476_v47  ;;  %v3568_v38 = vadd.f32 %v3567_v23, %v2998_v0  ;;  %v6514_v47 = vld [vmem:[%s10092_s0 + $0x7f0] sm:$0xf0] }
 0x531   :  { %3037 = vmatmul.bf16.gmra.mxu0 %v5707_v24  ;;  %v4282_v24 = vadd.f32 %v9722_v26, %v3713_v10  ;;  %v10513_v26 = vld [vmem:[#allocation57_spill] sm:$0xff] }
 0x532   :  { %v4592_v6 = vmax.f32 %v4536_v52, 0.0  ;;  %v4137_v60 = vadd.f32 %v4136_v34, %v3568_v38  ;;  %3606 = vmatmul.bf16.gmra.mxu1 %v5711_v59  ;;  %6259 = vmatmul.msk.bf16.gmra.mxu3 %vm2287_vm0, %v6075_v15  ;;  %v10506_v34 = vld [vmem:[#allocation146_spill] sm:$0xff]  ;;  %v5751_v52 = vor.u32 %v6514_v47, %v5750_v12 }
 0x533   :  { %v10507_v49 = vmax.f32 %v10505_v17, %v10506_v34  ;;  %v5730_v17 = vld [vmem:[%s10092_s0 + $0x7c8] sm:$0xf]  ;;  %v6510_v34 = vld [vmem:[%s10092_s0 + $0x7d0] sm:$0xf0] }
 0x534   :  { %v4648_v40 = vpack.c.bf16 %v4592_v6, %v4592_v6  ;;  %v4421_v58 = vmax.f32 %v4137_v60, %v4277_v27  ;;  %v10516_v27 = vld [vmem:[#allocation59_spill] sm:$0xff] }
 0x535   :  { %v4143_v16 = vpop.f32.mrf.mxu2  ;;  %v9774_v32 = vpop.f32.mrf.mxu3  ;;  %v3715_v6 = vadd.f32 %v8573_v63, %v10516_v27  ;;  %v6509_v63 = vld [vmem:[%s10092_s0 + $0x7cc] sm:$0xf]  ;;  %v10529_v27 = vld [vmem:[#allocation156_spill] sm:$0xff] }
 0x536   :  { %4705 = vst.msk [vmem:[%s10094_s3 + $0x84] sm:$0xf] %vm4671_vm1, %v4648_v40  ;;  %v4477_v42 = vmax.f32 %v10507_v49, %v4421_v58  ;;  %v3000_v36 = vpop.f32.mrf.mxu0 }
 0x537   :  { %v3569_v28 = vpop.f32.mrf.mxu1  ;;  %v4284_v31 = vadd.f32 %v9754_v33, %v3715_v6  ;;  %v5732_v33 = vld [vmem:[%s10092_s0 + $0x7d4] sm:$0xf0] }
 0x538   :  { %v4537_v61 = vadd.f32 %v9607_v44, %v4477_v42  ;;  %v3570_v50 = vadd.f32 %v3569_v28, %v3000_v36  ;;  %v10517_v28 = vld [vmem:[#allocation151_spill] sm:$0xff] }
 0x539   :  { %v10518_v19 = vmax.f32 %v7552_v30, %v10517_v28  ;;  %v5762_v30 = vld [vmem:[%s10092_s0 + $0x800] sm:$0xf] }
 0x53a   :  { %v4593_v62 = vmax.f32 %v4537_v61, 0.0  ;;  %v4139_v11 = vadd.f32 %v4138_v1, %v3570_v50  ;;  %6231 = vmatmul.msk.bf16.gmra.mxu2 %vm2287_vm0, %v5739_v5  ;;  %v5731_v5 = vor.u32 %v6510_v34, %v5730_v17  ;;  %v5735_v50 = vor.u32 %v6509_v63, %v5732_v33  ;;  %v10530_v63 = vld [vmem:[#allocation64_spill] sm:$0xff]  ;;  %v10531_v33 = vld [vmem:[#allocation155_spill] sm:$0xff] }
 0x53c   :  { %v4649_v55 = vpack.c.bf16 %v4593_v62, %v4593_v62  ;;  %v4422_v1 = vmax.f32 %v4139_v11, %v4279_v9  ;;  %v10519_v62 = vld [vmem:[#allocation61_spill] sm:$0xff] }
 0x53d   :  { %v4146_v29 = vpop.f32.mrf.mxu2  ;;  %v9800_v51 = vpop.f32.mrf.mxu3  ;;  %v10520_v11 = vld [vmem:[#allocation153_spill] sm:$0xff] }
 0x53e   :  { %4706 = vst.msk [vmem:[%s10094_s3 + $0x88] sm:$0xf] %vm4671_vm1, %v4649_v55  ;;  %v4478_v8 = vmax.f32 %v10510_v41, %v4422_v1  ;;  %v3003_v56 = vpop.f32.mrf.mxu0  ;;  %v3718_v4 = vadd.f32 %v10520_v11, %v10519_v62 }
 0x53f   :  { %v3572_v48 = vpop.f32.mrf.mxu1 }
 0x540   :  { %v4538_v39 = vadd.f32 %v9607_v44, %v4478_v8  ;;  %v3573_v20 = vadd.f32 %v3572_v48, %v3003_v56  ;;  %v4287_v53 = vadd.f32 %v9774_v32, %v3718_v4  ;;  %v10521_v32 = vld [vmem:[#allocation60_spill] sm:$0xff] }
 0x541   :  { %3042 = vmatmul.bf16.gmra.mxu0 %v5719_v54  ;;  %v6517_v54 = vld [vmem:[%s10092_s0 + $0x808] sm:$0xf0] }
 0x542   :  { %v4594_v37 = vmax.f32 %v4538_v39, 0.0  ;;  %v4142_v13 = vadd.f32 %v4141_v57, %v3573_v20  ;;  %3611 = vmatmul.bf16.gmra.mxu1 %v5723_v18  ;;  %v10514_v57 = vld [vmem:[#allocation149_spill] sm:$0xff]  ;;  %v5763_v21 = vor.u32 %v6517_v54, %v5762_v30  ;;  %v10524_v39 = vld [vmem:[#allocation63_spill] sm:$0xff] }
 0x543   :  { %v10515_v46 = vmax.f32 %v10513_v26, %v10514_v57  ;;  %v3720_v20 = vadd.f32 %v8610_v45, %v10524_v39  ;;  %v10525_v57 = vld [vmem:[#allocation62_spill] sm:$0xff] }
 0x544   :  { %v4650_v0 = vpack.c.bf16 %v4594_v37, %v4594_v37  ;;  %v4423_v59 = vmax.f32 %v4142_v13, %v4282_v24 }
 0x545   :  { %v4148_v15 = vpop.f32.mrf.mxu2  ;;  %v9819_v23 = vpop.f32.mrf.mxu3  ;;  %v4289_v13 = vadd.f32 %v9800_v51, %v3720_v20  ;;  %v10528_v51 = vld [vmem:[#allocation65_spill] sm:$0xff] }
 0x546   :  { %4707 = vst.msk [vmem:[%s10094_s3 + $0x8c] sm:$0xf] %vm4671_vm1, %v4650_v0  ;;  %v4479_v7 = vmax.f32 %v10515_v46, %v4423_v59  ;;  %v3005_v14 = vpop.f32.mrf.mxu0  ;;  %v10526_v46 = vld [vmem:[#allocation154_spill] sm:$0xff] }
 0x547   :  { %v3574_v38 = vpop.f32.mrf.mxu1  ;;  %v10527_v45 = vmax.f32 %v10525_v57, %v10526_v46  ;;  %v10544_v57 = vld [vmem:[#allocation162_spill] sm:$0xff] }
 0x548   :  { %v4539_v60 = vadd.f32 %v9607_v44, %v4479_v7  ;;  %v3575_v43 = vadd.f32 %v3574_v38, %v3005_v14 }
 0x54a   :  { %v4595_v40 = vmax.f32 %v4539_v60, 0.0  ;;  %v4144_v58 = vadd.f32 %v4143_v16, %v3575_v43  ;;  %6232 = vmatmul.msk.bf16.gmra.mxu2 %vm2287_vm0, %v5751_v52 }
 0x54c   :  { %v4651_v49 = vpack.c.bf16 %v4595_v40, %v4595_v40  ;;  %v4424_v16 = vmax.f32 %v4144_v58, %v4284_v31 }
 0x54d   :  { %v4151_v42 = vpop.f32.mrf.mxu2  ;;  %v4293_v36 = vpop.f32.mrf.mxu3 }
 0x54e   :  { %4708 = vst.msk [vmem:[%s10094_s3 + $0x90] sm:$0xf] %vm4671_vm1, %v4651_v49  ;;  %v4480_v2 = vmax.f32 %v10518_v19, %v4424_v16  ;;  %v3008_v61 = vpop.f32.mrf.mxu0  ;;  %v10532_v49 = vmax.f32 %v10530_v63, %v10531_v33  ;;  %v10533_v19 = vld [vmem:[#allocation67_spill] sm:$0xff]  ;;  %v10549_v63 = vld [vmem:[#allocation164_spill] sm:$0xff] }
 0x54f   :  { %v3577_v9 = vpop.f32.mrf.mxu1 }
 0x550   :  { %v4540_v3 = vadd.f32 %v9607_v44, %v4480_v2  ;;  %v3578_v22 = vadd.f32 %v3577_v9, %v3008_v61  ;;  %v10534_v2 = vld [vmem:[#allocation158_spill] sm:$0xff] }
 0x551   :  { %3047 = vmatmul.bf16.gmra.mxu0 %v5731_v5  ;;  %v3725_v61 = vadd.f32 %v10534_v2, %v10533_v19 }
 0x552   :  { %v4596_v55 = vmax.f32 %v4540_v3, 0.0  ;;  %v4147_v1 = vadd.f32 %v4146_v29, %v3578_v22  ;;  %3616 = vmatmul.bf16.gmra.mxu1 %v5735_v50  ;;  %v10522_v29 = vld [vmem:[#allocation152_spill] sm:$0xff] }
 0x553   :  { %v10523_v18 = vmax.f32 %v10521_v32, %v10522_v29  ;;  %v4294_v9 = vadd.f32 %v4293_v36, %v3725_v61  ;;  %v10539_v32 = vld [vmem:[#allocation160_spill] sm:$0xff] }
 0x554   :  { %v4652_v35 = vpack.c.bf16 %v4596_v55, %v4596_v55  ;;  %v4425_v41 = vmax.f32 %v4147_v1, %v4287_v53  ;;  %v10535_v53 = vld [vmem:[#allocation66_spill] sm:$0xff]  ;;  %v10536_v55 = vld [vmem:[#allocation157_spill] sm:$0xff]  ;;  %v10550_v61 = vld [vmem:[#allocation72_spill] sm:$0xff] }
 0x555   :  { %v4153_v8 = vpop.f32.mrf.mxu2  ;;  %v4296_v56 = vpop.f32.mrf.mxu3  ;;  %v10537_v1 = vmax.f32 %v10535_v53, %v10536_v55  ;;  %v10554_v53 = vld [vmem:[#allocation166_spill] sm:$0xff] }
 0x556   :  { %4709 = vst.msk [vmem:[%s10094_s3 + $0x94] sm:$0xf] %vm4671_vm1, %v4652_v35  ;;  %v4481_v48 = vmax.f32 %v10523_v18, %v4425_v41  ;;  %v3010_v25 = vpop.f32.mrf.mxu0  ;;  %v10538_v41 = vld [vmem:[#allocation69_spill] sm:$0xff] }
 0x557   :  { %v3579_v10 = vpop.f32.mrf.mxu1  ;;  %v3728_v29 = vadd.f32 %v10539_v32, %v10538_v41 }
 0x558   :  { %v4541_v24 = vadd.f32 %v9607_v44, %v4481_v48  ;;  %v3580_v37 = vadd.f32 %v3579_v10, %v3010_v25 }
 0x559   :  { %v4297_v18 = vadd.f32 %v4296_v56, %v3728_v29  ;;  %v10555_v29 = vld [vmem:[#allocation74_spill] sm:$0xff] }
 0x55a   :  { %v4597_v12 = vmax.f32 %v4541_v24, 0.0  ;;  %v4149_v47 = vadd.f32 %v4148_v15, %v3580_v37  ;;  %6233 = vmatmul.msk.bf16.gmra.mxu2 %vm2287_vm0, %v5763_v21  ;;  %v3723_v15 = vadd.f32 %v10529_v27, %v10528_v51  ;;  %v10540_v24 = vld [vmem:[#allocation68_spill] sm:$0xff]  ;;  %v10541_v37 = vld [vmem:[#allocation159_spill] sm:$0xff] }
 0x55c   :  { %v4653_v0 = vpack.c.bf16 %v4597_v12, %v4597_v12  ;;  %v4426_v59 = vmax.f32 %v4149_v47, %v4289_v13  ;;  %v4292_v43 = vadd.f32 %v9819_v23, %v3723_v15  ;;  %v10542_v13 = vmax.f32 %v10540_v24, %v10541_v37 }
 0x55d   :  { %v4156_v26 = vpop.f32.mrf.mxu2  ;;  %v4298_v52 = vpop.f32.mrf.mxu3 }
 0x55e   :  { %4710 = vst.msk [vmem:[%s10094_s3 + $0x98] sm:$0xf] %vm4671_vm1, %v4653_v0  ;;  %v4482_v7 = vmax.f32 %v10527_v45, %v4426_v59  ;;  %v3013_v14 = vpop.f32.mrf.mxu0  ;;  %v10543_v59 = vld [vmem:[#allocation71_spill] sm:$0xff] }
 0x55f   :  { %v3582_v38 = vpop.f32.mrf.mxu1  ;;  %v3730_v56 = vadd.f32 %v10544_v57, %v10543_v59 }
 0x560   :  { %v4542_v6 = vadd.f32 %v9607_v44, %v4482_v7  ;;  %v3583_v60 = vadd.f32 %v3582_v38, %v3013_v14 }
 0x561   :  { %v4299_v45 = vadd.f32 %v4298_v52, %v3730_v56  ;;  %v10560_v56 = vld [vmem:[#allocation76_spill] sm:$0xff] }
 0x562   :  { %v4598_v31 = vmax.f32 %v4542_v6, 0.0  ;;  %v4152_v40 = vadd.f32 %v4151_v42, %v3583_v60  ;;  %v10545_v6 = vld [vmem:[#allocation70_spill] sm:$0xff]  ;;  %v10546_v60 = vld [vmem:[#allocation161_spill] sm:$0xff] }
 0x564   :  { %v4654_v58 = vpack.c.bf16 %v4598_v31, %v4598_v31  ;;  %v4427_v17 = vmax.f32 %v4152_v40, %v4292_v43  ;;  %v10547_v43 = vmax.f32 %v10545_v6, %v10546_v60 }
 0x565   :  { %v4158_v34 = vpop.f32.mrf.mxu2  ;;  %v4301_v50 = vpop.f32.mrf.mxu3 }
 0x566   :  { %4711 = vst.msk [vmem:[%s10094_s3 + $0x9c] sm:$0xf] %vm4671_vm1, %v4654_v58  ;;  %v4483_v16 = vmax.f32 %v10532_v49, %v4427_v17  ;;  %v3015_v5 = vpop.f32.mrf.mxu0  ;;  %v10548_v17 = vld [vmem:[#allocation73_spill] sm:$0xff] }
 0x567   :  { %v3584_v28 = vpop.f32.mrf.mxu1  ;;  %v3733_v52 = vadd.f32 %v10549_v63, %v10548_v17 }
 0x568   :  { %v4543_v23 = vadd.f32 %v9607_v44, %v4483_v16  ;;  %v3585_v42 = vadd.f32 %v3584_v28, %v3015_v5 }
 0x569   :  { %v4302_v49 = vadd.f32 %v4301_v50, %v3733_v52  ;;  %v10565_v52 = vld [vmem:[#allocation78_spill] sm:$0xff] }
 0x56a   :  { %v4599_v62 = vmax.f32 %v4543_v23, 0.0  ;;  %v4154_v11 = vadd.f32 %v4153_v8, %v3585_v42  ;;  %v10551_v23 = vld [vmem:[#allocation163_spill] sm:$0xff] }
 0x56b   :  { %v10552_v42 = vmax.f32 %v10550_v61, %v10551_v23 }
 0x56c   :  { %v4655_v4 = vpack.c.bf16 %v4599_v62, %v4599_v62  ;;  %v4428_v3 = vmax.f32 %v4154_v11, %v4294_v9 }
 0x56d   :  { %v4161_v22 = vpop.f32.mrf.mxu2  ;;  %v4303_v21 = vpop.f32.mrf.mxu3 }
 0x56e   :  { %4712 = vst.msk [vmem:[%s10094_s3 + $0xa0] sm:$0xf] %vm4671_vm1, %v4655_v4  ;;  %v4484_v30 = vmax.f32 %v10537_v1, %v4428_v3  ;;  %v3018_v54 = vpop.f32.mrf.mxu0  ;;  %v10553_v3 = vld [vmem:[#allocation75_spill] sm:$0xff] }
 0x56f   :  { %v3587_v35 = vpop.f32.mrf.mxu1  ;;  %v3735_v50 = vadd.f32 %v10554_v53, %v10553_v3 }
 0x570   :  { %v4544_v36 = vadd.f32 %v9607_v44, %v4484_v30  ;;  %v3588_v8 = vadd.f32 %v3587_v35, %v3018_v54 }
 0x571   :  { %v4304_v1 = vadd.f32 %v4303_v21, %v3735_v50  ;;  %v10570_v50 = vld [vmem:[#allocation80_spill] sm:$0xff] }
 0x572   :  { %v4600_v48 = vmax.f32 %v4544_v36, 0.0  ;;  %v4157_v25 = vadd.f32 %v4156_v26, %v3588_v8  ;;  %v10556_v36 = vld [vmem:[#allocation165_spill] sm:$0xff] }
 0x573   :  { %v10557_v8 = vmax.f32 %v10555_v29, %v10556_v36 }
 0x574   :  { %v4656_v10 = vpack.c.bf16 %v4600_v48, %v4600_v48  ;;  %v4429_v39 = vmax.f32 %v4157_v25, %v4297_v18 }
 0x575   :  { %v4163_v20 = vpop.f32.mrf.mxu2  ;;  %v4306_v27 = vpop.f32.mrf.mxu3 }
 0x576   :  { %4713 = vst.msk [vmem:[%s10094_s3 + $0xa4] sm:$0xf] %vm4671_vm1, %v4656_v10  ;;  %v4485_v12 = vmax.f32 %v10542_v13, %v4429_v39  ;;  %v3020_v47 = vpop.f32.mrf.mxu0  ;;  %v10558_v10 = vld [vmem:[#allocation77_spill] sm:$0xff]  ;;  %v10559_v39 = vld [vmem:[#allocation168_spill] sm:$0xff] }
 0x577   :  { %v3589_v0 = vpop.f32.mrf.mxu1  ;;  %v3738_v24 = vadd.f32 %v10559_v39, %v10558_v10 }
 0x578   :  { %v4545_v26 = vadd.f32 %v9607_v44, %v4485_v12  ;;  %v3590_v46 = vadd.f32 %v3589_v0, %v3020_v47 }
 0x579   :  { %v4307_v13 = vadd.f32 %v4306_v27, %v3738_v24  ;;  %v10575_v24 = vld [vmem:[#allocation82_spill] sm:$0xff] }
 0x57a   :  { %v4601_v7 = vmax.f32 %v4545_v26, 0.0  ;;  %v4159_v14 = vadd.f32 %v4158_v34, %v3590_v46  ;;  %v10561_v26 = vld [vmem:[#allocation167_spill] sm:$0xff] }
 0x57b   :  { %v10562_v46 = vmax.f32 %v10560_v56, %v10561_v26 }
 0x57c   :  { %v4657_v38 = vpack.c.bf16 %v4601_v7, %v4601_v7  ;;  %v4430_v51 = vmax.f32 %v4159_v14, %v4299_v45 }
 0x57d   :  { %v4166_v15 = vpop.f32.mrf.mxu2  ;;  %v4308_v11 = vpop.f32.mrf.mxu3 }
 0x57e   :  { %4714 = vst.msk [vmem:[%s10094_s3 + $0xa8] sm:$0xf] %vm4671_vm1, %v4657_v38  ;;  %v4486_v31 = vmax.f32 %v10547_v43, %v4430_v51  ;;  %v3023_v40 = vpop.f32.mrf.mxu0  ;;  %v10563_v38 = vld [vmem:[#allocation79_spill] sm:$0xff]  ;;  %v10564_v51 = vld [vmem:[#allocation170_spill] sm:$0xff] }
 0x57f   :  { %v3592_v58 = vpop.f32.mrf.mxu1  ;;  %v3740_v6 = vadd.f32 %v10564_v51, %v10563_v38 }
 0x580   :  { %v4546_v34 = vadd.f32 %v9607_v44, %v4486_v31  ;;  %v3593_v33 = vadd.f32 %v3592_v58, %v3023_v40 }
 0x581   :  { %v4309_v60 = vadd.f32 %v4308_v11, %v3740_v6  ;;  %v10580_v6 = vld [vmem:[#allocation84_spill] sm:$0xff] }
 0x582   :  { %v4602_v16 = vmax.f32 %v4546_v34, 0.0  ;;  %v4162_v5 = vadd.f32 %v4161_v22, %v3593_v33  ;;  %v10566_v34 = vld [vmem:[#allocation169_spill] sm:$0xff] }
 0x583   :  { %v10567_v33 = vmax.f32 %v10565_v52, %v10566_v34 }
 0x584   :  { %v4658_v28 = vpack.c.bf16 %v4602_v16, %v4602_v16  ;;  %v4431_v19 = vmax.f32 %v4162_v5, %v4302_v49 }
 0x585   :  { %v4168_v2 = vpop.f32.mrf.mxu2  ;;  %v4311_v37 = vpop.f32.mrf.mxu3 }
 0x586   :  { %4715 = vst.msk [vmem:[%s10094_s3 + $0xac] sm:$0xf] %vm4671_vm1, %v4658_v28  ;;  %v4487_v9 = vmax.f32 %v10552_v42, %v4431_v19  ;;  %v3025_v62 = vpop.f32.mrf.mxu0  ;;  %v10568_v28 = vld [vmem:[#allocation81_spill] sm:$0xff]  ;;  %v10569_v19 = vld [vmem:[#allocation172_spill] sm:$0xff] }
 0x587   :  { %v3594_v4 = vpop.f32.mrf.mxu1  ;;  %v3743_v61 = vadd.f32 %v10569_v19, %v10568_v28 }
 0x588   :  { %v4547_v22 = vadd.f32 %v9607_v44, %v4487_v9  ;;  %v3595_v55 = vadd.f32 %v3594_v4, %v3025_v62 }
 0x589   :  { %v4312_v42 = vadd.f32 %v4311_v37, %v3743_v61  ;;  %v10585_v61 = vld [vmem:[#allocation86_spill] sm:$0xff] }
 0x58a   :  { %v4603_v30 = vmax.f32 %v4547_v22, 0.0  ;;  %v4164_v54 = vadd.f32 %v4163_v20, %v3595_v55  ;;  %v10571_v22 = vld [vmem:[#allocation171_spill] sm:$0xff] }
 0x58b   :  { %v10572_v55 = vmax.f32 %v10570_v50, %v10571_v22 }
 0x58c   :  { %v4659_v35 = vpack.c.bf16 %v4603_v30, %v4603_v30  ;;  %v4432_v41 = vmax.f32 %v4164_v54, %v4304_v1 }
 0x58d   :  { %v4171_v32 = vpop.f32.mrf.mxu2  ;;  %v4313_v40 = vpop.f32.mrf.mxu3 }
 0x58e   :  { %4716 = vst.msk [vmem:[%s10094_s3 + $0xb0] sm:$0xf] %vm4671_vm1, %v4659_v35  ;;  %v4488_v18 = vmax.f32 %v10557_v8, %v4432_v41  ;;  %v3028_v48 = vpop.f32.mrf.mxu0  ;;  %v10573_v35 = vld [vmem:[#allocation83_spill] sm:$0xff]  ;;  %v10574_v41 = vld [vmem:[#allocation174_spill] sm:$0xff] }
 0x58f   :  { %v3597_v25 = vpop.f32.mrf.mxu1  ;;  %v3745_v29 = vadd.f32 %v10574_v41, %v10573_v35 }
 0x590   :  { %v4548_v21 = vadd.f32 %v9607_v44, %v4488_v18  ;;  %v3598_v20 = vadd.f32 %v3597_v25, %v3028_v48 }
 0x591   :  { %v4314_v8 = vadd.f32 %v4313_v40, %v3745_v29  ;;  %v10583_v40 = vld [vmem:[#allocation87_spill] sm:$0xff]  ;;  %v10590_v29 = vld [vmem:[#allocation88_spill] sm:$0xff] }
 0x592   :  { %v4604_v12 = vmax.f32 %v4548_v21, 0.0  ;;  %v4167_v47 = vadd.f32 %v4166_v15, %v3598_v20  ;;  %v10576_v21 = vld [vmem:[#allocation173_spill] sm:$0xff] }
 0x593   :  { %v10577_v20 = vmax.f32 %v10575_v24, %v10576_v21 }
 0x594   :  { %v4660_v0 = vpack.c.bf16 %v4604_v12, %v4604_v12  ;;  %v4433_v59 = vmax.f32 %v4167_v47, %v4307_v13 }
 0x595   :  { %v4173_v57 = vpop.f32.mrf.mxu2  ;;  %v4316_v3 = vpop.f32.mrf.mxu3 }
 0x596   :  { %4717 = vst.msk [vmem:[%s10094_s3 + $0xb4] sm:$0xf] %vm4671_vm1, %v4660_v0  ;;  %v4489_v45 = vmax.f32 %v10562_v46, %v4433_v59  ;;  %v3030_v7 = vpop.f32.mrf.mxu0  ;;  %v10578_v0 = vld [vmem:[#allocation85_spill] sm:$0xff]  ;;  %v10579_v59 = vld [vmem:[#allocation176_spill] sm:$0xff] }
 0x597   :  { %v3599_v14 = vpop.f32.mrf.mxu1  ;;  %v3748_v56 = vadd.f32 %v10579_v59, %v10578_v0 }
 0x598   :  { %v4549_v27 = vadd.f32 %v9607_v44, %v4489_v45  ;;  %v3600_v15 = vadd.f32 %v3599_v14, %v3030_v7 }
 0x599   :  { %v4317_v46 = vadd.f32 %v4316_v3, %v3748_v56 }
 0x59a   :  { %v4605_v43 = vmax.f32 %v4549_v27, 0.0  ;;  %v4169_v31 = vadd.f32 %v4168_v2, %v3600_v15  ;;  %v10581_v27 = vld [vmem:[#allocation175_spill] sm:$0xff] }
 0x59b   :  { %v10582_v15 = vmax.f32 %v10580_v6, %v10581_v27 }
 0x59c   :  { %v4661_v58 = vpack.c.bf16 %v4605_v43, %v4605_v43  ;;  %v4434_v17 = vmax.f32 %v4169_v31, %v4309_v60 }
 0x59d   :  { %v4176_v63 = vpop.f32.mrf.mxu2  ;;  %v4318_v12 = vpop.f32.mrf.mxu3 }
 0x59e   :  { %4718 = vst.msk [vmem:[%s10094_s3 + $0xb8] sm:$0xf] %vm4671_vm1, %v4661_v58  ;;  %v4490_v49 = vmax.f32 %v10567_v33, %v4434_v17  ;;  %v3033_v16 = vpop.f32.mrf.mxu0  ;;  %v10584_v58 = vld [vmem:[#allocation178_spill] sm:$0xff] }
 0x59f   :  { %v3602_v5 = vpop.f32.mrf.mxu1  ;;  %v3750_v17 = vadd.f32 %v10584_v58, %v10583_v40 }
 0x5a0   :  { %v4550_v2 = vadd.f32 %v9607_v44, %v4490_v49  ;;  %v3603_v23 = vadd.f32 %v3602_v5, %v3033_v16 }
 0x5a1   :  { %v4319_v33 = vadd.f32 %v4318_v12, %v3750_v17  ;;  %v10595_v12 = vld [vmem:[#allocation3_spill] sm:$0xff] }
 0x5a2   :  { %v4606_v9 = vmax.f32 %v4550_v2, 0.0  ;;  %v4172_v62 = vadd.f32 %v4171_v32, %v3603_v23  ;;  %v10586_v2 = vld [vmem:[#allocation177_spill] sm:$0xff] }
 0x5a3   :  { %v10587_v23 = vmax.f32 %v10585_v61, %v10586_v2 }
 0x5a4   :  { %v4662_v11 = vpack.c.bf16 %v4606_v9, %v4606_v9  ;;  %v4435_v4 = vmax.f32 %v4172_v62, %v4312_v42 }
 0x5a5   :  { %v4178_v53 = vpop.f32.mrf.mxu2  ;;  %v4321_v34 = vpop.f32.mrf.mxu3 }
 0x5a6   :  { %4719 = vst.msk [vmem:[%s10094_s3 + $0xbc] sm:$0xf] %vm4671_vm1, %v4662_v11  ;;  %v4491_v1 = vmax.f32 %v10572_v55, %v4435_v4  ;;  %v3035_v30 = vpop.f32.mrf.mxu0  ;;  %v10588_v11 = vld [vmem:[#allocation89_spill] sm:$0xff]  ;;  %v10589_v4 = vld [vmem:[#allocation180_spill] sm:$0xff] }
 0x5a7   :  { %v3604_v54 = vpop.f32.mrf.mxu1  ;;  %v3753_v3 = vadd.f32 %v10589_v4, %v10588_v11  ;;  %v10608_v11 = vld [vmem:[#allocation92_spill] sm:$0xff]  ;;  %v10609_v4 = vld [vmem:[#allocation183_spill] sm:$0xff] }
 0x5a8   :  { %v4551_v32 = vadd.f32 %v9607_v44, %v4491_v1  ;;  %v3605_v36 = vadd.f32 %v3604_v54, %v3035_v30 }
 0x5a9   :  { %v4322_v22 = vadd.f32 %v4321_v34, %v3753_v3  ;;  %v10604_v34 = vld [vmem:[#allocation96_spill] sm:$0xff]  ;;  %v10610_v3 = vmax.f32 %v10608_v11, %v10609_v4 }
 0x5aa   :  { %v4607_v18 = vmax.f32 %v4551_v32, 0.0  ;;  %v4174_v48 = vadd.f32 %v4173_v57, %v3605_v36  ;;  %v10591_v32 = vld [vmem:[#allocation179_spill] sm:$0xff] }
 0x5ab   :  { %v10592_v36 = vmax.f32 %v10590_v29, %v10591_v32  ;;  %v10613_v32 = vld [vmem:[#allocation188_spill] sm:$0xff] }
 0x5ac   :  { %v4663_v25 = vpack.c.bf16 %v4607_v18, %v4607_v18  ;;  %v4436_v10 = vmax.f32 %v4174_v48, %v4314_v8 }
 0x5ad   :  { %v4181_v39 = vpop.f32.mrf.mxu2  ;;  %v4323_v30 = vpop.f32.mrf.mxu3 }
 0x5ae   :  { %4720 = vst.msk [vmem:[%s10094_s3 + $0xc0] sm:$0xf] %vm4671_vm1, %v4663_v25  ;;  %v4492_v37 = vmax.f32 %v10577_v20, %v4436_v10  ;;  %v3038_v13 = vpop.f32.mrf.mxu0  ;;  %v10593_v25 = vld [vmem:[#allocation91_spill] sm:$0xff]  ;;  %v10594_v10 = vld [vmem:[#allocation182_spill] sm:$0xff] }
 0x5af   :  { %v3607_v47 = vpop.f32.mrf.mxu1  ;;  %v3755_v24 = vadd.f32 %v10594_v10, %v10593_v25  ;;  %v10614_v25 = vld [vmem:[#allocation4_spill] sm:$0xff]  ;;  %v10615_v10 = vld [vmem:[#allocation98_spill] sm:$0xff] }
 0x5b0   :  { %v4552_v57 = vadd.f32 %v9607_v44, %v4492_v37  ;;  %v3608_v26 = vadd.f32 %v3607_v47, %v3038_v13  ;;  %v10596_v47 = vld [vmem:[#allocation97_spill] sm:$0xff] }
 0x5b1   :  { %v4324_v20 = vadd.f32 %v4323_v30, %v3755_v24  ;;  %v3623_v0 = vadd.f32 %v10596_v47, %v10595_v12  ;;  %v10616_v24 = vmax.f32 %v10614_v25, %v10615_v10 }
 0x5b2   :  { %v4608_v45 = vmax.f32 %v4552_v57, 0.0  ;;  %v4177_v7 = vadd.f32 %v4176_v63, %v3608_v26 }
 0x5b4   :  { %v4664_v14 = vpack.c.bf16 %v4608_v45, %v4608_v45  ;;  %v4437_v38 = vmax.f32 %v4177_v7, %v4317_v46  ;;  %v10597_v46 = vld [vmem:[#allocation90_spill] sm:$0xff]  ;;  %v10598_v45 = vld [vmem:[#allocation181_spill] sm:$0xff] }
 0x5b5   :  { %v4183_v51 = vpop.f32.mrf.mxu2  ;;  %v4326_v57 = vpop.f32.mrf.mxu3  ;;  %v10599_v7 = vmax.f32 %v10597_v46, %v10598_v45 }
 0x5b6   :  { %4721 = vst.msk [vmem:[%s10094_s3 + $0xc4] sm:$0xf] %vm4671_vm1, %v4664_v14  ;;  %v4493_v60 = vmax.f32 %v10582_v15, %v4437_v38  ;;  %v3040_v43 = vpop.f32.mrf.mxu0  ;;  %v10601_v15 = vld [vmem:[#allocation184_spill] sm:$0xff] }
 0x5b7   :  { %v3609_v31 = vpop.f32.mrf.mxu1 }
 0x5b8   :  { %v4553_v52 = vadd.f32 %v9607_v44, %v4493_v60  ;;  %v3610_v63 = vadd.f32 %v3609_v31, %v3040_v43  ;;  %v10602_v31 = vld [vmem:[#allocation187_spill] sm:$0xff] }
 0x5ba   :  { %v4609_v49 = vmax.f32 %v4553_v52, 0.0  ;;  %v4179_v16 = vadd.f32 %v4178_v53, %v3610_v63  ;;  %v10603_v63 = vld [vmem:[#allocation2_spill] sm:$0xff] }
 0x5bc   :  { %v4665_v5 = vpack.c.bf16 %v4609_v49, %v4609_v49  ;;  %v4438_v28 = vmax.f32 %v4179_v16, %v4319_v33  ;;  %v10605_v33 = vmax.f32 %v10603_v63, %v10604_v34 }
 0x5bd   :  { %v4186_v19 = vpop.f32.mrf.mxu2  ;;  %v4328_v30 = vpop.f32.mrf.mxu3 }
 0x5be   :  { %4722 = vst.msk [vmem:[%s10094_s3 + $0xc8] sm:$0xf] %vm4671_vm1, %v4665_v5  ;;  %v4494_v42 = vmax.f32 %v10587_v23, %v4438_v28  ;;  %v3043_v9 = vpop.f32.mrf.mxu0  ;;  %v10606_v5 = vld [vmem:[#allocation5_spill] sm:$0xff]  ;;  %v10607_v28 = vld [vmem:[#allocation99_spill] sm:$0xff] }
 0x5bf   :  { %v3612_v62 = vpop.f32.mrf.mxu1  ;;  %v3625_v61 = vadd.f32 %v10607_v28, %v10606_v5  ;;  %v10629_v28 = vld [vmem:[#allocation8_spill] sm:$0xff] }
 0x5c0   :  { %v4554_v50 = vadd.f32 %v9607_v44, %v4494_v42  ;;  %v3613_v53 = vadd.f32 %v3612_v62, %v3043_v9 }
 0x5c2   :  { %v4610_v55 = vmax.f32 %v4554_v50, 0.0  ;;  %v4182_v1 = vadd.f32 %v4181_v39, %v3613_v53 }
 0x5c4   :  { %v4666_v54 = vpack.c.bf16 %v4610_v55, %v4610_v55  ;;  %v4439_v35 = vmax.f32 %v4182_v1, %v4322_v22  ;;  %v10611_v22 = vld [vmem:[#allocation95_spill] sm:$0xff]  ;;  %v10612_v55 = vld [vmem:[#allocation186_spill] sm:$0xff] }
 0x5c5   :  { %v4188_v41 = vpop.f32.mrf.mxu2  ;;  %v3760_v1 = vadd.f32 %v10612_v55, %v10611_v22 }
 0x5c6   :  { %4723 = vst.msk [vmem:[%s10094_s3 + $0xcc] sm:$0xf] %vm4671_vm1, %v4666_v54  ;;  %v4495_v8 = vmax.f32 %v10592_v36, %v4439_v35  ;;  %v3045_v18 = vpop.f32.mrf.mxu0 }
 0x5c7   :  { %v3614_v48 = vpop.f32.mrf.mxu1 }
 0x5c8   :  { %v4555_v39 = vadd.f32 %v9607_v44, %v4495_v8  ;;  %v3615_v21 = vadd.f32 %v3614_v48, %v3045_v18  ;;  %v4329_v18 = vadd.f32 %v4328_v30, %v3760_v1 }
 0x5ca   :  { %v4611_v37 = vmax.f32 %v4555_v39, 0.0  ;;  %v4184_v13 = vadd.f32 %v4183_v51, %v3615_v21  ;;  %v10600_v51 = vld [vmem:[#allocation93_spill] sm:$0xff] }
 0x5cb   :  { %v3758_v60 = vadd.f32 %v10601_v15, %v10600_v51  ;;  %v10623_v51 = vld [vmem:[#allocation6_spill] sm:$0xff]  ;;  %v10624_v15 = vld [vmem:[#allocation100_spill] sm:$0xff] }
 0x5cc   :  { %v4667_v59 = vpack.c.bf16 %v4611_v37, %v4611_v37  ;;  %v4440_v56 = vmax.f32 %v4184_v13, %v4324_v20  ;;  %v10617_v20 = vld [vmem:[#allocation7_spill] sm:$0xff]  ;;  %v10618_v37 = vld [vmem:[#allocation101_spill] sm:$0xff] }
 0x5cd   :  { %v4191_v26 = vpop.f32.mrf.mxu2  ;;  %v4327_v17 = vadd.f32 %v4326_v57, %v3758_v60  ;;  %v3628_v13 = vadd.f32 %v10618_v37, %v10617_v20  ;;  %v10619_v57 = vld [vmem:[#allocation94_spill] sm:$0xff]  ;;  %v10625_v60 = vmax.f32 %v10623_v51, %v10624_v15 }
 0x5ce   :  { %4724 = vst.msk [vmem:[%s10094_s3 + $0xd0] sm:$0xf] %vm4671_vm1, %v4667_v59  ;;  %v4496_v14 = vmax.f32 %v10599_v7, %v4440_v56  ;;  %v4192_v38 = vadd.f32 %v4191_v26, %v3623_v0  ;;  %v3048_v6 = vpop.f32.mrf.mxu0  ;;  %v10620_v26 = vld [vmem:[#allocation185_spill] sm:$0xff] }
 0x5cf   :  { %v3617_v27 = vpop.f32.mrf.mxu1  ;;  %v10621_v46 = vmax.f32 %v10619_v57, %v10620_v26 }
 0x5d0   :  { %v4556_v43 = vadd.f32 %v9607_v44, %v4496_v14  ;;  %v4387_v40 = vmax.f32 %v10602_v31, %v4192_v38  ;;  %v3618_v58 = vadd.f32 %v3617_v27, %v3048_v6  ;;  %v10622_v38 = vld [vmem:[#allocation189_spill] sm:$0xff] }
 0x5d1   :  { %v10626_v31 = vld [vmem:[#allocation9_spill] sm:$0xff] }
 0x5d2   :  { %v4612_v52 = vmax.f32 %v4556_v43, 0.0  ;;  %v4443_v49 = vmax.f32 %v10605_v33, %v4387_v40  ;;  %v4187_v16 = vadd.f32 %v4186_v19, %v3618_v58  ;;  %v10627_v40 = vld [vmem:[#allocation103_spill] sm:$0xff] }
 0x5d3   :  { %v3630_v58 = vadd.f32 %v10627_v40, %v10626_v31 }
 0x5d4   :  { %v4668_v2 = vpack.c.bf16 %v4612_v52, %v4612_v52  ;;  %v4503_v23 = vadd.f32 %v9607_v44, %v4443_v49  ;;  %v4441_v42 = vmax.f32 %v4187_v16, %v4327_v17  ;;  %v10628_v16 = vld [vmem:[#allocation190_spill] sm:$0xff] }
 0x5d5   :  { %v4193_v9 = vpop.f32.mrf.mxu2 }
 0x5d6   :  { %4725 = vst.msk [vmem:[%s10094_s3 + $0xd4] sm:$0xf] %vm4671_vm1, %v4668_v2  ;;  %v4559_v62 = vmax.f32 %v4503_v23, 0.0  ;;  %v4497_v50 = vmax.f32 %v10610_v3, %v4441_v42  ;;  %v4194_v53 = vadd.f32 %v4193_v9, %v3625_v61  ;;  %v3050_v19 = vpop.f32.mrf.mxu0  ;;  %v10630_v61 = vld [vmem:[#allocation102_spill] sm:$0xff] }
 0x5d7   :  { %v3619_v54 = vpop.f32.mrf.mxu1  ;;  %v10631_v2 = vmax.f32 %v10629_v28, %v10630_v61 }
 0x5d8   :  { %v4615_v35 = vpack.c.bf16 %v4559_v62, %v4559_v62  ;;  %v4557_v29 = vadd.f32 %v9607_v44, %v4497_v50  ;;  %v4388_v36 = vmax.f32 %v10613_v32, %v4194_v53  ;;  %v3620_v8 = vadd.f32 %v3619_v54, %v3050_v19 }
 0x5da   :  { %4672 = vst.msk [vmem:[%s10094_s3] sm:$0xf] %vm4671_vm1, %v4615_v35  ;;  %v4613_v48 = vmax.f32 %v4557_v29, 0.0  ;;  %v4444_v39 = vmax.f32 %v10616_v24, %v4388_v36  ;;  %v4189_v21 = vadd.f32 %v4188_v41, %v3620_v8 }
 0x5dc   :  { %v4669_v12 = vpack.c.bf16 %v4613_v48, %v4613_v48  ;;  %v4504_v47 = vadd.f32 %v9607_v44, %v4444_v39  ;;  %v4442_v0 = vmax.f32 %v4189_v21, %v4329_v18 }
 0x5dd   :  { %v4196_v59 = vpop.f32.mrf.mxu2 }
 0x5de   :  { %4726 = vst.msk [vmem:[%s10094_s3 + $0xd8] sm:$0xf] %vm4671_vm1, %v4669_v12  ;;  %v4560_v56 = vmax.f32 %v4504_v47, 0.0  ;;  %v4498_v45 = vmax.f32 %v10621_v46, %v4442_v0  ;;  %v4197_v7 = vadd.f32 %v4196_v59, %v3628_v13 }
 0x5e0   :  { %v4616_v41 = vpack.c.bf16 %v4560_v56, %v4560_v56  ;;  %v4558_v14 = vadd.f32 %v9607_v44, %v4498_v45  ;;  %v4389_v6 = vmax.f32 %v10622_v38, %v4197_v7 }
 0x5e2   :  { %4673 = vst.msk [vmem:[%s10094_s3 + $0x4] sm:$0xf] %vm4671_vm1, %v4616_v41  ;;  %v4614_v27 = vmax.f32 %v4558_v14, 0.0  ;;  %v4445_v43 = vmax.f32 %v10625_v60, %v4389_v6 }
 0x5e4   :  { %v4670_v17 = vpack.c.bf16 %v4614_v27, %v4614_v27  ;;  %v4505_v52 = vadd.f32 %v9607_v44, %v4445_v43 }
 0x5e5   :  { %v4198_v63 = vpop.f32.mrf.mxu2 }
 0x5e6   :  { %4727 = vst.msk [vmem:[%s10094_s3 + $0xdc] sm:$0xf] %vm4671_vm1, %v4670_v17  ;;  %v4561_v34 = vmax.f32 %v4505_v52, 0.0  ;;  %v4199_v33 = vadd.f32 %v4198_v63, %v3630_v58 }
 0x5e8   :  { %v4617_v49 = vpack.c.bf16 %v4561_v34, %v4561_v34  ;;  %v4390_v5 = vmax.f32 %v10628_v16, %v4199_v33 }
 0x5ea   :  { %4674 = vst.msk [vmem:[%s10094_s3 + $0x8] sm:$0xf] %vm4671_vm1, %v4617_v49  ;;  %v4446_v23 = vmax.f32 %v10631_v2, %v4390_v5 }
 0x5ec   :  { %v4506_v42 = vadd.f32 %v9607_v44, %v4446_v23 }
 0x5ee   :  { %v4562_v9 = vmax.f32 %v4506_v42, 0.0 }
 0x5f0   :  { %v4618_v62 = vpack.c.bf16 %v4562_v9, %v4562_v9 }
 0x5f2   :  { %4675 = vst.msk [vmem:[%s10094_s3 + $0xc] sm:$0xf] %vm4671_vm1, %v4618_v62 }

// kernel: mnist_forward.5
= control target key start
LH: loop header
LB: loop body
LE: loop exit
PB: predicated region body
PF: predicated region fallthrough
CT: control target
= control target key end

     0   :  { %vm1693_vm0 = vcmask 523264   ;;  %s3823_s1 = inlined_call_operand.vmem [shape: bf16[3136,128], index: 1, kind: input, shape index: {}]   ;;  %s3824_s0 = inlined_call_operand.vmem [shape: bf16[8,3136], index: 0, kind: input, shape index: {}]   ;;  %s3825_s2 = inlined_call_operand.vmem [shape: f32[1,128], index: 2, kind: input, shape index: {}]   ;;  %s3826_s4 = inlined_call_operand.vmem [shape: f32[1,128], index: 4, kind: input, shape index: {}]   ;;  %s3827_s3 = inlined_call_operand.vmem [shape: bf16[128,128], index: 3, kind: input, shape index: {}]   ;;  %s3828_s5 = inlined_call_operand.vmem [shape: f32[8,128], index: 5, kind: output, shape index: {}]  }
   0x1   :  { %v2934_v0 = vld [vmem:[%s3823_s1 + $0x38] sm:$0xff]  ;;  %v2933_v4 = vld [vmem:[%s3823_s1 + $0x30] sm:$0xff]  ;;  %v2932_v8 = vld [vmem:[%s3823_s1 + $0x28] sm:$0xff] }
   0x2   :  { %v2950_v1 = vld [vmem:[%s3823_s1 + $0xb8] sm:$0xff]  ;;  %1697 = vmatpush.bf16.msra.mxu0 %v2934_v0  ;;  %v2949_v5 = vld [vmem:[%s3823_s1 + $0xb0] sm:$0xff]  ;;  %v2948_v9 = vld [vmem:[%s3823_s1 + $0xa8] sm:$0xff] }
   0x3   :  { %v2958_v2 = vld [vmem:[%s3823_s1 + $0xf8] sm:$0xff]  ;;  %1723 = vmatpush.bf16.msra.mxu2 %v2950_v1  ;;  %v2957_v6 = vld [vmem:[%s3823_s1 + $0xf0] sm:$0xff]  ;;  %v2956_v10 = vld [vmem:[%s3823_s1 + $0xe8] sm:$0xff] }
   0x4   :  { %v2942_v3 = vld [vmem:[%s3823_s1 + $0x78] sm:$0xff]  ;;  %1736 = vmatpush.bf16.msra.mxu3 %v2958_v2  ;;  %v2941_v7 = vld [vmem:[%s3823_s1 + $0x70] sm:$0xff]  ;;  %v2940_v11 = vld [vmem:[%s3823_s1 + $0x68] sm:$0xff] }
   0x5   :  { %1710 = vmatpush.bf16.msra.mxu1 %v2942_v3  ;;  %v2931_v12 = vld [vmem:[%s3823_s1 + $0x20] sm:$0xff]  ;;  %v2930_v16 = vld [vmem:[%s3823_s1 + $0x18] sm:$0xff]  ;;  %v2929_v20 = vld [vmem:[%s3823_s1 + $0x10] sm:$0xff] }
   0x6   :  { %1698 = vmatpush.bf16.msra.mxu0 %v2933_v4  ;;  %v2947_v13 = vld [vmem:[%s3823_s1 + $0xa0] sm:$0xff]  ;;  %v2946_v17 = vld [vmem:[%s3823_s1 + $0x98] sm:$0xff]  ;;  %v2945_v21 = vld [vmem:[%s3823_s1 + $0x90] sm:$0xff] }
   0x7   :  { %1724 = vmatpush.bf16.msra.mxu2 %v2949_v5  ;;  %v2955_v14 = vld [vmem:[%s3823_s1 + $0xe0] sm:$0xff]  ;;  %v2954_v18 = vld [vmem:[%s3823_s1 + $0xd8] sm:$0xff]  ;;  %v2953_v22 = vld [vmem:[%s3823_s1 + $0xd0] sm:$0xff] }
   0x8   :  { %1737 = vmatpush.bf16.msra.mxu3 %v2957_v6  ;;  %v2939_v15 = vld [vmem:[%s3823_s1 + $0x60] sm:$0xff]  ;;  %v2938_v19 = vld [vmem:[%s3823_s1 + $0x58] sm:$0xff]  ;;  %v2937_v23 = vld [vmem:[%s3823_s1 + $0x50] sm:$0xff] }
   0x9   :  { %1711 = vmatpush.bf16.msra.mxu1 %v2941_v7  ;;  %v2928_v24 = vld [vmem:[%s3823_s1 + $0x8] sm:$0xff]  ;;  %v21_v29 = vld [vmem:[%s3824_s0] sm:$0xff]  ;;  %v2966_v35 = vld [vmem:[%s3823_s1 + $0x138] sm:$0xff] }
   0xa   :  { %1699 = vmatpush.bf16.msra.mxu0 %v2932_v8  ;;  %v2944_v25 = vld [vmem:[%s3823_s1 + $0x88] sm:$0xff]  ;;  %v2927_v31 = vld [vmem:[%s3823_s1] sm:$0xff]  ;;  %v443_v33 = vunpack.c.l.b16 %v21_v29  ;;  %v2982_v37 = vld [vmem:[%s3823_s1 + $0x1b8] sm:$0xff]  ;;  %v444_v41 = vunpack.c.h.b16 %v21_v29 }
   0xb   :  { %1725 = vmatpush.bf16.msra.mxu2 %v2948_v9  ;;  %v22_v26 = vld [vmem:[%s3824_s0 + $0x8] sm:$0xff]  ;;  %v2943_v32 = vld [vmem:[%s3823_s1 + $0x80] sm:$0xff]  ;;  %v2990_v38 = vld [vmem:[%s3823_s1 + $0x1f8] sm:$0xff] }
   0xc   :  { %1738 = vmatpush.bf16.msra.mxu3 %v2956_v10  ;;  %v2952_v27 = vld [vmem:[%s3823_s1 + $0xc8] sm:$0xff]  ;;  %v445_v30 = vunpack.c.l.b16 %v22_v26  ;;  %v2951_v34 = vld [vmem:[%s3823_s1 + $0xc0] sm:$0xff]  ;;  %v446_v36 = vunpack.c.h.b16 %v22_v26  ;;  %v2974_v42 = vld [vmem:[%s3823_s1 + $0x178] sm:$0xff]  ;;  %v468_v43 = vpack.c.b16 %v443_v33, %v443_v33  ;;  %v469_v48 = vpack.c.b16 %v444_v41, %v444_v41 }
   0xd   :  { %1712 = vmatpush.bf16.msra.mxu1 %v2940_v11  ;;  %v2936_v28 = vld [vmem:[%s3823_s1 + $0x48] sm:$0xff]  ;;  %v2935_v39 = vld [vmem:[%s3823_s1 + $0x40] sm:$0xff]  ;;  %v2965_v44 = vld [vmem:[%s3823_s1 + $0x130] sm:$0xff] }
   0xe   :  { %1700 = vmatpush.bf16.msra.mxu0 %v2931_v12  ;;  %v470_v40 = vpack.c.b16 %v445_v30, %v445_v30  ;;  %v471_v45 = vpack.c.b16 %v446_v36, %v446_v36  ;;  %v2981_v46 = vld [vmem:[%s3823_s1 + $0x1b0] sm:$0xff]  ;;  %v2964_v50 = vld [vmem:[%s3823_s1 + $0x128] sm:$0xff]  ;;  %v2963_v54 = vld [vmem:[%s3823_s1 + $0x120] sm:$0xff] }
   0xf   :  { %1726 = vmatpush.bf16.msra.mxu2 %v2947_v13  ;;  %v2989_v47 = vld [vmem:[%s3823_s1 + $0x1f0] sm:$0xff]  ;;  %v2980_v51 = vld [vmem:[%s3823_s1 + $0x1a8] sm:$0xff]  ;;  %v2979_v55 = vld [vmem:[%s3823_s1 + $0x1a0] sm:$0xff] }
  0x10   :  { %1739 = vmatpush.bf16.msra.mxu3 %v2955_v14  ;;  %v2973_v49 = vld [vmem:[%s3823_s1 + $0x170] sm:$0xff]  ;;  %v2988_v52 = vld [vmem:[%s3823_s1 + $0x1e8] sm:$0xff]  ;;  %v2987_v56 = vld [vmem:[%s3823_s1 + $0x1e0] sm:$0xff] }
  0x11   :  { %1713 = vmatpush.bf16.msra.mxu1 %v2939_v15  ;;  %v2972_v53 = vld [vmem:[%s3823_s1 + $0x168] sm:$0xff]  ;;  %v2971_v57 = vld [vmem:[%s3823_s1 + $0x160] sm:$0xff]  ;;  %v2962_v58 = vld [vmem:[%s3823_s1 + $0x118] sm:$0xff] }
  0x12   :  { %1701 = vmatpush.bf16.msra.mxu0 %v2930_v16  ;;  %v2978_v59 = vld [vmem:[%s3823_s1 + $0x198] sm:$0xff]  ;;  %v2961_v62 = vld [vmem:[%s3823_s1 + $0x110] sm:$0xff]  ;;  %v2960_v2 = vld [vmem:[%s3823_s1 + $0x108] sm:$0xff] }
  0x13   :  { %1727 = vmatpush.bf16.msra.mxu2 %v2946_v17  ;;  %v2986_v60 = vld [vmem:[%s3823_s1 + $0x1d8] sm:$0xff]  ;;  %v2977_v63 = vld [vmem:[%s3823_s1 + $0x190] sm:$0xff]  ;;  %v2976_v3 = vld [vmem:[%s3823_s1 + $0x188] sm:$0xff] }
  0x14   :  { %1740 = vmatpush.bf16.msra.mxu3 %v2954_v18  ;;  %v2970_v61 = vld [vmem:[%s3823_s1 + $0x158] sm:$0xff]  ;;  %v2985_v0 = vld [vmem:[%s3823_s1 + $0x1d0] sm:$0xff]  ;;  %v2984_v4 = vld [vmem:[%s3823_s1 + $0x1c8] sm:$0xff] }
  0x15   :  { %1714 = vmatpush.bf16.msra.mxu1 %v2938_v19  ;;  %v2969_v1 = vld [vmem:[%s3823_s1 + $0x150] sm:$0xff]  ;;  %v24_v5 = vld [vmem:[%s3824_s0 + $0x18] sm:$0xff]  ;;  %v2968_v7 = vld [vmem:[%s3823_s1 + $0x148] sm:$0xff] }
  0x16   :  { %1702 = vmatpush.bf16.msra.mxu0 %v2929_v20  ;;  %v23_v6 = vld [vmem:[%s3824_s0 + $0x10] sm:$0xff]  ;;  %v2959_v8 = vld [vmem:[%s3823_s1 + $0x100] sm:$0xff]  ;;  %v449_v9 = vunpack.c.l.b16 %v24_v5  ;;  %v450_v13 = vunpack.c.h.b16 %v24_v5  ;;  %v2998_v14 = vld [vmem:[%s3823_s1 + $0x238] sm:$0xff] }
  0x17   :  { %1728 = vmatpush.bf16.msra.mxu2 %v2945_v21  ;;  %v2975_v10 = vld [vmem:[%s3823_s1 + $0x180] sm:$0xff]  ;;  %v447_v12 = vunpack.c.l.b16 %v23_v6  ;;  %v3014_v15 = vld [vmem:[%s3823_s1 + $0x2b8] sm:$0xff]  ;;  %v448_v18 = vunpack.c.h.b16 %v23_v6  ;;  %v3012_v29 = vld [vmem:[%s3823_s1 + $0x2a8] sm:$0xff] }
  0x18   :  { %1741 = vmatpush.bf16.msra.mxu3 %v2953_v22  ;;  %v2983_v11 = vld [vmem:[%s3823_s1 + $0x1c0] sm:$0xff]  ;;  %v3022_v16 = vld [vmem:[%s3823_s1 + $0x2f8] sm:$0xff]  ;;  %v474_v20 = vpack.c.b16 %v449_v9, %v449_v9  ;;  %v475_v22 = vpack.c.b16 %v450_v13, %v450_v13  ;;  %v3020_v30 = vld [vmem:[%s3823_s1 + $0x2e8] sm:$0xff] }
  0x19   :  { %1715 = vmatpush.bf16.msra.mxu1 %v2937_v23  ;;  %v2967_v17 = vld [vmem:[%s3823_s1 + $0x140] sm:$0xff]  ;;  %v3006_v19 = vld [vmem:[%s3823_s1 + $0x278] sm:$0xff]  ;;  %v472_v21 = vpack.c.b16 %v447_v12, %v447_v12  ;;  %v2997_v23 = vld [vmem:[%s3823_s1 + $0x230] sm:$0xff]  ;;  %v473_v26 = vpack.c.b16 %v448_v18, %v448_v18 }
  0x1a   :  { %1703 = vmatpush.bf16.msra.mxu0 %v2928_v24  ;;  %v3013_v24 = vld [vmem:[%s3823_s1 + $0x2b0] sm:$0xff]  ;;  %v3011_v33 = vld [vmem:[%s3823_s1 + $0x2a0] sm:$0xff]  ;;  %v2994_v36 = vld [vmem:[%s3823_s1 + $0x218] sm:$0xff] }
  0x1b   :  { %1729 = vmatpush.bf16.msra.mxu2 %v2944_v25  ;;  %v3021_v25 = vld [vmem:[%s3823_s1 + $0x2f0] sm:$0xff]  ;;  %v3028_v6 = vld [vmem:[%s3823_s1 + $0x328] sm:$0xff]  ;;  %v3051_v12 = vld [vmem:[%s3823_s1 + $0x3e0] sm:$0xff] }
  0x1c   :  { %1742 = vmatpush.bf16.msra.mxu3 %v2952_v27  ;;  %v3005_v27 = vld [vmem:[%s3823_s1 + $0x270] sm:$0xff]  ;;  %v3036_v9 = vld [vmem:[%s3823_s1 + $0x368] sm:$0xff]  ;;  %v3035_v13 = vld [vmem:[%s3823_s1 + $0x360] sm:$0xff] }
  0x1d   :  { %1716 = vmatpush.bf16.msra.mxu1 %v2936_v28  ;;  %v2996_v28 = vld [vmem:[%s3823_s1 + $0x228] sm:$0xff]  ;;  %v3009_v41 = vld [vmem:[%s3823_s1 + $0x290] sm:$0xff] }
  0x1e   :  { %1704 = vmatpush.bf16.msra.mxu0 %v2927_v31  ;;  %v3004_v31 = vld [vmem:[%s3823_s1 + $0x268] sm:$0xff]  ;;  %v3037_v5 = vld [vmem:[%s3823_s1 + $0x370] sm:$0xff] }
  0x1f   :  { %1730 = vmatpush.bf16.msra.mxu2 %v2943_v32  ;;  %v2995_v32 = vld [vmem:[%s3823_s1 + $0x220] sm:$0xff]  ;;  %v3025_v18 = vld [vmem:[%s3823_s1 + $0x310] sm:$0xff] }
  0x20   :  { %1743 = vmatpush.bf16.msra.mxu3 %v2951_v34  ;;  %v3019_v34 = vld [vmem:[%s3823_s1 + $0x2e0] sm:$0xff] }
  0x21   :  { %1717 = vmatpush.bf16.msra.mxu1 %v2935_v39  ;;  %1705 = vmatmul.bf16.vlgmr.msra.gmra.mxu0 %v468_v43  ;;  %v3002_v39 = vld [vmem:[%s3823_s1 + $0x258] sm:$0xff]  ;;  %v3001_v43 = vld [vmem:[%s3823_s1 + $0x250] sm:$0xff] }
  0x22   :  { %1749 = vmatpush.bf16.msrb.mxu0 %v2966_v35  ;;  %1731 = vmatmul.bf16.vlgmr.msra.gmra.mxu2 %v470_v40  ;;  %v3003_v35 = vld [vmem:[%s3823_s1 + $0x260] sm:$0xff]  ;;  %v2993_v40 = vld [vmem:[%s3823_s1 + $0x210] sm:$0xff] }
  0x23   :  { %1775 = vmatpush.bf16.msrb.mxu2 %v2982_v37  ;;  %1744 = vmatmul.bf16.vlgmr.msra.gmra.mxu3 %v471_v45  ;;  %v3010_v37 = vld [vmem:[%s3823_s1 + $0x298] sm:$0xff]  ;;  %v3008_v45 = vld [vmem:[%s3823_s1 + $0x288] sm:$0xff] }
  0x24   :  { %1788 = vmatpush.bf16.msrb.mxu3 %v2990_v38  ;;  %1718 = vmatmul.bf16.vlgmr.msra.gmra.mxu1 %v469_v48  ;;  %v3018_v38 = vld [vmem:[%s3823_s1 + $0x2d8] sm:$0xff]  ;;  %v26_v48 = vld [vmem:[%s3824_s0 + $0x28] sm:$0xff] }
  0x25   :  { %1762 = vmatpush.bf16.msrb.mxu1 %v2974_v42  ;;  %v3017_v42 = vld [vmem:[%s3823_s1 + $0x2d0] sm:$0xff] }
  0x26   :  { %1750 = vmatpush.bf16.msrb.mxu0 %v2965_v44  ;;  %v2992_v44 = vld [vmem:[%s3823_s1 + $0x208] sm:$0xff] }
  0x27   :  { %1776 = vmatpush.bf16.msrb.mxu2 %v2981_v46  ;;  %v25_v46 = vld [vmem:[%s3824_s0 + $0x20] sm:$0xff] }
  0x28   :  { %1789 = vmatpush.bf16.msrb.mxu3 %v2989_v47  ;;  %v3016_v47 = vld [vmem:[%s3823_s1 + $0x2c8] sm:$0xff] }
  0x29   :  { %1763 = vmatpush.bf16.msrb.mxu1 %v2973_v49  ;;  %v3000_v49 = vld [vmem:[%s3823_s1 + $0x248] sm:$0xff] }
  0x2a   :  { %1751 = vmatpush.bf16.msrb.mxu0 %v2964_v50  ;;  %v451_v50 = vunpack.c.l.b16 %v25_v46 }
  0x2b   :  { %1777 = vmatpush.bf16.msrb.mxu2 %v2980_v51  ;;  %v2991_v51 = vld [vmem:[%s3823_s1 + $0x200] sm:$0xff] }
  0x2c   :  { %1790 = vmatpush.bf16.msrb.mxu3 %v2988_v52  ;;  %v3007_v52 = vld [vmem:[%s3823_s1 + $0x280] sm:$0xff] }
  0x2d   :  { %1764 = vmatpush.bf16.msrb.mxu1 %v2972_v53  ;;  %v453_v53 = vunpack.c.l.b16 %v26_v48 }
  0x2e   :  { %1752 = vmatpush.bf16.msrb.mxu0 %v2963_v54  ;;  %v3015_v54 = vld [vmem:[%s3823_s1 + $0x2c0] sm:$0xff] }
  0x2f   :  { %1778 = vmatpush.bf16.msrb.mxu2 %v2979_v55  ;;  %v3030_v55 = vld [vmem:[%s3823_s1 + $0x338] sm:$0xff] }
  0x30   :  { %1791 = vmatpush.bf16.msrb.mxu3 %v2987_v56  ;;  %v454_v56 = vunpack.c.h.b16 %v26_v48  ;;  %v3060_v48 = vld [vmem:[%s3823_s1 + $0x428] sm:$0xff] }
  0x31   :  { %1765 = vmatpush.bf16.msrb.mxu1 %v2971_v57  ;;  %v3046_v57 = vld [vmem:[%s3823_s1 + $0x3b8] sm:$0xff] }
  0x32   :  { %1753 = vmatpush.bf16.msrb.mxu0 %v2962_v58  ;;  %v3054_v58 = vld [vmem:[%s3823_s1 + $0x3f8] sm:$0xff] }
  0x33   :  { %1779 = vmatpush.bf16.msrb.mxu2 %v2978_v59  ;;  %v452_v59 = vunpack.c.h.b16 %v25_v46  ;;  %v3085_v46 = vld [vmem:[%s3823_s1 + $0x4f0] sm:$0xff] }
  0x34   :  { %1792 = vmatpush.bf16.msrb.mxu3 %v2986_v60  ;;  %v2999_v60 = vld [vmem:[%s3823_s1 + $0x240] sm:$0xff] }
  0x35   :  { %1766 = vmatpush.bf16.msrb.mxu1 %v2970_v61  ;;  %v476_v61 = vpack.c.b16 %v451_v50, %v451_v50  ;;  %v3084_v50 = vld [vmem:[%s3823_s1 + $0x4e8] sm:$0xff] }
  0x36   :  { %1754 = vmatpush.bf16.msrb.mxu0 %v2961_v62  ;;  %v478_v62 = vpack.c.b16 %v453_v53, %v453_v53  ;;  %v3075_v53 = vld [vmem:[%s3823_s1 + $0x4a0] sm:$0xff] }
  0x37   :  { %1780 = vmatpush.bf16.msrb.mxu2 %v2977_v63  ;;  %v3038_v63 = vld [vmem:[%s3823_s1 + $0x378] sm:$0xff] }
  0x38   :  { %1793 = vmatpush.bf16.msrb.mxu3 %v2985_v0  ;;  %v479_v0 = vpack.c.b16 %v454_v56, %v454_v56  ;;  %v3058_v56 = vld [vmem:[%s3823_s1 + $0x418] sm:$0xff] }
  0x39   :  { %1767 = vmatpush.bf16.msrb.mxu1 %v2969_v1  ;;  %v3029_v1 = vld [vmem:[%s3823_s1 + $0x330] sm:$0xff] }
  0x3a   :  { %1755 = vmatpush.bf16.msrb.mxu0 %v2960_v2  ;;  %v477_v2 = vpack.c.b16 %v452_v59, %v452_v59  ;;  %v3066_v59 = vld [vmem:[%s3823_s1 + $0x458] sm:$0xff] }
  0x3b   :  { %1781 = vmatpush.bf16.msrb.mxu2 %v2976_v3  ;;  %v3045_v3 = vld [vmem:[%s3823_s1 + $0x3b0] sm:$0xff] }
  0x3c   :  { %1794 = vmatpush.bf16.msrb.mxu3 %v2984_v4  ;;  %v3053_v4 = vld [vmem:[%s3823_s1 + $0x3f0] sm:$0xff] }
  0x3d   :  { %1768 = vmatpush.bf16.msrb.mxu1 %v2968_v7  ;;  %v3044_v7 = vld [vmem:[%s3823_s1 + $0x3a8] sm:$0xff] }
  0x3e   :  { %1756 = vmatpush.bf16.msrb.mxu0 %v2959_v8  ;;  %v3052_v8 = vld [vmem:[%s3823_s1 + $0x3e8] sm:$0xff] }
  0x3f   :  { %1782 = vmatpush.bf16.msrb.mxu2 %v2975_v10  ;;  %v3027_v10 = vld [vmem:[%s3823_s1 + $0x320] sm:$0xff] }
  0x40   :  { %1795 = vmatpush.bf16.msrb.mxu3 %v2983_v11  ;;  %v3043_v11 = vld [vmem:[%s3823_s1 + $0x3a0] sm:$0xff] }
  0x41   :  { %1769 = vmatpush.bf16.msrb.mxu1 %v2967_v17  ;;  %1757 = vmatmul.bf16.vlgmr.msrb.gmra.mxu0 %v472_v21  ;;  %v3034_v17 = vld [vmem:[%s3823_s1 + $0x358] sm:$0xff]  ;;  %v3033_v21 = vld [vmem:[%s3823_s1 + $0x350] sm:$0xff] }
  0x42   :  { %1801 = vmatpush.bf16.msra.mxu0 %v2998_v14  ;;  %1783 = vmatmul.bf16.vlgmr.msrb.gmra.mxu2 %v474_v20  ;;  %v3026_v14 = vld [vmem:[%s3823_s1 + $0x318] sm:$0xff]  ;;  %v3049_v20 = vld [vmem:[%s3823_s1 + $0x3d0] sm:$0xff] }
  0x43   :  { %1827 = vmatpush.bf16.msra.mxu2 %v3014_v15  ;;  %1796 = vmatmul.bf16.vlgmr.msrb.gmra.mxu3 %v475_v22  ;;  %v3042_v15 = vld [vmem:[%s3823_s1 + $0x398] sm:$0xff]  ;;  %v3024_v22 = vld [vmem:[%s3823_s1 + $0x308] sm:$0xff] }
  0x44   :  { %1840 = vmatpush.bf16.msra.mxu3 %v3022_v16  ;;  %1770 = vmatmul.bf16.vlgmr.msrb.gmra.mxu1 %v473_v26  ;;  %v3050_v16 = vld [vmem:[%s3823_s1 + $0x3d8] sm:$0xff]  ;;  %v3048_v26 = vld [vmem:[%s3823_s1 + $0x3c8] sm:$0xff] }
  0x45   :  { %1814 = vmatpush.bf16.msra.mxu1 %v3006_v19  ;;  %v3041_v19 = vld [vmem:[%s3823_s1 + $0x390] sm:$0xff] }
  0x46   :  { %1802 = vmatpush.bf16.msra.mxu0 %v2997_v23  ;;  %v3040_v23 = vld [vmem:[%s3823_s1 + $0x388] sm:$0xff] }
  0x47   :  { %1828 = vmatpush.bf16.msra.mxu2 %v3013_v24  ;;  %v27_v24 = vld [vmem:[%s3824_s0 + $0x30] sm:$0xff] }
  0x48   :  { %1841 = vmatpush.bf16.msra.mxu3 %v3021_v25  ;;  %v28_v25 = vld [vmem:[%s3824_s0 + $0x38] sm:$0xff] }
  0x49   :  { %1815 = vmatpush.bf16.msra.mxu1 %v3005_v27  ;;  %v3032_v27 = vld [vmem:[%s3823_s1 + $0x348] sm:$0xff] }
  0x4a   :  { %1803 = vmatpush.bf16.msra.mxu0 %v2996_v28  ;;  %v3023_v28 = vld [vmem:[%s3823_s1 + $0x300] sm:$0xff] }
  0x4b   :  { %1829 = vmatpush.bf16.msra.mxu2 %v3012_v29  ;;  %v455_v29 = vunpack.c.l.b16 %v27_v24 }
  0x4c   :  { %1842 = vmatpush.bf16.msra.mxu3 %v3020_v30  ;;  %v457_v30 = vunpack.c.l.b16 %v28_v25 }
  0x4d   :  { %1816 = vmatpush.bf16.msra.mxu1 %v3004_v31  ;;  %v3039_v31 = vld [vmem:[%s3823_s1 + $0x380] sm:$0xff] }
  0x4e   :  { %1804 = vmatpush.bf16.msra.mxu0 %v2995_v32  ;;  %v3062_v32 = vld [vmem:[%s3823_s1 + $0x438] sm:$0xff] }
  0x4f   :  { %1830 = vmatpush.bf16.msra.mxu2 %v3011_v33  ;;  %v458_v33 = vunpack.c.h.b16 %v28_v25  ;;  %v3101_v25 = vld [vmem:[%s3823_s1 + $0x570] sm:$0xff] }
  0x50   :  { %1843 = vmatpush.bf16.msra.mxu3 %v3019_v34  ;;  %v3047_v34 = vld [vmem:[%s3823_s1 + $0x3c0] sm:$0xff] }
  0x51   :  { %1817 = vmatpush.bf16.msra.mxu1 %v3003_v35  ;;  %v3078_v35 = vld [vmem:[%s3823_s1 + $0x4b8] sm:$0xff] }
  0x52   :  { %1805 = vmatpush.bf16.msra.mxu0 %v2994_v36  ;;  %v456_v36 = vunpack.c.h.b16 %v27_v24  ;;  %v3117_v24 = vld [vmem:[%s3823_s1 + $0x5f0] sm:$0xff] }
  0x53   :  { %1831 = vmatpush.bf16.msra.mxu2 %v3010_v37  ;;  %v3086_v37 = vld [vmem:[%s3823_s1 + $0x4f8] sm:$0xff] }
  0x54   :  { %1844 = vmatpush.bf16.msra.mxu3 %v3018_v38  ;;  %v3031_v38 = vld [vmem:[%s3823_s1 + $0x340] sm:$0xff] }
  0x55   :  { %1818 = vmatpush.bf16.msra.mxu1 %v3002_v39  ;;  %v480_v39 = vpack.c.b16 %v455_v29, %v455_v29  ;;  %v3131_v29 = vld [vmem:[%s3825_s2] ss:$0 sm:$0xff] }
  0x56   :  { %1806 = vmatpush.bf16.msra.mxu0 %v2993_v40  ;;  %v482_v40 = vpack.c.b16 %v457_v30, %v457_v30  ;;  %v3100_v30 = vld [vmem:[%s3823_s1 + $0x568] sm:$0xff] }
  0x57   :  { %1832 = vmatpush.bf16.msra.mxu2 %v3009_v41  ;;  %v3070_v41 = vld [vmem:[%s3823_s1 + $0x478] sm:$0xff] }
  0x58   :  { %1845 = vmatpush.bf16.msra.mxu3 %v3017_v42  ;;  %v483_v42 = vpack.c.b16 %v458_v33, %v458_v33  ;;  %v3115_v33 = vld [vmem:[%s3823_s1 + $0x5e0] sm:$0xff] }
  0x59   :  { %1819 = vmatpush.bf16.msra.mxu1 %v3001_v43  ;;  %v481_v43 = vpack.c.b16 %v456_v36, %v456_v36  ;;  %v3099_v36 = vld [vmem:[%s3823_s1 + $0x560] sm:$0xff] }
  0x5a   :  { %1807 = vmatpush.bf16.msra.mxu0 %v2992_v44  ;;  %v3061_v44 = vld [vmem:[%s3823_s1 + $0x430] sm:$0xff] }
  0x5b   :  { %1833 = vmatpush.bf16.msra.mxu2 %v3008_v45  ;;  %v3077_v45 = vld [vmem:[%s3823_s1 + $0x4b0] sm:$0xff] }
  0x5c   :  { %1846 = vmatpush.bf16.msra.mxu3 %v3016_v47  ;;  %v3069_v47 = vld [vmem:[%s3823_s1 + $0x470] sm:$0xff] }
  0x5d   :  { %1820 = vmatpush.bf16.msra.mxu1 %v3000_v49  ;;  %v3076_v49 = vld [vmem:[%s3823_s1 + $0x4a8] sm:$0xff] }
  0x5e   :  { %1808 = vmatpush.bf16.msra.mxu0 %v2991_v51  ;;  %v3068_v51 = vld [vmem:[%s3823_s1 + $0x468] sm:$0xff] }
  0x5f   :  { %1834 = vmatpush.bf16.msra.mxu2 %v3007_v52  ;;  %v3059_v52 = vld [vmem:[%s3823_s1 + $0x420] sm:$0xff] }
  0x60   :  { %1847 = vmatpush.bf16.msra.mxu3 %v3015_v54  ;;  %v3083_v54 = vld [vmem:[%s3823_s1 + $0x4e0] sm:$0xff] }
  0x61   :  { %1821 = vmatpush.bf16.msra.mxu1 %v2999_v60  ;;  %1809 = vmatmul.bf16.vlgmr.msra.gmra.mxu0 %v476_v61  ;;  %v3057_v60 = vld [vmem:[%s3823_s1 + $0x410] sm:$0xff] }
  0x62   :  { %1853 = vmatpush.bf16.msrb.mxu0 %v3030_v55  ;;  %1835 = vmatmul.bf16.vlgmr.msra.gmra.mxu2 %v478_v62  ;;  %v3067_v55 = vld [vmem:[%s3823_s1 + $0x460] sm:$0xff]  ;;  %v3073_v61 = vld [vmem:[%s3823_s1 + $0x490] sm:$0xff] }
  0x63   :  { %1879 = vmatpush.bf16.msrb.mxu2 %v3046_v57  ;;  %1848 = vmatmul.bf16.vlgmr.msra.gmra.mxu3 %v479_v0  ;;  %v3074_v57 = vld [vmem:[%s3823_s1 + $0x498] sm:$0xff]  ;;  %v3081_v62 = vld [vmem:[%s3823_s1 + $0x4d0] sm:$0xff]  ;;  %v3056_v0 = vld [vmem:[%s3823_s1 + $0x408] sm:$0xff] }
  0x64   :  { %1892 = vmatpush.bf16.msrb.mxu3 %v3054_v58  ;;  %1822 = vmatmul.bf16.vlgmr.msra.gmra.mxu1 %v477_v2  ;;  %v3082_v58 = vld [vmem:[%s3823_s1 + $0x4d8] sm:$0xff]  ;;  %v3080_v2 = vld [vmem:[%s3823_s1 + $0x4c8] sm:$0xff] }
  0x65   :  { %1866 = vmatpush.bf16.msrb.mxu1 %v3038_v63  ;;  %v3065_v63 = vld [vmem:[%s3823_s1 + $0x450] sm:$0xff] }
  0x66   :  { %1854 = vmatpush.bf16.msrb.mxu0 %v3029_v1  ;;  %v3072_v1 = vld [vmem:[%s3823_s1 + $0x488] sm:$0xff] }
  0x67   :  { %1880 = vmatpush.bf16.msrb.mxu2 %v3045_v3  ;;  %v29_v3 = vld [vmem:[%s3824_s0 + $0x40] sm:$0xff] }
  0x68   :  { %1893 = vmatpush.bf16.msrb.mxu3 %v3053_v4  ;;  %v30_v4 = vld [vmem:[%s3824_s0 + $0x48] sm:$0xff] }
  0x69   :  { %1867 = vmatpush.bf16.msrb.mxu1 %v3037_v5  ;;  %v3064_v5 = vld [vmem:[%s3823_s1 + $0x448] sm:$0xff] }
  0x6a   :  { %1855 = vmatpush.bf16.msrb.mxu0 %v3028_v6  ;;  %v3055_v6 = vld [vmem:[%s3823_s1 + $0x400] sm:$0xff] }
  0x6b   :  { %1881 = vmatpush.bf16.msrb.mxu2 %v3044_v7  ;;  %v459_v7 = vunpack.c.l.b16 %v29_v3 }
  0x6c   :  { %1894 = vmatpush.bf16.msrb.mxu3 %v3052_v8  ;;  %v461_v8 = vunpack.c.l.b16 %v30_v4 }
  0x6d   :  { %1868 = vmatpush.bf16.msrb.mxu1 %v3036_v9  ;;  %v3071_v9 = vld [vmem:[%s3823_s1 + $0x480] sm:$0xff] }
  0x6e   :  { %1856 = vmatpush.bf16.msrb.mxu0 %v3027_v10  ;;  %v3079_v10 = vld [vmem:[%s3823_s1 + $0x4c0] sm:$0xff] }
  0x6f   :  { %1882 = vmatpush.bf16.msrb.mxu2 %v3043_v11  ;;  %v462_v11 = vunpack.c.h.b16 %v30_v4 }
  0x70   :  { %1895 = vmatpush.bf16.msrb.mxu3 %v3051_v12  ;;  %v3094_v12 = vld [vmem:[%s3823_s1 + $0x538] sm:$0xff] }
  0x71   :  { %1869 = vmatpush.bf16.msrb.mxu1 %v3035_v13  ;;  %v3110_v13 = vld [vmem:[%s3823_s1 + $0x5b8] sm:$0xff] }
  0x72   :  { %1857 = vmatpush.bf16.msrb.mxu0 %v3026_v14  ;;  %v460_v14 = vunpack.c.h.b16 %v29_v3  ;;  %v3122_v3 = vld [vmem:[%s3823_s1 + $0x618] sm:$0xff] }
  0x73   :  { %1883 = vmatpush.bf16.msrb.mxu2 %v3042_v15  ;;  %v3118_v15 = vld [vmem:[%s3823_s1 + $0x5f8] sm:$0xff] }
  0x74   :  { %1896 = vmatpush.bf16.msrb.mxu3 %v3050_v16  ;;  %v3063_v16 = vld [vmem:[%s3823_s1 + $0x440] sm:$0xff] }
  0x75   :  { %1870 = vmatpush.bf16.msrb.mxu1 %v3034_v17  ;;  %v484_v17 = vpack.c.b16 %v459_v7, %v459_v7 }
  0x76   :  { %1858 = vmatpush.bf16.msrb.mxu0 %v3025_v18  ;;  %v486_v18 = vpack.c.b16 %v461_v8, %v461_v8 }
  0x77   :  { %1884 = vmatpush.bf16.msrb.mxu2 %v3041_v19  ;;  %v3102_v19 = vld [vmem:[%s3823_s1 + $0x578] sm:$0xff] }
  0x78   :  { %1897 = vmatpush.bf16.msrb.mxu3 %v3049_v20  ;;  %v487_v20 = vpack.c.b16 %v462_v11, %v462_v11  ;;  %v3120_v11 = vld [vmem:[%s3823_s1 + $0x608] sm:$0xff] }
  0x79   :  { %1871 = vmatpush.bf16.msrb.mxu1 %v3033_v21  ;;  %v485_v21 = vpack.c.b16 %v460_v14, %v460_v14 }
  0x7a   :  { %1859 = vmatpush.bf16.msrb.mxu0 %v3024_v22  ;;  %v3093_v22 = vld [vmem:[%s3823_s1 + $0x530] sm:$0xff] }
  0x7b   :  { %1885 = vmatpush.bf16.msrb.mxu2 %v3040_v23  ;;  %v3109_v23 = vld [vmem:[%s3823_s1 + $0x5b0] sm:$0xff] }
  0x7c   :  { %1898 = vmatpush.bf16.msrb.mxu3 %v3048_v26  ;;  %v3092_v26 = vld [vmem:[%s3823_s1 + $0x528] sm:$0xff] }
  0x7d   :  { %1872 = vmatpush.bf16.msrb.mxu1 %v3032_v27  ;;  %v3108_v27 = vld [vmem:[%s3823_s1 + $0x5a8] sm:$0xff] }
  0x7e   :  { %1860 = vmatpush.bf16.msrb.mxu0 %v3023_v28  ;;  %v3116_v28 = vld [vmem:[%s3823_s1 + $0x5e8] sm:$0xff] }
  0x7f   :  { %1886 = vmatpush.bf16.msrb.mxu2 %v3039_v31  ;;  %v3091_v31 = vld [vmem:[%s3823_s1 + $0x520] sm:$0xff] }
  0x80   :  { %1899 = vmatpush.bf16.msrb.mxu3 %v3047_v34 }
  0x81   :  { %1873 = vmatpush.bf16.msrb.mxu1 %v3031_v38  ;;  %1861 = vmatmul.bf16.vlgmr.msrb.gmra.mxu0 %v480_v39  ;;  %v3106_v39 = vld [vmem:[%s3823_s1 + $0x598] sm:$0xff] }
  0x82   :  { %1905 = vmatpush.bf16.msra.mxu0 %v3062_v32  ;;  %1887 = vmatmul.bf16.vlgmr.msrb.gmra.mxu2 %v482_v40  ;;  %v3107_v32 = vld [vmem:[%s3823_s1 + $0x5a0] sm:$0xff]  ;;  %v3114_v40 = vld [vmem:[%s3823_s1 + $0x5d8] sm:$0xff] }
  0x83   :  { %1931 = vmatpush.bf16.msra.mxu2 %v3078_v35  ;;  %1900 = vmatmul.bf16.vlgmr.msrb.gmra.mxu3 %v483_v42 }
  0x84   :  { %1944 = vmatpush.bf16.msra.mxu3 %v3086_v37  ;;  %1874 = vmatmul.bf16.vlgmr.msrb.gmra.mxu1 %v481_v43  ;;  %v3090_v37 = vld [vmem:[%s3823_s1 + $0x518] sm:$0xff] }
  0x85   :  { %1918 = vmatpush.bf16.msra.mxu1 %v3070_v41  ;;  %v3098_v43 = vld [vmem:[%s3823_s1 + $0x558] sm:$0xff] }
  0x86   :  { %1906 = vmatpush.bf16.msra.mxu0 %v3061_v44 }
  0x87   :  { %1932 = vmatpush.bf16.msra.mxu2 %v3077_v45  ;;  %v3089_v45 = vld [vmem:[%s3823_s1 + $0x510] sm:$0xff] }
  0x88   :  { %1945 = vmatpush.bf16.msra.mxu3 %v3085_v46 }
  0x89   :  { %1919 = vmatpush.bf16.msra.mxu1 %v3069_v47  ;;  %v3105_v47 = vld [vmem:[%s3823_s1 + $0x590] sm:$0xff] }
  0x8a   :  { %1907 = vmatpush.bf16.msra.mxu0 %v3060_v48  ;;  %v3113_v48 = vld [vmem:[%s3823_s1 + $0x5d0] sm:$0xff] }
  0x8b   :  { %1933 = vmatpush.bf16.msra.mxu2 %v3076_v49 }
  0x8c   :  { %1946 = vmatpush.bf16.msra.mxu3 %v3084_v50 }
  0x8d   :  { %1920 = vmatpush.bf16.msra.mxu1 %v3068_v51  ;;  %v3097_v51 = vld [vmem:[%s3823_s1 + $0x550] sm:$0xff] }
  0x8e   :  { %1908 = vmatpush.bf16.msra.mxu0 %v3059_v52  ;;  %v3088_v52 = vld [vmem:[%s3823_s1 + $0x508] sm:$0xff] }
  0x8f   :  { %1934 = vmatpush.bf16.msra.mxu2 %v3075_v53  ;;  %v31_v53 = vld [vmem:[%s3824_s0 + $0x50] sm:$0xff] }
  0x90   :  { %1947 = vmatpush.bf16.msra.mxu3 %v3083_v54  ;;  %v464_v4 = vunpack.c.h.b16 %v31_v53 }
  0x91   :  { %1921 = vmatpush.bf16.msra.mxu1 %v3067_v55  ;;  %v3104_v55 = vld [vmem:[%s3823_s1 + $0x588] sm:$0xff] }
  0x92   :  { %1909 = vmatpush.bf16.msra.mxu0 %v3058_v56  ;;  %v3112_v56 = vld [vmem:[%s3823_s1 + $0x5c8] sm:$0xff] }
  0x93   :  { %1935 = vmatpush.bf16.msra.mxu2 %v3074_v57  ;;  %v32_v57 = vld [vmem:[%s3824_s0 + $0x58] sm:$0xff] }
  0x94   :  { %1948 = vmatpush.bf16.msra.mxu3 %v3082_v58 }
  0x95   :  { %1922 = vmatpush.bf16.msra.mxu1 %v3066_v59  ;;  %v3096_v59 = vld [vmem:[%s3823_s1 + $0x548] sm:$0xff] }
  0x96   :  { %1910 = vmatpush.bf16.msra.mxu0 %v3057_v60  ;;  %v463_v60 = vunpack.c.l.b16 %v31_v53 }
  0x97   :  { %1936 = vmatpush.bf16.msra.mxu2 %v3073_v61  ;;  %v3087_v61 = vld [vmem:[%s3823_s1 + $0x500] sm:$0xff] }
  0x98   :  { %1949 = vmatpush.bf16.msra.mxu3 %v3081_v62  ;;  %v465_v62 = vunpack.c.l.b16 %v32_v57 }
  0x99   :  { %1923 = vmatpush.bf16.msra.mxu1 %v3065_v63  ;;  %v466_v63 = vunpack.c.h.b16 %v32_v57 }
  0x9a   :  { %1911 = vmatpush.bf16.msra.mxu0 %v3056_v0  ;;  %v490_v7 = vpack.c.b16 %v465_v62, %v465_v62 }
  0x9b   :  { %1937 = vmatpush.bf16.msra.mxu2 %v3072_v1  ;;  %v3103_v1 = vld [vmem:[%s3823_s1 + $0x580] sm:$0xff]  ;;  %v491_v8 = vpack.c.b16 %v466_v63, %v466_v63 }
  0x9c   :  { %1950 = vmatpush.bf16.msra.mxu3 %v3080_v2  ;;  %v3111_v2 = vld [vmem:[%s3823_s1 + $0x5c0] sm:$0xff] }
  0x9d   :  { %1924 = vmatpush.bf16.msra.mxu1 %v3064_v5  ;;  %v3095_v5 = vld [vmem:[%s3823_s1 + $0x540] sm:$0xff] }
  0x9e   :  { %1912 = vmatpush.bf16.msra.mxu0 %v3055_v6  ;;  %v1706_v34 = vpop.f32.mrf.mxu0  ;;  %v488_v6 = vpack.c.b16 %v463_v60, %v463_v60 }
  0x9f   :  { %1938 = vmatpush.bf16.msra.mxu2 %v3071_v9  ;;  %v1707_v35 = vadd.f32 %v3131_v29, %v1706_v34  ;;  %v489_v9 = vpack.c.b16 %v464_v4, %v464_v4 }
  0xa0   :  { %1951 = vmatpush.bf16.msra.mxu3 %v3079_v10  ;;  %v3121_v10 = vld [vmem:[%s3823_s1 + $0x610] sm:$0xff] }
  0xa1   :  { %1925 = vmatpush.bf16.msra.mxu1 %v3063_v16  ;;  %1913 = vmatmul.bf16.vlgmr.msra.gmra.mxu0 %v484_v17  ;;  %v1719_v38 = vpop.f32.mrf.mxu1 }
  0xa2   :  { %1957 = vmatpush.bf16.msrb.mxu0 %v3094_v12  ;;  %1939 = vmatmul.bf16.vlgmr.msra.gmra.mxu2 %v486_v18  ;;  %v1720_v41 = vadd.f32 %v1719_v38, %v1707_v35  ;;  %v33_v12 = vld [vmem:[%s3824_s0 + $0x60] sm:$0xf] }
  0xa3   :  { %1983 = vmatpush.bf16.msrb.mxu2 %v3110_v13  ;;  %1952 = vmatmul.bf16.vlgmr.msra.gmra.mxu3 %v487_v20  ;;  %v3119_v13 = vld [vmem:[%s3823_s1 + $0x600] sm:$0xff] }
  0xa4   :  { %1996 = vmatpush.bf16.msrb.mxu3 %v3118_v15  ;;  %1926 = vmatmul.bf16.vlgmr.msra.gmra.mxu1 %v485_v21  ;;  %v467_v15 = vunpack.c.l.b16 %v33_v12 }
  0xa5   :  { %1970 = vmatpush.bf16.msrb.mxu1 %v3102_v19  ;;  %v1732_v42 = vpop.f32.mrf.mxu2 }
  0xa6   :  { %1958 = vmatpush.bf16.msrb.mxu0 %v3093_v22  ;;  %v1733_v44 = vadd.f32 %v1732_v42, %v1720_v41  ;;  %v1745_v46 = vpop.f32.mrf.mxu3  ;;  %v1708_v50 = vpop.f32.mrf.mxu0  ;;  %v492_v19 = vpack.c.b16 %v467_v15, %v467_v15 }
  0xa7   :  { %1984 = vmatpush.bf16.msrb.mxu2 %v3109_v23  ;;  %v3128_v50 = vld [vmem:[%s3827_s3 + $0x28] sm:$0xff] }
  0xa8   :  { %1997 = vmatpush.bf16.msrb.mxu3 %v3117_v24  ;;  %v1746_v49 = vadd.f32 %v1745_v46, %v1733_v44  ;;  %v3130_v44 = vld [vmem:[%s3827_s3 + $0x38] sm:$0xff] }
  0xa9   :  { %1971 = vmatpush.bf16.msrb.mxu1 %v3101_v25  ;;  %v1721_v54 = vpop.f32.mrf.mxu1 }
  0xaa   :  { %1959 = vmatpush.bf16.msrb.mxu0 %v3092_v26  ;;  %v3126_v54 = vld [vmem:[%s3827_s3 + $0x18] sm:$0xff] }
  0xab   :  { %1985 = vmatpush.bf16.msrb.mxu2 %v3108_v27 }
  0xac   :  { %1998 = vmatpush.bf16.msrb.mxu3 %v3116_v28 }
  0xad   :  { %1972 = vmatpush.bf16.msrb.mxu1 %v3100_v30  ;;  %v1734_v58 = vpop.f32.mrf.mxu2 }
  0xae   :  { %1960 = vmatpush.bf16.msrb.mxu0 %v3091_v31  ;;  %v1747_v0 = vpop.f32.mrf.mxu3  ;;  %v3125_v58 = vld [vmem:[%s3827_s3 + $0x10] sm:$0xff] }
  0xaf   :  { %1986 = vmatpush.bf16.msrb.mxu2 %v3107_v32 }
  0xb0   :  { %1999 = vmatpush.bf16.msrb.mxu3 %v3115_v33 }
  0xb1   :  { %1973 = vmatpush.bf16.msrb.mxu1 %v3099_v36 }
  0xb2   :  { %1961 = vmatpush.bf16.msrb.mxu0 %v3090_v37 }
  0xb3   :  { %1987 = vmatpush.bf16.msrb.mxu2 %v3106_v39 }
  0xb4   :  { %2000 = vmatpush.bf16.msrb.mxu3 %v3114_v40 }
  0xb5   :  { %1974 = vmatpush.bf16.msrb.mxu1 %v3098_v43 }
  0xb6   :  { %1962 = vmatpush.bf16.msrb.mxu0 %v3089_v45 }
  0xb7   :  { %1988 = vmatpush.bf16.msrb.mxu2 %v3105_v47  ;;  %v3129_v47 = vld [vmem:[%s3827_s3 + $0x30] sm:$0xff] }
  0xb8   :  { %2001 = vmatpush.bf16.msrb.mxu3 %v3113_v48 }
  0xb9   :  { %1975 = vmatpush.bf16.msrb.mxu1 %v3097_v51 }
  0xba   :  { %1963 = vmatpush.bf16.msrb.mxu0 %v3088_v52  ;;  %v3127_v52 = vld [vmem:[%s3827_s3 + $0x20] sm:$0xff] }
  0xbb   :  { %1989 = vmatpush.bf16.msrb.mxu2 %v3104_v55 }
  0xbc   :  { %2002 = vmatpush.bf16.msrb.mxu3 %v3112_v56 }
  0xbd   :  { %1976 = vmatpush.bf16.msrb.mxu1 %v3096_v59 }
  0xbe   :  { %1964 = vmatpush.bf16.msrb.mxu0 %v3087_v61  ;;  %v1758_v14 = vpop.f32.mrf.mxu0  ;;  %v3124_v61 = vld [vmem:[%s3827_s3 + $0x8] sm:$0xff] }
  0xbf   :  { %1990 = vmatpush.bf16.msrb.mxu2 %v3103_v1  ;;  %v1759_v16 = vadd.f32 %v1758_v14, %v1746_v49 }
  0xc0   :  { %2003 = vmatpush.bf16.msrb.mxu3 %v3111_v2  ;;  %v3123_v2 = vld [vmem:[%s3827_s3] sm:$0xff] }
  0xc1   :  { %1977 = vmatpush.bf16.msrb.mxu1 %v3095_v5  ;;  %1965 = vmatmul.bf16.vlgmr.msrb.gmra.mxu0 %v488_v6  ;;  %v1771_v17 = vpop.f32.mrf.mxu1 }
  0xc2   :  { %2013 = vmatpush.bf16.msra.mxu0 %v3122_v3  ;;  %1991 = vmatmul.bf16.vlgmr.msrb.gmra.mxu2 %v490_v7  ;;  %v1772_v18 = vadd.f32 %v1771_v17, %v1759_v16 }
  0xc3   :  { %2004 = vmatmul.bf16.vlgmr.msrb.gmra.mxu3 %v491_v8 }
  0xc4   :  { %1978 = vmatmul.bf16.vlgmr.msrb.gmra.mxu1 %v489_v9 }
  0xc5   :  { %v1784_v20 = vpop.f32.mrf.mxu2  ;;  %2092 = vmatpush.bf16.msra.mxu1 %v3130_v44 }
  0xc6   :  { %2014 = vmatpush.bf16.msra.mxu0 %v3121_v10  ;;  %v1785_v21 = vadd.f32 %v1784_v20, %v1772_v18  ;;  %v1797_v22 = vpop.f32.mrf.mxu3  ;;  %v1760_v24 = vpop.f32.mrf.mxu0 }
  0xc8   :  { %v1798_v23 = vadd.f32 %v1797_v22, %v1785_v21 }
  0xc9   :  { %v1773_v25 = vpop.f32.mrf.mxu1  ;;  %2093 = vmatpush.bf16.msra.mxu1 %v3129_v47 }
  0xca   :  { %2015 = vmatpush.bf16.msra.mxu0 %v3120_v11  ;;  %v3132_v25 = vld [vmem:[%s3826_s4] ss:$0 sm:$0xff] }
  0xcd   :  { %v1786_v26 = vpop.f32.mrf.mxu2  ;;  %2094 = vmatpush.bf16.msra.mxu1 %v3128_v50 }
  0xce   :  { %2016 = vmatpush.bf16.msra.mxu0 %v3119_v13  ;;  %v1799_v27 = vpop.f32.mrf.mxu3 }
  0xd1   :  { %2894 = vmatmul.msk.bf16.vlgmr.msra.gmra.mxu0 %vm1693_vm0, %v492_v19  ;;  %2095 = vmatpush.bf16.msra.mxu1 %v3127_v52 }
  0xd5   :  { %2096 = vmatpush.bf16.msra.mxu1 %v3126_v54 }
  0xd9   :  { %2097 = vmatpush.bf16.msra.mxu1 %v3125_v58 }
  0xdd   :  { %2098 = vmatpush.bf16.msra.mxu1 %v3124_v61 }
  0xde   :  { %v1810_v28 = vpop.f32.mrf.mxu0 }
  0xdf   :  { %v1811_v29 = vadd.f32 %v1810_v28, %v1798_v23 }
  0xe1   :  { %v1823_v30 = vpop.f32.mrf.mxu1  ;;  %2099 = vmatpush.bf16.msra.mxu1 %v3123_v2 }
  0xe2   :  { %v1824_v31 = vadd.f32 %v1823_v30, %v1811_v29 }
  0xe5   :  { %v1836_v32 = vpop.f32.mrf.mxu2 }
  0xe6   :  { %v1837_v33 = vadd.f32 %v1836_v32, %v1824_v31  ;;  %v1849_v34 = vpop.f32.mrf.mxu3  ;;  %v1812_v35 = vpop.f32.mrf.mxu0 }
  0xe8   :  { %v1850_v36 = vadd.f32 %v1849_v34, %v1837_v33 }
  0xe9   :  { %v1825_v37 = vpop.f32.mrf.mxu1 }
  0xed   :  { %v1838_v38 = vpop.f32.mrf.mxu2 }
  0xee   :  { %v1851_v39 = vpop.f32.mrf.mxu3 }
  0xfe   :  { %v1862_v40 = vpop.f32.mrf.mxu0 }
  0xff   :  { %v1863_v59 = vadd.f32 %v1862_v40, %v1850_v36 }
 0x101   :  { %v1875_v41 = vpop.f32.mrf.mxu1 }
 0x102   :  { %v1876_v62 = vadd.f32 %v1875_v41, %v1863_v59 }
 0x105   :  { %v1888_v42 = vpop.f32.mrf.mxu2 }
 0x106   :  { %v1901_v43 = vpop.f32.mrf.mxu3  ;;  %v1864_v45 = vpop.f32.mrf.mxu0  ;;  %v1889_v1 = vadd.f32 %v1888_v42, %v1876_v62 }
 0x108   :  { %v1902_v3 = vadd.f32 %v1901_v43, %v1889_v1 }
 0x109   :  { %v1877_v46 = vpop.f32.mrf.mxu1 }
 0x10d   :  { %v1890_v48 = vpop.f32.mrf.mxu2 }
 0x10e   :  { %v1903_v49 = vpop.f32.mrf.mxu3 }
 0x11e   :  { %v1914_v51 = vpop.f32.mrf.mxu0 }
 0x11f   :  { %v1915_v4 = vadd.f32 %v1914_v51, %v1902_v3 }
 0x121   :  { %v1927_v53 = vpop.f32.mrf.mxu1 }
 0x122   :  { %v1928_v5 = vadd.f32 %v1927_v53, %v1915_v4 }
 0x125   :  { %v1940_v55 = vpop.f32.mrf.mxu2 }
 0x126   :  { %v1953_v56 = vpop.f32.mrf.mxu3  ;;  %v1916_v57 = vpop.f32.mrf.mxu0  ;;  %v1941_v6 = vadd.f32 %v1940_v55, %v1928_v5 }
 0x128   :  { %v1954_v8 = vadd.f32 %v1953_v56, %v1941_v6 }
 0x129   :  { %v1929_v60 = vpop.f32.mrf.mxu1 }
 0x12d   :  { %v1942_v63 = vpop.f32.mrf.mxu2 }
 0x12e   :  { %v1955_v0 = vpop.f32.mrf.mxu3 }
 0x13e   :  { %v1966_v7 = vpop.f32.mrf.mxu0 }
 0x13f   :  { %v1967_v10 = vadd.f32 %v1966_v7, %v1954_v8 }
 0x141   :  { %v1979_v9 = vpop.f32.mrf.mxu1 }
 0x142   :  { %v1980_v14 = vadd.f32 %v1979_v9, %v1967_v10 }
 0x145   :  { %v1992_v11 = vpop.f32.mrf.mxu2 }
 0x146   :  { %v2005_v12 = vpop.f32.mrf.mxu3  ;;  %v1968_v13 = vpop.f32.mrf.mxu0  ;;  %v1993_v15 = vadd.f32 %v1992_v11, %v1980_v14 }
 0x148   :  { %v2006_v17 = vadd.f32 %v2005_v12, %v1993_v15 }
 0x149   :  { %v1981_v16 = vpop.f32.mrf.mxu1 }
 0x14d   :  { %v1994_v18 = vpop.f32.mrf.mxu2 }
 0x14e   :  { %v2007_v19 = vpop.f32.mrf.mxu3  ;;  %v2018_v20 = vpop.f32.mrf.mxu0 }
 0x14f   :  { %v2019_v21 = vadd.f32 %v2018_v20, %v2006_v17 }
 0x151   :  { %v2022_v22 = vmax.f32 %v2019_v21, 0.0 }
 0x153   :  { %v2023_v23 = vpack.c.bf16 %v2022_v22, %v2022_v22 }
 0x155   :  { %2100 = vmatmul.bf16.vlgmr.msra.gmra.mxu1 %v2023_v23 }
 0x156   :  { %v2020_v24 = vpop.f32.mrf.mxu0 }
 0x1d2   :  { %v2101_v26 = vpop.f32.mrf.mxu1 }
 0x1d3   :  { %v2102_v27 = vadd.f32 %v3132_v25, %v2101_v26 }
 0x1d5   :  { %2105 = vst [vmem:[%s3828_s5] sm:$0xff] %v2102_v27 }
 0x1da   :  { %v2103_v28 = vpop.f32.mrf.mxu1 }

</bundles_post_ra>
